<compile_context>
chip_gen: v6e
topology: v6e:2x2x1
jax: 0.10.0
libtpu: 0.0.40
codegen_flags: <defaults>
</compile_context>

<pallas_src>
import functools

import jax
import jax.numpy as jnp
from jax.experimental import pallas as pl
from jax.experimental.pallas import tpu as pltpu

LANE = 128


def _round_up(x, m):
  return ((x + m - 1) // m) * m


# --------------------------------------------------------------------------
# Kernel 1: Bahdanau attention + single-step GRU (gridded over batch tiles).
# --------------------------------------------------------------------------
def _attn_gru_kernel(emb_ref, hid_ref, enc_ref, bias_ref,
                     a_wh_ref, a_we_ref, a_b_ref, v_ref,
                     w_ih_ref, b_ih_ref, w_hh_ref, b_hh_ref,
                     hnew_ref, attn_ref, lin_ref):
  f32 = jnp.float32
  bf16 = jnp.bfloat16
  dot = functools.partial(jnp.dot, preferred_element_type=f32)

  emb = emb_ref[...]                      # [TB, Ep]  f32
  hid = hid_ref[...]                      # [TB, Dp]  f32
  enc = enc_ref[...]                      # [TB, Sp, H2p]  bf16
  TB, Sp, H2p = enc.shape
  Dp = hid.shape[-1]

  emb_b = emb.astype(bf16)
  hid_b = hid.astype(bf16)

  # ---- attention: energy = tanh(W [hid ; enc] + b); score = energy . v ----
  hid_proj = dot(hid_b, a_wh_ref[...]) + a_b_ref[...]              # [TB, Dp]
  enc_proj = dot(enc.reshape(TB * Sp, H2p), a_we_ref[...])         # [TB*Sp, Dp]
  energy = jnp.tanh(hid_proj[:, None, :] + enc_proj.reshape(TB, Sp, Dp))
  scores = jnp.sum(energy * v_ref[...][None, :, :], axis=-1)       # [TB, Sp]
  scores = scores + bias_ref[...]              # additive mask (0 / -1e10)
  scores = scores - jnp.max(scores, axis=-1, keepdims=True)
  exps = jnp.exp(scores)
  denom = jnp.sum(exps, axis=-1, keepdims=True)
  attn = exps * pl.reciprocal(denom, approx=True)                  # [TB, Sp]
  attn_ref[...] = attn

  # ---- weighted context: batched matmul on the MXU ----
  weighted = jnp.einsum("bqs,bsh->bqh",
                        attn[:, None, :].astype(bf16), enc,
                        preferred_element_type=f32)[:, 0, :]       # [TB, H2p]

  # ---- single-step GRU (PyTorch gate order r, z, n), fused input matmul ----
  x = jnp.concatenate([emb_b, weighted.astype(bf16)], axis=-1)     # [TB, Ep+H2p]
  gi = dot(x, w_ih_ref[...]) + b_ih_ref[...]                       # [TB, 3Dp]
  gh = dot(hid_b, w_hh_ref[...]) + b_hh_ref[...]                   # [TB, 3Dp]
  r = jax.nn.sigmoid(gi[:, :Dp] + gh[:, :Dp])
  z = jax.nn.sigmoid(gi[:, Dp:2 * Dp] + gh[:, Dp:2 * Dp])
  n = jnp.tanh(gi[:, 2 * Dp:] + r * gh[:, 2 * Dp:])
  h_new = (1.0 - z) * n + z * hid                                  # [TB, Dp]
  hnew_ref[...] = h_new

  # lane-dense operand for the fused output projection: [h_new|weighted|emb]
  lin_ref[...] = jnp.concatenate([h_new, weighted, emb], axis=-1)


# --------------------------------------------------------------------------
# Kernel 2: fused output projection, gridded over (batch tiles, vocab tiles).
# --------------------------------------------------------------------------
def _out_proj_kernel(lin_ref, wo_ref, b_ref, logits_ref):
  logits_ref[...] = (jnp.dot(lin_ref[...].astype(jnp.bfloat16), wo_ref[...],
                             preferred_element_type=jnp.float32)
                     + b_ref[...])


def init_params(key, output_dim, emb_dim, enc_hid, dec_hid):
  ks = jax.random.split(key, 10)

  def rnd(k, shape, scale=0.1):
    return (scale * jax.random.normal(k, shape)).astype(jnp.float32)

  p = {}
  p["embedding"] = rnd(ks[0], (output_dim, emb_dim))
  # attention: Linear(dec_hid + 2*enc_hid -> dec_hid), v: Linear(dec_hid -> 1)
  p["attn_w"] = rnd(ks[1], (dec_hid, dec_hid + 2 * enc_hid))      # torch [out, in]
  p["attn_b"] = rnd(ks[2], (dec_hid,))
  p["attn_v"] = rnd(ks[3], (1, dec_hid))
  # GRU(input = emb_dim + 2*enc_hid, hidden = dec_hid)
  in_dim = emb_dim + 2 * enc_hid
  p["gru_w_ih"] = rnd(ks[4], (3 * dec_hid, in_dim))
  p["gru_w_hh"] = rnd(ks[5], (3 * dec_hid, dec_hid))
  p["gru_b_ih"] = rnd(ks[6], (3 * dec_hid,))
  p["gru_b_hh"] = rnd(ks[7], (3 * dec_hid,))
  # out: Linear(dec_hid + 2*enc_hid + emb_dim -> output_dim)
  p["out_w"] = rnd(ks[8], (output_dim, dec_hid + 2 * enc_hid + emb_dim))
  p["out_b"] = rnd(ks[9], (output_dim,))
  return p


def bahdanau_decoder_forward(token_ids, hidden, encoder_outputs, params,
                             src_mask=None):
  """token_ids: [B] int32; hidden: [B, D]; encoder_outputs: [S, B, 2H]."""
  f32, bf16 = jnp.float32, jnp.bfloat16

  embedded = params["embedding"][token_ids]                       # [B, E]
  # TODO(synk): dropout treated as eval-mode identity (deterministic run).
  enc_bf = jnp.transpose(encoder_outputs, (1, 0, 2))              # [B, S, 2H]
  B, S, H2 = enc_bf.shape
  D = hidden.shape[-1]
  E = embedded.shape[-1]
  V = params["out_b"].shape[-1]

  # ---- lane-dense padded sizes ----
  Bp = _round_up(B, 8)
  Sp = _round_up(S, LANE)
  Dp = _round_up(D, LANE)
  Ep = _round_up(E, LANE)
  H2p = _round_up(H2, LANE)
  Vp = _round_up(V, LANE)
  Kp = Dp + H2p + Ep

  # ---- activations (zero-padded) ----
  emb_p = jnp.zeros((Bp, Ep), f32).at[:B, :E].set(embedded.astype(f32))
  hid_p = jnp.zeros((Bp, Dp), f32).at[:B, :D].set(hidden.astype(f32))
  enc_p = jnp.zeros((Bp, Sp, H2p), bf16).at[:B, :S, :H2].set(enc_bf.astype(bf16))

  mask = (src_mask.astype(f32) if src_mask is not None
          else jnp.ones((B, S), f32))
  bias = jnp.where(mask > 0, 0.0, -1e10).astype(f32)
  bias_p = jnp.full((Bp, Sp), -1e10, f32).at[:B, :S].set(bias)

  # ---- attention weights: [in, out], bf16, zero-padded ----
  a_wh = jnp.zeros((Dp, Dp), bf16).at[:D, :D].set(
      params["attn_w"][:, :D].T.astype(bf16))
  a_we = jnp.zeros((H2p, Dp), bf16).at[:H2, :D].set(
      params["attn_w"][:, D:].T.astype(bf16))
  a_b = jnp.zeros((1, Dp), f32).at[0, :D].set(params["attn_b"].astype(f32))
  v_p = jnp.zeros((1, Dp), f32).at[0, :D].set(params["attn_v"][0].astype(f32))

  # ---- GRU weights: fused [emb|weighted] input matmul, per-gate padding ----
  w_ih, w_hh = params["gru_w_ih"], params["gru_w_hh"]
  b_ih, b_hh = params["gru_b_ih"], params["gru_b_hh"]

  def gate_block_ih(g):                      # g: [D, E+2H]
    blk = jnp.zeros((Ep + H2p, Dp), bf16)
    blk = blk.at[:E, :D].set(g[:, :E].T.astype(bf16))
    blk = blk.at[Ep:Ep + H2, :D].set(g[:, E:].T.astype(bf16))
    return blk

  def gate_block_hh(g):                      # g: [D, D]
    return jnp.zeros((Dp, Dp), bf16).at[:D, :D].set(g.T.astype(bf16))

  def gate_bias(b):                          # b: [D]
    return jnp.zeros((Dp,), f32).at[:D].set(b.astype(f32))

  w_ih_p = jnp.concatenate(
      [gate_block_ih(w_ih[i * D:(i + 1) * D]) for i in range(3)], axis=1)
  w_hh_p = jnp.concatenate(
      [gate_block_hh(w_hh[i * D:(i + 1) * D]) for i in range(3)], axis=1)
  b_ih_p = jnp.concatenate(
      [gate_bias(b_ih[i * D:(i + 1) * D]) for i in range(3)]).reshape(1, 3 * Dp)
  b_hh_p = jnp.concatenate(
      [gate_bias(b_hh[i * D:(i + 1) * D]) for i in range(3)]).reshape(1, 3 * Dp)

  # ---- fused output projection weight [Dp|H2p|Ep, Vp], bf16 ----
  out_w = params["out_w"]                    # [V, D+2H+E]
  wo_p = jnp.zeros((Kp, Vp), bf16)
  wo_p = wo_p.at[:D, :V].set(out_w[:, :D].T.astype(bf16))
  wo_p = wo_p.at[Dp:Dp + H2, :V].set(out_w[:, D:D + H2].T.astype(bf16))
  wo_p = wo_p.at[Dp + H2p:Dp + H2p + E, :V].set(out_w[:, D + H2:].T.astype(bf16))
  b_out_p = jnp.zeros((1, Vp), f32).at[0, :V].set(params["out_b"].astype(f32))

  # ---- tile choices ----
  TB = 8
  for c in (64, 32, 16, 8):
    if Bp % c == 0:
      TB = c
      break
  TV = 128
  for c in (512, 256, 128):
    if Vp % c == 0:
      TV = c
      break

  cparams = pltpu.CompilerParams(
      dimension_semantics=("parallel",),
      vmem_limit_bytes=64 * 1024 * 1024)      # above the 16 MiB v5e default

  # ---- kernel 1: attention + GRU ----
  flops1 = 2 * Bp * (Sp * H2p * Dp + Dp * Dp + Sp * Dp + Sp * H2p
                     + (Ep + H2p) * 3 * Dp + Dp * 3 * Dp)
  transc1 = Bp * (Sp * Dp + Sp + 3 * Dp + 1)
  bytes1 = sum(int(a.size) * a.dtype.itemsize for a in
               (emb_p, hid_p, enc_p, bias_p, a_wh, a_we, a_b, v_p,
                w_ih_p, b_ih_p, w_hh_p, b_hh_p))
  bytes1 += 4 * (Bp * Dp + Bp * Sp + Bp * Kp)

  h_new_p, attn_p, lin_p = pl.pallas_call(
      _attn_gru_kernel,
      out_shape=(
          jax.ShapeDtypeStruct((Bp, Dp), f32),
          jax.ShapeDtypeStruct((Bp, Sp), f32),
          jax.ShapeDtypeStruct((Bp, Kp), f32),
      ),
      grid=(Bp // TB,),
      in_specs=[
          pl.BlockSpec((TB, Ep), lambda i: (i, 0)),
          pl.BlockSpec((TB, Dp), lambda i: (i, 0)),
          pl.BlockSpec((TB, Sp, H2p), lambda i: (i, 0, 0)),
          pl.BlockSpec((TB, Sp), lambda i: (i, 0)),
          pl.BlockSpec((Dp, Dp), lambda i: (0, 0)),
          pl.BlockSpec((H2p, Dp), lambda i: (0, 0)),
          pl.BlockSpec((1, Dp), lambda i: (0, 0)),
          pl.BlockSpec((1, Dp), lambda i: (0, 0)),
          pl.BlockSpec((Ep + H2p, 3 * Dp), lambda i: (0, 0)),
          pl.BlockSpec((1, 3 * Dp), lambda i: (0, 0)),
          pl.BlockSpec((Dp, 3 * Dp), lambda i: (0, 0)),
          pl.BlockSpec((1, 3 * Dp), lambda i: (0, 0)),
      ],
      out_specs=(
          pl.BlockSpec((TB, Dp), lambda i: (i, 0)),
          pl.BlockSpec((TB, Sp), lambda i: (i, 0)),
          pl.BlockSpec((TB, Kp), lambda i: (i, 0)),
      ),
      input_output_aliases={1: 0},            # hidden buffer reused for h_new
      compiler_params=cparams,
      cost_estimate=pl.CostEstimate(flops=flops1, transcendentals=transc1,
                                    bytes_accessed=bytes1),
  )(emb_p, hid_p, enc_p, bias_p, a_wh, a_we, a_b, v_p,
    w_ih_p, b_ih_p, w_hh_p, b_hh_p)

  # ---- kernel 2: vocab projection, streams lane-dense weight slabs ----
  wo_spec = pl.BlockSpec((Kp, TV), lambda i, j: (0, j))
  if Vp // TV >= 3:
    # Deeper buffering on the weight slabs hides the HBM stream (v6e).
    wo_spec = pl.BlockSpec((Kp, TV), lambda i, j: (0, j),
                           pipeline_mode=pl.Buffered(3))

  flops2 = 2 * Bp * Kp * Vp
  bytes2 = 4 * Bp * Kp + 2 * Kp * Vp + 4 * Vp + 4 * Bp * Vp

  logits_p = pl.pallas_call(
      _out_proj_kernel,
      out_shape=jax.ShapeDtypeStruct((Bp, Vp), f32),
      grid=(Bp // TB, Vp // TV),
      in_specs=[
          pl.BlockSpec((TB, Kp), lambda i, j: (i, 0)),
          wo_spec,
          pl.BlockSpec((1, TV), lambda i, j: (0, j)),
      ],
      out_specs=pl.BlockSpec((TB, TV), lambda i, j: (i, j)),
      compiler_params=pltpu.CompilerParams(
          dimension_semantics=("parallel", "parallel"),
          vmem_limit_bytes=64 * 1024 * 1024),
      cost_estimate=pl.CostEstimate(flops=flops2, transcendentals=0,
                                    bytes_accessed=bytes2),
  )(lin_p, wo_p, b_out_p)

  return logits_p[:B, :V], h_new_p[:B, :D], attn_p[:B, :S]


def reference_forward(token_ids, hidden, encoder_outputs, params):
  """Pure-JAX full-precision replica of the PyTorch forward."""
  hp = jax.lax.Precision.HIGHEST
  emb = params["embedding"][token_ids]
  enc_bf = jnp.transpose(encoder_outputs, (1, 0, 2))
  B, S, _ = enc_bf.shape
  D = hidden.shape[-1]
  hid_rep = jnp.broadcast_to(hidden[:, None, :], (B, S, D))
  cat = jnp.concatenate([hid_rep, enc_bf], axis=-1)
  energy = jnp.tanh(jnp.einsum("bsi,oi->bso", cat, params["attn_w"],
                               precision=hp) + params["attn_b"])
  scores = jnp.einsum("bsd,od->bso", energy, params["attn_v"],
                      precision=hp)[..., 0]
  attn = jax.nn.softmax(scores, axis=-1)
  weighted = jnp.einsum("bs,bsh->bh", attn, enc_bf, precision=hp)
  x = jnp.concatenate([emb, weighted], axis=-1)
  gi = jnp.dot(x, params["gru_w_ih"].T, precision=hp) + params["gru_b_ih"]
  gh = jnp.dot(hidden, params["gru_w_hh"].T, precision=hp) + params["gru_b_hh"]
  r = jax.nn.sigmoid(gi[:, :D] + gh[:, :D])
  z = jax.nn.sigmoid(gi[:, D:2 * D] + gh[:, D:2 * D])
  n = jnp.tanh(gi[:, 2 * D:] + r * gh[:, 2 * D:])
  h_new = (1.0 - z) * n + z * hidden
  lin = jnp.concatenate([h_new, weighted, emb], axis=-1)
  logits = jnp.dot(lin, params["out_w"].T, precision=hp) + params["out_b"]
  return logits, h_new, attn


if __name__ == "__main__":
  output_dim, emb_dim, enc_hid, dec_hid = 50, 32, 16, 32
  src_len, batch = 8, 2

  key = jax.random.PRNGKey(0)
  kp, k1, k2, k3 = jax.random.split(key, 4)
  params = init_params(kp, output_dim, emb_dim, enc_hid, dec_hid)

  token_ids = jax.random.randint(k1, (batch,), 0, output_dim)
  hidden = jax.random.normal(k2, (batch, dec_hid), jnp.float32)
  encoder_outputs = jax.random.normal(k3, (src_len, batch, 2 * enc_hid),
                                      jnp.float32)

  fwd = jax.jit(bahdanau_decoder_forward)
  logits, h_new, attn = jax.block_until_ready(
      fwd(token_ids, hidden, encoder_outputs, params))

  ref_logits, ref_h, ref_attn = reference_forward(
      token_ids, hidden, encoder_outputs, params)

  assert logits.shape == (batch, output_dim)
  assert h_new.shape == (batch, dec_hid)
  assert attn.shape == (batch, src_len)
  # bf16 MXU operands + approx reciprocal => looser tolerance than f32 ref.
  assert jnp.allclose(attn, ref_attn, atol=3e-2, rtol=3e-2)
  assert jnp.allclose(h_new, ref_h, atol=3e-2, rtol=3e-2)
  assert jnp.allclose(logits, ref_logits, atol=3e-2, rtol=3e-2)

  print("KERNEL_OK")
</pallas_src>

<mosaic_0001>
module attributes {stable_mosaic.version = 11 : i64} {
  func.func @_attn_gru_kernel(%arg0: i32, %arg1: memref<8x128xf32, #tpu.memory_space<vmem>>, %arg2: memref<8x128xf32, #tpu.memory_space<vmem>>, %arg3: memref<8x128x128xbf16, #tpu.memory_space<vmem>>, %arg4: memref<8x128xf32, #tpu.memory_space<vmem>>, %arg5: memref<128x128xbf16, #tpu.memory_space<vmem>>, %arg6: memref<128x128xbf16, #tpu.memory_space<vmem>>, %arg7: memref<1x128xf32, #tpu.memory_space<vmem>>, %arg8: memref<1x128xf32, #tpu.memory_space<vmem>>, %arg9: memref<256x384xbf16, #tpu.memory_space<vmem>>, %arg10: memref<1x384xf32, #tpu.memory_space<vmem>>, %arg11: memref<128x384xbf16, #tpu.memory_space<vmem>>, %arg12: memref<1x384xf32, #tpu.memory_space<vmem>>, %arg13: memref<8x128xf32, #tpu.memory_space<vmem>>, %arg14: memref<8x128xf32, #tpu.memory_space<vmem>>, %arg15: memref<8x384xf32, #tpu.memory_space<vmem>>) attributes {dimension_semantics = [#tpu.dimension_semantics<parallel>], iteration_bounds = array<i64: 1>, scalar_prefetch = 0 : i64, scratch_operands = 0 : i64, tpu.core_type = #tpu.core_type<tc>, window_params = [{transform_indices = @transform_0, window_bounds = array<i64: 8, 128>}, {transform_indices = @transform_1, window_bounds = array<i64: 8, 128>}, {transform_indices = @transform_2, window_bounds = array<i64: 8, 128, 128>}, {transform_indices = @transform_3, window_bounds = array<i64: 8, 128>}, {pipeline_mode = #tpu.pipeline_mode<synchronous>, transform_indices = @transform_4, window_bounds = array<i64: 128, 128>}, {pipeline_mode = #tpu.pipeline_mode<synchronous>, transform_indices = @transform_5, window_bounds = array<i64: 128, 128>}, {pipeline_mode = #tpu.pipeline_mode<synchronous>, transform_indices = @transform_6, window_bounds = array<i64: 1, 128>}, {pipeline_mode = #tpu.pipeline_mode<synchronous>, transform_indices = @transform_7, window_bounds = array<i64: 1, 128>}, {pipeline_mode = #tpu.pipeline_mode<synchronous>, transform_indices = @transform_8, window_bounds = array<i64: 256, 384>}, {pipeline_mode = #tpu.pipeline_mode<synchronous>, transform_indices = @transform_9, window_bounds = array<i64: 1, 384>}, {pipeline_mode = #tpu.pipeline_mode<synchronous>, transform_indices = @transform_10, window_bounds = array<i64: 128, 384>}, {pipeline_mode = #tpu.pipeline_mode<synchronous>, transform_indices = @transform_11, window_bounds = array<i64: 1, 384>}, {transform_indices = @transform_12, window_bounds = array<i64: 8, 128>}, {transform_indices = @transform_13, window_bounds = array<i64: 8, 128>}, {transform_indices = @transform_14, window_bounds = array<i64: 8, 384>}]} {
    %c0 = arith.constant 0 : index
    %c0_0 = arith.constant 0 : index
    %0 = vector.load %arg1[%c0, %c0_0] : memref<8x128xf32, #tpu.memory_space<vmem>>, vector<8x128xf32>
    %c0_1 = arith.constant 0 : index
    %c0_2 = arith.constant 0 : index
    %1 = vector.load %arg2[%c0_1, %c0_2] : memref<8x128xf32, #tpu.memory_space<vmem>>, vector<8x128xf32>
    %c0_3 = arith.constant 0 : index
    %c0_4 = arith.constant 0 : index
    %c0_5 = arith.constant 0 : index
    %2 = vector.load %arg3[%c0_3, %c0_4, %c0_5] : memref<8x128x128xbf16, #tpu.memory_space<vmem>>, vector<8x128x128xbf16>
    %3 = arith.truncf %0 : vector<8x128xf32> to vector<8x128xbf16>
    %4 = arith.truncf %1 : vector<8x128xf32> to vector<8x128xbf16>
    %c0_6 = arith.constant 0 : index
    %c0_7 = arith.constant 0 : index
    %5 = vector.load %arg5[%c0_6, %c0_7] : memref<128x128xbf16, #tpu.memory_space<vmem>>, vector<128x128xbf16>
    %cst = arith.constant dense<0.000000e+00> : vector<8x128xf32>
    %6 = tpu.matmul %4, %5, %cst {dimension_numbers = #tpu.dot_dimension_numbers<[1], [0], [0], [1], [0, 0, 1, 1], [], []>} : vector<8x128xbf16>, vector<128x128xbf16>, vector<8x128xf32> -> vector<8x128xf32>
    %c0_8 = arith.constant 0 : index
    %c0_9 = arith.constant 0 : index
    %7 = vector.load %arg7[%c0_8, %c0_9] : memref<1x128xf32, #tpu.memory_space<vmem>>, vector<1x128xf32>
    %8 = vector.broadcast %7 : vector<1x128xf32> to vector<8x128xf32>
    %9 = arith.addf %6, %8 : vector<8x128xf32>
    %10 = vector.shape_cast %2 : vector<8x128x128xbf16> to vector<1024x128xbf16>
    %c0_10 = arith.constant 0 : index
    %c0_11 = arith.constant 0 : index
    %11 = vector.load %arg6[%c0_10, %c0_11] : memref<128x128xbf16, #tpu.memory_space<vmem>>, vector<128x128xbf16>
    %cst_12 = arith.constant dense<0.000000e+00> : vector<1024x128xf32>
    %12 = tpu.matmul %10, %11, %cst_12 {dimension_numbers = #tpu.dot_dimension_numbers<[1], [0], [0], [1], [0, 0, 1, 1], [], []>} : vector<1024x128xbf16>, vector<128x128xbf16>, vector<1024x128xf32> -> vector<1024x128xf32>
    %13 = vector.shape_cast %9 : vector<8x128xf32> to vector<8x1x128xf32>
    %14 = vector.shape_cast %12 : vector<1024x128xf32> to vector<8x128x128xf32>
    %15 = vector.broadcast %13 : vector<8x1x128xf32> to vector<8x128x128xf32>
    %16 = arith.addf %15, %14 : vector<8x128x128xf32>
    %17 = math.tanh %16 : vector<8x128x128xf32>
    %c0_13 = arith.constant 0 : index
    %c0_14 = arith.constant 0 : index
    %18 = vector.load %arg8[%c0_13, %c0_14] : memref<1x128xf32, #tpu.memory_space<vmem>>, vector<1x128xf32>
    %19 = vector.shape_cast %18 : vector<1x128xf32> to vector<1x1x128xf32>
    %20 = vector.broadcast %19 : vector<1x1x128xf32> to vector<8x128x128xf32>
    %21 = arith.mulf %17, %20 : vector<8x128x128xf32>
    %cst_15 = arith.constant dense<0.000000e+00> : vector<8x128xf32>
    %22 = vector.multi_reduction <add>, %21, %cst_15 [2] : vector<8x128x128xf32> to vector<8x128xf32>
    %c0_16 = arith.constant 0 : index
    %c0_17 = arith.constant 0 : index
    %23 = vector.load %arg4[%c0_16, %c0_17] : memref<8x128xf32, #tpu.memory_space<vmem>>, vector<8x128xf32>
    %24 = arith.addf %22, %23 : vector<8x128xf32>
    %cst_18 = arith.constant dense<0xFF800000> : vector<8xf32>
    %25 = vector.multi_reduction <maximumf>, %24, %cst_18 [1] : vector<8x128xf32> to vector<8xf32>
    %26 = vector.shape_cast %25 : vector<8xf32> to vector<8x1xf32>
    %27 = vector.broadcast %26 : vector<8x1xf32> to vector<8x128xf32>
    %28 = arith.subf %24, %27 : vector<8x128xf32>
    %29 = math.exp %28 : vector<8x128xf32>
    %cst_19 = arith.constant dense<0.000000e+00> : vector<8xf32>
    %30 = vector.multi_reduction <add>, %29, %cst_19 [1] : vector<8x128xf32> to vector<8xf32>
    %31 = vector.shape_cast %30 : vector<8xf32> to vector<8x1xf32>
    %32 = tpu.reciprocal %31 {approx = true} : vector<8x1xf32> -> vector<8x1xf32>
    %33 = vector.broadcast %32 : vector<8x1xf32> to vector<8x128xf32>
    %34 = arith.mulf %29, %33 : vector<8x128xf32>
    %c0_20 = arith.constant 0 : index
    %c0_21 = arith.constant 0 : index
    %35 = vector.load %arg14[%c0_20, %c0_21] : memref<8x128xf32, #tpu.memory_space<vmem>>, vector<8x128xf32>
    tpu.vector_store %arg14[%c0_20, %c0_21], %34 {strides = array<i32>} : memref<8x128xf32, #tpu.memory_space<vmem>>, vector<8x128xf32>,
    %36 = vector.shape_cast %34 : vector<8x128xf32> to vector<8x1x128xf32>
    %37 = arith.truncf %36 : vector<8x1x128xf32> to vector<8x1x128xbf16>
    "tpu.trace_start"() <{level = 10 : i32, message = "bqs,bsh->bqh"}> : () -> ()
    %cst_22 = arith.constant dense<0.000000e+00> : vector<8x1x128xf32>
    %38 = tpu.matmul %37, %2, %cst_22 {dimension_numbers = #tpu.dot_dimension_numbers<[2], [1], [1], [2], [0, 0, 0, 1, 1, 2], [0], [0]>} : vector<8x1x128xbf16>, vector<8x128x128xbf16>, vector<8x1x128xf32> -> vector<8x1x128xf32>
    "tpu.trace_stop"() : () -> ()
    %39 = vector.shape_cast %38 : vector<8x1x128xf32> to vector<8x128xf32>
    %40 = arith.truncf %39 : vector<8x128xf32> to vector<8x128xbf16>
    %41 = tpu.concatenate %3, %40 in 1 : vector<8x128xbf16>, vector<8x128xbf16> -> vector<8x256xbf16>
    %c0_23 = arith.constant 0 : index
    %c0_24 = arith.constant 0 : index
    %42 = vector.load %arg9[%c0_23, %c0_24] : memref<256x384xbf16, #tpu.memory_space<vmem>>, vector<256x384xbf16>
    %cst_25 = arith.constant dense<0.000000e+00> : vector<8x384xf32>
    %43 = tpu.matmul %41, %42, %cst_25 {dimension_numbers = #tpu.dot_dimension_numbers<[1], [0], [0], [1], [0, 0, 1, 1], [], []>} : vector<8x256xbf16>, vector<256x384xbf16>, vector<8x384xf32> -> vector<8x384xf32>
    %c0_26 = arith.constant 0 : index
    %c0_27 = arith.constant 0 : index
    %44 = vector.load %arg10[%c0_26, %c0_27] : memref<1x384xf32, #tpu.memory_space<vmem>>, vector<1x384xf32>
    %45 = vector.broadcast %44 : vector<1x384xf32> to vector<8x384xf32>
    %46 = arith.addf %43, %45 : vector<8x384xf32>
    %c0_28 = arith.constant 0 : index
    %c0_29 = arith.constant 0 : index
    %47 = vector.load %arg11[%c0_28, %c0_29] : memref<128x384xbf16, #tpu.memory_space<vmem>>, vector<128x384xbf16>
    %cst_30 = arith.constant dense<0.000000e+00> : vector<8x384xf32>
    %48 = tpu.matmul %4, %47, %cst_30 {dimension_numbers = #tpu.dot_dimension_numbers<[1], [0], [0], [1], [0, 0, 1, 1], [], []>} : vector<8x128xbf16>, vector<128x384xbf16>, vector<8x384xf32> -> vector<8x384xf32>
    %c0_31 = arith.constant 0 : index
    %c0_32 = arith.constant 0 : index
    %49 = vector.load %arg12[%c0_31, %c0_32] : memref<1x384xf32, #tpu.memory_space<vmem>>, vector<1x384xf32>
    %50 = vector.broadcast %49 : vector<1x384xf32> to vector<8x384xf32>
    %51 = arith.addf %48, %50 : vector<8x384xf32>
    %52 = vector.extract_strided_slice %46 {offsets = [0, 0], sizes = [8, 128], strides = [1, 1]} : vector<8x384xf32> to vector<8x128xf32>
    %53 = vector.extract_strided_slice %51 {offsets = [0, 0], sizes = [8, 128], strides = [1, 1]} : vector<8x384xf32> to vector<8x128xf32>
    %54 = arith.addf %52, %53 : vector<8x128xf32>
    %55 = arith.negf %54 : vector<8x128xf32>
    %56 = math.exp %55 : vector<8x128xf32>
    %cst_33 = arith.constant 1.000000e+00 : f32
    %57 = vector.broadcast %cst_33 : f32 to vector<8x128xf32>
    %58 = arith.addf %57, %56 : vector<8x128xf32>
    %59 = arith.divf %57, %58 : vector<8x128xf32>
    %60 = vector.extract_strided_slice %46 {offsets = [0, 128], sizes = [8, 128], strides = [1, 1]} : vector<8x384xf32> to vector<8x128xf32>
    %61 = vector.extract_strided_slice %51 {offsets = [0, 128], sizes = [8, 128], strides = [1, 1]} : vector<8x384xf32> to vector<8x128xf32>
    %62 = arith.addf %60, %61 : vector<8x128xf32>
    %63 = arith.negf %62 : vector<8x128xf32>
    %64 = math.exp %63 : vector<8x128xf32>
    %cst_34 = arith.constant 1.000000e+00 : f32
    %65 = vector.broadcast %cst_34 : f32 to vector<8x128xf32>
    %66 = arith.addf %65, %64 : vector<8x128xf32>
    %67 = arith.divf %65, %66 : vector<8x128xf32>
    %68 = vector.extract_strided_slice %46 {offsets = [0, 256], sizes = [8, 128], strides = [1, 1]} : vector<8x384xf32> to vector<8x128xf32>
    %69 = vector.extract_strided_slice %51 {offsets = [0, 256], sizes = [8, 128], strides = [1, 1]} : vector<8x384xf32> to vector<8x128xf32>
    %70 = arith.mulf %59, %69 : vector<8x128xf32>
    %71 = arith.addf %68, %70 : vector<8x128xf32>
    %72 = math.tanh %71 : vector<8x128xf32>
    %cst_35 = arith.constant 1.000000e+00 : f32
    %73 = vector.broadcast %cst_35 : f32 to vector<8x128xf32>
    %74 = arith.subf %73, %67 : vector<8x128xf32>
    %75 = arith.mulf %74, %72 : vector<8x128xf32>
    %76 = arith.mulf %67, %1 : vector<8x128xf32>
    %77 = arith.addf %75, %76 : vector<8x128xf32>
    %c0_36 = arith.constant 0 : index
    %c0_37 = arith.constant 0 : index
    %78 = vector.load %arg13[%c0_36, %c0_37] : memref<8x128xf32, #tpu.memory_space<vmem>>, vector<8x128xf32>
    tpu.vector_store %arg13[%c0_36, %c0_37], %77 {strides = array<i32>} : memref<8x128xf32, #tpu.memory_space<vmem>>, vector<8x128xf32>,
    %79 = tpu.concatenate %77, %39, %0 in 1 : vector<8x128xf32>, vector<8x128xf32>, vector<8x128xf32> -> vector<8x384xf32>
    %c0_38 = arith.constant 0 : index
    %c0_39 = arith.constant 0 : index
    %80 = vector.load %arg15[%c0_38, %c0_39] : memref<8x384xf32, #tpu.memory_space<vmem>>, vector<8x384xf32>
    tpu.vector_store %arg15[%c0_38, %c0_39], %79 {strides = array<i32>} : memref<8x384xf32, #tpu.memory_space<vmem>>, vector<8x384xf32>,
    return
  }
  func.func @transform_0(%arg0: i32) -> (i32, i32) {
    %c0_i32 = arith.constant 0 : i32
    %c0_i32_0 = arith.constant 0 : i32
    return %arg0, %c0_i32 : i32, i32
  }
  func.func @transform_1(%arg0: i32) -> (i32, i32) {
    %c0_i32 = arith.constant 0 : i32
    %c0_i32_0 = arith.constant 0 : i32
    return %arg0, %c0_i32 : i32, i32
  }
  func.func @transform_2(%arg0: i32) -> (i32, i32, i32) {
    %c0_i32 = arith.constant 0 : i32
    %c0_i32_0 = arith.constant 0 : i32
    %c0_i32_1 = arith.constant 0 : i32
    return %arg0, %c0_i32, %c0_i32_0 : i32, i32, i32
  }
  func.func @transform_3(%arg0: i32) -> (i32, i32) {
    %c0_i32 = arith.constant 0 : i32
    %c0_i32_0 = arith.constant 0 : i32
    return %arg0, %c0_i32 : i32, i32
  }
  func.func @transform_4(%arg0: i32) -> (i32, i32) {
    %c0_i32 = arith.constant 0 : i32
    %c0_i32_0 = arith.constant 0 : i32
    %c0_i32_1 = arith.constant 0 : i32
    return %c0_i32, %c0_i32_0 : i32, i32
  }
  func.func @transform_5(%arg0: i32) -> (i32, i32) {
    %c0_i32 = arith.constant 0 : i32
    %c0_i32_0 = arith.constant 0 : i32
    %c0_i32_1 = arith.constant 0 : i32
    return %c0_i32, %c0_i32_0 : i32, i32
  }
  func.func @transform_6(%arg0: i32) -> (i32, i32) {
    %c0_i32 = arith.constant 0 : i32
    %c0_i32_0 = arith.constant 0 : i32
    %c0_i32_1 = arith.constant 0 : i32
    return %c0_i32, %c0_i32_0 : i32, i32
  }
  func.func @transform_7(%arg0: i32) -> (i32, i32) {
    %c0_i32 = arith.constant 0 : i32
    %c0_i32_0 = arith.constant 0 : i32
    %c0_i32_1 = arith.constant 0 : i32
    return %c0_i32, %c0_i32_0 : i32, i32
  }
  func.func @transform_8(%arg0: i32) -> (i32, i32) {
    %c0_i32 = arith.constant 0 : i32
    %c0_i32_0 = arith.constant 0 : i32
    %c0_i32_1 = arith.constant 0 : i32
    return %c0_i32, %c0_i32_0 : i32, i32
  }
  func.func @transform_9(%arg0: i32) -> (i32, i32) {
    %c0_i32 = arith.constant 0 : i32
    %c0_i32_0 = arith.constant 0 : i32
    %c0_i32_1 = arith.constant 0 : i32
    return %c0_i32, %c0_i32_0 : i32, i32
  }
  func.func @transform_10(%arg0: i32) -> (i32, i32) {
    %c0_i32 = arith.constant 0 : i32
    %c0_i32_0 = arith.constant 0 : i32
    %c0_i32_1 = arith.constant 0 : i32
    return %c0_i32, %c0_i32_0 : i32, i32
  }
  func.func @transform_11(%arg0: i32) -> (i32, i32) {
    %c0_i32 = arith.constant 0 : i32
    %c0_i32_0 = arith.constant 0 : i32
    %c0_i32_1 = arith.constant 0 : i32
    return %c0_i32, %c0_i32_0 : i32, i32
  }
  func.func @transform_12(%arg0: i32) -> (i32, i32) {
    %c0_i32 = arith.constant 0 : i32
    %c0_i32_0 = arith.constant 0 : i32
    return %arg0, %c0_i32 : i32, i32
  }
  func.func @transform_13(%arg0: i32) -> (i32, i32) {
    %c0_i32 = arith.constant 0 : i32
    %c0_i32_0 = arith.constant 0 : i32
    return %arg0, %c0_i32 : i32, i32
  }
  func.func @transform_14(%arg0: i32) -> (i32, i32) {
    %c0_i32 = arith.constant 0 : i32
    %c0_i32_0 = arith.constant 0 : i32
    return %arg0, %c0_i32 : i32, i32
  }
}

module attributes {stable_mosaic.version = 11 : i64} {
  func.func @_out_proj_kernel(%arg0: i32, %arg1: i32, %arg2: memref<8x384xf32, #tpu.memory_space<vmem>>, %arg3: memref<384x128xbf16, #tpu.memory_space<vmem>>, %arg4: memref<1x128xf32, #tpu.memory_space<vmem>>, %arg5: memref<8x128xf32, #tpu.memory_space<vmem>>) attributes {dimension_semantics = [#tpu.dimension_semantics<parallel>, #tpu.dimension_semantics<parallel>], iteration_bounds = array<i64: 1, 1>, scalar_prefetch = 0 : i64, scratch_operands = 0 : i64, tpu.core_type = #tpu.core_type<tc>, window_params = [{transform_indices = @transform_0, window_bounds = array<i64: 8, 384>}, {transform_indices = @transform_1, window_bounds = array<i64: 384, 128>}, {transform_indices = @transform_2, window_bounds = array<i64: 1, 128>}, {transform_indices = @transform_3, window_bounds = array<i64: 8, 128>}]} {
    %c0 = arith.constant 0 : index
    %c0_0 = arith.constant 0 : index
    %0 = vector.load %arg2[%c0, %c0_0] : memref<8x384xf32, #tpu.memory_space<vmem>>, vector<8x384xf32>
    %1 = arith.truncf %0 : vector<8x384xf32> to vector<8x384xbf16>
    %c0_1 = arith.constant 0 : index
    %c0_2 = arith.constant 0 : index
    %2 = vector.load %arg3[%c0_1, %c0_2] : memref<384x128xbf16, #tpu.memory_space<vmem>>, vector<384x128xbf16>
    %cst = arith.constant dense<0.000000e+00> : vector<8x128xf32>
    %3 = tpu.matmul %1, %2, %cst {dimension_numbers = #tpu.dot_dimension_numbers<[1], [0], [0], [1], [0, 0, 1, 1], [], []>} : vector<8x384xbf16>, vector<384x128xbf16>, vector<8x128xf32> -> vector<8x128xf32>
    %c0_3 = arith.constant 0 : index
    %c0_4 = arith.constant 0 : index
    %4 = vector.load %arg4[%c0_3, %c0_4] : memref<1x128xf32, #tpu.memory_space<vmem>>, vector<1x128xf32>
    %5 = vector.broadcast %4 : vector<1x128xf32> to vector<8x128xf32>
    %6 = arith.addf %3, %5 : vector<8x128xf32>
    %c0_5 = arith.constant 0 : index
    %c0_6 = arith.constant 0 : index
    %7 = vector.load %arg5[%c0_5, %c0_6] : memref<8x128xf32, #tpu.memory_space<vmem>>, vector<8x128xf32>
    tpu.vector_store %arg5[%c0_5, %c0_6], %6 {strides = array<i32>} : memref<8x128xf32, #tpu.memory_space<vmem>>, vector<8x128xf32>,
    return
  }
  func.func @transform_0(%arg0: i32, %arg1: i32) -> (i32, i32) {
    %c0_i32 = arith.constant 0 : i32
    %c0_i32_0 = arith.constant 0 : i32
    return %arg0, %c0_i32 : i32, i32
  }
  func.func @transform_1(%arg0: i32, %arg1: i32) -> (i32, i32) {
    %c0_i32 = arith.constant 0 : i32
    %c0_i32_0 = arith.constant 0 : i32
    return %c0_i32, %arg1 : i32, i32
  }
  func.func @transform_2(%arg0: i32, %arg1: i32) -> (i32, i32) {
    %c0_i32 = arith.constant 0 : i32
    %c0_i32_0 = arith.constant 0 : i32
    return %c0_i32, %arg1 : i32, i32
  }
  func.func @transform_3(%arg0: i32, %arg1: i32) -> (i32, i32) {
    %c0_i32 = arith.constant 0 : i32
    return %arg0, %arg1 : i32, i32
  }
}

</mosaic_0001>

<bundles_post_ra>
// kernel: bahdanau_decoder_forward.3
= control target key start
LH: loop header
LB: loop body
LE: loop exit
PB: predicated region body
PF: predicated region fallthrough
CT: control target
= control target key end

     0   :  { %v407_v0 = vmov 0.0   ;;  %vm408_vm0 = vmmov 0   ;;  %s516_s1 = inlined_call_operand.vmem [shape: bf16[384,128], index: 1, kind: input, shape index: {}]   ;;  %s517_s0 = inlined_call_operand.vmem [shape: f32[8,384], index: 0, kind: input, shape index: {}]   ;;  %s518_s2 = inlined_call_operand.vmem [shape: f32[1,128], index: 2, kind: input, shape index: {}]   ;;  %s519_s3 = inlined_call_operand.vmem [shape: f32[8,128], index: 3, kind: output, shape index: {}]  }
   0x1   :  { %361 = vmatprep.subr.bf16.mxu1 %v407_v0  ;;  %v383_v1 = vld [vmem:[%s516_s1 + $0x78] sm:$0xff]   ;;  %377 = vmatprep.mubr.msk.bf16.mxu1 %vm408_vm0, %v407_v0  ;;  %v386_v4 = vld [vmem:[%s516_s1 + $0x70] sm:$0xff]   ;;  %v389_v7 = vld [vmem:[%s516_s1 + $0x68] sm:$0xff]  }
   0x2   :  { %v384_v2 = vld [vmem:[%s516_s1 + $0xb8] sm:$0xff]   ;;  %330 = vmatprep.subr.bf16.mxu0 %v383_v1  ;;  %v387_v5 = vld [vmem:[%s516_s1 + $0xb0] sm:$0xff]   ;;  %v390_v8 = vld [vmem:[%s516_s1 + $0xa8] sm:$0xff]  }
   0x3   :  { %v385_v3 = vld [vmem:[%s516_s1 + $0x38] sm:$0xff]   ;;  %362 = vmatpush3.bf16.msra.mxu1 %v384_v2  ;;  %v388_v6 = vld [vmem:[%s516_s1 + $0x30] sm:$0xff]   ;;  %v391_v9 = vld [vmem:[%s516_s1 + $0x28] sm:$0xff]  }
   0x4   :  { %331 = vmatpush3.bf16.msra.mxu0 %v385_v3  ;;  %363 = vmatprep.subr.bf16.mxu1 %v407_v0  ;;  %v392_v10 = vld [vmem:[%s516_s1 + $0x60] sm:$0xff]   ;;  %v395_v13 = vld [vmem:[%s516_s1 + $0x58] sm:$0xff]   ;;  %v398_v16 = vld [vmem:[%s516_s1 + $0x50] sm:$0xff]  }
   0x5   :  { %332 = vmatprep.subr.bf16.mxu0 %v386_v4  ;;  %v393_v11 = vld [vmem:[%s516_s1 + $0xa0] sm:$0xff]   ;;  %v396_v14 = vld [vmem:[%s516_s1 + $0x98] sm:$0xff]   ;;  %v399_v17 = vld [vmem:[%s516_s1 + $0x90] sm:$0xff]  }
   0x6   :  { %v394_v12 = vld [vmem:[%s516_s1 + $0x20] sm:$0xff]   ;;  %v397_v15 = vld [vmem:[%s516_s1 + $0x18] sm:$0xff]   ;;  %v400_v18 = vld [vmem:[%s516_s1 + $0x10] sm:$0xff]  }
   0x7   :  { %364 = vmatpush3.bf16.msra.mxu1 %v387_v5  ;;  %v401_v19 = vld [vmem:[%s516_s1 + $0x48] sm:$0xff]   ;;  %v404_v23 = vld [vmem:[%s516_s1 + $0x40] sm:$0xff]   ;;  %v17_v26 = vld [vmem:[%s517_s0 + $0x10] sm:$0xff] }
   0x8   :  { %333 = vmatpush3.bf16.msra.mxu0 %v388_v6  ;;  %365 = vmatprep.subr.bf16.mxu1 %v407_v0  ;;  %v402_v20 = vld [vmem:[%s516_s1 + $0x88] sm:$0xff]   ;;  %v405_v25 = vld [vmem:[%s516_s1 + $0x80] sm:$0xff]   ;;  %v20_v29 = vpack.c.bf16 %v17_v26, %v17_v26 }
   0x9   :  { %334 = vmatprep.subr.bf16.mxu0 %v389_v7  ;;  %v403_v21 = vld [vmem:[%s516_s1 + $0x8] sm:$0xff]   ;;  %v406_v27 = vld [vmem:[%s516_s1] sm:$0xff]  }
   0xa   :  { %v16_v22 = vld [vmem:[%s517_s0 + $0x8] sm:$0xff]  ;;  %v15_v28 = vld [vmem:[%s517_s0] sm:$0xff] }
   0xb   :  { %366 = vmatpush3.bf16.msra.mxu1 %v390_v8  ;;  %v19_v24 = vpack.c.bf16 %v16_v22, %v16_v22  ;;  %v18_v30 = vpack.c.bf16 %v15_v28, %v15_v28  ;;  %v305_v34 = vld [vmem:[%s518_s2] ss:$0 sm:$0xff] }
   0xc   :  { %335 = vmatpush3.bf16.msra.mxu0 %v391_v9  ;;  %367 = vmatprep.subr.bf16.mxu1 %v407_v0 }
   0xd   :  { %336 = vmatprep.subr.bf16.mxu0 %v392_v10  ;;  %252 = vmatprep.mubr.bf16.mxu0 %v19_v24 }
   0xf   :  { %368 = vmatpush3.bf16.msra.mxu1 %v393_v11 }
  0x10   :  { %337 = vmatpush3.bf16.msra.mxu0 %v394_v12  ;;  %369 = vmatprep.subr.bf16.mxu1 %v407_v0 }
  0x11   :  { %338 = vmatprep.subr.bf16.mxu0 %v395_v13 }
  0x13   :  { %370 = vmatpush3.bf16.msra.mxu1 %v396_v14 }
  0x14   :  { %339 = vmatpush3.bf16.msra.mxu0 %v397_v15  ;;  %371 = vmatprep.subr.bf16.mxu1 %v407_v0 }
  0x15   :  { %340 = vmatprep.subr.bf16.mxu0 %v398_v16 }
  0x17   :  { %372 = vmatpush3.bf16.msra.mxu1 %v399_v17 }
  0x18   :  { %341 = vmatpush3.bf16.msra.mxu0 %v400_v18  ;;  %373 = vmatprep.subr.bf16.mxu1 %v407_v0 }
  0x19   :  { %342 = vmatprep.subr.bf16.mxu0 %v401_v19 }
  0x1b   :  { %374 = vmatpush3.bf16.msra.mxu1 %v402_v20 }
  0x1c   :  { %343 = vmatpush3.bf16.msra.mxu0 %v403_v21  ;;  %375 = vmatprep.subr.bf16.mxu1 %v407_v0 }
  0x1d   :  { %344 = vmatprep.subr.bf16.mxu0 %v404_v23 }
  0x1f   :  { %376 = vmatpush3.bf16.msra.mxu1 %v405_v25 }
  0x20   :  { %345 = vmatpush3.bf16.msra.mxu0 %v406_v27 }
  0x22   :  { %378 = vmatmul.mubr.bf16.vlgmr.msra.gmra.mxu1 %v20_v29 }
  0x23   :  { %253 = vmatmul.mubr.bf16.vlgmr.msra.gmra.mxu0 %v18_v30 }
  0xe2   :  { %v294_v31 = vpop.f32.mrf.mxu1 }
  0xe3   :  { %v346_v32 = vpop.f32.mrf.mxu0 }
  0xe4   :  { %v379_v33 = vpop.f32.mrf.mxu1 }
  0xe5   :  { %v347_v35 = vpop.f32.mrf.mxu0 }
  0xe6   :  { %v348_v36 = vadd.f32 %v347_v35, %v346_v32  ;;  %v297_v37 = vpop.f32.mrf.mxu1 }
  0xe7   :  { %v349_v38 = vpop.f32.mrf.mxu0 }
  0xe8   :  { %v255_v39 = vadd.f32 %v348_v36, %v305_v34  ;;  %v380_v40 = vpop.f32.mrf.mxu1 }
  0xe9   :  { %v350_v41 = vpop.f32.mrf.mxu0 }
  0xea   :  { %v295_v42 = vadd.f32 %v294_v31, %v255_v39 }
  0xec   :  { %300 = vst [vmem:[%s519_s3] sm:$0xff] %v295_v42 }

// kernel: bahdanau_decoder_forward.2
= control target key start
LH: loop header
LB: loop body
LE: loop exit
PB: predicated region body
PF: predicated region fallthrough
CT: control target
= control target key end

     0   :  { %v17225_v0 = vlaneseq  ;;  %v17223_v2 = vmov 0.0   ;;  %vm17379_vm0 = vmmov 0   ;;  %vm17634_vm1 = vcmask 130112   ;;  %s17208_s5 = inlined_call_operand.vmem [shape: bf16[128,128], index: 5, kind: input, shape index: {}]   ;;  %s17209_s3 = inlined_call_operand.vmem [shape: f32[8,128], index: 3, kind: input, shape index: {}]   ;;  %s17210_s4 = inlined_call_operand.vmem [shape: bf16[128,128], index: 4, kind: input, shape index: {}]   ;;  %s17211_s2 = inlined_call_operand.vmem [shape: bf16[8,128,128], index: 2, kind: input, shape index: {}]   ;;  %s17212_s1 = inlined_call_operand.vmem [shape: f32[8,128], index: 1, kind: input, shape index: {}, may-alias: {1,12}]   ;;  %s17213_s6 = inlined_call_operand.vmem [shape: f32[1,128], index: 6, kind: input, shape index: {}]   ;;  %s17214_s7 = inlined_call_operand.vmem [shape: f32[1,128], index: 7, kind: input, shape index: {}]   ;;  %s17215_s8 = inlined_call_operand.vmem [shape: bf16[256,384], index: 8, kind: input, shape index: {}]   ;;  %s17216_s0 = inlined_call_operand.vmem [shape: f32[8,128], index: 0, kind: input, shape index: {}]   ;;  %s17217_s14 = inlined_call_operand.vmem [shape: f32[8,384], index: 14, kind: output, shape index: {2}]   ;;  %s17218_s10 = inlined_call_operand.vmem [shape: bf16[128,384], index: 10, kind: input, shape index: {}]   ;;  %s17219_s13 = inlined_call_operand.vmem [shape: f32[8,128], index: 13, kind: output, shape index: {1}]   ;;  %s17220_s9 = inlined_call_operand.vmem [shape: f32[1,384], index: 9, kind: input, shape index: {}]   ;;  %s17221_s11 = inlined_call_operand.vmem [shape: f32[1,384], index: 11, kind: input, shape index: {}]   ;;  %s17222_s12 = inlined_call_operand.vmem [shape: f32[8,128], index: 12, kind: output, shape index: {0}, may-alias: {1,12}]  }
   0x1   :  { %v9981_v1 = vld [vmem:[%s17208_s5 + $0x38] sm:$0xff]   ;;  %9631 = vmatprep.subr.bf16.mxu0 %v17223_v2  ;;  %9647 = vmatprep.mubr.msk.bf16.mxu0 %vm17379_vm0, %v17223_v2  ;;  %v9982_v3 = vld [vmem:[%s17208_s5 + $0x30] sm:$0xff]   ;;  %v10833_v5 = vld [vmem:[%s17209_s3] sm:$0xff]  ;;  %vm3342_vm2 = vcmask 195712   ;;  %vm3349_vm3 = vcmask 261312   ;;  %vm17383_vm4 = vcmask 326912  }
   0x2   :  { %v10828_v4 = vshrl.u32 %v17225_v0, 7  ;;  %9651 = vmatprep.subr.bf16.mxu1 %v9981_v1  ;;  %v9983_v7 = vld [vmem:[%s17210_s4 + $0x38] sm:$0xff]   ;;  %v9984_v8 = vld [vmem:[%s17208_s5 + $0x28] sm:$0xff]   ;;  %v9985_v10 = vld [vmem:[%s17210_s4 + $0x30] sm:$0xff]   ;;  %vm17381_vm5 = vcmask 392512   ;;  %vm17382_vm6 = vcmask 458112  }
   0x3   :  { %9652 = vmatpush3.bf16.msra.mxu1 %v9981_v1  ;;  %9632 = vmatpush3.bf16.msra.mxu0 %v9983_v7  ;;  %v9986_v11 = vld [vmem:[%s17208_s5 + $0x20] sm:$0xff]   ;;  %v9987_v12 = vld [vmem:[%s17210_s4 + $0x28] sm:$0xff]   ;;  %v9988_v13 = vld [vmem:[%s17208_s5 + $0x18] sm:$0xff]   ;;  %vm3377_vm7 = vcmask 523712   ;;  %vm3384_vm8 = vcmask 589312   ;;  %vm3391_vm9 = vcmask 654912  }
   0x4   :  { %17636 = vst [vmem:[#allocation2_spill] sm:$0xff] %v10828_v4  ;;  %v10836_v6 = vsub.s32 0, %v10828_v4  ;;  %9653 = vmatprep.subr.bf16.mxu1 %v9982_v3  ;;  %9633 = vmatprep.subr.bf16.mxu0 %v17223_v2  ;;  %v9989_v14 = vld [vmem:[%s17210_s4 + $0x20] sm:$0xff]   ;;  %v9990_v15 = vld [vmem:[%s17208_s5 + $0x10] sm:$0xff]   ;;  %v9991_v17 = vld [vmem:[%s17210_s4 + $0x18] sm:$0xff]   ;;  %v10906_v22 = vsub.s32 1, %v10828_v4 }
   0x5   :  { %v10878_v16 = vld [vmem:[%s17211_s2] sm:$0xff]   ;;  %v9992_v18 = vld [vmem:[%s17208_s5 + $0x8] sm:$0xff]   ;;  %v9993_v19 = vld [vmem:[%s17210_s4 + $0x10] sm:$0xff]   ;;  %v10969_v35 = vsub.s32 2, %v10828_v4  ;;  %v11008_v45 = vsub.s32 3, %v10828_v4  ;;  %v11041_v57 = vsub.s32 4, %v10828_v4 }
   0x6   :  { %17637 = vst [vmem:[#allocation3_spill] sm:$0xff] %v10836_v6  ;;  %v10846_v9 = vrot.slane %v10833_v5, %v10836_v6  ;;  %9667 = vmatprep.mubr.bf16.mxu1 %v10878_v16  ;;  %v9994_v20 = vld [vmem:[%s17208_s5] sm:$0xff]   ;;  %v9995_v21 = vld [vmem:[%s17210_s4 + $0x8] sm:$0xff]   ;;  %17638 = vst [vmem:[#allocation4_spill] sm:$0xff] %v10906_v22  ;;  %v10919_v25 = vrot.slane %v10833_v5, %v10906_v22  ;;  %vm3398_vm10 = vcmask 720512   ;;  %vm17384_vm11 = vcmask 786112  }
   0x7   :  { %9654 = vmatpush3.bf16.msra.mxu1 %v9982_v3  ;;  %9634 = vmatpush3.bf16.msra.mxu0 %v9985_v10  ;;  %v9998_v23 = vld [vmem:[%s17210_s4] sm:$0xff]   ;;  %v9997_v26 = vld [vmem:[%s17211_s2 + $0x8] sm:$0xff]   ;;  %v9999_v28 = vld [vmem:[%s17211_s2 + $0x10] sm:$0xff]   ;;  %17640 = vst [vmem:[#allocation6_spill] sm:$0xff] %v10969_v35  ;;  %v2157_v37 = vrot.slane %v10833_v5, %v10969_v35  ;;  %v2224_v46 = vrot.slane %v10833_v5, %v11008_v45  ;;  %vm3412_vm12 = vcmask 851712   ;;  %vm3419_vm13 = vcmask 917312  }
   0x8   :  { %2029 = vbcast.lane.b32.xlu1 %v10846_v9, 264  ;;  %2025 = vbcast.lane.b32.xlu0 %v10846_v9, 256  ;;  %v46_v24 = vld [vmem:[%s17212_s1] sm:$0xff]  ;;  %v10004_v29 = vld [vmem:[%s17211_s2 + $0x38] sm:$0xff]   ;;  %v10003_v31 = vld [vmem:[%s17211_s2 + $0x30] sm:$0xff]   ;;  %17641 = vst [vmem:[#allocation7_spill] sm:$0xff] %v11008_v45  ;;  %v2291_v60 = vrot.slane %v10833_v5, %v11041_v57 }
   0x9   :  { %9655 = vmatprep.subr.bf16.mxu1 %v9984_v8  ;;  %9635 = vmatprep.subr.bf16.mxu0 %v17223_v2  ;;  %v10924_v27 = vpack.c.bf16 %v46_v24, %v46_v24  ;;  %v10000_v30 = vld [vmem:[%s17211_s2 + $0x18] sm:$0xff]   ;;  %v10001_v32 = vld [vmem:[%s17211_s2 + $0x20] sm:$0xff]   ;;  %v10002_v33 = vld [vmem:[%s17211_s2 + $0x28] sm:$0xff]   ;;  %17642 = vst [vmem:[#allocation8_spill] sm:$0xff] %v11041_v57  ;;  %vm3426_vm14 = vcmask 982912   ;;  %vm3433_vm15 = vcmask 1048512  }
   0xa   :  { %v10005_v34 = vld [vmem:[%s17211_s2 + $0x40] sm:$0xff]   ;;  %v10006_v36 = vld [vmem:[%s17211_s2 + $0x48] sm:$0xff]   ;;  %v10007_v38 = vld [vmem:[%s17211_s2 + $0x50] sm:$0xff]  }
   0xb   :  { %9656 = vmatpush3.bf16.msra.mxu1 %v9984_v8  ;;  %9636 = vmatpush3.bf16.msra.mxu0 %v9987_v12  ;;  %17639 = vst [vmem:[#allocation5_spill] sm:$0xff] %v10924_v27  ;;  %v10008_v39 = vld [vmem:[%s17211_s2 + $0x58] sm:$0xff]   ;;  %v10009_v40 = vld [vmem:[%s17211_s2 + $0x60] sm:$0xff]   ;;  %v10010_v41 = vld [vmem:[%s17211_s2 + $0x68] sm:$0xff]  }
   0xc   :  { %2033 = vbcast.lane.b32.xlu1 %v10846_v9, 272  ;;  %2041 = vbcast.lane.b32.xlu0 %v10846_v9, 288  ;;  %v10011_v42 = vld [vmem:[%s17211_s2 + $0x70] sm:$0xff]   ;;  %v10012_v43 = vld [vmem:[%s17211_s2 + $0x78] sm:$0xff]   ;;  %v10013_v44 = vld [vmem:[%s17211_s2 + $0x80] sm:$0xff]  }
   0xd   :  { %9657 = vmatprep.subr.bf16.mxu1 %v9986_v11  ;;  %9637 = vmatprep.subr.bf16.mxu0 %v17223_v2  ;;  %v10014_v47 = vld [vmem:[%s17211_s2 + $0x88] sm:$0xff]   ;;  %v10015_v48 = vld [vmem:[%s17211_s2 + $0x90] sm:$0xff]   ;;  %v10016_v49 = vld [vmem:[%s17211_s2 + $0x98] sm:$0xff]  }
   0xe   :  { %v10017_v50 = vld [vmem:[%s17211_s2 + $0xa0] sm:$0xff]   ;;  %v10018_v51 = vld [vmem:[%s17211_s2 + $0xa8] sm:$0xff]   ;;  %v10019_v52 = vld [vmem:[%s17211_s2 + $0xb0] sm:$0xff]  }
   0xf   :  { %9658 = vmatpush3.bf16.msra.mxu1 %v9986_v11  ;;  %9638 = vmatpush3.bf16.msra.mxu0 %v9989_v14  ;;  %v10020_v53 = vld [vmem:[%s17211_s2 + $0xb8] sm:$0xff]   ;;  %v10021_v55 = vld [vmem:[%s17211_s2 + $0xc0] sm:$0xff]   ;;  %v10022_v61 = vld [vmem:[%s17211_s2 + $0xc8] sm:$0xff]  }
  0x10   :  { %2037 = vbcast.lane.b32.xlu1 %v10846_v9, 280  ;;  %2049 = vbcast.lane.b32.xlu0 %v10846_v9, 304  ;;  %v10023_v63 = vld [vmem:[%s17211_s2 + $0xd0] sm:$0xff]   ;;  %v10024_v8 = vld [vmem:[%s17211_s2 + $0xd8] sm:$0xff]   ;;  %v10025_v10 = vld [vmem:[%s17211_s2 + $0xe0] sm:$0xff]  }
  0x11   :  { %9659 = vmatprep.subr.bf16.mxu1 %v9988_v13  ;;  %9639 = vmatprep.subr.bf16.mxu0 %v17223_v2  ;;  %v10026_v14 = vld [vmem:[%s17211_s2 + $0xe8] sm:$0xff]   ;;  %v10045_v0 = vld [vmem:[%s17211_s2 + $0x180] sm:$0xff]  }
  0x12   :  { %v10046_v22 = vld [vmem:[%s17211_s2 + $0x188] sm:$0xff]  }
  0x13   :  { %9660 = vmatpush3.bf16.msra.mxu1 %v9988_v13  ;;  %9640 = vmatpush3.bf16.msra.mxu0 %v9991_v17 }
  0x14   :  { %2045 = vbcast.lane.b32.xlu1 %v10846_v9, 296  ;;  %2057 = vbcast.lane.b32.xlu0 %v10846_v9, 320 }
  0x15   :  { %9661 = vmatprep.subr.bf16.mxu1 %v9990_v15  ;;  %9641 = vmatprep.subr.bf16.mxu0 %v17223_v2 }
  0x17   :  { %9662 = vmatpush3.bf16.msra.mxu1 %v9990_v15  ;;  %9642 = vmatpush3.bf16.msra.mxu0 %v9993_v19 }
  0x18   :  { %2053 = vbcast.lane.b32.xlu1 %v10846_v9, 312  ;;  %2065 = vbcast.lane.b32.xlu0 %v10846_v9, 336 }
  0x19   :  { %9663 = vmatprep.subr.bf16.mxu1 %v9992_v18  ;;  %9643 = vmatprep.subr.bf16.mxu0 %v17223_v2 }
  0x1b   :  { %9664 = vmatpush3.bf16.msra.mxu1 %v9992_v18  ;;  %9644 = vmatpush3.bf16.msra.mxu0 %v9995_v21 }
  0x1c   :  { %2061 = vbcast.lane.b32.xlu1 %v10846_v9, 328  ;;  %2073 = vbcast.lane.b32.xlu0 %v10846_v9, 352 }
  0x1d   :  { %9665 = vmatprep.subr.bf16.mxu1 %v9994_v20  ;;  %9645 = vmatprep.subr.bf16.mxu0 %v17223_v2 }
  0x1f   :  { %9666 = vmatpush3.bf16.msra.mxu1 %v9994_v20  ;;  %9646 = vmatpush3.bf16.msra.mxu0 %v9998_v23  ;;  %v10028_v20 = vld [vmem:[%s17211_s2 + $0xf8] sm:$0xff]   ;;  %v10029_v23 = vld [vmem:[%s17211_s2 + $0x100] sm:$0xff]  }
  0x20   :  { %2069 = vbcast.lane.b32.xlu1 %v10846_v9, 344  ;;  %2081 = vbcast.lane.b32.xlu0 %v10846_v9, 368 }
  0x21   :  { %9795 = vmatprep.subr.bf16.mxu0 %v17223_v2 }
  0x22   :  { %9668 = vmatmul.mubr.bf16.vlgmr.msra.gmra.mxu1 %v9997_v26  ;;  %9648 = vmatmul.mubr.bf16.vlgmr.msra.gmra.mxu0 %v10924_v27  ;;  %v10741_v27 = vmov 1966171168  }
  0x23   :  { %9671 = vmatprep.mubr.bf16.mxu1 %v9999_v28  ;;  %9796 = vmatpush3.bf16.msra.mxu0 %v10004_v29 }
  0x24   :  { %2077 = vbcast.lane.b32.xlu1 %v10846_v9, 360  ;;  %2092 = vbcast.lane.b32.xlu0 %v10919_v25, 256 }
  0x25   :  { %9797 = vmatprep.subr.bf16.mxu0 %v17223_v2  ;;  %9811 = vmatprep.mubr.msk.bf16.mxu0 %vm17379_vm0, %v17223_v2  ;;  %vm17385_vm0 = vcmask 1041409  }
  0x27   :  { %9798 = vmatpush3.bf16.msra.mxu0 %v10003_v31 }
  0x28   :  { %2085 = vbcast.lane.b32.xlu1 %v10846_v9, 376  ;;  %2100 = vbcast.lane.b32.xlu0 %v10919_v25, 272 }
  0x29   :  { %9799 = vmatprep.subr.bf16.mxu0 %v17223_v2 }
  0x2a   :  { %9672 = vmatmul.mubr.bf16.gmra.mxu1 %v10000_v30 }
  0x2b   :  { %9675 = vmatprep.mubr.bf16.mxu1 %v10001_v32  ;;  %9800 = vmatpush3.bf16.msra.mxu0 %v10002_v33 }
  0x2c   :  { %2096 = vbcast.lane.b32.xlu1 %v10919_v25, 264  ;;  %2108 = vbcast.lane.b32.xlu0 %v10919_v25, 288 }
  0x2d   :  { %9801 = vmatprep.subr.bf16.mxu0 %v17223_v2 }
  0x2f   :  { %9802 = vmatpush3.bf16.msra.mxu0 %v10001_v32  ;;  %v10031_v32 = vld [vmem:[%s17211_s2 + $0x110] sm:$0xff]  }
  0x30   :  { %2104 = vbcast.lane.b32.xlu1 %v10919_v25, 280  ;;  %2116 = vbcast.lane.b32.xlu0 %v10919_v25, 304 }
  0x31   :  { %9803 = vmatprep.subr.bf16.mxu0 %v17223_v2 }
  0x32   :  { %9676 = vmatmul.mubr.bf16.gmra.mxu1 %v10002_v33 }
  0x33   :  { %9679 = vmatprep.mubr.bf16.mxu1 %v10003_v31  ;;  %9804 = vmatpush3.bf16.msra.mxu0 %v10000_v30  ;;  %v10030_v30 = vld [vmem:[%s17211_s2 + $0x108] sm:$0xff]  }
  0x34   :  { %2112 = vbcast.lane.b32.xlu1 %v10919_v25, 296  ;;  %2124 = vbcast.lane.b32.xlu0 %v10919_v25, 320 }
  0x35   :  { %9805 = vmatprep.subr.bf16.mxu0 %v17223_v2 }
  0x37   :  { %9806 = vmatpush3.bf16.msra.mxu0 %v9999_v28 }
  0x38   :  { %2120 = vbcast.lane.b32.xlu1 %v10919_v25, 312  ;;  %2132 = vbcast.lane.b32.xlu0 %v10919_v25, 336 }
  0x39   :  { %9807 = vmatprep.subr.bf16.mxu0 %v17223_v2 }
  0x3a   :  { %9680 = vmatmul.mubr.bf16.gmra.mxu1 %v10004_v29 }
  0x3b   :  { %9683 = vmatprep.mubr.bf16.mxu1 %v10005_v34  ;;  %9808 = vmatpush3.bf16.msra.mxu0 %v9997_v26 }
  0x3c   :  { %2128 = vbcast.lane.b32.xlu1 %v10919_v25, 328  ;;  %2140 = vbcast.lane.b32.xlu0 %v10919_v25, 352 }
  0x3d   :  { %9809 = vmatprep.subr.bf16.mxu0 %v17223_v2 }
  0x3f   :  { %9810 = vmatpush3.bf16.msra.mxu0 %v10878_v16  ;;  %v10027_v16 = vld [vmem:[%s17211_s2 + $0xf0] sm:$0xff]  }
  0x40   :  { %2136 = vbcast.lane.b32.xlu1 %v10919_v25, 344  ;;  %2148 = vbcast.lane.b32.xlu0 %v10919_v25, 368 }
  0x41   :  { %9815 = vmatprep.subr.bf16.mxu0 %v17223_v2 }
  0x42   :  { %9684 = vmatmul.mubr.bf16.gmra.mxu1 %v10006_v36 }
  0x43   :  { %9687 = vmatprep.mubr.bf16.mxu1 %v10007_v38 }
  0x44   :  { %2144 = vbcast.lane.b32.xlu1 %v10919_v25, 360  ;;  %2159 = vbcast.lane.b32.xlu0 %v2157_v37, 256 }
  0x48   :  { %2152 = vbcast.lane.b32.xlu1 %v10919_v25, 376  ;;  %2167 = vbcast.lane.b32.xlu0 %v2157_v37, 272  ;;  %v11102_v25 = vsub.s32 5, %v10828_v4 }
  0x4a   :  { %9688 = vmatmul.mubr.bf16.gmra.mxu1 %v10008_v39  ;;  %17650 = vst [vmem:[#allocation16_spill] sm:$0xff] %v11102_v25  ;;  %v2358_v29 = vrot.slane %v10833_v5, %v11102_v25  ;;  %v10033_v39 = vld [vmem:[%s17211_s2 + $0x120] sm:$0xff]  }
  0x4b   :  { %9691 = vmatprep.mubr.bf16.mxu1 %v10009_v40 }
  0x4c   :  { %2163 = vbcast.lane.b32.xlu1 %v2157_v37, 264  ;;  %2175 = vbcast.lane.b32.xlu0 %v2157_v37, 288 }
  0x50   :  { %2171 = vbcast.lane.b32.xlu1 %v2157_v37, 280  ;;  %2183 = vbcast.lane.b32.xlu0 %v2157_v37, 304 }
  0x52   :  { %9692 = vmatmul.mubr.bf16.gmra.mxu1 %v10010_v41 }
  0x53   :  { %9695 = vmatprep.mubr.bf16.mxu1 %v10011_v42 }
  0x54   :  { %2179 = vbcast.lane.b32.xlu1 %v2157_v37, 296  ;;  %2191 = vbcast.lane.b32.xlu0 %v2157_v37, 320 }
  0x58   :  { %2187 = vbcast.lane.b32.xlu1 %v2157_v37, 312  ;;  %2199 = vbcast.lane.b32.xlu0 %v2157_v37, 336 }
  0x5a   :  { %9696 = vmatmul.mubr.bf16.gmra.mxu1 %v10012_v43  ;;  %v10034_v43 = vld [vmem:[%s17211_s2 + $0x128] sm:$0xff]  }
  0x5b   :  { %9699 = vmatprep.mubr.bf16.mxu1 %v10013_v44 }
  0x5c   :  { %2195 = vbcast.lane.b32.xlu1 %v2157_v37, 328  ;;  %2207 = vbcast.lane.b32.xlu0 %v2157_v37, 352 }
  0x60   :  { %2203 = vbcast.lane.b32.xlu1 %v2157_v37, 344  ;;  %2215 = vbcast.lane.b32.xlu0 %v2157_v37, 368 }
  0x62   :  { %9700 = vmatmul.mubr.bf16.gmra.mxu1 %v10014_v47 }
  0x63   :  { %9703 = vmatprep.mubr.bf16.mxu1 %v10015_v48 }
  0x64   :  { %2211 = vbcast.lane.b32.xlu1 %v2157_v37, 360  ;;  %2226 = vbcast.lane.b32.xlu0 %v2224_v46, 256 }
  0x68   :  { %2219 = vbcast.lane.b32.xlu1 %v2157_v37, 376  ;;  %2234 = vbcast.lane.b32.xlu0 %v2224_v46, 272  ;;  %v10032_v37 = vld [vmem:[%s17211_s2 + $0x118] sm:$0xff]  }
  0x6a   :  { %9704 = vmatmul.mubr.bf16.gmra.mxu1 %v10016_v49 }
  0x6b   :  { %9707 = vmatprep.mubr.bf16.mxu1 %v10017_v50  ;;  %v10036_v50 = vld [vmem:[%s17211_s2 + $0x138] sm:$0xff]  }
  0x6c   :  { %2230 = vbcast.lane.b32.xlu1 %v2224_v46, 264  ;;  %2242 = vbcast.lane.b32.xlu0 %v2224_v46, 288 }
  0x70   :  { %2238 = vbcast.lane.b32.xlu1 %v2224_v46, 280  ;;  %2250 = vbcast.lane.b32.xlu0 %v2224_v46, 304 }
  0x72   :  { %9708 = vmatmul.mubr.bf16.gmra.mxu1 %v10018_v51 }
  0x73   :  { %9711 = vmatprep.mubr.bf16.mxu1 %v10019_v52  ;;  %v10037_v52 = vld [vmem:[%s17211_s2 + $0x140] sm:$0xff]  }
  0x74   :  { %2246 = vbcast.lane.b32.xlu1 %v2224_v46, 296  ;;  %2258 = vbcast.lane.b32.xlu0 %v2224_v46, 320 }
  0x78   :  { %2254 = vbcast.lane.b32.xlu1 %v2224_v46, 312  ;;  %2266 = vbcast.lane.b32.xlu0 %v2224_v46, 336 }
  0x7a   :  { %v11033_v54 = vpop.permute.xlu1 %2029  ;;  %v11038_v56 = vpop.permute.xlu0 %2025  ;;  %9712 = vmatmul.mubr.bf16.gmra.mxu1 %v10020_v53 }
  0x7b   :  { %9715 = vmatprep.mubr.bf16.mxu1 %v10021_v55  ;;  %v11163_v55 = vsub.s32 6, %v10828_v4 }
  0x7c   :  { %2262 = vbcast.lane.b32.xlu1 %v2224_v46, 328  ;;  %2274 = vbcast.lane.b32.xlu0 %v2224_v46, 352 }
  0x7d   :  { %17659 = vst [vmem:[#allocation25_spill] sm:$0xff] %v11163_v55 }
  0x7e   :  { %v11043_v58 = vpop.permute.xlu1 %2033  ;;  %v11045_v59 = vpop.permute.xlu0 %2041 }
  0x80   :  { %2270 = vbcast.lane.b32.xlu1 %v2224_v46, 344  ;;  %2282 = vbcast.lane.b32.xlu0 %v2224_v46, 368 }
  0x82   :  { %v11052_v62 = vpop.permute.xlu1 %2037  ;;  %v11057_v1 = vpop.permute.xlu0 %2049  ;;  %9716 = vmatmul.mubr.bf16.gmra.mxu1 %v10022_v61 }
  0x83   :  { %17643 = vst [vmem:[#allocation9_spill] sm:$0xff] %v11057_v1  ;;  %9719 = vmatprep.mubr.bf16.mxu1 %v10023_v63  ;;  %v11171_v63 = vrot.slane %v10833_v5, %v11163_v55  ;;  %v1284_v55 = vunpack.c.l.s4 %v10741_v27 }
  0x84   :  { %2278 = vbcast.lane.b32.xlu1 %v2224_v46, 360  ;;  %2293 = vbcast.lane.b32.xlu0 %v2291_v60, 256 }
  0x85   :  { %v1285_v35 = vunpack.c.0.s8 %v1284_v55 }
  0x86   :  { %v11059_v3 = vpop.permute.xlu1 %2045  ;;  %v11061_v7 = vpop.permute.xlu0 %2057 }
  0x87   :  { %17644 = vst [vmem:[#allocation10_spill] sm:$0xff] %v11061_v7 }
  0x88   :  { %2286 = vbcast.lane.b32.xlu1 %v2224_v46, 376  ;;  %2301 = vbcast.lane.b32.xlu0 %v2291_v60, 272  ;;  %v10035_v46 = vld [vmem:[%s17211_s2 + $0x130] sm:$0xff]  }
  0x8a   :  { %v11066_v9 = vpop.permute.xlu1 %2053  ;;  %v11071_v11 = vpop.permute.xlu0 %2065  ;;  %9720 = vmatmul.mubr.bf16.gmra.mxu1 %v10024_v8  ;;  %v10038_v8 = vld [vmem:[%s17211_s2 + $0x148] sm:$0xff]  }
  0x8b   :  { %17645 = vst [vmem:[#allocation11_spill] sm:$0xff] %v11071_v11  ;;  %9723 = vmatprep.mubr.bf16.mxu1 %v10025_v10 }
  0x8c   :  { %2297 = vbcast.lane.b32.xlu1 %v2291_v60, 264  ;;  %2309 = vbcast.lane.b32.xlu0 %v2291_v60, 288 }
  0x8e   :  { %v11073_v12 = vpop.permute.xlu1 %2061  ;;  %v11075_v13 = vpop.permute.xlu0 %2073 }
  0x8f   :  { %17646 = vst [vmem:[#allocation12_spill] sm:$0xff] %v11075_v13 }
  0x90   :  { %2305 = vbcast.lane.b32.xlu1 %v2291_v60, 280  ;;  %2317 = vbcast.lane.b32.xlu0 %v2291_v60, 304 }
  0x92   :  { %v11080_v15 = vpop.permute.xlu1 %2069  ;;  %v11085_v17 = vpop.permute.xlu0 %2081  ;;  %9724 = vmatmul.mubr.bf16.gmra.mxu1 %v10026_v14  ;;  %v10039_v14 = vld [vmem:[%s17211_s2 + $0x150] sm:$0xff]  }
  0x93   :  { %17647 = vst [vmem:[#allocation13_spill] sm:$0xff] %v11085_v17  ;;  %9727 = vmatprep.mubr.bf16.mxu1 %v10027_v16 }
  0x94   :  { %2313 = vbcast.lane.b32.xlu1 %v2291_v60, 296  ;;  %2325 = vbcast.lane.b32.xlu0 %v2291_v60, 320 }
  0x96   :  { %v11087_v18 = vpop.permute.xlu1 %2077  ;;  %v11089_v19 = vpop.permute.xlu0 %2092 }
  0x97   :  { %17648 = vst [vmem:[#allocation14_spill] sm:$0xff] %v11089_v19 }
  0x98   :  { %2321 = vbcast.lane.b32.xlu1 %v2291_v60, 312  ;;  %2333 = vbcast.lane.b32.xlu0 %v2291_v60, 336 }
  0x9a   :  { %v11094_v21 = vpop.permute.xlu1 %2085  ;;  %v11099_v24 = vpop.permute.xlu0 %2100  ;;  %9728 = vmatmul.mubr.bf16.gmra.mxu1 %v10028_v20 }
  0x9b   :  { %17649 = vst [vmem:[#allocation15_spill] sm:$0xff] %v11099_v24  ;;  %9731 = vmatprep.mubr.bf16.mxu1 %v10029_v23 }
  0x9c   :  { %2329 = vbcast.lane.b32.xlu1 %v2291_v60, 328  ;;  %2341 = vbcast.lane.b32.xlu0 %v2291_v60, 352 }
  0x9e   :  { %v11104_v26 = vpop.permute.xlu1 %2096  ;;  %v11106_v28 = vpop.permute.xlu0 %2108 }
  0x9f   :  { %17651 = vst [vmem:[#allocation17_spill] sm:$0xff] %v11106_v28 }
  0xa0   :  { %2337 = vbcast.lane.b32.xlu1 %v2291_v60, 344  ;;  %2349 = vbcast.lane.b32.xlu0 %v2291_v60, 368 }
  0xa2   :  { %v11113_v31 = vpop.permute.xlu1 %2104  ;;  %v11118_v33 = vpop.permute.xlu0 %2116  ;;  %9732 = vmatmul.mubr.bf16.gmra.mxu1 %v10030_v30  ;;  %v10040_v30 = vld [vmem:[%s17211_s2 + $0x158] sm:$0xff]  }
  0xa3   :  { %17652 = vst [vmem:[#allocation18_spill] sm:$0xff] %v11118_v33  ;;  %9735 = vmatprep.mubr.bf16.mxu1 %v10031_v32 }
  0xa4   :  { %2345 = vbcast.lane.b32.xlu1 %v2291_v60, 360  ;;  %2360 = vbcast.lane.b32.xlu0 %v2358_v29, 256 }
  0xa6   :  { %v11120_v34 = vpop.permute.xlu1 %2112  ;;  %v11122_v36 = vpop.permute.xlu0 %2124 }
  0xa7   :  { %17653 = vst [vmem:[#allocation19_spill] sm:$0xff] %v11122_v36 }
  0xa8   :  { %2353 = vbcast.lane.b32.xlu1 %v2291_v60, 376  ;;  %2368 = vbcast.lane.b32.xlu0 %v2358_v29, 272 }
  0xaa   :  { %v11127_v38 = vpop.permute.xlu1 %2120  ;;  %v11132_v40 = vpop.permute.xlu0 %2132  ;;  %9736 = vmatmul.mubr.bf16.gmra.mxu1 %v10032_v37  ;;  %v10041_v37 = vld [vmem:[%s17211_s2 + $0x160] sm:$0xff]  }
  0xab   :  { %17654 = vst [vmem:[#allocation20_spill] sm:$0xff] %v11132_v40  ;;  %9739 = vmatprep.mubr.bf16.mxu1 %v10033_v39 }
  0xac   :  { %2364 = vbcast.lane.b32.xlu1 %v2358_v29, 264  ;;  %2376 = vbcast.lane.b32.xlu0 %v2358_v29, 288 }
  0xae   :  { %v11134_v41 = vpop.permute.xlu1 %2128  ;;  %v11136_v42 = vpop.permute.xlu0 %2140 }
  0xaf   :  { %17655 = vst [vmem:[#allocation21_spill] sm:$0xff] %v11136_v42 }
  0xb0   :  { %2372 = vbcast.lane.b32.xlu1 %v2358_v29, 280  ;;  %2384 = vbcast.lane.b32.xlu0 %v2358_v29, 304 }
  0xb2   :  { %v11141_v44 = vpop.permute.xlu1 %2136  ;;  %v11146_v47 = vpop.permute.xlu0 %2148  ;;  %9740 = vmatmul.mubr.bf16.gmra.mxu1 %v10034_v43 }
  0xb3   :  { %17656 = vst [vmem:[#allocation22_spill] sm:$0xff] %v11146_v47  ;;  %9743 = vmatprep.mubr.bf16.mxu1 %v10035_v46  ;;  %v10042_v46 = vld [vmem:[%s17211_s2 + $0x168] sm:$0xff]  }
  0xb4   :  { %2380 = vbcast.lane.b32.xlu1 %v2358_v29, 296  ;;  %2392 = vbcast.lane.b32.xlu0 %v2358_v29, 320 }
  0xb6   :  { %v11148_v48 = vpop.permute.xlu1 %2144  ;;  %v11150_v49 = vpop.permute.xlu0 %2159 }
  0xb7   :  { %17657 = vst [vmem:[#allocation23_spill] sm:$0xff] %v11150_v49 }
  0xb8   :  { %2388 = vbcast.lane.b32.xlu1 %v2358_v29, 312  ;;  %2400 = vbcast.lane.b32.xlu0 %v2358_v29, 336 }
  0xba   :  { %v11155_v51 = vpop.permute.xlu1 %2152  ;;  %v11160_v53 = vpop.permute.xlu0 %2167  ;;  %9744 = vmatmul.mubr.bf16.gmra.mxu1 %v10036_v50 }
  0xbb   :  { %17658 = vst [vmem:[#allocation24_spill] sm:$0xff] %v11160_v53  ;;  %9747 = vmatprep.mubr.bf16.mxu1 %v10037_v52  ;;  %v10043_v52 = vld [vmem:[%s17211_s2 + $0x170] sm:$0xff]  }
  0xbc   :  { %2396 = vbcast.lane.b32.xlu1 %v2358_v29, 328  ;;  %2408 = vbcast.lane.b32.xlu0 %v2358_v29, 352 }
  0xbe   :  { %v11165_v60 = vpop.permute.xlu1 %2163  ;;  %v11167_v61 = vpop.permute.xlu0 %2175 }
  0xbf   :  { %17660 = vst [vmem:[#allocation26_spill] sm:$0xff] %v11165_v60  ;;  %17661 = vst [vmem:[#allocation27_spill] sm:$0xff] %v11167_v61 }
  0xc0   :  { %2404 = vbcast.lane.b32.xlu1 %v2358_v29, 344  ;;  %2416 = vbcast.lane.b32.xlu0 %v2358_v29, 368 }
  0xc2   :  { %v11176_v10 = vpop.permute.xlu1 %2171  ;;  %v11181_v16 = vpop.permute.xlu0 %2183  ;;  %9748 = vmatmul.mubr.bf16.gmra.mxu1 %v10038_v8 }
  0xc3   :  { %17662 = vst [vmem:[#allocation28_spill] sm:$0xff] %v11176_v10  ;;  %17663 = vst [vmem:[#allocation29_spill] sm:$0xff] %v11181_v16  ;;  %9751 = vmatprep.mubr.bf16.mxu1 %v10039_v14 }
  0xc4   :  { %2412 = vbcast.lane.b32.xlu1 %v2358_v29, 360  ;;  %2427 = vbcast.lane.b32.xlu0 %v11171_v63, 256 }
  0xc6   :  { %v11184_v20 = vpop.permute.xlu1 %2179  ;;  %v11186_v23 = vpop.permute.xlu0 %2191 }
  0xc7   :  { %17664 = vst [vmem:[#allocation30_spill] sm:$0xff] %v11184_v20  ;;  %17665 = vst [vmem:[#allocation31_spill] sm:$0xff] %v11186_v23 }
  0xc8   :  { %2420 = vbcast.lane.b32.xlu1 %v2358_v29, 376  ;;  %2435 = vbcast.lane.b32.xlu0 %v11171_v63, 272 }
  0xca   :  { %v11192_v32 = vpop.permute.xlu1 %2187  ;;  %v11197_v39 = vpop.permute.xlu0 %2199  ;;  %9752 = vmatmul.mubr.bf16.gmra.mxu1 %v10040_v30 }
  0xcb   :  { %17666 = vst [vmem:[#allocation32_spill] sm:$0xff] %v11192_v32  ;;  %17667 = vst [vmem:[#allocation33_spill] sm:$0xff] %v11197_v39  ;;  %9755 = vmatprep.mubr.bf16.mxu1 %v10041_v37  ;;  %v10044_v37 = vld [vmem:[%s17211_s2 + $0x178] sm:$0xff]  }
  0xcc   :  { %2431 = vbcast.lane.b32.xlu1 %v11171_v63, 264  ;;  %2443 = vbcast.lane.b32.xlu0 %v11171_v63, 288 }
  0xce   :  { %v11201_v29 = vpop.permute.xlu1 %2195  ;;  %v11203_v43 = vpop.permute.xlu0 %2207 }
  0xcf   :  { %17668 = vst [vmem:[#allocation34_spill] sm:$0xff] %v11201_v29  ;;  %17669 = vst [vmem:[#allocation35_spill] sm:$0xff] %v11203_v43 }
  0xd0   :  { %2439 = vbcast.lane.b32.xlu1 %v11171_v63, 280  ;;  %2451 = vbcast.lane.b32.xlu0 %v11171_v63, 304 }
  0xd2   :  { %v11210_v50 = vpop.permute.xlu1 %2203  ;;  %v11215_v8 = vpop.permute.xlu0 %2215  ;;  %9756 = vmatmul.mubr.bf16.gmra.mxu1 %v10042_v46 }
  0xd3   :  { %17670 = vst [vmem:[#allocation36_spill] sm:$0xff] %v11210_v50  ;;  %17671 = vst [vmem:[#allocation37_spill] sm:$0xff] %v11215_v8  ;;  %9759 = vmatprep.mubr.bf16.mxu1 %v10043_v52  ;;  %v11238_v52 = vsub.s32 7, %v10828_v4 }
  0xd4   :  { %2447 = vbcast.lane.b32.xlu1 %v11171_v63, 296  ;;  %2459 = vbcast.lane.b32.xlu0 %v11171_v63, 320 }
  0xd5   :  { %17676 = vst [vmem:[#allocation42_spill] sm:$0xff] %v11238_v52  ;;  %v11248_v45 = vrot.slane %v10833_v5, %v11238_v52  ;;  %v11266_v5 = vsub.s32 %v1285_v35, %v10828_v4 }
  0xd6   :  { %v11219_v14 = vpop.permute.xlu1 %2211  ;;  %v11221_v30 = vpop.permute.xlu0 %2226 }
  0xd7   :  { %17672 = vst [vmem:[#allocation38_spill] sm:$0xff] %v11219_v14  ;;  %17673 = vst [vmem:[#allocation39_spill] sm:$0xff] %v11221_v30 }
  0xd8   :  { %2455 = vbcast.lane.b32.xlu1 %v11171_v63, 312  ;;  %2467 = vbcast.lane.b32.xlu0 %v11171_v63, 336 }
  0xda   :  { %v11228_v2 = vpop.permute.xlu1 %2219  ;;  %v11233_v46 = vpop.permute.xlu0 %2234  ;;  %9760 = vmatmul.mubr.bf16.gmra.mxu1 %v10044_v37 }
  0xdb   :  { %17674 = vst [vmem:[#allocation40_spill] sm:$0xff] %v11228_v2  ;;  %17675 = vst [vmem:[#allocation41_spill] sm:$0xff] %v11233_v46  ;;  %9763 = vmatprep.mubr.bf16.mxu1 %v10045_v0  ;;  %v10047_v0 = vld [vmem:[%s17211_s2 + $0x190] sm:$0xff]  }
  0xdc   :  { %2463 = vbcast.lane.b32.xlu1 %v11171_v63, 328  ;;  %2475 = vbcast.lane.b32.xlu0 %v11171_v63, 352 }
  0xde   :  { %v11240_v25 = vpop.permute.xlu1 %2230  ;;  %v11242_v57 = vpop.permute.xlu0 %2242 }
  0xdf   :  { %17677 = vst [vmem:[#allocation43_spill] sm:$0xff] %v11240_v25  ;;  %17678 = vst [vmem:[#allocation44_spill] sm:$0xff] %v11242_v57  ;;  %v9291_v57 = vld [vmem:[%s17213_s6] ss:$0 sm:$0xff] }
  0xe0   :  { %2471 = vbcast.lane.b32.xlu1 %v11171_v63, 344  ;;  %2483 = vbcast.lane.b32.xlu0 %v11171_v63, 368 }
  0xe2   :  { %v11253_v27 = vpop.permute.xlu1 %2238  ;;  %v11258_v37 = vpop.permute.xlu0 %2250  ;;  %9764 = vmatmul.mubr.bf16.gmra.mxu1 %v10046_v22  ;;  %v10048_v22 = vld [vmem:[%s17211_s2 + $0x198] sm:$0xff]  }
  0xe3   :  { %17679 = vst [vmem:[#allocation45_spill] sm:$0xff] %v11253_v27  ;;  %17680 = vst [vmem:[#allocation46_spill] sm:$0xff] %v11258_v37  ;;  %v9669_v55 = vpop.f32.mrf.mxu1  ;;  %v282_v52 = vpop.f32.mrf.mxu0  ;;  %9767 = vmatprep.mubr.bf16.mxu1 %v10047_v0 }
  0xe4   :  { %2479 = vbcast.lane.b32.xlu1 %v11171_v63, 360  ;;  %2494 = vbcast.lane.b32.xlu0 %v11248_v45, 256  ;;  %v283_v30 = vadd.f32 %v9291_v57, %v282_v52 }
  0xe5   :  { %v770_v37 = vpop.f32.mrf.mxu1  ;;  %v9649_v43 = vpop.f32.mrf.mxu0 }
  0xe6   :  { %v11268_v46 = vpop.permute.xlu1 %2246  ;;  %v11270_v8 = vpop.permute.xlu0 %2258  ;;  %v1282_v39 = vcombine.high %v283_v30, %v283_v30  ;;  %v11274_v23 = vrot.slane %v283_v30, %v11266_v5  ;;  %v10049_v43 = vld [vmem:[%s17211_s2 + $0x1a0] sm:$0xff]  }
  0xe7   :  { %17681 = vst [vmem:[#allocation47_spill] sm:$0xff] %v11268_v46  ;;  %17682 = vst [vmem:[#allocation48_spill] sm:$0xff] %v11270_v8  ;;  %v9670_v16 = vpop.f32.mrf.mxu1  ;;  %v285_v35 = vpop.f32.mrf.mxu0 }
  0xe8   :  { %2487 = vbcast.lane.b32.xlu1 %v11171_v63, 376  ;;  %v1296_v4 = vrot.slane %v1282_v39, %v11266_v5  ;;  %v11289_v63 = vrot.slane %v11274_v23, %v11266_v5  ;;  %v1297_v2 = vcombine.high %v11274_v23, %v11274_v23  ;;  %v10057_v23 = vld [vmem:[%s17211_s2 + $0x1e0] sm:$0xff]  }
  0xe9   :  { %v773_v30 = vpop.f32.mrf.mxu1  ;;  %v9650_v0 = vpop.f32.mrf.mxu0 }
  0xea   :  { %v11280_v57 = vpop.permute.xlu1 %2254  ;;  %v11285_v52 = vpop.permute.xlu0 %2266  ;;  %v1298_v8 = vcombine.high %v1296_v4, %v1296_v4  ;;  %v11292_v61 = vrot.slane %v1296_v4, %v11266_v5  ;;  %9768 = vmatmul.mubr.bf16.gmra.mxu1 %v10048_v22  ;;  %v11304_v49 = vrot.slane %v11289_v63, %v10836_v6  ;;  %v10050_v4 = vld [vmem:[%s17211_s2 + $0x1a8] sm:$0xff]  }
  0xeb   :  { %17683 = vst [vmem:[#allocation49_spill] sm:$0xff] %v11280_v57  ;;  %17684 = vst [vmem:[#allocation50_spill] sm:$0xff] %v11285_v52  ;;  %v9673_v39 = vpop.f32.mrf.mxu1  ;;  %9771 = vmatprep.mubr.bf16.mxu1 %v10049_v43 }
  0xec   :  { %2498 = vbcast.lane.b32.xlu1 %v11248_v45, 264  ;;  %v11296_v35 = vrot.slane %v1298_v8, %v11266_v5  ;;  %v1372_v22 = vadd.f32 %v11304_v49, %v773_v30  ;;  %v10051_v8 = vld [vmem:[%s17211_s2 + $0x1b0] sm:$0xff]   ;;  %v1377_v46 = vadd.f32 %v9673_v39, %v11304_v49 }
  0xed   :  { %v786_v0 = vpop.f32.mrf.mxu1 }
  0xee   :  { %v11298_v53 = vpop.permute.xlu1 %2262  ;;  %v11300_v52 = vpop.permute.xlu0 %2274  ;;  %10157 = vtanh.f32 %v1372_v22  ;;  %v1375_v39 = vadd.f32 %v11304_v49, %v786_v0 }
  0xef   :  { %17685 = vst [vmem:[#allocation51_spill] sm:$0xff] %v11298_v53  ;;  %17686 = vst [vmem:[#allocation52_spill] sm:$0xff] %v11300_v52  ;;  %v9674_v47 = vpop.f32.mrf.mxu1  ;;  %v1371_v52 = vadd.f32 %v11304_v49, %v770_v37  ;;  %v10053_v37 = vld [vmem:[%s17211_s2 + $0x1c0] sm:$0xff]  }
  0xf1   :  { %v789_v43 = vpop.f32.mrf.mxu1  ;;  %10159 = vtanh.f32 %v1371_v52 }
  0xf2   :  { %v11313_v53 = vpop.permute.xlu1 %2270  ;;  %v11316_v57 = vpop.permute.xlu0 %2282  ;;  %9772 = vmatmul.mubr.bf16.gmra.mxu1 %v10050_v4  ;;  %10161 = vtanh.f32 %v1377_v46  ;;  %v10054_v46 = vld [vmem:[%s17211_s2 + $0x1c8] sm:$0xff]  }
  0xf3   :  { %17687 = vst [vmem:[#allocation53_spill] sm:$0xff] %v11313_v53  ;;  %17688 = vst [vmem:[#allocation54_spill] sm:$0xff] %v11316_v57  ;;  %v9677_v42 = vpop.f32.mrf.mxu1  ;;  %9775 = vmatprep.mubr.bf16.mxu1 %v10051_v8  ;;  %v10052_v53 = vld [vmem:[%s17211_s2 + $0x1b8] sm:$0xff]   ;;  %v1373_v57 = vadd.f32 %v9669_v55, %v11304_v49  ;;  %v1374_v8 = vadd.f32 %v9670_v16, %v11304_v49  ;;  %v11344_v16 = vld [vmem:[%s17214_s7] ss:$0 sm:$0xff] }
  0xf4   :  { %v1381_v55 = vadd.f32 %v9677_v42, %v11304_v49 }
  0xf5   :  { %v802_v40 = vpop.f32.mrf.mxu1  ;;  %10163 = vtanh.f32 %v1373_v57  ;;  %v10055_v57 = vld [vmem:[%s17211_s2 + $0x1d0] sm:$0xff]  }
  0xf6   :  { %v11319_v30 = vpop.permute.xlu1 %2278  ;;  %v11328_v4 = vpop.permute.xlu0 %2293  ;;  %10165 = vtanh.f32 %v1375_v39  ;;  %v1379_v39 = vadd.f32 %v11304_v49, %v802_v40 }
  0xf7   :  { %17689 = vst [vmem:[#allocation55_spill] sm:$0xff] %v11319_v30  ;;  %v9678_v27 = vpop.f32.mrf.mxu1  ;;  %17690 = vst [vmem:[#allocation56_spill] sm:$0xff] %v11328_v4  ;;  %10167 = vtanh.f32 %v1374_v8  ;;  %v1376_v4 = vadd.f32 %v11304_v49, %v789_v43  ;;  %v10056_v43 = vld [vmem:[%s17211_s2 + $0x1d8] sm:$0xff]  }
  0xf8   :  { %10169 = vtanh.f32 %v1381_v55 }
  0xf9   :  { %v805_v22 = vpop.f32.mrf.mxu1 }
  0xfa   :  { %9776 = vmatmul.mubr.bf16.gmra.mxu1 %v10052_v53  ;;  %v11332_v30 = vpop.permute.xlu1 %2286  ;;  %v11334_v25 = vpop.permute.xlu0 %2301  ;;  %v1378_v53 = vadd.f32 %v9674_v47, %v11304_v49  ;;  %v1380_v14 = vadd.f32 %v11304_v49, %v805_v22  ;;  %v10058_v22 = vld [vmem:[%s17211_s2 + $0x1e8] sm:$0xff]  }
  0xfb   :  { %v9681_v52 = vpop.f32.mrf.mxu1  ;;  %9779 = vmatprep.mubr.bf16.mxu1 %v10053_v37  ;;  %17691 = vst [vmem:[#allocation57_spill] sm:$0xff] %v11332_v30  ;;  %17692 = vst [vmem:[#allocation58_spill] sm:$0xff] %v11334_v25  ;;  %v10158_v0 = vpop.eup %10157 }
  0xfc   :  { %10171 = vtanh.f32 %v1378_v53  ;;  %v1635_v55 = vmul.f32 %v10158_v0, %v11344_v16 }
  0xfd   :  { %v818_v36 = vpop.f32.mrf.mxu1  ;;  %10173 = vtanh.f32 %v1379_v39 }
  0xfe   :  { %v10160_v42 = vpop.eup %10159  ;;  %v11352_v25 = vpop.permute.xlu1 %2297  ;;  %10175 = vtanh.f32 %v1376_v4 }
  0xff   :  { %v9682_v33 = vpop.f32.mrf.mxu1  ;;  %17693 = vst [vmem:[#allocation59_spill] sm:$0xff] %v11352_v25  ;;  %v1634_v47 = vmul.f32 %v10160_v42, %v11344_v16  ;;  %v11356_v30 = vpop.permute.xlu0 %2309  ;;  %v1385_v25 = vadd.f32 %v9681_v52, %v11304_v49 }
 0x100   :  { %17694 = vst [vmem:[#allocation60_spill] sm:$0xff] %v11356_v30  ;;  %v10162_v40 = vpop.eup %10161 }
 0x101   :  { %v11349_v37 = vpop.f32.mrf.mxu1  ;;  %v1640_v39 = vmul.f32 %v10162_v40, %v11344_v16  ;;  %10177 = vtanh.f32 %v1385_v25 }
 0x102   :  { %9780 = vmatmul.mubr.bf16.gmra.mxu1 %v10054_v46  ;;  %v1382_v46 = vadd.f32 %v9678_v27, %v11304_v49  ;;  %v10164_v53 = vpop.eup %10163  ;;  %v11374_v0 = vpop.permute.xlu1 %2305  ;;  %v1383_v27 = vadd.f32 %v11304_v49, %v818_v36 }
 0x103   :  { %v9685_v8 = vpop.f32.mrf.mxu1  ;;  %9783 = vmatprep.mubr.bf16.mxu1 %v10055_v57  ;;  %1762 = vadd.xlane.f32.xlu0 %v1634_v47  ;;  %v11372_v57 = vrot.slane %v1297_v2, %v11266_v5  ;;  %17695 = vst [vmem:[#allocation61_spill] sm:$0xff] %v11374_v0  ;;  %v10166_v47 = vpop.eup %10165  ;;  %v1636_v2 = vmul.f32 %v10164_v53, %v11344_v16 }
 0x104   :  { %v11379_v30 = vpop.permute.xlu0 %2317  ;;  %10179 = vtanh.f32 %v1382_v46  ;;  %v10168_v5 = vpop.eup %10167 }
 0x105   :  { %v834_v28 = vpop.f32.mrf.mxu1  ;;  %17696 = vst [vmem:[#allocation62_spill] sm:$0xff] %v11379_v30  ;;  %v1638_v30 = vmul.f32 %v10166_v47, %v11344_v16  ;;  %10181 = vtanh.f32 %v1383_v27  ;;  %v10170_v46 = vpop.eup %10169  ;;  %v1637_v53 = vmul.f32 %v10168_v5, %v11344_v16  ;;  %v1384_v5 = vadd.f32 %v11304_v49, %v11349_v37 }
 0x106   :  { %v11390_v36 = vpop.permute.xlu1 %2313  ;;  %10183 = vtanh.f32 %v1380_v14  ;;  %v1644_v14 = vmul.f32 %v10170_v46, %v11344_v16 }
 0x107   :  { %v11362_v42 = vpop.f32.mrf.mxu1  ;;  %1764 = vadd.xlane.f32.xlu0 %v1635_v55  ;;  %v11386_v55 = vrot.slane %v11372_v57, %v10836_v6  ;;  %17697 = vst [vmem:[#allocation63_spill] sm:$0xff] %v11390_v36 }
 0x108   :  { %v11400_v47 = vpop.permute.xlu0 %2325 }
 0x109   :  { %v11376_v52 = vpop.f32.mrf.mxu1  ;;  %v1389_v25 = vadd.f32 %v9685_v8, %v11386_v55  ;;  %17698 = vst [vmem:[#allocation64_spill] sm:$0xff] %v11400_v47  ;;  %v10172_v8 = vpop.eup %10171 }
 0x10a   :  { %9784 = vmatmul.mubr.bf16.gmra.mxu1 %v10056_v43  ;;  %v1641_v0 = vmul.f32 %v10172_v8, %v11344_v16 }
 0x10b   :  { %v9689_v4 = vpop.f32.mrf.mxu1  ;;  %9787 = vmatprep.mubr.bf16.mxu1 %v10057_v23  ;;  %1774 = vadd.xlane.f32.xlu0 %v1640_v39  ;;  %v1386_v23 = vadd.f32 %v9682_v33, %v11304_v49  ;;  %v10059_v39 = vld [vmem:[%s17211_s2 + $0x1f0] sm:$0xff]   ;;  %10185 = vtanh.f32 %v1389_v25  ;;  %v10174_v33 = vpop.eup %10173  ;;  %v10060_v49 = vld [vmem:[%s17211_s2 + $0x1f8] sm:$0xff]  }
 0x10c   :  { %v10176_v47 = vpop.eup %10175  ;;  %v11411_v25 = vpop.permute.xlu0 %2333 }
 0x10d   :  { %v850_v40 = vpop.f32.mrf.mxu1  ;;  %10187 = vtanh.f32 %v1386_v23  ;;  %17700 = vst [vmem:[#allocation66_spill] sm:$0xff] %v11411_v25  ;;  %v1390_v23 = vadd.f32 %v11362_v42, %v11386_v55  ;;  %v1388_v42 = vadd.f32 %v11386_v55, %v11376_v52 }
 0x10e   :  { %v10178_v37 = vpop.eup %10177 }
 0x10f   :  { %v9690_v43 = vpop.f32.mrf.mxu1  ;;  %1770 = vadd.xlane.f32.xlu0 %v1638_v30  ;;  %v11409_v30 = vpop.permute.xlu1 %2321 }
 0x110   :  { %1766 = vadd.xlane.f32.xlu1 %v1636_v2  ;;  %v1387_v2 = vadd.f32 %v11386_v55, %v834_v28  ;;  %17699 = vst [vmem:[#allocation65_spill] sm:$0xff] %v11409_v30  ;;  %v1393_v28 = vadd.f32 %v9689_v4, %v11386_v55 }
 0x111   :  { %v11402_v27 = vpop.f32.mrf.mxu1 }
 0x112   :  { %9788 = vmatmul.mubr.bf16.gmra.mxu1 %v10058_v22  ;;  %10189 = vtanh.f32 %v1387_v2  ;;  %v1642_v22 = vmul.f32 %v10174_v33, %v11344_v16  ;;  %v1391_v2 = vadd.f32 %v11386_v55, %v850_v40 }
 0x113   :  { %v9693_v36 = vpop.f32.mrf.mxu1  ;;  %9791 = vmatprep.mubr.bf16.mxu1 %v10059_v39  ;;  %1782 = vadd.xlane.f32.xlu0 %v1644_v14  ;;  %10191 = vtanh.f32 %v1384_v5  ;;  %v1639_v39 = vmul.f32 %v10176_v47, %v11344_v16  ;;  %v11423_v4 = vpop.permute.xlu1 %2329  ;;  %v1648_v14 = vmul.f32 %v10178_v37, %v11344_v16 }
 0x114   :  { %1768 = vadd.xlane.f32.xlu1 %v1637_v53  ;;  %10193 = vtanh.f32 %v1393_v28  ;;  %17701 = vst [vmem:[#allocation67_spill] sm:$0xff] %v11423_v4  ;;  %v1397_v40 = vadd.f32 %v9693_v36, %v11386_v55 }
 0x115   :  { %v866_v53 = vpop.f32.mrf.mxu1  ;;  %10195 = vtanh.f32 %v1390_v23  ;;  %v1394_v23 = vadd.f32 %v9690_v43, %v11386_v55  ;;  %v1392_v43 = vadd.f32 %v11386_v55, %v11402_v27 }
 0x116   :  { %10197 = vtanh.f32 %v1391_v2  ;;  %v1395_v36 = vadd.f32 %v11386_v55, %v866_v53 }
 0x117   :  { %v9694_v46 = vpop.f32.mrf.mxu1  ;;  %1778 = vadd.xlane.f32.xlu0 %v1642_v22  ;;  %v11430_v22 = vpop.permute.xlu0 %2341  ;;  %10199 = vtanh.f32 %v1388_v42 }
 0x118   :  { %1776 = vadd.xlane.f32.xlu1 %v1641_v0  ;;  %v10180_v0 = vpop.eup %10179  ;;  %17702 = vst [vmem:[#allocation68_spill] sm:$0xff] %v11430_v22  ;;  %10201 = vtanh.f32 %v1397_v40 }
 0x119   :  { %v11421_v8 = vpop.f32.mrf.mxu1  ;;  %v10182_v5 = vpop.eup %10181  ;;  %v1645_v47 = vmul.f32 %v10180_v0, %v11344_v16  ;;  %10203 = vtanh.f32 %v1394_v23  ;;  %v1398_v23 = vadd.f32 %v9694_v46, %v11386_v55 }
 0x11a   :  { %9792 = vmatmul.mubr.bf16.gmra.mxu1 %v10060_v49  ;;  %v10184_v25 = vpop.eup %10183  ;;  %v1646_v37 = vmul.f32 %v10182_v5, %v11344_v16  ;;  %v11436_v0 = vpop.permute.xlu1 %2337  ;;  %10205 = vtanh.f32 %v1395_v36  ;;  %v1396_v46 = vadd.f32 %v11386_v55, %v11421_v8 }
 0x11b   :  { %v9697_v33 = vpop.f32.mrf.mxu1  ;;  %1790 = vadd.xlane.f32.xlu0 %v1648_v14  ;;  %v10186_v49 = vpop.eup %10185  ;;  %v1643_v52 = vmul.f32 %v10184_v25, %v11344_v16  ;;  %17703 = vst [vmem:[#allocation69_spill] sm:$0xff] %v11436_v0  ;;  %10207 = vtanh.f32 %v1392_v43 }
 0x11c   :  { %1772 = vadd.xlane.f32.xlu1 %v1639_v39  ;;  %v10188_v4 = vpop.eup %10187  ;;  %v11440_v14 = vpop.permute.xlu0 %2349  ;;  %v1652_v2 = vmul.f32 %v10186_v49, %v11344_v16  ;;  %v1401_v40 = vadd.f32 %v9697_v33, %v11386_v55 }
 0x11d   :  { %v882_v28 = vpop.f32.mrf.mxu1  ;;  %17704 = vst [vmem:[#allocation70_spill] sm:$0xff] %v11440_v14  ;;  %v1649_v25 = vmul.f32 %v10188_v4, %v11344_v16 }
 0x11e   :  { %10209 = vtanh.f32 %v1401_v40  ;;  %v1399_v33 = vadd.f32 %v11386_v55, %v882_v28 }
 0x11f   :  { %v9698_v39 = vpop.f32.mrf.mxu1  ;;  %1786 = vadd.xlane.f32.xlu0 %v1646_v37  ;;  %v10190_v42 = vpop.eup %10189  ;;  %10211 = vtanh.f32 %v1398_v23 }
 0x120   :  { %1784 = vadd.xlane.f32.xlu1 %v1645_v47  ;;  %v10192_v47 = vpop.eup %10191  ;;  %v1650_v53 = vmul.f32 %v10190_v42, %v11344_v16  ;;  %v11453_v0 = vpop.permute.xlu0 %2360  ;;  %10213 = vtanh.f32 %v1399_v33 }
 0x121   :  { %v11438_v22 = vpop.f32.mrf.mxu1  ;;  %v10194_v14 = vpop.eup %10193  ;;  %v1647_v27 = vmul.f32 %v10192_v47, %v11344_v16  ;;  %17706 = vst [vmem:[#allocation72_spill] sm:$0xff] %v11453_v0  ;;  %10215 = vtanh.f32 %v1396_v46 }
 0x122   :  { %v10196_v4 = vpop.eup %10195  ;;  %v1656_v36 = vmul.f32 %v10194_v14, %v11344_v16  ;;  %v1400_v46 = vadd.f32 %v11386_v55, %v11438_v22 }
 0x123   :  { %v9701_v5 = vpop.f32.mrf.mxu1  ;;  %1798 = vadd.xlane.f32.xlu0 %v1652_v2  ;;  %v1327_v2 = vcombine.high %v11289_v63, %v11289_v63  ;;  %v10198_v43 = vpop.eup %10197  ;;  %v1653_v47 = vmul.f32 %v10196_v4, %v11344_v16  ;;  %v1402_v4 = vadd.f32 %v9698_v39, %v11386_v55 }
 0x124   :  { %1780 = vadd.xlane.f32.xlu1 %v1643_v52  ;;  %v11447_v52 = vpop.permute.xlu1 %2345  ;;  %v10200_v0 = vpop.eup %10199  ;;  %v1654_v23 = vmul.f32 %v10198_v43, %v11344_v16 }
 0x125   :  { %v898_v37 = vpop.f32.mrf.mxu1  ;;  %17705 = vst [vmem:[#allocation71_spill] sm:$0xff] %v11447_v52  ;;  %v11465_v63 = vrot.slane %v1327_v2, %v10836_v6  ;;  %v11469_v28 = vpop.permute.xlu0 %2368  ;;  %v1651_v2 = vmul.f32 %v10200_v0, %v11344_v16 }
 0x126   :  { %17708 = vst [vmem:[#allocation74_spill] sm:$0xff] %v11469_v28  ;;  %v10202_v8 = vpop.eup %10201 }
 0x127   :  { %v9702_v49 = vpop.f32.mrf.mxu1  ;;  %1794 = vadd.xlane.f32.xlu0 %v1650_v53  ;;  %v1405_v14 = vadd.f32 %v9701_v5, %v11465_v63  ;;  %v10204_v52 = vpop.eup %10203  ;;  %v1403_v33 = vadd.f32 %v11465_v63, %v898_v37  ;;  %v1660_v5 = vmul.f32 %v10202_v8, %v11344_v16 }
 0x128   :  { %1792 = vadd.xlane.f32.xlu1 %v1649_v25  ;;  %v11467_v53 = vpop.permute.xlu1 %2353  ;;  %v10206_v43 = vpop.eup %10205  ;;  %v1657_v39 = vmul.f32 %v10204_v52, %v11344_v16 }
 0x129   :  { %v11457_v25 = vpop.f32.mrf.mxu1  ;;  %17707 = vst [vmem:[#allocation73_spill] sm:$0xff] %v11467_v53  ;;  %10217 = vtanh.f32 %v1405_v14  ;;  %v11482_v0 = vpop.permute.xlu0 %2376  ;;  %v1658_v37 = vmul.f32 %v10206_v43, %v11344_v16 }
 0x12a   :  { %10219 = vtanh.f32 %v1402_v4  ;;  %17710 = vst [vmem:[#allocation76_spill] sm:$0xff] %v11482_v0  ;;  %v1406_v4 = vadd.f32 %v9702_v49, %v11465_v63  ;;  %v1404_v49 = vadd.f32 %v11465_v63, %v11457_v25 }
 0x12b   :  { %v9705_v42 = vpop.f32.mrf.mxu1  ;;  %1806 = vadd.xlane.f32.xlu0 %v1656_v36  ;;  %10221 = vtanh.f32 %v1403_v33 }
 0x12c   :  { %1788 = vadd.xlane.f32.xlu1 %v1647_v27  ;;  %v11475_v36 = vpop.permute.xlu1 %2364  ;;  %v1409_v14 = vadd.f32 %v9705_v42, %v11465_v63  ;;  %10223 = vtanh.f32 %v1400_v46 }
 0x12d   :  { %v914_v40 = vpop.f32.mrf.mxu1  ;;  %17709 = vst [vmem:[#allocation75_spill] sm:$0xff] %v11475_v36 }
 0x12e   :  { %10225 = vtanh.f32 %v1409_v14  ;;  %v1407_v42 = vadd.f32 %v11465_v63, %v914_v40 }
 0x12f   :  { %v9706_v27 = vpop.f32.mrf.mxu1  ;;  %1802 = vadd.xlane.f32.xlu0 %v1654_v23  ;;  %v10208_v23 = vpop.eup %10207  ;;  %10227 = vtanh.f32 %v1406_v4 }
 0x130   :  { %1800 = vadd.xlane.f32.xlu1 %v1653_v47  ;;  %v10210_v28 = vpop.eup %10209  ;;  %v1655_v55 = vmul.f32 %v10208_v23, %v11344_v16  ;;  %v11488_v52 = vpop.permute.xlu1 %2372  ;;  %10229 = vtanh.f32 %v1407_v42  ;;  %v1410_v4 = vadd.f32 %v9706_v27, %v11465_v63 }
 0x131   :  { %v917_v53 = vpop.f32.mrf.mxu1  ;;  %v10212_v22 = vpop.eup %10211  ;;  %17711 = vst [vmem:[#allocation77_spill] sm:$0xff] %v11488_v52  ;;  %v1664_v33 = vmul.f32 %v10210_v28, %v11344_v16  ;;  %10231 = vtanh.f32 %v1404_v49 }
 0x132   :  { %v10214_v46 = vpop.eup %10213  ;;  %v1408_v49 = vadd.f32 %v11465_v63, %v917_v53 }
 0x133   :  { %v9709_v47 = vpop.f32.mrf.mxu1  ;;  %1814 = vadd.xlane.f32.xlu0 %v1660_v5  ;;  %v11492_v5 = vpop.permute.xlu0 %2384  ;;  %v1662_v40 = vmul.f32 %v10214_v46, %v11344_v16 }
 0x134   :  { %1796 = vadd.xlane.f32.xlu1 %v1651_v2  ;;  %17712 = vst [vmem:[#allocation78_spill] sm:$0xff] %v11492_v5  ;;  %v10216_v23 = vpop.eup %10215  ;;  %v1413_v14 = vadd.f32 %v9709_v47, %v11465_v63 }
 0x135   :  { %v930_v2 = vpop.f32.mrf.mxu1  ;;  %v1659_v25 = vmul.f32 %v10216_v23, %v11344_v16 }
 0x136   :  { %v10218_v5 = vpop.eup %10217  ;;  %10233 = vtanh.f32 %v1413_v14  ;;  %v1411_v42 = vadd.f32 %v11465_v63, %v930_v2 }
 0x137   :  { %v9710_v8 = vpop.f32.mrf.mxu1  ;;  %1810 = vadd.xlane.f32.xlu0 %v1658_v37  ;;  %v11505_v52 = vpop.permute.xlu0 %2392  ;;  %v1668_v47 = vmul.f32 %v10218_v5, %v11344_v16  ;;  %10235 = vtanh.f32 %v1410_v4 }
 0x138   :  { %1808 = vadd.xlane.f32.xlu1 %v1657_v39  ;;  %v1661_v39 = vmul.f32 %v10212_v22, %v11344_v16  ;;  %17714 = vst [vmem:[#allocation80_spill] sm:$0xff] %v11505_v52  ;;  %v10220_v22 = vpop.eup %10219  ;;  %10237 = vtanh.f32 %v1411_v42  ;;  %v1414_v53 = vadd.f32 %v9710_v8, %v11465_v63 }
 0x139   :  { %v11490_v0 = vpop.f32.mrf.mxu1  ;;  %v1665_v27 = vmul.f32 %v10220_v22, %v11344_v16  ;;  %10239 = vtanh.f32 %v1408_v49 }
 0x13a   :  { %v1412_v8 = vadd.f32 %v11465_v63, %v11490_v0 }
 0x13b   :  { %v9713_v43 = vpop.f32.mrf.mxu1  ;;  %1822 = vadd.xlane.f32.xlu0 %v1664_v33  ;;  %v11515_v52 = vpop.permute.xlu0 %2400 }
 0x13c   :  { %1804 = vadd.xlane.f32.xlu1 %v1655_v55  ;;  %v11499_v55 = vpop.permute.xlu1 %2380  ;;  %17716 = vst [vmem:[#allocation82_spill] sm:$0xff] %v11515_v52  ;;  %v1417_v2 = vadd.f32 %v9713_v43, %v11465_v63 }
 0x13d   :  { %v946_v37 = vpop.f32.mrf.mxu1  ;;  %17713 = vst [vmem:[#allocation79_spill] sm:$0xff] %v11499_v55 }
 0x13e   :  { %10241 = vtanh.f32 %v1417_v2  ;;  %v1415_v43 = vadd.f32 %v11465_v63, %v946_v37 }
 0x13f   :  { %v9714_v28 = vpop.f32.mrf.mxu1  ;;  %1818 = vadd.xlane.f32.xlu0 %v1662_v40  ;;  %10243 = vtanh.f32 %v1414_v53 }
 0x140   :  { %1816 = vadd.xlane.f32.xlu1 %v1661_v39  ;;  %v10222_v39 = vpop.eup %10221  ;;  %v11513_v55 = vpop.permute.xlu1 %2388  ;;  %10245 = vtanh.f32 %v1415_v43  ;;  %v1418_v0 = vadd.f32 %v9714_v28, %v11465_v63 }
 0x141   :  { %v11507_v33 = vpop.f32.mrf.mxu1  ;;  %v10224_v23 = vpop.eup %10223  ;;  %17715 = vst [vmem:[#allocation81_spill] sm:$0xff] %v11513_v55  ;;  %v1666_v5 = vmul.f32 %v10222_v39, %v11344_v16  ;;  %10247 = vtanh.f32 %v1412_v8 }
 0x142   :  { %v1663_v4 = vmul.f32 %v10224_v23, %v11344_v16  ;;  %v1416_v28 = vadd.f32 %v11465_v63, %v11507_v33 }
 0x143   :  { %v9717_v46 = vpop.f32.mrf.mxu1  ;;  %1830 = vadd.xlane.f32.xlu0 %v1668_v47  ;;  %v1329_v47 = vcombine.high %v11372_v57, %v11372_v57  ;;  %v11532_v57 = vpop.permute.xlu0 %2408 }
 0x144   :  { %1812 = vadd.xlane.f32.xlu1 %v1659_v25  ;;  %v10226_v25 = vpop.eup %10225  ;;  %v11525_v42 = vpop.permute.xlu1 %2396  ;;  %17718 = vst [vmem:[#allocation84_spill] sm:$0xff] %v11532_v57 }
 0x145   :  { %v962_v40 = vpop.f32.mrf.mxu1  ;;  %v10228_v22 = vpop.eup %10227  ;;  %17717 = vst [vmem:[#allocation83_spill] sm:$0xff] %v11525_v42  ;;  %v1672_v39 = vmul.f32 %v10226_v25, %v11344_v16 }
 0x146   :  { %v10230_v52 = vpop.eup %10229  ;;  %v1669_v23 = vmul.f32 %v10228_v22, %v11344_v16 }
 0x147   :  { %v9718_v14 = vpop.f32.mrf.mxu1  ;;  %1826 = vadd.xlane.f32.xlu0 %v1666_v5  ;;  %v10232_v5 = vpop.eup %10231  ;;  %v1670_v25 = vmul.f32 %v10230_v52, %v11344_v16 }
 0x148   :  { %1824 = vadd.xlane.f32.xlu1 %v1665_v27  ;;  %v10234_v42 = vpop.eup %10233  ;;  %v1667_v22 = vmul.f32 %v10232_v5, %v11344_v16  ;;  %v11541_v55 = vpop.permute.xlu1 %2404 }
 0x149   :  { %v11523_v27 = vpop.f32.mrf.mxu1  ;;  %v10236_v57 = vpop.eup %10235  ;;  %17719 = vst [vmem:[#allocation85_spill] sm:$0xff] %v11541_v55  ;;  %v1676_v52 = vmul.f32 %v10234_v42, %v11344_v16 }
 0x14a   :  { %v1673_v8 = vmul.f32 %v10236_v57, %v11344_v16 }
 0x14b   :  { %v9721_v49 = vpop.f32.mrf.mxu1  ;;  %1838 = vadd.xlane.f32.xlu0 %v1672_v39  ;;  %v11543_v39 = vpop.permute.xlu0 %2416 }
 0x14c   :  { %1820 = vadd.xlane.f32.xlu1 %v1663_v4  ;;  %v11535_v4 = vrot.slane %v1329_v47, %v10836_v6  ;;  %17720 = vst [vmem:[#allocation86_spill] sm:$0xff] %v11543_v39 }
 0x14d   :  { %v978_v2 = vpop.f32.mrf.mxu1 }
 0x14e   :  { %v1421_v37 = vadd.f32 %v9717_v46, %v11535_v4  ;;  %v1419_v46 = vadd.f32 %v11535_v4, %v962_v40 }
 0x14f   :  { %v9722_v53 = vpop.f32.mrf.mxu1  ;;  %1834 = vadd.xlane.f32.xlu0 %v1670_v25  ;;  %v11556_v33 = vpop.permute.xlu0 %2427 }
 0x150   :  { %1832 = vadd.xlane.f32.xlu1 %v1669_v23  ;;  %10249 = vtanh.f32 %v1421_v37  ;;  %v10238_v23 = vpop.eup %10237  ;;  %v1425_v37 = vadd.f32 %v9721_v49, %v11535_v4  ;;  %17722 = vst [vmem:[#allocation88_spill] sm:$0xff] %v11556_v33 }
 0x151   :  { %v981_v47 = vpop.f32.mrf.mxu1  ;;  %10251 = vtanh.f32 %v1418_v0  ;;  %v10240_v5 = vpop.eup %10239  ;;  %v1674_v40 = vmul.f32 %v10238_v23, %v11344_v16  ;;  %v1422_v0 = vadd.f32 %v9718_v14, %v11535_v4 }
 0x152   :  { %10253 = vtanh.f32 %v1419_v46  ;;  %v10242_v39 = vpop.eup %10241  ;;  %v1671_v63 = vmul.f32 %v10240_v5, %v11344_v16  ;;  %v1423_v46 = vadd.f32 %v11535_v4, %v978_v2 }
 0x153   :  { %v9725_v43 = vpop.f32.mrf.mxu1  ;;  %1846 = vadd.xlane.f32.xlu0 %v1676_v52  ;;  %10255 = vtanh.f32 %v1416_v28  ;;  %v10244_v57 = vpop.eup %10243  ;;  %v1680_v49 = vmul.f32 %v10242_v39, %v11344_v16  ;;  %v1420_v28 = vadd.f32 %v11535_v4, %v11523_v27  ;;  %v1426_v27 = vadd.f32 %v9722_v53, %v11535_v4 }
 0x154   :  { %1828 = vadd.xlane.f32.xlu1 %v1667_v22  ;;  %v11550_v22 = vpop.permute.xlu1 %2412  ;;  %10257 = vtanh.f32 %v1425_v37  ;;  %v10246_v23 = vpop.eup %10245  ;;  %v1677_v14 = vmul.f32 %v10244_v57, %v11344_v16  ;;  %v1429_v2 = vadd.f32 %v9725_v43, %v11535_v4 }
 0x155   :  { %v994_v25 = vpop.f32.mrf.mxu1  ;;  %17721 = vst [vmem:[#allocation87_spill] sm:$0xff] %v11550_v22  ;;  %10259 = vtanh.f32 %v1422_v0  ;;  %v10248_v5 = vpop.eup %10247  ;;  %v1678_v39 = vmul.f32 %v10246_v23, %v11344_v16 }
 0x156   :  { %10261 = vtanh.f32 %v1423_v46  ;;  %v1675_v57 = vmul.f32 %v10248_v5, %v11344_v16  ;;  %v1427_v46 = vadd.f32 %v11535_v4, %v994_v25 }
 0x157   :  { %v9726_v42 = vpop.f32.mrf.mxu1  ;;  %1842 = vadd.xlane.f32.xlu0 %v1674_v40  ;;  %10263 = vtanh.f32 %v1420_v28  ;;  %v1424_v28 = vadd.f32 %v11535_v4, %v981_v47 }
 0x158   :  { %1840 = vadd.xlane.f32.xlu1 %v1673_v8  ;;  %v11563_v22 = vpop.permute.xlu1 %2420  ;;  %10265 = vtanh.f32 %v1429_v2 }
 0x159   :  { %v997_v52 = vpop.f32.mrf.mxu1  ;;  %17723 = vst [vmem:[#allocation89_spill] sm:$0xff] %v11563_v22  ;;  %10267 = vtanh.f32 %v1426_v27  ;;  %v1430_v27 = vadd.f32 %v9726_v42, %v11535_v4 }
 0x15a   :  { %10269 = vtanh.f32 %v1427_v46  ;;  %v1428_v42 = vadd.f32 %v11535_v4, %v997_v52 }
 0x15b   :  { %v9729_v8 = vpop.f32.mrf.mxu1  ;;  %1854 = vadd.xlane.f32.xlu0 %v1680_v49  ;;  %10271 = vtanh.f32 %v1424_v28 }
 0x15c   :  { %1836 = vadd.xlane.f32.xlu1 %v1671_v63  ;;  %v11565_v63 = vpop.permute.xlu0 %2435  ;;  %v11573_v49 = vpop.permute.xlu1 %2431  ;;  %v1433_v2 = vadd.f32 %v9729_v8, %v11535_v4 }
 0x15d   :  { %v1010_v40 = vpop.f32.mrf.mxu1  ;;  %17724 = vst [vmem:[#allocation90_spill] sm:$0xff] %v11565_v63  ;;  %v10250_v0 = vpop.eup %10249  ;;  %17725 = vst [vmem:[#allocation91_spill] sm:$0xff] %v11573_v49 }
 0x15e   :  { %v10252_v33 = vpop.eup %10251  ;;  %v1684_v43 = vmul.f32 %v10250_v0, %v11344_v16  ;;  %10273 = vtanh.f32 %v1433_v2  ;;  %v1431_v8 = vadd.f32 %v11535_v4, %v1010_v40 }
 0x15f   :  { %v9730_v37 = vpop.f32.mrf.mxu1  ;;  %1850 = vadd.xlane.f32.xlu0 %v1678_v39  ;;  %v1681_v53 = vmul.f32 %v10252_v33, %v11344_v16  ;;  %10275 = vtanh.f32 %v1430_v27 }
 0x160   :  { %1848 = vadd.xlane.f32.xlu1 %v1677_v14  ;;  %v10254_v14 = vpop.eup %10253  ;;  %v11579_v5 = vpop.permute.xlu0 %2443  ;;  %10277 = vtanh.f32 %v1431_v8  ;;  %v1434_v52 = vadd.f32 %v9730_v37, %v11535_v4 }
 0x161   :  { %v11571_v22 = vpop.f32.mrf.mxu1  ;;  %17726 = vst [vmem:[#allocation92_spill] sm:$0xff] %v11579_v5  ;;  %v10256_v39 = vpop.eup %10255  ;;  %v1682_v25 = vmul.f32 %v10254_v14, %v11344_v16  ;;  %10279 = vtanh.f32 %v1428_v42 }
 0x162   :  { %v10258_v0 = vpop.eup %10257  ;;  %v1679_v47 = vmul.f32 %v10256_v39, %v11344_v16  ;;  %v11585_v33 = vpop.permute.xlu1 %2439  ;;  %v1432_v42 = vadd.f32 %v11535_v4, %v11571_v22 }
 0x163   :  { %v9733_v23 = vpop.f32.mrf.mxu1  ;;  %1862 = vadd.xlane.f32.xlu0 %v1684_v43  ;;  %v10260_v49 = vpop.eup %10259  ;;  %17727 = vst [vmem:[#allocation93_spill] sm:$0xff] %v11585_v33  ;;  %v1688_v46 = vmul.f32 %v10258_v0, %v11344_v16 }
 0x164   :  { %1844 = vadd.xlane.f32.xlu1 %v1675_v57  ;;  %v11589_v43 = vpop.permute.xlu0 %2451  ;;  %v10262_v28 = vpop.eup %10261 }
 0x165   :  { %v1026_v63 = vpop.f32.mrf.mxu1  ;;  %17728 = vst [vmem:[#allocation94_spill] sm:$0xff] %v11589_v43  ;;  %v10264_v39 = vpop.eup %10263  ;;  %v1686_v0 = vmul.f32 %v10262_v28, %v11344_v16 }
 0x166   :  { %v11599_v2 = vpop.permute.xlu1 %2447  ;;  %v10266_v43 = vpop.eup %10265 }
 0x167   :  { %v9734_v57 = vpop.f32.mrf.mxu1  ;;  %1858 = vadd.xlane.f32.xlu0 %v1682_v25  ;;  %v11597_v25 = vrot.slane %v11292_v61, %v10836_v6  ;;  %17729 = vst [vmem:[#allocation95_spill] sm:$0xff] %v11599_v2  ;;  %v10268_v55 = vpop.eup %10267 }
 0x168   :  { %1856 = vadd.xlane.f32.xlu1 %v1681_v53  ;;  %v1685_v53 = vmul.f32 %v10260_v49, %v11344_v16  ;;  %v1683_v49 = vmul.f32 %v10264_v39, %v11344_v16  ;;  %v11605_v33 = vpop.permute.xlu0 %2459  ;;  %v10270_v28 = vpop.eup %10269  ;;  %v1689_v37 = vmul.f32 %v10268_v55, %v11344_v16 }
 0x169   :  { %v11587_v5 = vpop.f32.mrf.mxu1  ;;  %v1437_v40 = vadd.f32 %v9733_v23, %v11597_v25  ;;  %17730 = vst [vmem:[#allocation96_spill] sm:$0xff] %v11605_v33  ;;  %v1435_v8 = vadd.f32 %v11597_v25, %v1026_v63  ;;  %v1692_v23 = vmul.f32 %v10266_v43, %v11344_v16  ;;  %v10272_v39 = vpop.eup %10271  ;;  %v1690_v43 = vmul.f32 %v10270_v28, %v11344_v16 }
 0x16a   :  { %v11612_v2 = vpop.permute.xlu1 %2455  ;;  %v1438_v4 = vadd.f32 %v9734_v57, %v11597_v25  ;;  %v1687_v55 = vmul.f32 %v10272_v39, %v11344_v16 }
 0x16b   :  { %v9737_v14 = vpop.f32.mrf.mxu1  ;;  %1870 = vadd.xlane.f32.xlu0 %v1688_v46  ;;  %10281 = vtanh.f32 %v1437_v40  ;;  %17731 = vst [vmem:[#allocation97_spill] sm:$0xff] %v11612_v2 }
 0x16c   :  { %1852 = vadd.xlane.f32.xlu1 %v1679_v47  ;;  %10283 = vtanh.f32 %v1434_v52  ;;  %v1441_v63 = vadd.f32 %v9737_v14, %v11597_v25  ;;  %v10274_v52 = vpop.eup %10273 }
 0x16d   :  { %v1042_v47 = vpop.f32.mrf.mxu1  ;;  %10285 = vtanh.f32 %v1435_v8  ;;  %v10276_v22 = vpop.eup %10275  ;;  %v1696_v14 = vmul.f32 %v10274_v52, %v11344_v16 }
 0x16e   :  { %10287 = vtanh.f32 %v1432_v42  ;;  %v1439_v8 = vadd.f32 %v11597_v25, %v1042_v47  ;;  %v10278_v28 = vpop.eup %10277  ;;  %v1436_v42 = vadd.f32 %v11597_v25, %v11587_v5  ;;  %v1693_v39 = vmul.f32 %v10276_v22, %v11344_v16 }
 0x16f   :  { %v9738_v27 = vpop.f32.mrf.mxu1  ;;  %1866 = vadd.xlane.f32.xlu0 %v1686_v0  ;;  %10289 = vtanh.f32 %v1441_v63  ;;  %v1694_v47 = vmul.f32 %v10278_v28, %v11344_v16 }
 0x170   :  { %1864 = vadd.xlane.f32.xlu1 %v1685_v53  ;;  %10291 = vtanh.f32 %v1438_v4  ;;  %v1442_v4 = vadd.f32 %v9738_v27, %v11597_v25 }
 0x171   :  { %v1045_v46 = vpop.f32.mrf.mxu1  ;;  %10293 = vtanh.f32 %v1439_v8 }
 0x172   :  { %10295 = vtanh.f32 %v1436_v42  ;;  %v1440_v27 = vadd.f32 %v11597_v25, %v1045_v46 }
 0x173   :  { %v9741_v53 = vpop.f32.mrf.mxu1  ;;  %1878 = vadd.xlane.f32.xlu0 %v1692_v23  ;;  %v11620_v23 = vpop.permute.xlu1 %2463 }
 0x174   :  { %1860 = vadd.xlane.f32.xlu1 %v1683_v49  ;;  %v11614_v49 = vpop.permute.xlu0 %2467  ;;  %17733 = vst [vmem:[#allocation99_spill] sm:$0xff] %v11620_v23  ;;  %v1445_v63 = vadd.f32 %v9741_v53, %v11597_v25 }
 0x175   :  { %v1058_v0 = vpop.f32.mrf.mxu1  ;;  %17732 = vst [vmem:[#allocation98_spill] sm:$0xff] %v11614_v49 }
 0x176   :  { %10297 = vtanh.f32 %v1445_v63  ;;  %v1443_v53 = vadd.f32 %v11597_v25, %v1058_v0 }
 0x177   :  { %v9742_v40 = vpop.f32.mrf.mxu1  ;;  %1874 = vadd.xlane.f32.xlu0 %v1690_v43  ;;  %v10280_v43 = vpop.eup %10279  ;;  %10299 = vtanh.f32 %v1442_v4 }
 0x178   :  { %1872 = vadd.xlane.f32.xlu1 %v1689_v37  ;;  %v11626_v57 = vpop.permute.xlu0 %2475  ;;  %v10282_v49 = vpop.eup %10281  ;;  %v1691_v5 = vmul.f32 %v10280_v43, %v11344_v16  ;;  %10301 = vtanh.f32 %v1443_v53  ;;  %v1446_v4 = vadd.f32 %v9742_v40, %v11597_v25 }
 0x179   :  { %v1061_v33 = vpop.f32.mrf.mxu1  ;;  %17734 = vst [vmem:[#allocation100_spill] sm:$0xff] %v11626_v57  ;;  %v10284_v23 = vpop.eup %10283  ;;  %v1700_v8 = vmul.f32 %v10282_v49, %v11344_v16  ;;  %10303 = vtanh.f32 %v1440_v27 }
 0x17a   :  { %v11633_v57 = vpop.permute.xlu1 %2471  ;;  %v10286_v42 = vpop.eup %10285  ;;  %v1444_v27 = vadd.f32 %v11597_v25, %v1061_v33 }
 0x17b   :  { %v9745_v37 = vpop.f32.mrf.mxu1  ;;  %1886 = vadd.xlane.f32.xlu0 %v1696_v14  ;;  %17735 = vst [vmem:[#allocation101_spill] sm:$0xff] %v11633_v57  ;;  %v10288_v43 = vpop.eup %10287  ;;  %v1698_v0 = vmul.f32 %v10286_v42, %v11344_v16 }
 0x17c   :  { %1868 = vadd.xlane.f32.xlu1 %v1687_v55  ;;  %v11637_v14 = vpop.permute.xlu0 %2483  ;;  %v1449_v63 = vadd.f32 %v9745_v37, %v11597_v25  ;;  %v10290_v49 = vpop.eup %10289  ;;  %v1695_v46 = vmul.f32 %v10288_v43, %v11344_v16  ;;  %v11659_v43 = vrot.slane %v11296_v35, %v10836_v6 }
 0x17d   :  { %v1074_v55 = vpop.f32.mrf.mxu1  ;;  %17736 = vst [vmem:[#allocation102_spill] sm:$0xff] %v11637_v14  ;;  %v1704_v37 = vmul.f32 %v10290_v49, %v11344_v16 }
 0x17e   :  { %v11643_v57 = vpop.permute.xlu1 %2479  ;;  %10305 = vtanh.f32 %v1449_v63  ;;  %v1447_v53 = vadd.f32 %v11597_v25, %v1074_v55 }
 0x17f   :  { %v9746_v52 = vpop.f32.mrf.mxu1  ;;  %1882 = vadd.xlane.f32.xlu0 %v1694_v47  ;;  %17737 = vst [vmem:[#allocation103_spill] sm:$0xff] %v11643_v57  ;;  %10307 = vtanh.f32 %v1446_v4 }
 0x180   :  { %1880 = vadd.xlane.f32.xlu1 %v1693_v39  ;;  %v1697_v39 = vmul.f32 %v10284_v23, %v11344_v16  ;;  %v11648_v14 = vpop.permute.xlu0 %2494  ;;  %v10292_v23 = vpop.eup %10291  ;;  %10309 = vtanh.f32 %v1447_v53 }
 0x181   :  { %v11635_v22 = vpop.f32.mrf.mxu1  ;;  %17738 = vst [vmem:[#allocation104_spill] sm:$0xff] %v11648_v14  ;;  %v1701_v40 = vmul.f32 %v10292_v23, %v11344_v16  ;;  %10311 = vtanh.f32 %v1444_v27  ;;  %v1450_v23 = vadd.f32 %v9746_v52, %v11597_v25 }
 0x182   :  { %v1448_v52 = vadd.f32 %v11597_v25, %v11635_v22 }
 0x183   :  { %v9749_v28 = vpop.f32.mrf.mxu1  ;;  %1894 = vadd.xlane.f32.xlu0 %v1700_v8 }
 0x184   :  { %1876 = vadd.xlane.f32.xlu1 %v1691_v5  ;;  %v1453_v55 = vadd.f32 %v9749_v28, %v11659_v43 }
 0x185   :  { %v1090_v47 = vpop.f32.mrf.mxu1 }
 0x186   :  { %10313 = vtanh.f32 %v1453_v55  ;;  %v1451_v28 = vadd.f32 %v11659_v43, %v1090_v47  ;;  %v11686_v47 = vld [vmem:[%s17214_s7] ss:$0 sm:$0xff] }
 0x187   :  { %v9750_v5 = vpop.f32.mrf.mxu1  ;;  %1890 = vadd.xlane.f32.xlu0 %v1698_v0  ;;  %v11661_v0 = vpop.permute.xlu1 %2487  ;;  %10315 = vtanh.f32 %v1450_v23 }
 0x188   :  { %1888 = vadd.xlane.f32.xlu1 %v1697_v39  ;;  %v10294_v39 = vpop.eup %10293  ;;  %17739 = vst [vmem:[#allocation105_spill] sm:$0xff] %v11661_v0  ;;  %10317 = vtanh.f32 %v1451_v28 }
 0x189   :  { %v11651_v8 = vpop.f32.mrf.mxu1  ;;  %v10296_v14 = vpop.eup %10295  ;;  %v1702_v49 = vmul.f32 %v10294_v39, %v11344_v16  ;;  %10319 = vtanh.f32 %v1448_v52 }
 0x18a   :  { %v10298_v4 = vpop.eup %10297  ;;  %v1699_v57 = vmul.f32 %v10296_v14, %v11344_v16 }
 0x18b   :  { %v9753_v42 = vpop.f32.mrf.mxu1  ;;  %1902 = vadd.xlane.f32.xlu0 %v1704_v37  ;;  %v10300_v2 = vpop.eup %10299  ;;  %v1708_v53 = vmul.f32 %v10298_v4, %v11344_v16 }
 0x18c   :  { %1884 = vadd.xlane.f32.xlu1 %v1695_v46  ;;  %v11663_v46 = vpop.xlane.xlu0 %1762  ;;  %v10302_v27 = vpop.eup %10301  ;;  %v1705_v14 = vmul.f32 %v10300_v2, %v11344_v16  ;;  %v1454_v2 = vadd.f32 %v9750_v5, %v11659_v43  ;;  %v1452_v5 = vadd.f32 %v11659_v43, %v11651_v8 }
 0x18d   :  { %v1106_v63 = vpop.f32.mrf.mxu1  ;;  %v1706_v55 = vmul.f32 %v11686_v47, %v10302_v27 }
 0x18f   :  { %v9754_v33 = vpop.f32.mrf.mxu1  ;;  %1898 = vadd.xlane.f32.xlu0 %v1702_v49  ;;  %v10304_v49 = vpop.eup %10303 }
 0x190   :  { %1896 = vadd.xlane.f32.xlu1 %v1701_v40  ;;  %v11671_v37 = vpop.xlane.xlu0 %1764  ;;  %v11673_v40 = vpop.permute.xlu1 %2498  ;;  %v1703_v22 = vmul.f32 %v11686_v47, %v10304_v49  ;;  %v1458_v8 = vadd.f32 %v9754_v33, %v11659_v43 }
 0x191   :  { %v11669_v0 = vpop.f32.mrf.mxu1  ;;  %17740 = vst [vmem:[#allocation106_spill] sm:$0xff] %v11673_v40  ;;  %v10306_v16 = vpop.eup %10305 }
 0x192   :  { %v10308_v23 = vpop.eup %10307  ;;  %v1712_v27 = vmul.f32 %v11686_v47, %v10306_v16  ;;  %v1456_v33 = vadd.f32 %v11659_v43, %v11669_v0 }
 0x193   :  { %v9757_v39 = vpop.f32.mrf.mxu1  ;;  %1910 = vadd.xlane.f32.xlu0 %v1708_v53  ;;  %v1455_v53 = vadd.f32 %v11659_v43, %v1106_v63  ;;  %v10310_v52 = vpop.eup %10309  ;;  %v1709_v49 = vmul.f32 %v11686_v47, %v10308_v23 }
 0x194   :  { %1892 = vadd.xlane.f32.xlu1 %v1699_v57  ;;  %v11680_v30 = vpop.xlane.xlu0 %1774  ;;  %v1457_v57 = vadd.f32 %v9753_v42, %v11659_v43  ;;  %v1461_v63 = vadd.f32 %v9757_v39, %v11659_v43 }
 0x195   :  { %v1122_v36 = vpop.f32.mrf.mxu1  ;;  %17741 = vst [vmem:[#allocation107_spill] sm:$0xff] %v11680_v30 }
 0x196   :  { %10321 = vtanh.f32 %v1457_v57  ;;  %v1710_v57 = vmul.f32 %v11686_v47, %v10310_v52  ;;  %v1459_v39 = vadd.f32 %v11659_v43, %v1122_v36 }
 0x197   :  { %v9758_v4 = vpop.f32.mrf.mxu1  ;;  %1906 = vadd.xlane.f32.xlu0 %v1706_v55  ;;  %10323 = vtanh.f32 %v1454_v2  ;;  %v10312_v55 = vpop.eup %10311 }
 0x198   :  { %1904 = vadd.xlane.f32.xlu1 %v1705_v14  ;;  %v11695_v42 = vpop.xlane.xlu0 %1770  ;;  %10325 = vtanh.f32 %v1455_v53  ;;  %v10314_v2 = vpop.eup %10313  ;;  %v1707_v23 = vmul.f32 %v11686_v47, %v10312_v55  ;;  %v1462_v0 = vadd.f32 %v9758_v4, %v11659_v43 }
 0x199   :  { %v11689_v25 = vpop.xlane.xlu1 %1766  ;;  %v11693_v28 = vpop.f32.mrf.mxu1  ;;  %10327 = vtanh.f32 %v1452_v5  ;;  %v1716_v53 = vmul.f32 %v11686_v47, %v10314_v2 }
 0x19a   :  { %v10316_v19 = vpop.eup %10315  ;;  %10329 = vtanh.f32 %v1461_v63 }
 0x19b   :  { %v9761_v14 = vpop.f32.mrf.mxu1  ;;  %1918 = vadd.xlane.f32.xlu0 %v1712_v27  ;;  %v10318_v5 = vpop.eup %10317  ;;  %10331 = vtanh.f32 %v1458_v8  ;;  %v1713_v55 = vmul.f32 %v11686_v47, %v10316_v19 }
 0x19c   :  { %1900 = vadd.xlane.f32.xlu1 %v1703_v22  ;;  %v11704_v50 = vpop.xlane.xlu0 %1782  ;;  %10333 = vtanh.f32 %v1459_v39  ;;  %v1465_v36 = vadd.f32 %v9761_v14, %v11659_v43  ;;  %v1714_v63 = vmul.f32 %v11686_v47, %v10318_v5 }
 0x19d   :  { %v11699_v40 = vpop.xlane.xlu1 %1768  ;;  %v1138_v24 = vpop.f32.mrf.mxu1  ;;  %17742 = vst [vmem:[#allocation108_spill] sm:$0xff] %v11704_v50  ;;  %10335 = vtanh.f32 %v1456_v33 }
 0x19e   :  { %10337 = vtanh.f32 %v1465_v36  ;;  %v1463_v5 = vadd.f32 %v11659_v43, %v1138_v24 }
 0x19f   :  { %v9762_v16 = vpop.f32.mrf.mxu1  ;;  %1914 = vadd.xlane.f32.xlu0 %v1710_v57  ;;  %v10320_v57 = vpop.eup %10319  ;;  %10339 = vtanh.f32 %v1462_v0 }
 0x1a0   :  { %1912 = vadd.xlane.f32.xlu1 %v1709_v49  ;;  %v11714_v29 = vpop.xlane.xlu0 %1778  ;;  %v1711_v19 = vmul.f32 %v11686_v47, %v10320_v57  ;;  %v1460_v57 = vadd.f32 %v11659_v43, %v11693_v28  ;;  %10341 = vtanh.f32 %v1463_v5 }
 0x1a1   :  { %v11708_v22 = vpop.xlane.xlu1 %1776  ;;  %v11712_v27 = vpop.f32.mrf.mxu1  ;;  %17743 = vst [vmem:[#allocation109_spill] sm:$0xff] %v11714_v29 }
 0x1a2   :  { %10343 = vtanh.f32 %v1460_v57 }
 0x1a3   :  { %v9765_v52 = vpop.f32.mrf.mxu1  ;;  %1926 = vadd.xlane.f32.xlu0 %v1716_v53  ;;  %v10322_v8 = vpop.eup %10321 }
 0x1a4   :  { %1908 = vadd.xlane.f32.xlu1 %v1707_v23  ;;  %v11723_v32 = vpop.xlane.xlu0 %1790  ;;  %v10324_v53 = vpop.eup %10323 }
 0x1a5   :  { %v11718_v49 = vpop.xlane.xlu1 %1772  ;;  %v1154_v17 = vpop.f32.mrf.mxu1  ;;  %17744 = vst [vmem:[#allocation110_spill] sm:$0xff] %v11723_v32  ;;  %v1328_v32 = vcombine.high %v11292_v61, %v11292_v61  ;;  %v1717_v61 = vmul.f32 %v11686_v47, %v10324_v53  ;;  %v1466_v53 = vadd.f32 %v9762_v16, %v11659_v43 }
 0x1a6   :  { %v10326_v4 = vpop.eup %10325 }
 0x1a7   :  { %v11727_v2 = vpop.f32.mrf.mxu1  ;;  %1922 = vadd.xlane.f32.xlu0 %v1714_v63  ;;  %v10328_v63 = vpop.eup %10327  ;;  %v11747_v20 = vrot.slane %v1328_v32, %v10836_v6 }
 0x1a8   :  { %1920 = vadd.xlane.f32.xlu1 %v1713_v55  ;;  %v11737_v14 = vpop.xlane.xlu0 %1786  ;;  %v1720_v55 = vmul.f32 %v11686_v47, %v10322_v8  ;;  %v1718_v8 = vmul.f32 %v11686_v47, %v10326_v4  ;;  %v10330_v28 = vpop.eup %10329  ;;  %v1715_v32 = vmul.f32 %v11686_v47, %v10328_v63 }
 0x1a9   :  { %v11729_v23 = vpop.xlane.xlu1 %1784  ;;  %v11735_v39 = vpop.f32.mrf.mxu1  ;;  %17745 = vst [vmem:[#allocation111_spill] sm:$0xff] %v11737_v14  ;;  %v1469_v24 = vadd.f32 %v9765_v52, %v11747_v20  ;;  %v1724_v57 = vmul.f32 %v11686_v47, %v10330_v28 }
 0x1aa   :  { %v10332_v5 = vpop.eup %10331 }
 0x1ab   :  { %v9769_v33 = vpop.f32.mrf.mxu1  ;;  %1934 = vadd.xlane.f32.xlu0 %v1720_v55  ;;  %v17244_v55 = vmov 0   ;;  %10345 = vtanh.f32 %v1469_v24  ;;  %v10334_v63 = vpop.eup %10333 }
 0x1ac   :  { %1916 = vadd.xlane.f32.xlu1 %v1711_v19  ;;  %v11749_v19 = vpop.xlane.xlu0 %1798  ;;  %9979 = vset.pattern.permute.xlu0 %v17244_v55  ;;  %10347 = vtanh.f32 %v1466_v53  ;;  %v10336_v11 = vpop.eup %10335  ;;  %v1722_v24 = vmul.f32 %v11686_v47, %v10334_v63 }
 0x1ad   :  { %v11741_v13 = vpop.xlane.xlu1 %1780  ;;  %v1170_v36 = vpop.f32.mrf.mxu1  ;;  %17746 = vst [vmem:[#allocation112_spill] sm:$0xff] %v11749_v19  ;;  %9980 = vset.pattern.permute.xlu1 %v17244_v55  ;;  %v1464_v55 = vadd.f32 %v11659_v43, %v11712_v27  ;;  %v1470_v43 = vadd.f32 %v11727_v2, %v11747_v20  ;;  %v1719_v27 = vmul.f32 %v11686_v47, %v10336_v11 }
 0x1ae   :  { %v10338_v53 = vpop.eup %10337  ;;  %v1468_v11 = vadd.f32 %v11747_v20, %v11735_v39 }
 0x1af   :  { %v11753_v0 = vpop.f32.mrf.mxu1  ;;  %1930 = vadd.xlane.f32.xlu0 %v1718_v8  ;;  %v1721_v8 = vmul.f32 %v11686_v47, %v10332_v5  ;;  %v10340_v5 = vpop.eup %10339 }
 0x1b0   :  { %1928 = vadd.xlane.f32.xlu1 %v1717_v61  ;;  %v11763_v4 = vpop.xlane.xlu0 %1794  ;;  %v1467_v61 = vadd.f32 %v11747_v20, %v1154_v17  ;;  %v1473_v17 = vadd.f32 %v9769_v33, %v11747_v20  ;;  %v1471_v33 = vadd.f32 %v11747_v20, %v1170_v36  ;;  %v1725_v2 = vmul.f32 %v11686_v47, %v10340_v5 }
 0x1b1   :  { %v11755_v14 = vpop.xlane.xlu1 %1792  ;;  %v11761_v52 = vpop.f32.mrf.mxu1  ;;  %17747 = vst [vmem:[#allocation113_spill] sm:$0xff] %v11763_v4  ;;  %v1474_v39 = vadd.f32 %v11753_v0, %v11747_v20 }
 0x1b2   :  { %10349 = vtanh.f32 %v1467_v61  ;;  %v1728_v61 = vmul.f32 %v11686_v47, %v10338_v53  ;;  %v1472_v0 = vadd.f32 %v11747_v20, %v11761_v52 }
 0x1b3   :  { %v9773_v16 = vpop.f32.mrf.mxu1  ;;  %1942 = vadd.xlane.f32.xlu0 %v1724_v57  ;;  %10351 = vtanh.f32 %v1464_v55  ;;  %v10342_v55 = vpop.eup %10341 }
 0x1b4   :  { %1924 = vadd.xlane.f32.xlu1 %v1715_v32  ;;  %v11772_v4 = vpop.xlane.xlu0 %1806  ;;  %10353 = vtanh.f32 %v1473_v17  ;;  %v1477_v36 = vadd.f32 %v9773_v16, %v11747_v20  ;;  %v1726_v17 = vmul.f32 %v11686_v47, %v10342_v55 }
 0x1b5   :  { %v11767_v19 = vpop.xlane.xlu1 %1788  ;;  %v1186_v50 = vpop.f32.mrf.mxu1  ;;  %17748 = vst [vmem:[#allocation114_spill] sm:$0xff] %v11772_v4  ;;  %10355 = vtanh.f32 %v1470_v43 }
 0x1b6   :  { %10357 = vtanh.f32 %v1471_v33  ;;  %v1475_v16 = vadd.f32 %v11747_v20, %v1186_v50 }
 0x1b7   :  { %v9774_v28 = vpop.f32.mrf.mxu1  ;;  %1938 = vadd.xlane.f32.xlu0 %v1722_v24  ;;  %v10344_v24 = vpop.eup %10343  ;;  %10359 = vtanh.f32 %v1468_v11 }
 0x1b8   :  { %1936 = vadd.xlane.f32.xlu1 %v1721_v8  ;;  %v11783_v8 = vpop.xlane.xlu0 %1802  ;;  %v10346_v43 = vpop.eup %10345  ;;  %v1723_v5 = vmul.f32 %v11686_v47, %v10344_v24  ;;  %10361 = vtanh.f32 %v1477_v36  ;;  %v1478_v52 = vadd.f32 %v9774_v28, %v11747_v20 }
 0x1b9   :  { %v11776_v32 = vpop.xlane.xlu1 %1800  ;;  %v11781_v57 = vpop.f32.mrf.mxu1  ;;  %17749 = vst [vmem:[#allocation115_spill] sm:$0xff] %v11783_v8  ;;  %v1732_v33 = vmul.f32 %v11686_v47, %v10346_v43  ;;  %10363 = vtanh.f32 %v1474_v39 }
 0x1ba   :  { %10365 = vtanh.f32 %v1475_v16 }
 0x1bb   :  { %v9777_v63 = vpop.f32.mrf.mxu1  ;;  %1950 = vadd.xlane.f32.xlu0 %v1728_v61  ;;  %v10348_v61 = vpop.eup %10347  ;;  %10367 = vtanh.f32 %v1472_v0 }
 0x1bc   :  { %1932 = vadd.xlane.f32.xlu1 %v1719_v27  ;;  %v11792_v8 = vpop.xlane.xlu0 %1814  ;;  %v1729_v24 = vmul.f32 %v11686_v47, %v10348_v61  ;;  %v1481_v50 = vadd.f32 %v9777_v63, %v11747_v20 }
 0x1bd   :  { %v11787_v4 = vpop.xlane.xlu1 %1796  ;;  %v1202_v10 = vpop.f32.mrf.mxu1  ;;  %17750 = vst [vmem:[#allocation116_spill] sm:$0xff] %v11792_v8 }
 0x1be   :  { %10369 = vtanh.f32 %v1481_v50  ;;  %v1479_v63 = vadd.f32 %v11747_v20, %v1202_v10 }
 0x1bf   :  { %v9778_v53 = vpop.f32.mrf.mxu1  ;;  %1946 = vadd.xlane.f32.xlu0 %v1726_v17  ;;  %v10350_v11 = vpop.eup %10349  ;;  %10371 = vtanh.f32 %v1478_v52 }
 0x1c0   :  { %1944 = vadd.xlane.f32.xlu1 %v1725_v2  ;;  %v11803_v2 = vpop.xlane.xlu0 %1810  ;;  %v10352_v17 = vpop.eup %10351  ;;  %v1730_v36 = vmul.f32 %v11686_v47, %v10350_v11  ;;  %10373 = vtanh.f32 %v1479_v63 }
 0x1c1   :  { %v11796_v27 = vpop.xlane.xlu1 %1808  ;;  %v11801_v7 = vpop.f32.mrf.mxu1  ;;  %17751 = vst [vmem:[#allocation117_spill] sm:$0xff] %v11803_v2  ;;  %v1727_v61 = vmul.f32 %v11686_v47, %v10352_v17  ;;  %v1476_v17 = vadd.f32 %v11747_v20, %v11781_v57 }
 0x1c2   :  { %v10354_v39 = vpop.eup %10353 }
 0x1c3   :  { %v9781_v55 = vpop.f32.mrf.mxu1  ;;  %1958 = vadd.xlane.f32.xlu0 %v1732_v33  ;;  %v10356_v60 = vpop.eup %10355  ;;  %v1330_v33 = vcombine.high %v11296_v35, %v11296_v35  ;;  %v1736_v11 = vmul.f32 %v11686_v47, %v10354_v39  ;;  %10375 = vtanh.f32 %v1476_v17 }
 0x1c4   :  { %1940 = vadd.xlane.f32.xlu1 %v1723_v5  ;;  %v11812_v2 = vpop.xlane.xlu0 %1822  ;;  %v10358_v28 = vpop.eup %10357  ;;  %v1733_v35 = vmul.f32 %v11686_v47, %v10356_v60  ;;  %v1482_v60 = vadd.f32 %v9778_v53, %v11747_v20  ;;  %v1480_v53 = vadd.f32 %v11747_v20, %v11801_v7 }
 0x1c5   :  { %v11807_v8 = vpop.xlane.xlu1 %1804  ;;  %v1218_v29 = vpop.f32.mrf.mxu1  ;;  %17752 = vst [vmem:[#allocation118_spill] sm:$0xff] %v11812_v2  ;;  %v11834_v1 = vrot.slane %v1330_v33, %v10836_v6  ;;  %v1734_v39 = vmul.f32 %v11686_v47, %v10358_v28 }
 0x1c7   :  { %v9782_v43 = vpop.f32.mrf.mxu1  ;;  %1954 = vadd.xlane.f32.xlu0 %v1730_v36  ;;  %v10360_v36 = vpop.eup %10359  ;;  %v1485_v10 = vadd.f32 %v9781_v55, %v11834_v1  ;;  %v1483_v55 = vadd.f32 %v11834_v1, %v1218_v29 }
 0x1c8   :  { %1952 = vadd.xlane.f32.xlu1 %v1729_v24  ;;  %v11824_v16 = vpop.xlane.xlu0 %1818  ;;  %v10362_v57 = vpop.eup %10361  ;;  %v1731_v33 = vmul.f32 %v11686_v47, %v10360_v36 }
 0x1c9   :  { %v11816_v5 = vpop.xlane.xlu1 %1816  ;;  %v11822_v24 = vpop.f32.mrf.mxu1  ;;  %17753 = vst [vmem:[#allocation119_spill] sm:$0xff] %v11824_v16  ;;  %10377 = vtanh.f32 %v1485_v10  ;;  %v1740_v63 = vmul.f32 %v11686_v47, %v10362_v57 }
 0x1ca   :  { %v10364_v6 = vpop.eup %10363  ;;  %10379 = vtanh.f32 %v1482_v60  ;;  %v1486_v60 = vadd.f32 %v9782_v43, %v11834_v1  ;;  %v1484_v43 = vadd.f32 %v11834_v1, %v11822_v24 }
 0x1cb   :  { %v9785_v0 = vpop.f32.mrf.mxu1  ;;  %1966 = vadd.xlane.f32.xlu0 %v1736_v11  ;;  %v1737_v36 = vmul.f32 %v11686_v47, %v10364_v6  ;;  %10381 = vtanh.f32 %v1483_v55 }
 0x1cc   :  { %1948 = vadd.xlane.f32.xlu1 %v1727_v61  ;;  %v11836_v61 = vpop.xlane.xlu0 %1830  ;;  %v1489_v29 = vadd.f32 %v9785_v0, %v11834_v1  ;;  %10383 = vtanh.f32 %v1480_v53 }
 0x1cd   :  { %v11828_v2 = vpop.xlane.xlu1 %1812  ;;  %v1234_v50 = vpop.f32.mrf.mxu1  ;;  %17754 = vst [vmem:[#allocation120_spill] sm:$0xff] %v11836_v61 }
 0x1ce   :  { %10385 = vtanh.f32 %v1489_v29  ;;  %v1487_v55 = vadd.f32 %v11834_v1, %v1234_v50 }
 0x1cf   :  { %v9786_v52 = vpop.f32.mrf.mxu1  ;;  %1962 = vadd.xlane.f32.xlu0 %v1734_v39  ;;  %10387 = vtanh.f32 %v1486_v60 }
 0x1d0   :  { %1960 = vadd.xlane.f32.xlu1 %v1733_v35  ;;  %v11844_v30 = vpop.xlane.xlu0 %1826  ;;  %v10366_v35 = vpop.eup %10365  ;;  %10389 = vtanh.f32 %v1487_v55  ;;  %v1490_v60 = vadd.f32 %v9786_v52, %v11834_v1 }
 0x1d1   :  { %v11840_v16 = vpop.xlane.xlu1 %1824  ;;  %v1237_v11 = vpop.f32.mrf.mxu1  ;;  %17755 = vst [vmem:[#allocation121_spill] sm:$0xff] %v11844_v30  ;;  %v1738_v10 = vmul.f32 %v11686_v47, %v10366_v35  ;;  %10391 = vtanh.f32 %v1484_v43 }
 0x1d2   :  { %v10368_v39 = vpop.eup %10367  ;;  %v1488_v43 = vadd.f32 %v11834_v1, %v1237_v11 }
 0x1d3   :  { %v9789_v17 = vpop.f32.mrf.mxu1  ;;  %1974 = vadd.xlane.f32.xlu0 %v1740_v63  ;;  %v1735_v20 = vmul.f32 %v11686_v47, %v10368_v39 }
 0x1d4   :  { %1956 = vadd.xlane.f32.xlu1 %v1731_v33  ;;  %v11853_v61 = vpop.xlane.xlu0 %1838  ;;  %v10370_v33 = vpop.eup %10369  ;;  %v1493_v50 = vadd.f32 %v9789_v17, %v11834_v1 }
 0x1d5   :  { %v11848_v28 = vpop.xlane.xlu1 %1820  ;;  %17756 = vst [vmem:[#allocation122_spill] sm:$0xff] %v11853_v61  ;;  %v1250_v7 = vpop.f32.mrf.mxu1  ;;  %v1744_v0 = vmul.f32 %v11686_v47, %v10370_v33 }
 0x1d6   :  { %v10372_v6 = vpop.eup %10371  ;;  %10393 = vtanh.f32 %v1493_v50  ;;  %v1491_v55 = vadd.f32 %v11834_v1, %v1250_v7 }
 0x1d7   :  { %1970 = vadd.xlane.f32.xlu0 %v1738_v10  ;;  %v9790_v53 = vpop.f32.mrf.mxu1  ;;  %v1741_v39 = vmul.f32 %v11686_v47, %v10372_v6  ;;  %10395 = vtanh.f32 %v1490_v60 }
 0x1d8   :  { %1968 = vadd.xlane.f32.xlu1 %v1737_v36  ;;  %v11861_v63 = vpop.xlane.xlu0 %1834  ;;  %v10374_v36 = vpop.eup %10373  ;;  %10397 = vtanh.f32 %v1491_v55  ;;  %v1494_v60 = vadd.f32 %v9790_v53, %v11834_v1 }
 0x1d9   :  { %v11857_v57 = vpop.xlane.xlu1 %1832  ;;  %17757 = vst [vmem:[#allocation123_spill] sm:$0xff] %v11861_v63  ;;  %v10376_v61 = vpop.eup %10375  ;;  %v1742_v29 = vmul.f32 %v11686_v47, %v10374_v36  ;;  %10399 = vtanh.f32 %v1488_v43 }
 0x1da   :  { %v1253_v24 = vpop.f32.mrf.mxu1  ;;  %v1739_v63 = vmul.f32 %v11686_v47, %v10376_v61 }
 0x1db   :  { %1982 = vadd.xlane.f32.xlu0 %v1744_v0  ;;  %v1492_v43 = vadd.f32 %v11834_v1, %v1253_v24 }
 0x1dc   :  { %1964 = vadd.xlane.f32.xlu1 %v1735_v20  ;;  %v11870_v10 = vpop.xlane.xlu0 %1846  ;;  %v10378_v20 = vpop.eup %10377 }
 0x1dd   :  { %v11865_v35 = vpop.xlane.xlu1 %1828  ;;  %17758 = vst [vmem:[#allocation124_spill] sm:$0xff] %v11870_v10  ;;  %v10380_v6 = vpop.eup %10379  ;;  %v1748_v17 = vmul.f32 %v11686_v47, %v10378_v20 }
 0x1de   :  { %v9793_v52 = vpop.f32.mrf.mxu1  ;;  %v1745_v10 = vmul.f32 %v11686_v47, %v10380_v6 }
 0x1df   :  { %1978 = vadd.xlane.f32.xlu0 %v1742_v29 }
 0x1e0   :  { %1976 = vadd.xlane.f32.xlu1 %v1741_v39  ;;  %v11878_v0 = vpop.xlane.xlu0 %1842  ;;  %v10382_v39 = vpop.eup %10381 }
 0x1e1   :  { %v11874_v33 = vpop.xlane.xlu1 %1840  ;;  %17759 = vst [vmem:[#allocation125_spill] sm:$0xff] %v11878_v0  ;;  %v10384_v61 = vpop.eup %10383  ;;  %v1746_v7 = vmul.f32 %v11686_v47, %v10382_v39 }
 0x1e2   :  { %v10386_v20 = vpop.eup %10385  ;;  %v1266_v11 = vpop.f32.mrf.mxu1  ;;  %v1743_v0 = vmul.f32 %v11686_v47, %v10384_v61 }
 0x1e3   :  { %1990 = vadd.xlane.f32.xlu0 %v1748_v17  ;;  %v10388_v6 = vpop.eup %10387  ;;  %v1752_v55 = vmul.f32 %v11686_v47, %v10386_v20 }
 0x1e4   :  { %1972 = vadd.xlane.f32.xlu1 %v1739_v63  ;;  %v11886_v29 = vpop.xlane.xlu0 %1854  ;;  %v1497_v63 = vadd.f32 %v9793_v52, %v11834_v1  ;;  %v10390_v52 = vpop.eup %10389  ;;  %v1749_v53 = vmul.f32 %v11686_v47, %v10388_v6 }
 0x1e5   :  { %v11882_v36 = vpop.xlane.xlu1 %1836  ;;  %17760 = vst [vmem:[#allocation126_spill] sm:$0xff] %v11886_v29  ;;  %v10392_v29 = vpop.eup %10391 }
 0x1e6   :  { %10401 = vtanh.f32 %v1497_v63  ;;  %v1747_v20 = vmul.f32 %v11686_v47, %v10392_v29 }
 0x1e7   :  { %1986 = vadd.xlane.f32.xlu0 %v1746_v7  ;;  %10403 = vtanh.f32 %v1494_v60  ;;  %v10394_v7 = vpop.eup %10393 }
 0x1e8   :  { %1984 = vadd.xlane.f32.xlu1 %v1745_v10  ;;  %v11894_v17 = vpop.xlane.xlu0 %1850  ;;  %v1495_v10 = vadd.f32 %v11834_v1, %v1266_v11  ;;  %v10396_v11 = vpop.eup %10395  ;;  %v1756_v24 = vmul.f32 %v11686_v47, %v10394_v7 }
 0x1e9   :  { %v11890_v50 = vpop.xlane.xlu1 %1848  ;;  %17761 = vst [vmem:[#allocation127_spill] sm:$0xff] %v11894_v17 }
 0x1ea   :  { %10405 = vtanh.f32 %v1495_v10  ;;  %v1753_v10 = vmul.f32 %v11686_v47, %v10396_v11 }
 0x1eb   :  { %1998 = vadd.xlane.f32.xlu0 %v1752_v55  ;;  %10407 = vtanh.f32 %v1492_v43  ;;  %v10398_v55 = vpop.eup %10397 }
 0x1ec   :  { %1980 = vadd.xlane.f32.xlu1 %v1743_v0  ;;  %v11902_v61 = vpop.xlane.xlu0 %1862  ;;  %v1750_v0 = vmul.f32 %v11686_v47, %v10390_v52  ;;  %v1754_v43 = vmul.f32 %v11686_v47, %v10398_v55 }
 0x1ed   :  { %v11898_v39 = vpop.xlane.xlu1 %1844  ;;  %17762 = vst [vmem:[#allocation128_spill] sm:$0xff] %v11902_v61 }
 0x1ef   :  { %1994 = vadd.xlane.f32.xlu0 %v1750_v0 }
 0x1f0   :  { %1992 = vadd.xlane.f32.xlu1 %v1749_v53  ;;  %v11908_v60 = vpop.xlane.xlu0 %1858  ;;  %v10400_v53 = vpop.eup %10399 }
 0x1f1   :  { %v11905_v63 = vpop.xlane.xlu1 %1856  ;;  %17763 = vst [vmem:[#allocation129_spill] sm:$0xff] %v11908_v60  ;;  %v1751_v61 = vmul.f32 %v11686_v47, %v10400_v53 }
 0x1f3   :  { %2006 = vadd.xlane.f32.xlu0 %v1756_v24  ;;  %v10402_v0 = vpop.eup %10401 }
 0x1f4   :  { %1988 = vadd.xlane.f32.xlu1 %v1747_v20  ;;  %v11914_v52 = vpop.xlane.xlu0 %1870  ;;  %v10404_v20 = vpop.eup %10403  ;;  %v1760_v60 = vmul.f32 %v11686_v47, %v10402_v0 }
 0x1f5   :  { %v11911_v6 = vpop.xlane.xlu1 %1852  ;;  %17764 = vst [vmem:[#allocation130_spill] sm:$0xff] %v11914_v52  ;;  %v1757_v52 = vmul.f32 %v11686_v47, %v10404_v20 }
 0x1f7   :  { %2002 = vadd.xlane.f32.xlu0 %v1754_v43  ;;  %v10406_v24 = vpop.eup %10405 }
 0x1f8   :  { %2000 = vadd.xlane.f32.xlu1 %v1753_v10  ;;  %v11920_v7 = vpop.xlane.xlu0 %1866  ;;  %v10408_v10 = vpop.eup %10407  ;;  %v1758_v17 = vmul.f32 %v11686_v47, %v10406_v24 }
 0x1f9   :  { %v11917_v29 = vpop.xlane.xlu1 %1864  ;;  %17765 = vst [vmem:[#allocation131_spill] sm:$0xff] %v11920_v7  ;;  %v1755_v43 = vmul.f32 %v11686_v47, %v10408_v10 }
 0x1fb   :  { %2014 = vadd.xlane.f32.xlu0 %v1760_v60 }
 0x1fc   :  { %1996 = vadd.xlane.f32.xlu1 %v1751_v61  ;;  %v11926_v55 = vpop.xlane.xlu0 %1878 }
 0x1fd   :  { %v11923_v11 = vpop.xlane.xlu1 %1860  ;;  %17766 = vst [vmem:[#allocation132_spill] sm:$0xff] %v11926_v55 }
 0x1ff   :  { %2010 = vadd.xlane.f32.xlu0 %v1758_v17 }
 0x200   :  { %2008 = vadd.xlane.f32.xlu1 %v1757_v52  ;;  %v11932_v61 = vpop.xlane.xlu0 %1874 }
 0x201   :  { %v11929_v53 = vpop.xlane.xlu1 %1872  ;;  %17767 = vst [vmem:[#allocation133_spill] sm:$0xff] %v11932_v61 }
 0x204   :  { %2004 = vadd.xlane.f32.xlu1 %v1755_v43  ;;  %v11936_v7 = vpop.xlane.xlu0 %1886 }
 0x205   :  { %v11934_v0 = vpop.xlane.xlu1 %1868  ;;  %17768 = vst [vmem:[#allocation134_spill] sm:$0xff] %v11936_v7 }
 0x208   :  { %v11940_v60 = vpop.xlane.xlu0 %1882 }
 0x209   :  { %v11938_v20 = vpop.xlane.xlu1 %1880  ;;  %17769 = vst [vmem:[#allocation135_spill] sm:$0xff] %v11940_v60 }
 0x20c   :  { %v11944_v52 = vpop.xlane.xlu0 %1894 }
 0x20d   :  { %v11942_v55 = vpop.xlane.xlu1 %1876  ;;  %17770 = vst [vmem:[#allocation136_spill] sm:$0xff] %v11944_v52  ;;  %v9794_v52 = vpop.f32.mrf.mxu1 }
 0x210   :  { %v11948_v30 = vpop.xlane.xlu0 %1890 }
 0x211   :  { %v11946_v24 = vpop.xlane.xlu1 %1888  ;;  %17772 = vst [vmem:[#allocation138_spill] sm:$0xff] %v11948_v30 }
 0x212   :  { %17771 = vst [vmem:[#allocation137_spill] sm:$0xff] %v11946_v24  ;;  %v1498_v24 = vadd.f32 %v9794_v52, %v11834_v1 }
 0x214   :  { %v11953_v10 = vpop.xlane.xlu0 %1902  ;;  %10409 = vtanh.f32 %v1498_v24 }
 0x215   :  { %v11950_v17 = vpop.xlane.xlu1 %1884  ;;  %2506 = vbcast.lane.b32.xlu1 %v11248_v45, 280  ;;  %17774 = vst [vmem:[#allocation140_spill] sm:$0xff] %v11953_v10  ;;  %2502 = vbcast.lane.b32.xlu0 %v11248_v45, 272  ;;  %v1269_v10 = vpop.f32.mrf.mxu1 }
 0x216   :  { %17773 = vst [vmem:[#allocation139_spill] sm:$0xff] %v11950_v17 }
 0x218   :  { %v11958_v7 = vpop.xlane.xlu0 %1898 }
 0x219   :  { %v11956_v43 = vpop.xlane.xlu1 %1896  ;;  %17776 = vst [vmem:[#allocation142_spill] sm:$0xff] %v11958_v7  ;;  %2510 = vbcast.lane.b32.xlu0 %v11248_v45, 288  ;;  %v1496_v7 = vadd.f32 %v11834_v1, %v1269_v10  ;;  %v11992_v1 = vadd.f32 %v11038_v56, %v11663_v46  ;;  %v12011_v46 = vadd.f32 %v11059_v3, %v11718_v49 }
 0x21a   :  { %17775 = vst [vmem:[#allocation141_spill] sm:$0xff] %v11956_v43  ;;  %v12028_v3 = vadd.f32 %v11073_v12, %v11741_v13 }
 0x21b   :  { %10411 = vtanh.f32 %v1496_v7  ;;  %17786 = vst [vmem:[#allocation152_spill] sm:$0xff] %v11992_v1  ;;  %17789 = vst [vmem:[#allocation155_spill] sm:$0xff] %v12011_v46 }
 0x21c   :  { %v11963_v61 = vpop.xlane.xlu0 %1910  ;;  %17791 = vst [vmem:[#allocation157_spill] sm:$0xff] %v12028_v3 }
 0x21d   :  { %v11961_v60 = vpop.xlane.xlu1 %1892  ;;  %17778 = vst [vmem:[#allocation144_spill] sm:$0xff] %v11963_v61  ;;  %2518 = vbcast.lane.b32.xlu0 %v11248_v45, 304 }
 0x21e   :  { %17777 = vst [vmem:[#allocation143_spill] sm:$0xff] %v11961_v60 }
 0x220   :  { %v11969_v17 = vpop.xlane.xlu0 %1906 }
 0x221   :  { %v11966_v30 = vpop.xlane.xlu1 %1904  ;;  %17780 = vst [vmem:[#allocation146_spill] sm:$0xff] %v11969_v17  ;;  %2526 = vbcast.lane.b32.xlu0 %v11248_v45, 320  ;;  %v10410_v10 = vpop.eup %10409 }
 0x222   :  { %17779 = vst [vmem:[#allocation145_spill] sm:$0xff] %v11966_v30 }
 0x224   :  { %v11975_v60 = vpop.xlane.xlu0 %1918 }
 0x225   :  { %v11972_v43 = vpop.xlane.xlu1 %1900  ;;  %17781 = vst [vmem:[#allocation147_spill] sm:$0xff] %v11975_v60  ;;  %2534 = vbcast.lane.b32.xlu0 %v11248_v45, 336 }
 0x228   :  { %v11980_v30 = vpop.xlane.xlu0 %1914 }
 0x229   :  { %v11978_v61 = vpop.xlane.xlu1 %1912  ;;  %17783 = vst [vmem:[#allocation149_spill] sm:$0xff] %v11980_v30  ;;  %2542 = vbcast.lane.b32.xlu0 %v11248_v45, 352  ;;  %v12001_v30 = vadd.f32 %v11052_v62, %v11699_v40  ;;  %v12019_v62 = vadd.f32 %v11066_v9, %v11708_v22  ;;  %v12037_v9 = vadd.f32 %v11080_v15, %v11729_v23 }
 0x22a   :  { %17782 = vst [vmem:[#allocation148_spill] sm:$0xff] %v11978_v61  ;;  %v10412_v61 = vpop.eup %10411  ;;  %v12054_v15 = vadd.f32 %v11094_v21, %v11755_v14  ;;  %v12072_v21 = vadd.f32 %v11113_v31, %v11776_v32  ;;  %v12092_v31 = vadd.f32 %v11127_v38, %v11796_v27  ;;  %v12114_v38 = vadd.f32 %v11141_v44, %v11816_v5 }
 0x22b   :  { %17788 = vst [vmem:[#allocation154_spill] sm:$0xff] %v12001_v30  ;;  %17790 = vst [vmem:[#allocation156_spill] sm:$0xff] %v12019_v62  ;;  %v12132_v44 = vadd.f32 %v11045_v59, %v11695_v42  ;;  %v17809_v59 = vld [vmem:[#allocation26_spill] sm:$0xff] }
 0x22c   :  { %v11985_v17 = vpop.xlane.xlu0 %1926  ;;  %17792 = vst [vmem:[#allocation158_spill] sm:$0xff] %v12037_v9  ;;  %17794 = vst [vmem:[#allocation160_spill] sm:$0xff] %v12054_v15  ;;  %v12154_v42 = vadd.f32 %v17809_v59, %v11865_v35 }
 0x22d   :  { %v11983_v52 = vpop.xlane.xlu1 %1908  ;;  %17785 = vst [vmem:[#allocation151_spill] sm:$0xff] %v11985_v17  ;;  %2550 = vbcast.lane.b32.xlu0 %v11248_v45, 368  ;;  %v1761_v17 = vmul.f32 %v11686_v47, %v10410_v10  ;;  %17796 = vst [vmem:[#allocation162_spill] sm:$0xff] %v12072_v21 }
 0x22e   :  { %17784 = vst [vmem:[#allocation150_spill] sm:$0xff] %v11983_v52  ;;  %17798 = vst [vmem:[#allocation164_spill] sm:$0xff] %v12092_v31 }
 0x22f   :  { %17801 = vst [vmem:[#allocation167_spill] sm:$0xff] %v12114_v38  ;;  %17804 = vst [vmem:[#allocation170_spill] sm:$0xff] %v12132_v44 }
 0x230   :  { %v11994_v60 = vpop.xlane.xlu0 %1922 }
 0x231   :  { %v11988_v24 = vpop.xlane.xlu1 %1920  ;;  %17787 = vst [vmem:[#allocation153_spill] sm:$0xff] %v11994_v60  ;;  %2941 = vperm.xlu0 %9979, %v11992_v1   ;;  %v1759_v1 = vmul.f32 %v11686_v47, %v10412_v61  ;;  %v12044_v61 = vadd.f32 %v11087_v18, %v11767_v19  ;;  %v12064_v18 = vadd.f32 %v11104_v26, %v11787_v4 }
 0x232   :  { %v12082_v26 = vadd.f32 %v11120_v34, %v11807_v8  ;;  %v12100_v34 = vadd.f32 %v11134_v41, %v11828_v2  ;;  %v12104_v8 = vadd.f32 %v11033_v54, %v11671_v37  ;;  %v12128_v37 = vadd.f32 %v11148_v48, %v11848_v28  ;;  %v17807_v2 = vld [vmem:[#allocation9_spill] sm:$0xff] }
 0x233   :  { %17793 = vst [vmem:[#allocation159_spill] sm:$0xff] %v12044_v61  ;;  %17795 = vst [vmem:[#allocation161_spill] sm:$0xff] %v12064_v18 }
 0x234   :  { %v12004_v52 = vpop.xlane.xlu0 %1934  ;;  %17797 = vst [vmem:[#allocation163_spill] sm:$0xff] %v12082_v26  ;;  %17799 = vst [vmem:[#allocation165_spill] sm:$0xff] %v12100_v34 }
 0x235   :  { %v11997_v7 = vpop.xlane.xlu1 %1916  ;;  %2950 = vperm.xlu0 %9979, %v12001_v30   ;;  %17800 = vst [vmem:[#allocation166_spill] sm:$0xff] %v12104_v8  ;;  %17803 = vst [vmem:[#allocation169_spill] sm:$0xff] %v12128_v37 }
 0x236   :  { %17810 = vst [vmem:[#allocation9_spill] sm:$0xff] %v12154_v42 }
 0x238   :  { %v12014_v60 = vpop.xlane.xlu0 %1930 }
 0x239   :  { %2016 = vadd.xlane.f32.xlu1 %v1761_v17  ;;  %v12007_v56 = vpop.xlane.xlu1 %1928  ;;  %2956 = vperm.xlu0 %9979, %v12011_v46  }
 0x23c   :  { %v12021_v40 = vpop.xlane.xlu0 %1942 }
 0x23d   :  { %2012 = vadd.xlane.f32.xlu1 %v1759_v1  ;;  %v12023_v17 = vpop.xlane.xlu1 %1924  ;;  %2962 = vperm.xlu0 %9979, %v12019_v62  }
 0x240   :  { %v12030_v47 = vpop.xlane.xlu0 %1938 }
 0x241   :  { %2968 = vperm.xlu0 %9979, %v12028_v3   ;;  %v12033_v49 = vpop.xlane.xlu1 %1936 }
 0x244   :  { %v12039_v22 = vpop.xlane.xlu0 %1950 }
 0x245   :  { %2974 = vperm.xlu0 %9979, %v12037_v9   ;;  %v12046_v12 = vpop.xlane.xlu1 %1932 }
 0x248   :  { %v12048_v13 = vpop.xlane.xlu0 %1946 }
 0x249   :  { %2980 = vperm.xlu0 %9979, %v12044_v61   ;;  %v12059_v1 = vpop.xlane.xlu1 %1944 }
 0x24c   :  { %v12056_v23 = vpop.xlane.xlu0 %1958 }
 0x24d   :  { %2986 = vperm.xlu0 %9979, %v12054_v15   ;;  %v12074_v14 = vpop.xlane.xlu1 %1940 }
 0x24e   :  { %2514 = vbcast.lane.b32.xlu1 %v11248_v45, 296 }
 0x250   :  { %v12066_v19 = vpop.xlane.xlu0 %1954 }
 0x251   :  { %2992 = vperm.xlu0 %9979, %v12064_v18   ;;  %v12087_v61 = vpop.xlane.xlu1 %1952  ;;  %v17880_v18 = vld [vmem:[#allocation24_spill] sm:$0xff] }
 0x252   :  { %2522 = vbcast.lane.b32.xlu1 %v11248_v45, 312 }
 0x254   :  { %v12076_v10 = vpop.xlane.xlu0 %1966 }
 0x255   :  { %2998 = vperm.xlu0 %9979, %v12072_v21   ;;  %v12106_v9 = vpop.xlane.xlu1 %1948  ;;  %v17864_v21 = vld [vmem:[#allocation21_spill] sm:$0xff] }
 0x256   :  { %2530 = vbcast.lane.b32.xlu1 %v11248_v45, 328 }
 0x258   :  { %v12084_v4 = vpop.xlane.xlu0 %1962 }
 0x259   :  { %3004 = vperm.xlu0 %9979, %v12082_v26   ;;  %v12123_v54 = vpop.xlane.xlu1 %1960  ;;  %v17849_v26 = vld [vmem:[#allocation18_spill] sm:$0xff] }
 0x25a   :  { %2538 = vbcast.lane.b32.xlu1 %v11248_v45, 344 }
 0x25c   :  { %v12094_v32 = vpop.xlane.xlu0 %1974 }
 0x25d   :  { %3010 = vperm.xlu0 %9979, %v12092_v31   ;;  %v12146_v48 = vpop.xlane.xlu1 %1956  ;;  %v17832_v31 = vld [vmem:[#allocation14_spill] sm:$0xff] }
 0x25e   :  { %2546 = vbcast.lane.b32.xlu1 %v11248_v45, 360 }
 0x260   :  { %v12108_v62 = vpop.xlane.xlu0 %1970 }
 0x261   :  { %3016 = vperm.xlu0 %9979, %v12100_v34   ;;  %v17817_v34 = vld [vmem:[#allocation11_spill] sm:$0xff] }
 0x262   :  { %2554 = vbcast.lane.b32.xlu1 %v11248_v45, 376  ;;  %v12118_v45 = vadd.f32 %v11043_v58, %v11689_v25  ;;  %v12140_v58 = vadd.f32 %v11155_v51, %v11840_v16  ;;  %v17806_v25 = vld [vmem:[#allocation107_spill] sm:$0xff] }
 0x263   :  { %v12144_v5 = vadd.f32 %v17807_v2, %v17806_v25  ;;  %v12163_v25 = vpop.xlane.xlu1 %1968  ;;  %v17814_v2 = vld [vmem:[#allocation28_spill] sm:$0xff] }
 0x264   :  { %17802 = vst [vmem:[#allocation168_spill] sm:$0xff] %v12118_v45  ;;  %v12120_v41 = vpop.xlane.xlu0 %1982  ;;  %17805 = vst [vmem:[#allocation171_spill] sm:$0xff] %v12140_v58 }
 0x265   :  { %3022 = vperm.xlu0 %9979, %v12114_v38   ;;  %17808 = vst [vmem:[#allocation107_spill] sm:$0xff] %v12144_v5  ;;  %v17812_v38 = vld [vmem:[#allocation10_spill] sm:$0xff] }
 0x266   :  { %2944 = vperm.xlu1 %9980, %v12104_v8   ;;  %v17886_v8 = vld [vmem:[#allocation27_spill] sm:$0xff] }
 0x268   :  { %v12134_v27 = vpop.xlane.xlu0 %1978 }
 0x269   :  { %3028 = vperm.xlu0 %9979, %v12128_v37   ;;  %v17811_v37 = vld [vmem:[#allocation109_spill] sm:$0xff] }
 0x26a   :  { %2947 = vperm.xlu1 %9980, %v12118_v45   ;;  %v12158_v51 = vadd.f32 %v17812_v38, %v17811_v37  ;;  %v17819_v38 = vld [vmem:[#allocation30_spill] sm:$0xff] }
 0x26b   :  { %v12180_v37 = vadd.f32 %v17819_v38, %v11882_v36 }
 0x26c   :  { %v12148_v28 = vpop.xlane.xlu0 %1990  ;;  %17813 = vst [vmem:[#allocation26_spill] sm:$0xff] %v12158_v51 }
 0x26d   :  { %3034 = vperm.xlu0 %9979, %v12140_v58   ;;  %v12168_v58 = vadd.f32 %v17814_v2, %v11857_v57  ;;  %17820 = vst [vmem:[#allocation28_spill] sm:$0xff] %v12180_v37  ;;  %v12186_v57 = vpop.xlane.xlu1 %1964 }
 0x26e   :  { %2953 = vperm.xlu1 %9980, %v12132_v44  }
 0x26f   :  { %17815 = vst [vmem:[#allocation109_spill] sm:$0xff] %v12168_v58 }
 0x270   :  { %v12160_v16 = vpop.xlane.xlu0 %1986 }
 0x271   :  { %3040 = vperm.xlu0 %9979, %v12154_v42   ;;  %v17821_v42 = vld [vmem:[#allocation111_spill] sm:$0xff] }
 0x272   :  { %2959 = vperm.xlu1 %9980, %v12144_v5   ;;  %v17816_v5 = vld [vmem:[#allocation108_spill] sm:$0xff] }
 0x273   :  { %v12172_v35 = vadd.f32 %v17817_v34, %v17816_v5  ;;  %v17824_v34 = vld [vmem:[#allocation32_spill] sm:$0xff] }
 0x274   :  { %v12174_v59 = vpop.xlane.xlu0 %1998  ;;  %v12194_v5 = vadd.f32 %v17824_v34, %v11874_v33 }
 0x275   :  { %17818 = vst [vmem:[#allocation10_spill] sm:$0xff] %v12172_v35  ;;  %3046 = vperm.xlu0 %9979, %v12168_v58   ;;  %v17826_v58 = vld [vmem:[#allocation110_spill] sm:$0xff] }
 0x276   :  { %2965 = vperm.xlu1 %9980, %v12158_v51   ;;  %v17822_v51 = vld [vmem:[#allocation12_spill] sm:$0xff]  ;;  %17825 = vst [vmem:[#allocation11_spill] sm:$0xff] %v12194_v5 }
 0x277   :  { %v12184_v46 = vadd.f32 %v17822_v51, %v17821_v42  ;;  %v12203_v42 = vpop.xlane.xlu1 %1976  ;;  %v17829_v51 = vld [vmem:[#allocation34_spill] sm:$0xff] }
 0x278   :  { %v12188_v2 = vpop.xlane.xlu0 %1994 }
 0x279   :  { %17823 = vst [vmem:[#allocation108_spill] sm:$0xff] %v12184_v46  ;;  %3052 = vperm.xlu0 %9979, %v12180_v37   ;;  %v12208_v37 = vadd.f32 %v17829_v51, %v11898_v39 }
 0x27a   :  { %2971 = vperm.xlu1 %9980, %v12172_v35   ;;  %v17827_v35 = vld [vmem:[#allocation13_spill] sm:$0xff] }
 0x27b   :  { %v12198_v36 = vadd.f32 %v17827_v35, %v17826_v58  ;;  %17830 = vst [vmem:[#allocation111_spill] sm:$0xff] %v12208_v37  ;;  %v17834_v58 = vld [vmem:[#allocation36_spill] sm:$0xff]  ;;  %v12226_v39 = vpop.xlane.xlu1 %1972 }
 0x27c   :  { %v12200_v38 = vpop.xlane.xlu0 %2006  ;;  %v12220_v35 = vadd.f32 %v17834_v58, %v11890_v50 }
 0x27d   :  { %17828 = vst [vmem:[#allocation30_spill] sm:$0xff] %v12198_v36  ;;  %3058 = vperm.xlu0 %9979, %v12194_v5   ;;  %v17836_v5 = vld [vmem:[#allocation112_spill] sm:$0xff] }
 0x27e   :  { %2977 = vperm.xlu1 %9980, %v12184_v46   ;;  %v17831_v46 = vld [vmem:[#allocation113_spill] sm:$0xff]  ;;  %17835 = vst [vmem:[#allocation32_spill] sm:$0xff] %v12220_v35 }
 0x27f   :  { %v12212_v33 = vadd.f32 %v17832_v31, %v17831_v46  ;;  %v17840_v46 = vld [vmem:[#allocation38_spill] sm:$0xff] }
 0x280   :  { %v12214_v34 = vpop.xlane.xlu0 %2002  ;;  %v12234_v31 = vadd.f32 %v17840_v46, %v11911_v6 }
 0x281   :  { %17833 = vst [vmem:[#allocation12_spill] sm:$0xff] %v12212_v33  ;;  %3064 = vperm.xlu0 %9979, %v12208_v37   ;;  %v17843_v37 = vld [vmem:[#allocation17_spill] sm:$0xff] }
 0x282   :  { %2983 = vperm.xlu1 %9980, %v12198_v36   ;;  %v17837_v36 = vld [vmem:[#allocation15_spill] sm:$0xff]  ;;  %17841 = vst [vmem:[#allocation34_spill] sm:$0xff] %v12234_v31 }
 0x283   :  { %v12224_v44 = vadd.f32 %v17837_v36, %v17836_v5  ;;  %v12243_v5 = vpop.xlane.xlu1 %1984  ;;  %v17846_v36 = vld [vmem:[#allocation40_spill] sm:$0xff] }
 0x284   :  { %v12228_v51 = vpop.xlane.xlu0 %2014 }
 0x285   :  { %17838 = vst [vmem:[#allocation110_spill] sm:$0xff] %v12224_v44  ;;  %17839 = vst [vmem:[#allocation13_spill] sm:$0xff] %v12228_v51  ;;  %3070 = vperm.xlu0 %9979, %v12220_v35   ;;  %v12248_v35 = vadd.f32 %v17846_v36, %v11905_v63 }
 0x286   :  { %2989 = vperm.xlu1 %9980, %v12212_v33   ;;  %v17842_v33 = vld [vmem:[#allocation115_spill] sm:$0xff] }
 0x287   :  { %v12238_v50 = vadd.f32 %v17843_v37, %v17842_v33  ;;  %17847 = vst [vmem:[#allocation36_spill] sm:$0xff] %v12248_v35  ;;  %v17851_v37 = vld [vmem:[#allocation43_spill] sm:$0xff]  ;;  %v12266_v63 = vpop.xlane.xlu1 %1980 }
 0x288   :  { %v12240_v58 = vpop.xlane.xlu0 %2010  ;;  %v12260_v33 = vadd.f32 %v17851_v37, %v11923_v11 }
 0x289   :  { %17844 = vst [vmem:[#allocation113_spill] sm:$0xff] %v12238_v50  ;;  %17845 = vst [vmem:[#allocation14_spill] sm:$0xff] %v12240_v58  ;;  %3076 = vperm.xlu0 %9979, %v12234_v31   ;;  %v17853_v31 = vld [vmem:[#allocation117_spill] sm:$0xff] }
 0x28a   :  { %2995 = vperm.xlu1 %9980, %v12224_v44   ;;  %v17848_v44 = vld [vmem:[#allocation114_spill] sm:$0xff]  ;;  %17852 = vst [vmem:[#allocation15_spill] sm:$0xff] %v12260_v33  ;;  %v17934_v58 = vld [vmem:[#allocation41_spill] sm:$0xff] }
 0x28b   :  { %v12252_v6 = vadd.f32 %v17849_v26, %v17848_v44  ;;  %v17856_v26 = vld [vmem:[#allocation45_spill] sm:$0xff] }
 0x28c   :  { %v12254_v46 = vpop.permute.xlu0 %2502  ;;  %v12274_v44 = vadd.f32 %v17856_v26, %v11917_v29 }
 0x28d   :  { %17850 = vst [vmem:[#allocation112_spill] sm:$0xff] %v12252_v6  ;;  %3082 = vperm.xlu0 %9979, %v12248_v35   ;;  %v17859_v35 = vld [vmem:[#allocation20_spill] sm:$0xff] }
 0x28e   :  { %3001 = vperm.xlu1 %9980, %v12238_v50   ;;  %v17854_v50 = vld [vmem:[#allocation19_spill] sm:$0xff]  ;;  %17857 = vst [vmem:[#allocation115_spill] sm:$0xff] %v12274_v44 }
 0x28f   :  { %v12264_v30 = vadd.f32 %v17854_v50, %v17853_v31  ;;  %v12283_v31 = vpop.xlane.xlu1 %1992  ;;  %v17861_v50 = vld [vmem:[#allocation47_spill] sm:$0xff] }
 0x290   :  { %v12268_v36 = vpop.permute.xlu0 %2510 }
 0x291   :  { %17855 = vst [vmem:[#allocation38_spill] sm:$0xff] %v12264_v30  ;;  %3088 = vperm.xlu0 %9979, %v12260_v33   ;;  %v12288_v33 = vadd.f32 %v17861_v50, %v11934_v0 }
 0x292   :  { %3007 = vperm.xlu1 %9980, %v12252_v6   ;;  %v17858_v6 = vld [vmem:[#allocation116_spill] sm:$0xff] }
 0x293   :  { %v12278_v11 = vadd.f32 %v17859_v35, %v17858_v6  ;;  %17862 = vst [vmem:[#allocation40_spill] sm:$0xff] %v12288_v33  ;;  %v17866_v35 = vld [vmem:[#allocation49_spill] sm:$0xff]  ;;  %v12306_v0 = vpop.xlane.xlu1 %1988 }
 0x294   :  { %v12280_v37 = vpop.permute.xlu0 %2518  ;;  %v12300_v6 = vadd.f32 %v17866_v35, %v11929_v53  ;;  %v17877_v35 = vld [vmem:[#allocation53_spill] sm:$0xff] }
 0x295   :  { %17860 = vst [vmem:[#allocation17_spill] sm:$0xff] %v12278_v11  ;;  %3094 = vperm.xlu0 %9979, %v12274_v44   ;;  %v17868_v44 = vld [vmem:[#allocation118_spill] sm:$0xff] }
 0x296   :  { %3013 = vperm.xlu1 %9980, %v12264_v30   ;;  %v17863_v30 = vld [vmem:[#allocation119_spill] sm:$0xff]  ;;  %17867 = vst [vmem:[#allocation18_spill] sm:$0xff] %v12300_v6 }
 0x297   :  { %v12292_v29 = vadd.f32 %v17864_v21, %v17863_v30  ;;  %v17871_v30 = vld [vmem:[#allocation51_spill] sm:$0xff] }
 0x298   :  { %v12294_v26 = vpop.permute.xlu0 %2526  ;;  %v12314_v21 = vadd.f32 %v17871_v30, %v11942_v55 }
 0x299   :  { %17865 = vst [vmem:[#allocation114_spill] sm:$0xff] %v12292_v29  ;;  %3100 = vperm.xlu0 %9979, %v12288_v33   ;;  %v17874_v33 = vld [vmem:[#allocation23_spill] sm:$0xff] }
 0x29a   :  { %3019 = vperm.xlu1 %9980, %v12278_v11   ;;  %v17869_v11 = vld [vmem:[#allocation22_spill] sm:$0xff]  ;;  %17872 = vst [vmem:[#allocation117_spill] sm:$0xff] %v12314_v21 }
 0x29b   :  { %v12304_v45 = vadd.f32 %v17869_v11, %v17868_v44  ;;  %v12321_v44 = vpop.xlane.xlu1 %2000 }
 0x29c   :  { %v12308_v50 = vpop.permute.xlu0 %2534 }
 0x29d   :  { %17870 = vst [vmem:[#allocation43_spill] sm:$0xff] %v12304_v45  ;;  %3106 = vperm.xlu0 %9979, %v12300_v6   ;;  %v12328_v6 = vadd.f32 %v17877_v35, %v11938_v20 }
 0x29e   :  { %3025 = vperm.xlu1 %9980, %v12292_v29   ;;  %v17873_v29 = vld [vmem:[#allocation121_spill] sm:$0xff] }
 0x29f   :  { %v12318_v53 = vadd.f32 %v17874_v33, %v17873_v29  ;;  %17878 = vst [vmem:[#allocation116_spill] sm:$0xff] %v12328_v6  ;;  %v17882_v33 = vld [vmem:[#allocation139_spill] sm:$0xff] }
 0x2a0   :  { %v12323_v11 = vpop.permute.xlu0 %2542  ;;  %v17883_v29 = vld [vmem:[#allocation55_spill] sm:$0xff] }
 0x2a1   :  { %17875 = vst [vmem:[#allocation19_spill] sm:$0xff] %v12318_v53  ;;  %3112 = vperm.xlu0 %9979, %v12314_v21   ;;  %17876 = vst [vmem:[#allocation45_spill] sm:$0xff] %v12323_v11  ;;  %v12338_v30 = vadd.f32 %v17883_v29, %v17882_v33  ;;  %v17885_v21 = vld [vmem:[#allocation123_spill] sm:$0xff] }
 0x2a2   :  { %3031 = vperm.xlu1 %9980, %v12304_v45   ;;  %v17879_v45 = vld [vmem:[#allocation120_spill] sm:$0xff]  ;;  %v12342_v15 = vadd.f32 %v17886_v8, %v17885_v21  ;;  %v17896_v21 = vld [vmem:[#allocation143_spill] sm:$0xff] }
 0x2a3   :  { %v12332_v55 = vadd.f32 %v17880_v18, %v17879_v45  ;;  %17884 = vst [vmem:[#allocation47_spill] sm:$0xff] %v12338_v30  ;;  %v17889_v18 = vld [vmem:[#allocation137_spill] sm:$0xff]  ;;  %v17927_v11 = vld [vmem:[#allocation39_spill] sm:$0xff] }
 0x2a4   :  { %17887 = vst [vmem:[#allocation119_spill] sm:$0xff] %v12342_v15  ;;  %v12346_v20 = vpop.permute.xlu0 %2550  ;;  %v17890_v45 = vld [vmem:[#allocation57_spill] sm:$0xff] }
 0x2a5   :  { %17881 = vst [vmem:[#allocation20_spill] sm:$0xff] %v12332_v55  ;;  %3118 = vperm.xlu0 %9979, %v12328_v6   ;;  %17888 = vst [vmem:[#allocation21_spill] sm:$0xff] %v12346_v20  ;;  %v12352_v35 = vadd.f32 %v17890_v45, %v17889_v18  ;;  %v17893_v6 = vld [vmem:[#allocation29_spill] sm:$0xff]  ;;  %v17900_v20 = vld [vmem:[#allocation31_spill] sm:$0xff] }
 0x2a6   :  { %3037 = vperm.xlu1 %9980, %v12318_v53   ;;  %v12344_v53 = vpop.xlane.xlu1 %1996 }
 0x2a7   :  { %17891 = vst [vmem:[#allocation49_spill] sm:$0xff] %v12352_v35 }
 0x2a9   :  { %3124 = vperm.xlu0 %9979, %v12338_v30   ;;  %v17897_v30 = vld [vmem:[#allocation59_spill] sm:$0xff] }
 0x2aa   :  { %3043 = vperm.xlu1 %9980, %v12332_v55   ;;  %v17892_v55 = vld [vmem:[#allocation122_spill] sm:$0xff]  ;;  %v12361_v8 = vpop.xlane.xlu1 %2008  ;;  %v12366_v3 = vadd.f32 %v17897_v30, %v17896_v21 }
 0x2ab   :  { %v12356_v33 = vadd.f32 %v17893_v6, %v17892_v55  ;;  %v17903_v6 = vld [vmem:[#allocation141_spill] sm:$0xff] }
 0x2ac   :  { %v12358_v29 = vpop.permute.xlu0 %2941  ;;  %17898 = vst [vmem:[#allocation51_spill] sm:$0xff] %v12366_v3  ;;  %v17904_v55 = vld [vmem:[#allocation61_spill] sm:$0xff] }
 0x2ad   :  { %17894 = vst [vmem:[#allocation118_spill] sm:$0xff] %v12356_v33  ;;  %17895 = vst [vmem:[#allocation22_spill] sm:$0xff] %v12358_v29  ;;  %3130 = vperm.xlu0 %9979, %v12352_v35   ;;  %v12378_v35 = vadd.f32 %v17904_v55, %v17903_v6  ;;  %v17906_v29 = vld [vmem:[#allocation124_spill] sm:$0xff] }
 0x2ae   :  { %3049 = vperm.xlu1 %9980, %v12342_v15   ;;  %v17899_v15 = vld [vmem:[#allocation125_spill] sm:$0xff]  ;;  %v12384_v30 = vpop.xlane.xlu1 %2004 }
 0x2af   :  { %v12370_v18 = vadd.f32 %v17900_v20, %v17899_v15  ;;  %17905 = vst [vmem:[#allocation53_spill] sm:$0xff] %v12378_v35  ;;  %v17910_v15 = vld [vmem:[#allocation63_spill] sm:$0xff] }
 0x2b0   :  { %v12372_v45 = vpop.permute.xlu0 %2950  ;;  %v12392_v20 = vadd.f32 %v17910_v15, %v11972_v43 }
 0x2b1   :  { %17901 = vst [vmem:[#allocation121_spill] sm:$0xff] %v12370_v18  ;;  %17902 = vst [vmem:[#allocation23_spill] sm:$0xff] %v12372_v45  ;;  %3136 = vperm.xlu0 %9979, %v12366_v3   ;;  %v17913_v3 = vld [vmem:[#allocation35_spill] sm:$0xff]  ;;  %v17920_v45 = vld [vmem:[#allocation37_spill] sm:$0xff] }
 0x2b2   :  { %3055 = vperm.xlu1 %9980, %v12356_v33   ;;  %v17907_v33 = vld [vmem:[#allocation33_spill] sm:$0xff]  ;;  %17911 = vst [vmem:[#allocation139_spill] sm:$0xff] %v12392_v20 }
 0x2b3   :  { %v12382_v51 = vadd.f32 %v17907_v33, %v17906_v29  ;;  %v12401_v33 = vpop.permute.xlu1 %2506  ;;  %v17916_v29 = vld [vmem:[#allocation145_spill] sm:$0xff] }
 0x2b4   :  { %v12386_v21 = vpop.permute.xlu0 %2956 }
 0x2b5   :  { %17908 = vst [vmem:[#allocation120_spill] sm:$0xff] %v12382_v51  ;;  %17909 = vst [vmem:[#allocation24_spill] sm:$0xff] %v12386_v21  ;;  %3142 = vperm.xlu0 %9979, %v12378_v35   ;;  %v17917_v35 = vld [vmem:[#allocation65_spill] sm:$0xff] }
 0x2b6   :  { %3061 = vperm.xlu1 %9980, %v12370_v18   ;;  %v17912_v18 = vld [vmem:[#allocation127_spill] sm:$0xff]  ;;  %v12406_v21 = vadd.f32 %v17917_v35, %v17916_v29 }
 0x2b7   :  { %v12396_v6 = vadd.f32 %v17913_v3, %v17912_v18  ;;  %v17923_v18 = vld [vmem:[#allocation150_spill] sm:$0xff] }
 0x2b8   :  { %v12398_v55 = vpop.permute.xlu0 %2962  ;;  %17918 = vst [vmem:[#allocation27_spill] sm:$0xff] %v12406_v21 }
 0x2b9   :  { %17914 = vst [vmem:[#allocation55_spill] sm:$0xff] %v12396_v6  ;;  %17915 = vst [vmem:[#allocation123_spill] sm:$0xff] %v12398_v55  ;;  %3148 = vperm.xlu0 %9979, %v12392_v20   ;;  %v17924_v20 = vld [vmem:[#allocation67_spill] sm:$0xff] }
 0x2ba   :  { %3067 = vperm.xlu1 %9980, %v12382_v51   ;;  %v17919_v51 = vld [vmem:[#allocation126_spill] sm:$0xff]  ;;  %v12420_v55 = vadd.f32 %v17924_v20, %v17923_v18 }
 0x2bb   :  { %v12410_v43 = vadd.f32 %v17920_v45, %v17919_v51  ;;  %v17930_v45 = vld [vmem:[#allocation148_spill] sm:$0xff] }
 0x2bc   :  { %v12412_v15 = vpop.permute.xlu0 %2968  ;;  %17925 = vst [vmem:[#allocation122_spill] sm:$0xff] %v12420_v55 }
 0x2bd   :  { %17921 = vst [vmem:[#allocation137_spill] sm:$0xff] %v12410_v43  ;;  %17922 = vst [vmem:[#allocation57_spill] sm:$0xff] %v12412_v15  ;;  %3154 = vperm.xlu0 %9979, %v12406_v21   ;;  %v17933_v15 = vld [vmem:[#allocation128_spill] sm:$0xff] }
 0x2be   :  { %3073 = vperm.xlu1 %9980, %v12396_v6   ;;  %v17926_v6 = vld [vmem:[#allocation129_spill] sm:$0xff]  ;;  %v12438_v20 = vadd.f32 %v17934_v58, %v17933_v15 }
 0x2bf   :  { %v12424_v35 = vadd.f32 %v17927_v11, %v17926_v6  ;;  %v17937_v6 = vld [vmem:[#allocation71_spill] sm:$0xff]  ;;  %v17943_v15 = vld [vmem:[#allocation73_spill] sm:$0xff] }
 0x2c0   :  { %v12426_v29 = vpop.permute.xlu0 %2974  ;;  %17935 = vst [vmem:[#allocation125_spill] sm:$0xff] %v12438_v20 }
 0x2c1   :  { %17928 = vst [vmem:[#allocation29_spill] sm:$0xff] %v12424_v35  ;;  %17929 = vst [vmem:[#allocation143_spill] sm:$0xff] %v12426_v29  ;;  %3160 = vperm.xlu0 %9979, %v12420_v55   ;;  %v17939_v55 = vld [vmem:[#allocation131_spill] sm:$0xff]  ;;  %v17940_v29 = vld [vmem:[#allocation44_spill] sm:$0xff] }
 0x2c2   :  { %3079 = vperm.xlu1 %9980, %v12410_v43   ;;  %v12416_v3 = vpop.xlane.xlu1 %2016  ;;  %v17931_v43 = vld [vmem:[#allocation69_spill] sm:$0xff] }
 0x2c3   :  { %v12434_v21 = vadd.f32 %v17931_v43, %v17930_v45  ;;  %v12452_v43 = vadd.f32 %v17940_v29, %v17939_v55  ;;  %v17949_v29 = vld [vmem:[#allocation75_spill] sm:$0xff] }
 0x2c4   :  { %v12440_v18 = vpop.permute.xlu0 %2980 }
 0x2c5   :  { %17932 = vst [vmem:[#allocation59_spill] sm:$0xff] %v12434_v21  ;;  %17936 = vst [vmem:[#allocation31_spill] sm:$0xff] %v12440_v18  ;;  %3166 = vperm.xlu0 %9979, %v12434_v21   ;;  %v17945_v21 = vld [vmem:[#allocation130_spill] sm:$0xff] }
 0x2c6   :  { %3085 = vperm.xlu1 %9980, %v12424_v35   ;;  %v12430_v51 = vpop.xlane.xlu1 %2012  ;;  %v12448_v35 = vadd.f32 %v17937_v6, %v11997_v7  ;;  %17941 = vst [vmem:[#allocation61_spill] sm:$0xff] %v12452_v43  ;;  %v17946_v18 = vld [vmem:[#allocation46_spill] sm:$0xff] }
 0x2c7   :  { %v12466_v7 = vadd.f32 %v17946_v18, %v17945_v21  ;;  %v17955_v18 = vld [vmem:[#allocation77_spill] sm:$0xff] }
 0x2c8   :  { %17938 = vst [vmem:[#allocation141_spill] sm:$0xff] %v12448_v35  ;;  %v12454_v45 = vpop.permute.xlu0 %2986 }
 0x2c9   :  { %17942 = vst [vmem:[#allocation124_spill] sm:$0xff] %v12454_v45  ;;  %3172 = vperm.xlu0 %9979, %v12448_v35   ;;  %17947 = vst [vmem:[#allocation63_spill] sm:$0xff] %v12466_v7  ;;  %v17951_v35 = vld [vmem:[#allocation133_spill] sm:$0xff]  ;;  %v17952_v45 = vld [vmem:[#allocation48_spill] sm:$0xff] }
 0x2ca   :  { %3091 = vperm.xlu1 %9980, %v12438_v20   ;;  %v12444_v11 = vpop.permute.xlu1 %2514  ;;  %v12462_v20 = vadd.f32 %v17943_v15, %v11988_v24  ;;  %v12480_v24 = vadd.f32 %v17952_v45, %v17951_v35  ;;  %v17961_v45 = vld [vmem:[#allocation79_spill] sm:$0xff] }
 0x2cc   :  { %17944 = vst [vmem:[#allocation33_spill] sm:$0xff] %v12462_v20  ;;  %v12468_v6 = vpop.permute.xlu0 %2992  ;;  %17953 = vst [vmem:[#allocation145_spill] sm:$0xff] %v12480_v24 }
 0x2cd   :  { %17948 = vst [vmem:[#allocation127_spill] sm:$0xff] %v12468_v6  ;;  %3178 = vperm.xlu0 %9979, %v12462_v20   ;;  %v17957_v20 = vld [vmem:[#allocation132_spill] sm:$0xff]  ;;  %v17958_v6 = vld [vmem:[#allocation50_spill] sm:$0xff] }
 0x2ce   :  { %3097 = vperm.xlu1 %9980, %v12452_v43   ;;  %v12458_v58 = vpop.permute.xlu1 %2522  ;;  %v12476_v43 = vadd.f32 %v17949_v29, %v12023_v17  ;;  %v12494_v17 = vadd.f32 %v17958_v6, %v17957_v20  ;;  %v17967_v6 = vld [vmem:[#allocation81_spill] sm:$0xff] }
 0x2d0   :  { %17950 = vst [vmem:[#allocation35_spill] sm:$0xff] %v12476_v43  ;;  %v12482_v15 = vpop.permute.xlu0 %2998  ;;  %17959 = vst [vmem:[#allocation37_spill] sm:$0xff] %v12494_v17 }
 0x2d1   :  { %17954 = vst [vmem:[#allocation65_spill] sm:$0xff] %v12482_v15  ;;  %3184 = vperm.xlu0 %9979, %v12476_v43   ;;  %v17963_v43 = vld [vmem:[#allocation135_spill] sm:$0xff]  ;;  %v17964_v15 = vld [vmem:[#allocation52_spill] sm:$0xff] }
 0x2d2   :  { %3103 = vperm.xlu1 %9980, %v12466_v7   ;;  %v12472_v55 = vpop.permute.xlu1 %2530  ;;  %v12490_v7 = vadd.f32 %v17955_v18, %v12007_v56  ;;  %v12508_v56 = vadd.f32 %v17964_v15, %v17963_v43  ;;  %v17973_v15 = vld [vmem:[#allocation83_spill] sm:$0xff] }
 0x2d4   :  { %17956 = vst [vmem:[#allocation126_spill] sm:$0xff] %v12490_v7  ;;  %v12496_v29 = vpop.permute.xlu0 %3004  ;;  %17965 = vst [vmem:[#allocation129_spill] sm:$0xff] %v12508_v56 }
 0x2d5   :  { %17960 = vst [vmem:[#allocation150_spill] sm:$0xff] %v12496_v29  ;;  %3190 = vperm.xlu0 %9979, %v12490_v7   ;;  %v17969_v7 = vld [vmem:[#allocation134_spill] sm:$0xff] }
 0x2d6   :  { %3109 = vperm.xlu1 %9980, %v12480_v24   ;;  %v12486_v21 = vpop.permute.xlu1 %2538  ;;  %v12504_v24 = vadd.f32 %v17961_v45, %v12046_v12  ;;  %v17970_v29 = vld [vmem:[#allocation54_spill] sm:$0xff] }
 0x2d7   :  { %v12522_v12 = vadd.f32 %v17970_v29, %v17969_v7  ;;  %v17979_v29 = vld [vmem:[#allocation85_spill] sm:$0xff] }
 0x2d8   :  { %17962 = vst [vmem:[#allocation67_spill] sm:$0xff] %v12504_v24  ;;  %v12510_v18 = vpop.permute.xlu0 %3010 }
 0x2d9   :  { %17966 = vst [vmem:[#allocation39_spill] sm:$0xff] %v12510_v18  ;;  %3196 = vperm.xlu0 %9979, %v12504_v24   ;;  %17971 = vst [vmem:[#allocation69_spill] sm:$0xff] %v12522_v12  ;;  %v17975_v24 = vld [vmem:[#allocation138_spill] sm:$0xff]  ;;  %v17976_v18 = vld [vmem:[#allocation56_spill] sm:$0xff] }
 0x2da   :  { %3115 = vperm.xlu1 %9980, %v12494_v17   ;;  %v12500_v35 = vpop.permute.xlu1 %2546  ;;  %v12518_v17 = vadd.f32 %v17967_v6, %v12033_v49  ;;  %v12536_v49 = vadd.f32 %v17976_v18, %v17975_v24  ;;  %v17985_v18 = vld [vmem:[#allocation87_spill] sm:$0xff] }
 0x2dc   :  { %17968 = vst [vmem:[#allocation148_spill] sm:$0xff] %v12518_v17  ;;  %v12524_v45 = vpop.permute.xlu0 %3016  ;;  %17977 = vst [vmem:[#allocation71_spill] sm:$0xff] %v12536_v49 }
 0x2dd   :  { %17972 = vst [vmem:[#allocation128_spill] sm:$0xff] %v12524_v45  ;;  %3202 = vperm.xlu0 %9979, %v12518_v17   ;;  %v17981_v17 = vld [vmem:[#allocation136_spill] sm:$0xff]  ;;  %v17982_v45 = vld [vmem:[#allocation58_spill] sm:$0xff] }
 0x2de   :  { %3121 = vperm.xlu1 %9980, %v12508_v56   ;;  %v12514_v20 = vpop.permute.xlu1 %2554  ;;  %v12532_v56 = vadd.f32 %v17973_v15, %v12074_v14  ;;  %v12550_v14 = vadd.f32 %v17982_v45, %v17981_v17  ;;  %v17991_v45 = vld [vmem:[#allocation89_spill] sm:$0xff] }
 0x2e0   :  { %17974 = vst [vmem:[#allocation41_spill] sm:$0xff] %v12532_v56  ;;  %v12538_v6 = vpop.permute.xlu0 %3022  ;;  %17983 = vst [vmem:[#allocation73_spill] sm:$0xff] %v12550_v14 }
 0x2e1   :  { %17978 = vst [vmem:[#allocation131_spill] sm:$0xff] %v12538_v6  ;;  %3208 = vperm.xlu0 %9979, %v12532_v56   ;;  %v17987_v56 = vld [vmem:[#allocation142_spill] sm:$0xff]  ;;  %v17988_v6 = vld [vmem:[#allocation60_spill] sm:$0xff] }
 0x2e2   :  { %3127 = vperm.xlu1 %9980, %v12522_v12   ;;  %v12528_v43 = vpop.permute.xlu1 %2944  ;;  %v12546_v12 = vadd.f32 %v17979_v29, %v12059_v1  ;;  %v12564_v1 = vadd.f32 %v17988_v6, %v17987_v56  ;;  %v17997_v6 = vld [vmem:[#allocation91_spill] sm:$0xff] }
 0x2e4   :  { %17980 = vst [vmem:[#allocation44_spill] sm:$0xff] %v12546_v12  ;;  %v12552_v15 = vpop.permute.xlu0 %3028  ;;  %17989 = vst [vmem:[#allocation75_spill] sm:$0xff] %v12564_v1 }
 0x2e5   :  { %17984 = vst [vmem:[#allocation130_spill] sm:$0xff] %v12552_v15  ;;  %3214 = vperm.xlu0 %9979, %v12546_v12   ;;  %v17993_v12 = vld [vmem:[#allocation140_spill] sm:$0xff]  ;;  %v17994_v15 = vld [vmem:[#allocation62_spill] sm:$0xff] }
 0x2e6   :  { %3133 = vperm.xlu1 %9980, %v12536_v49   ;;  %v12542_v7 = vpop.permute.xlu1 %2947  ;;  %v12560_v49 = vadd.f32 %v17985_v18, %v12106_v9  ;;  %v12578_v9 = vadd.f32 %v17994_v15, %v17993_v12  ;;  %v18003_v15 = vld [vmem:[#allocation93_spill] sm:$0xff] }
 0x2e8   :  { %17986 = vst [vmem:[#allocation46_spill] sm:$0xff] %v12560_v49  ;;  %v12566_v29 = vpop.permute.xlu0 %3034  ;;  %17995 = vst [vmem:[#allocation77_spill] sm:$0xff] %v12578_v9 }
 0x2e9   :  { %17990 = vst [vmem:[#allocation133_spill] sm:$0xff] %v12566_v29  ;;  %3220 = vperm.xlu0 %9979, %v12560_v49   ;;  %v17999_v49 = vld [vmem:[#allocation146_spill] sm:$0xff]  ;;  %v18000_v29 = vld [vmem:[#allocation64_spill] sm:$0xff] }
 0x2ea   :  { %3139 = vperm.xlu1 %9980, %v12550_v14   ;;  %v12556_v24 = vpop.permute.xlu1 %2953  ;;  %v12574_v14 = vadd.f32 %v17991_v45, %v12087_v61  ;;  %v12592_v61 = vadd.f32 %v18000_v29, %v17999_v49  ;;  %v18009_v29 = vld [vmem:[#allocation95_spill] sm:$0xff] }
 0x2ec   :  { %17992 = vst [vmem:[#allocation48_spill] sm:$0xff] %v12574_v14  ;;  %v12580_v18 = vpop.permute.xlu0 %3040  ;;  %18001 = vst [vmem:[#allocation79_spill] sm:$0xff] %v12592_v61 }
 0x2ed   :  { %3226 = vperm.xlu0 %9979, %v12574_v14   ;;  %v18005_v14 = vld [vmem:[#allocation144_spill] sm:$0xff] }
 0x2ee   :  { %3145 = vperm.xlu1 %9980, %v12564_v1   ;;  %v12570_v17 = vpop.permute.xlu1 %2959  ;;  %v12588_v1 = vadd.f32 %v17997_v6, %v12146_v48 }
 0x2f0   :  { %17998 = vst [vmem:[#allocation50_spill] sm:$0xff] %v12588_v1  ;;  %v12594_v45 = vpop.permute.xlu0 %3046 }
 0x2f1   :  { %3232 = vperm.xlu0 %9979, %v12588_v1   ;;  %v18011_v1 = vld [vmem:[#allocation149_spill] sm:$0xff] }
 0x2f2   :  { %3151 = vperm.xlu1 %9980, %v12578_v9   ;;  %v12584_v56 = vpop.permute.xlu1 %2965  ;;  %v12602_v9 = vadd.f32 %v18003_v15, %v12123_v54 }
 0x2f3   :  { %17996 = vst [vmem:[#allocation132_spill] sm:$0xff] %v12584_v56  ;;  %v18006_v56 = vld [vmem:[#allocation66_spill] sm:$0xff] }
 0x2f4   :  { %18004 = vst [vmem:[#allocation52_spill] sm:$0xff] %v12602_v9  ;;  %v12606_v48 = vadd.f32 %v18006_v56, %v18005_v14  ;;  %v12608_v6 = vpop.permute.xlu0 %3052  ;;  %v18015_v56 = vld [vmem:[#allocation97_spill] sm:$0xff] }
 0x2f5   :  { %3238 = vperm.xlu0 %9979, %v12602_v9   ;;  %v18017_v9 = vld [vmem:[#allocation147_spill] sm:$0xff] }
 0x2f6   :  { %3157 = vperm.xlu1 %9980, %v12592_v61   ;;  %v12598_v12 = vpop.permute.xlu1 %2971  ;;  %18007 = vst [vmem:[#allocation81_spill] sm:$0xff] %v12606_v48  ;;  %v12616_v61 = vadd.f32 %v18009_v29, %v12186_v57 }
 0x2f7   :  { %18002 = vst [vmem:[#allocation135_spill] sm:$0xff] %v12598_v12  ;;  %v18012_v12 = vld [vmem:[#allocation68_spill] sm:$0xff] }
 0x2f8   :  { %18010 = vst [vmem:[#allocation54_spill] sm:$0xff] %v12616_v61  ;;  %v12620_v54 = vadd.f32 %v18012_v12, %v18011_v1  ;;  %v12622_v15 = vpop.permute.xlu0 %3058  ;;  %v18021_v12 = vld [vmem:[#allocation99_spill] sm:$0xff] }
 0x2f9   :  { %3244 = vperm.xlu0 %9979, %v12616_v61   ;;  %v18023_v61 = vld [vmem:[#allocation153_spill] sm:$0xff] }
 0x2fa   :  { %3163 = vperm.xlu1 %9980, %v12606_v48   ;;  %v12612_v49 = vpop.permute.xlu1 %2977  ;;  %18013 = vst [vmem:[#allocation83_spill] sm:$0xff] %v12620_v54  ;;  %v12630_v48 = vadd.f32 %v18015_v56, %v12163_v25 }
 0x2fb   :  { %18008 = vst [vmem:[#allocation134_spill] sm:$0xff] %v12612_v49  ;;  %v18018_v49 = vld [vmem:[#allocation70_spill] sm:$0xff] }
 0x2fc   :  { %18016 = vst [vmem:[#allocation56_spill] sm:$0xff] %v12630_v48  ;;  %v12634_v57 = vadd.f32 %v18018_v49, %v18017_v9  ;;  %v12636_v29 = vpop.permute.xlu0 %3064  ;;  %v18026_v49 = vld [vmem:[#allocation101_spill] sm:$0xff] }
 0x2fd   :  { %18020 = vst [vmem:[#allocation136_spill] sm:$0xff] %v12636_v29  ;;  %3250 = vperm.xlu0 %9979, %v12630_v48   ;;  %v18028_v48 = vld [vmem:[#allocation151_spill] sm:$0xff]  ;;  %v18029_v29 = vld [vmem:[#allocation74_spill] sm:$0xff] }
 0x2fe   :  { %3169 = vperm.xlu1 %9980, %v12620_v54   ;;  %v12626_v14 = vpop.permute.xlu1 %2983  ;;  %18019 = vst [vmem:[#allocation85_spill] sm:$0xff] %v12634_v57  ;;  %v12644_v54 = vadd.f32 %v18021_v12, %v12226_v39  ;;  %v12662_v39 = vadd.f32 %v18029_v29, %v18028_v48  ;;  %v18035_v29 = vld [vmem:[#allocation105_spill] sm:$0xff] }
 0x2ff   :  { %18014 = vst [vmem:[#allocation138_spill] sm:$0xff] %v12626_v14  ;;  %v18024_v14 = vld [vmem:[#allocation72_spill] sm:$0xff] }
 0x300   :  { %18022 = vst [vmem:[#allocation58_spill] sm:$0xff] %v12644_v54  ;;  %v12648_v25 = vadd.f32 %v18024_v14, %v18023_v61  ;;  %v12650_v56 = vpop.permute.xlu0 %3070  ;;  %18030 = vst [vmem:[#allocation60_spill] sm:$0xff] %v12662_v39  ;;  %v18031_v14 = vld [vmem:[#allocation103_spill] sm:$0xff] }
 0x301   :  { %3256 = vperm.xlu0 %9979, %v12644_v54   ;;  %v18033_v54 = vld [vmem:[#allocation76_spill] sm:$0xff] }
 0x302   :  { %3175 = vperm.xlu1 %9980, %v12634_v57   ;;  %v12640_v1 = vpop.permute.xlu1 %2989  ;;  %18025 = vst [vmem:[#allocation87_spill] sm:$0xff] %v12648_v25  ;;  %v12658_v57 = vadd.f32 %v18026_v49, %v12203_v42  ;;  %v12676_v42 = vadd.f32 %v18033_v54, %v12014_v60  ;;  %v18039_v54 = vld [vmem:[#allocation106_spill] sm:$0xff] }
 0x304   :  { %18027 = vst [vmem:[#allocation142_spill] sm:$0xff] %v12658_v57  ;;  %v12664_v12 = vpop.permute.xlu0 %3076  ;;  %18034 = vst [vmem:[#allocation140_spill] sm:$0xff] %v12676_v42 }
 0x305   :  { %3262 = vperm.xlu0 %9979, %v12658_v57   ;;  %v18037_v57 = vld [vmem:[#allocation78_spill] sm:$0xff] }
 0x306   :  { %3181 = vperm.xlu1 %9980, %v12648_v25   ;;  %v12654_v9 = vpop.permute.xlu1 %2995  ;;  %v12672_v25 = vadd.f32 %v18031_v14, %v12266_v63  ;;  %v12690_v63 = vadd.f32 %v18037_v57, %v12004_v52  ;;  %v12714_v57 = vadd.f32 %v12401_v33, %v12283_v31 }
 0x308   :  { %18032 = vst [vmem:[#allocation89_spill] sm:$0xff] %v12672_v25  ;;  %v12678_v49 = vpop.permute.xlu0 %3082  ;;  %18038 = vst [vmem:[#allocation91_spill] sm:$0xff] %v12690_v63 }
 0x309   :  { %3268 = vperm.xlu0 %9979, %v12672_v25   ;;  %v18041_v25 = vld [vmem:[#allocation80_spill] sm:$0xff]  ;;  %18043 = vst [vmem:[#allocation93_spill] sm:$0xff] %v12714_v57 }
 0x30a   :  { %3187 = vperm.xlu1 %9980, %v12662_v39   ;;  %v12668_v61 = vpop.permute.xlu1 %3001  ;;  %v12686_v39 = vadd.f32 %v18035_v29, %v12243_v5  ;;  %v12704_v5 = vadd.f32 %v18041_v25, %v12030_v47  ;;  %v12728_v25 = vadd.f32 %v12444_v11, %v12344_v53 }
 0x30c   :  { %18036 = vst [vmem:[#allocation62_spill] sm:$0xff] %v12686_v39  ;;  %v12692_v14 = vpop.permute.xlu0 %3088  ;;  %18042 = vst [vmem:[#allocation64_spill] sm:$0xff] %v12704_v5 }
 0x30d   :  { %3274 = vperm.xlu0 %9979, %v12686_v39   ;;  %18046 = vst [vmem:[#allocation66_spill] sm:$0xff] %v12728_v25 }
 0x30e   :  { %3193 = vperm.xlu1 %9980, %v12676_v42   ;;  %v12682_v48 = vpop.permute.xlu1 %3007  ;;  %v12700_v42 = vadd.f32 %v18039_v54, %v12306_v0 }
 0x310   :  { %18040 = vst [vmem:[#allocation146_spill] sm:$0xff] %v12700_v42  ;;  %v12706_v29 = vpop.permute.xlu0 %3094 }
 0x311   :  { %3280 = vperm.xlu0 %9979, %v12700_v42  }
 0x312   :  { %3199 = vperm.xlu1 %9980, %v12690_v63   ;;  %v12696_v60 = vpop.permute.xlu1 %3013  ;;  %v18044_v63 = vld [vmem:[#allocation82_spill] sm:$0xff] }
 0x313   :  { %v12718_v0 = vadd.f32 %v18044_v63, %v12021_v40  ;;  %v12742_v63 = vadd.f32 %v12458_v58, %v12321_v44 }
 0x314   :  { %v12720_v54 = vpop.permute.xlu0 %3100 }
 0x315   :  { %18045 = vst [vmem:[#allocation144_spill] sm:$0xff] %v12718_v0  ;;  %3286 = vperm.xlu0 %9979, %v12714_v57   ;;  %18049 = vst [vmem:[#allocation149_spill] sm:$0xff] %v12742_v63  ;;  %v18098_v57 = vld [vmem:[#allocation21_spill] sm:$0xff] }
 0x316   :  { %3205 = vperm.xlu1 %9980, %v12704_v5   ;;  %v12710_v52 = vpop.permute.xlu1 %3019  ;;  %v18047_v5 = vld [vmem:[#allocation84_spill] sm:$0xff] }
 0x317   :  { %v12732_v31 = vadd.f32 %v18047_v5, %v12048_v13  ;;  %v12756_v5 = vadd.f32 %v12472_v55, %v12384_v30 }
 0x318   :  { %v12734_v33 = vpop.permute.xlu0 %3106 }
 0x319   :  { %18048 = vst [vmem:[#allocation95_spill] sm:$0xff] %v12732_v31  ;;  %3292 = vperm.xlu0 %9979, %v12728_v25   ;;  %18052 = vst [vmem:[#allocation97_spill] sm:$0xff] %v12756_v5 }
 0x31a   :  { %3211 = vperm.xlu1 %9980, %v12718_v0   ;;  %v12724_v47 = vpop.permute.xlu1 %3025  ;;  %v18050_v0 = vld [vmem:[#allocation86_spill] sm:$0xff] }
 0x31b   :  { %v12746_v53 = vadd.f32 %v18050_v0, %v12039_v22  ;;  %v12770_v0 = vadd.f32 %v12486_v21, %v12361_v8 }
 0x31c   :  { %v12748_v11 = vpop.permute.xlu0 %3112 }
 0x31d   :  { %18051 = vst [vmem:[#allocation68_spill] sm:$0xff] %v12746_v53  ;;  %3298 = vperm.xlu0 %9979, %v12742_v63   ;;  %18055 = vst [vmem:[#allocation70_spill] sm:$0xff] %v12770_v0 }
 0x31e   :  { %3217 = vperm.xlu1 %9980, %v12732_v31   ;;  %v12738_v40 = vpop.permute.xlu1 %3031  ;;  %v18053_v31 = vld [vmem:[#allocation88_spill] sm:$0xff] }
 0x31f   :  { %v12760_v44 = vadd.f32 %v18053_v31, %v12066_v19  ;;  %v12784_v31 = vadd.f32 %v12500_v35, %v12430_v51 }
 0x320   :  { %v12762_v58 = vpop.permute.xlu0 %3118 }
 0x321   :  { %18054 = vst [vmem:[#allocation147_spill] sm:$0xff] %v12760_v44  ;;  %3304 = vperm.xlu0 %9979, %v12756_v5   ;;  %18058 = vst [vmem:[#allocation153_spill] sm:$0xff] %v12784_v31  ;;  %v18077_v5 = vld [vmem:[#allocation104_spill] sm:$0xff] }
 0x322   :  { %3223 = vperm.xlu1 %9980, %v12746_v53   ;;  %v12752_v13 = vpop.permute.xlu1 %3037  ;;  %v18056_v53 = vld [vmem:[#allocation90_spill] sm:$0xff] }
 0x323   :  { %v12774_v30 = vadd.f32 %v18056_v53, %v12056_v23  ;;  %v12798_v53 = vadd.f32 %v12514_v20, %v12416_v3 }
 0x324   :  { %v12776_v55 = vpop.permute.xlu0 %3124 }
 0x325   :  { %18057 = vst [vmem:[#allocation99_spill] sm:$0xff] %v12774_v30  ;;  %3310 = vperm.xlu0 %9979, %v12770_v0   ;;  %18061 = vst [vmem:[#allocation101_spill] sm:$0xff] %v12798_v53  ;;  %v18074_v0 = vld [vmem:[#allocation102_spill] sm:$0xff] }
 0x326   :  { %3229 = vperm.xlu1 %9980, %v12760_v44   ;;  %v12766_v22 = vpop.permute.xlu1 %3043  ;;  %v18059_v44 = vld [vmem:[#allocation92_spill] sm:$0xff] }
 0x327   :  { %v12788_v8 = vadd.f32 %v18059_v44, %v12084_v4  ;;  %v18065_v44 = vld [vmem:[#allocation96_spill] sm:$0xff] }
 0x328   :  { %v12790_v21 = vpop.permute.xlu0 %3130 }
 0x329   :  { %18060 = vst [vmem:[#allocation72_spill] sm:$0xff] %v12788_v8  ;;  %3316 = vperm.xlu0 %9979, %v12784_v31  }
 0x32a   :  { %3235 = vperm.xlu1 %9980, %v12774_v30   ;;  %v12780_v19 = vpop.permute.xlu1 %3049  ;;  %v18062_v30 = vld [vmem:[#allocation94_spill] sm:$0xff] }
 0x32b   :  { %v12802_v51 = vadd.f32 %v18062_v30, %v12076_v10  ;;  %v18068_v10 = vld [vmem:[#allocation98_spill] sm:$0xff] }
 0x32c   :  { %v12804_v35 = vpop.permute.xlu0 %3136  ;;  %v12821_v20 = vadd.f32 %v18068_v10, %v12094_v32  ;;  %v12839_v32 = vadd.f32 %v18074_v0, %v12120_v41  ;;  %v12857_v41 = vadd.f32 %v12254_v46, %v12148_v28  ;;  %v12875_v28 = vadd.f32 %v12280_v37, %v12174_v59 }
 0x32d   :  { %18063 = vst [vmem:[#allocation151_spill] sm:$0xff] %v12802_v51  ;;  %18064 = vst [vmem:[#allocation74_spill] sm:$0xff] %v12804_v35  ;;  %3322 = vperm.xlu0 %9979, %v12798_v53   ;;  %v18071_v53 = vld [vmem:[#allocation100_spill] sm:$0xff] }
 0x32e   :  { %3241 = vperm.xlu1 %9980, %v12788_v8   ;;  %v12794_v23 = vpop.permute.xlu1 %3055  ;;  %v12812_v8 = vadd.f32 %v18065_v44, %v12108_v62  ;;  %18069 = vst [vmem:[#allocation105_spill] sm:$0xff] %v12821_v20  ;;  %v12830_v62 = vadd.f32 %v18071_v53, %v12134_v27  ;;  %18075 = vst [vmem:[#allocation82_spill] sm:$0xff] %v12839_v32  ;;  %v12848_v27 = vadd.f32 %v18077_v5, %v12160_v16 }
 0x32f   :  { %18080 = vst [vmem:[#allocation90_spill] sm:$0xff] %v12857_v41  ;;  %v12866_v16 = vadd.f32 %v12268_v36, %v12188_v2  ;;  %18084 = vst [vmem:[#allocation98_spill] sm:$0xff] %v12875_v28  ;;  %v12884_v2 = vadd.f32 %v12294_v26, %v12214_v34 }
 0x330   :  { %18066 = vst [vmem:[#allocation103_spill] sm:$0xff] %v12812_v8  ;;  %v12814_v31 = vpop.permute.xlu0 %3142  ;;  %18072 = vst [vmem:[#allocation106_spill] sm:$0xff] %v12830_v62 }
 0x331   :  { %18067 = vst [vmem:[#allocation76_spill] sm:$0xff] %v12814_v31  ;;  %18078 = vst [vmem:[#allocation86_spill] sm:$0xff] %v12848_v27 }
 0x332   :  { %3247 = vperm.xlu1 %9980, %v12802_v51   ;;  %v12808_v4 = vpop.permute.xlu1 %3061  ;;  %18082 = vst [vmem:[#allocation94_spill] sm:$0xff] %v12866_v16  ;;  %18087 = vst [vmem:[#allocation104_spill] sm:$0xff] %v12884_v2 }
 0x334   :  { %v12823_v30 = vpop.permute.xlu0 %3148 }
 0x335   :  { %18070 = vst [vmem:[#allocation78_spill] sm:$0xff] %v12823_v30 }
 0x336   :  { %3253 = vperm.xlu1 %9980, %v12812_v8   ;;  %v12817_v3 = vpop.permute.xlu1 %3067 }
 0x338   :  { %v12832_v44 = vpop.permute.xlu0 %3154 }
 0x339   :  { %18073 = vst [vmem:[#allocation80_spill] sm:$0xff] %v12832_v44 }
 0x33a   :  { %3259 = vperm.xlu1 %9980, %v12821_v20   ;;  %v12826_v51 = vpop.permute.xlu1 %3073 }
 0x33c   :  { %v12841_v10 = vpop.permute.xlu0 %3160 }
 0x33d   :  { %18076 = vst [vmem:[#allocation84_spill] sm:$0xff] %v12841_v10 }
 0x33e   :  { %3265 = vperm.xlu1 %9980, %v12830_v62   ;;  %v12835_v8 = vpop.permute.xlu1 %3079 }
 0x340   :  { %v12850_v53 = vpop.permute.xlu0 %3166 }
 0x341   :  { %18079 = vst [vmem:[#allocation88_spill] sm:$0xff] %v12850_v53 }
 0x342   :  { %3271 = vperm.xlu1 %9980, %v12839_v32   ;;  %v12844_v20 = vpop.permute.xlu1 %3085 }
 0x344   :  { %v12859_v0 = vpop.permute.xlu0 %3172 }
 0x345   :  { %18081 = vst [vmem:[#allocation92_spill] sm:$0xff] %v12859_v0  ;;  %v18122_v0 = vld [vmem:[#allocation2_spill] sm:$0xff] }
 0x346   :  { %v12852_v63 = vpop.permute.xlu1 %3091  ;;  %3277 = vperm.xlu1 %9980, %v12848_v27  }
 0x348   :  { %v12868_v5 = vpop.permute.xlu0 %3178 }
 0x349   :  { %18083 = vst [vmem:[#allocation96_spill] sm:$0xff] %v12868_v5 }
 0x34a   :  { %v12861_v62 = vpop.permute.xlu1 %3097  ;;  %3283 = vperm.xlu1 %9980, %v12857_v41   ;;  %v18093_v41 = vld [vmem:[#allocation45_spill] sm:$0xff] }
 0x34c   :  { %v12880_v27 = vpop.permute.xlu0 %3184 }
 0x34d   :  { %18086 = vst [vmem:[#allocation102_spill] sm:$0xff] %v12880_v27 }
 0x34e   :  { %v12870_v32 = vpop.permute.xlu1 %3103  ;;  %3289 = vperm.xlu1 %9980, %v12866_v16   ;;  %v12891_v16 = vadd.f32 %v12308_v50, %v12200_v38 }
 0x350   :  { %18089 = vst [vmem:[#allocation173_spill] sm:$0xff] %v12891_v16  ;;  %v12893_v59 = vpop.permute.xlu0 %3190 }
 0x351   :  { %18090 = vst [vmem:[#allocation174_spill] sm:$0xff] %v12893_v59 }
 0x352   :  { %v12877_v46 = vpop.permute.xlu1 %3109  ;;  %3295 = vperm.xlu1 %9980, %v12875_v28   ;;  %v18092_v28 = vld [vmem:[#allocation14_spill] sm:$0xff] }
 0x353   :  { %18085 = vst [vmem:[#allocation100_spill] sm:$0xff] %v12877_v46  ;;  %v12900_v25 = vadd.f32 %v18093_v41, %v18092_v28 }
 0x354   :  { %v12905_v26 = vpop.permute.xlu0 %3196 }
 0x355   :  { %18094 = vst [vmem:[#allocation14_spill] sm:$0xff] %v12900_v25  ;;  %18096 = vst [vmem:[#allocation176_spill] sm:$0xff] %v12905_v26 }
 0x356   :  { %v12886_v36 = vpop.permute.xlu1 %3115  ;;  %3301 = vperm.xlu1 %9980, %v12884_v2   ;;  %v18097_v2 = vld [vmem:[#allocation13_spill] sm:$0xff] }
 0x357   :  { %18088 = vst [vmem:[#allocation172_spill] sm:$0xff] %v12886_v36  ;;  %v12909_v38 = vadd.f32 %v18098_v57, %v18097_v2 }
 0x358   :  { %v12914_v42 = vpop.permute.xlu0 %3202 }
 0x359   :  { %18099 = vst [vmem:[#allocation13_spill] sm:$0xff] %v12909_v38  ;;  %18101 = vst [vmem:[#allocation177_spill] sm:$0xff] %v12914_v42 }
 0x35a   :  { %v12895_v37 = vpop.permute.xlu1 %3121  ;;  %3307 = vperm.xlu1 %9980, %v12891_v16  }
 0x35b   :  { %18091 = vst [vmem:[#allocation175_spill] sm:$0xff] %v12895_v37 }
 0x35c   :  { %v12920_v28 = vpop.permute.xlu0 %3208 }
 0x35d   :  { %18104 = vst [vmem:[#allocation180_spill] sm:$0xff] %v12920_v28 }
 0x35e   :  { %v12902_v34 = vpop.permute.xlu1 %3127  ;;  %3313 = vperm.xlu1 %9980, %v12900_v25  }
 0x35f   :  { %18095 = vst [vmem:[#allocation45_spill] sm:$0xff] %v12902_v34 }
 0x360   :  { %v12924_v25 = vpop.permute.xlu0 %3214 }
 0x361   :  { %18106 = vst [vmem:[#allocation182_spill] sm:$0xff] %v12924_v25 }
 0x362   :  { %v12911_v50 = vpop.permute.xlu1 %3133  ;;  %3319 = vperm.xlu1 %9980, %v12909_v38  }
 0x363   :  { %18100 = vst [vmem:[#allocation21_spill] sm:$0xff] %v12911_v50  ;;  %v18135_v50 = vld [vmem:[#allocation127_spill] sm:$0xff] }
 0x364   :  { %v12930_v2 = vpop.permute.xlu0 %3220 }
 0x365   :  { %18109 = vst [vmem:[#allocation185_spill] sm:$0xff] %v12930_v2 }
 0x366   :  { %v12916_v16 = vpop.permute.xlu1 %3139 }
 0x367   :  { %18102 = vst [vmem:[#allocation178_spill] sm:$0xff] %v12916_v16 }
 0x368   :  { %v12934_v38 = vpop.permute.xlu0 %3226 }
 0x369   :  { %18111 = vst [vmem:[#allocation187_spill] sm:$0xff] %v12934_v38 }
 0x36a   :  { %v12918_v41 = vpop.permute.xlu1 %3145 }
 0x36b   :  { %18103 = vst [vmem:[#allocation179_spill] sm:$0xff] %v12918_v41 }
 0x36c   :  { %v12940_v26 = vpop.permute.xlu0 %3232 }
 0x36d   :  { %18114 = vst [vmem:[#allocation190_spill] sm:$0xff] %v12940_v26 }
 0x36e   :  { %v12922_v39 = vpop.permute.xlu1 %3151 }
 0x36f   :  { %18105 = vst [vmem:[#allocation181_spill] sm:$0xff] %v12922_v39 }
 0x370   :  { %v12944_v39 = vpop.permute.xlu0 %3238 }
 0x371   :  { %18116 = vst [vmem:[#allocation192_spill] sm:$0xff] %v12944_v39 }
 0x372   :  { %v12926_v5 = vpop.permute.xlu1 %3157 }
 0x373   :  { %18107 = vst [vmem:[#allocation183_spill] sm:$0xff] %v12926_v5 }
 0x376   :  { %v12928_v57 = vpop.permute.xlu1 %3163 }
 0x377   :  { %18108 = vst [vmem:[#allocation184_spill] sm:$0xff] %v12928_v57  ;;  %v18119_v57 = vlaneseq }
 0x379   :  { %v12951_v2 = vand.u32 127, %v18119_v57 }
 0x37a   :  { %v12932_v34 = vpop.permute.xlu1 %3169 }
 0x37b   :  { %18110 = vst [vmem:[#allocation186_spill] sm:$0xff] %v12932_v34  ;;  %v12953_v34 = vpop.permute.xlu0 %3244  ;;  %v3337_v38 = vadd.s32 4294967280, %v12951_v2  ;;  %v3344_v41 = vadd.s32 4294967272, %v12951_v2  ;;  %v3351_v39 = vadd.s32 4294967264, %v12951_v2  ;;  %v12968_v57 = vsub.s32 %v12951_v2, %v18122_v0 }
 0x37c   :  { %18120 = vst [vmem:[#allocation195_spill] sm:$0xff] %v12953_v34  ;;  %v3372_v36 = vadd.s32 4294967240, %v12951_v2  ;;  %v3386_v10 = vadd.s32 4294967224, %v12951_v2  ;;  %v3414_v44 = vadd.s32 4294967192, %v12951_v2 }
 0x37d   :  { %v12961_v26 = vsub.s32 %v3337_v38, %v18122_v0  ;;  %18125 = vst [vmem:[#allocation198_spill] sm:$0xff] %v12968_v57  ;;  %v12978_v38 = vsub.s32 %v3344_v41, %v18122_v0  ;;  %v12985_v53 = vsub.s32 %v3351_v39, %v18122_v0  ;;  %v3438_v41 = vrot.slane %v12640_v1, %v12968_v57 }
 0x37e   :  { %v12936_v42 = vpop.permute.xlu1 %3175  ;;  %v3400_v39 = vadd.s32 4294967208, %v12951_v2  ;;  %v13020_v31 = vsub.s32 %v3386_v10, %v18122_v0  ;;  %v18142_v10 = vld [vmem:[#allocation65_spill] sm:$0xff] }
 0x37f   :  { %18112 = vst [vmem:[#allocation188_spill] sm:$0xff] %v12936_v42  ;;  %v3330_v42 = vadd.s32 4294967288, %v12951_v2  ;;  %18123 = vst [vmem:[#allocation2_spill] sm:$0xff] %v12961_v26  ;;  %v3447_v16 = vrot.slane %v12654_v9, %v12961_v26  ;;  %v3379_v9 = vadd.s32 4294967232, %v12951_v2 }
 0x380   :  { %18128 = vst [vmem:[#allocation201_spill] sm:$0xff] %v12978_v38  ;;  %18129 = vst [vmem:[#allocation202_spill] sm:$0xff] %v12985_v53 }
 0x381   :  { %v12971_v34 = vsub.s32 %v3330_v42, %v18122_v0  ;;  %v3365_v42 = vadd.s32 4294967248, %v12951_v2 }
 0x382   :  { %v12938_v37 = vpop.permute.xlu1 %3181 }
 0x383   :  { %18113 = vst [vmem:[#allocation189_spill] sm:$0xff] %v12938_v37  ;;  %18126 = vst [vmem:[#allocation199_spill] sm:$0xff] %v12971_v34  ;;  %v3334_v27 = vrot.slane %v12528_v43, %v12971_v34  ;;  %v3442_v1 = vrot.slane %v18135_v50, %v12971_v34  ;;  %v13014_v46 = vsub.s32 %v3365_v42, %v18122_v0 }
 0x384   :  { %v13033_v42 = vsub.s32 %v3414_v44, %v18122_v0  ;;  %v18145_v44 = vld [vmem:[#allocation24_spill] sm:$0xff] }
 0x385   :  { %18136 = vst [vmem:[#allocation127_spill] sm:$0xff] %v13014_v46 }
 0x386   :  { %v12942_v28 = vpop.permute.xlu1 %3187  ;;  %18141 = vst [vmem:[#allocation208_spill] sm:$0xff] %v13033_v42 }
 0x387   :  { %18115 = vst [vmem:[#allocation191_spill] sm:$0xff] %v12942_v28 }
 0x38a   :  { %v12946_v25 = vpop.permute.xlu1 %3193 }
 0x38b   :  { %18117 = vst [vmem:[#allocation193_spill] sm:$0xff] %v12946_v25  ;;  %v12964_v25 = vpop.permute.xlu0 %3250 }
 0x38c   :  { %18124 = vst [vmem:[#allocation197_spill] sm:$0xff] %v12964_v25  ;;  %v3341_v25 = vrot.slane %v12542_v7, %v12961_v26  ;;  %v12999_v7 = vsub.s32 %v3372_v36, %v18122_v0  ;;  %v3355_v36 = vrot.slane %v12556_v24, %v12985_v53  ;;  %v3428_v24 = vadd.s32 4294967176, %v12951_v2 }
 0x38e   :  { %v12948_v5 = vpop.permute.xlu1 %3199  ;;  %18133 = vst [vmem:[#allocation204_spill] sm:$0xff] %v12999_v7 }
 0x38f   :  { %18118 = vst [vmem:[#allocation194_spill] sm:$0xff] %v12948_v5 }
 0x392   :  { %v12957_v59 = vpop.permute.xlu1 %3205 }
 0x393   :  { %18121 = vst [vmem:[#allocation196_spill] sm:$0xff] %v12957_v59  ;;  %v3358_v59 = vadd.s32 4294967256, %v12951_v2 }
 0x395   :  { %v12996_v43 = vsub.s32 %v3358_v59, %v18122_v0 }
 0x396   :  { %v12973_v5 = vpop.permute.xlu1 %3211 }
 0x397   :  { %18127 = vst [vmem:[#allocation200_spill] sm:$0xff] %v12973_v5  ;;  %v18130_v5 = vld [vmem:[#allocation22_spill] sm:$0xff]  ;;  %18132 = vst [vmem:[#allocation203_spill] sm:$0xff] %v12996_v43 }
 0x398   :  { %v3329_v28 = vrot.slane %v18130_v5, %v12968_v57  ;;  %v13004_v5 = vpop.permute.xlu0 %3256 }
 0x399   :  { %18134 = vst [vmem:[#allocation205_spill] sm:$0xff] %v13004_v5  ;;  %v18137_v5 = vld [vmem:[#allocation23_spill] sm:$0xff] }
 0x39a   :  { %v12993_v37 = vpop.permute.xlu1 %3217  ;;  %v3348_v30 = vrot.slane %v18137_v5, %v12978_v38  ;;  %18138 = vst [vmem:[#allocation23_spill] sm:$0xff] %v13020_v31  ;;  %v3452_v5 = vrot.slane %v18142_v10, %v12978_v38 }
 0x39b   :  { %18131 = vst [vmem:[#allocation22_spill] sm:$0xff] %v12993_v37  ;;  %v3336_v37 = vsel %vm17634_vm1, %v3334_v27, %v3329_v28  ;;  %v3443_v27 = vsel %vm17634_vm1, %v3442_v1, %v3438_v41  ;;  %v3457_v28 = vrot.slane %v12668_v61, %v12985_v53 }
 0x39c   :  { %v3343_v59 = vsel %vm3342_vm2, %v3341_v25, %v3336_v37  ;;  %v13026_v25 = vsub.s32 %v3400_v39, %v18122_v0  ;;  %v3448_v37 = vsel %vm3342_vm2, %v3447_v16, %v3443_v27  ;;  %v3369_v39 = vrot.slane %v12570_v17, %v13014_v46  ;;  %v13045_v61 = vpop.permute.xlu0 %3262 }
 0x39d   :  { %v3350_v41 = vsel %vm3349_vm3, %v3348_v30, %v3343_v59  ;;  %v3393_v16 = vadd.s32 4294967216, %v12951_v2  ;;  %18144 = vst [vmem:[#allocation209_spill] sm:$0xff] %v13045_v61  ;;  %v3362_v27 = vrot.slane %v18145_v44, %v12996_v43  ;;  %v3453_v10 = vsel %vm3349_vm3, %v3452_v5, %v3448_v37  ;;  %v18148_v44 = vld [vmem:[#allocation150_spill] sm:$0xff]  ;;  %v18149_v5 = vld [vmem:[#allocation132_spill] sm:$0xff] }
 0x39e   :  { %v13023_v50 = vpop.permute.xlu1 %3223  ;;  %18140 = vst [vmem:[#allocation207_spill] sm:$0xff] %v13026_v25  ;;  %v3357_v1 = vsel %vm17383_vm4, %v3355_v36, %v3350_v41  ;;  %v3517_v30 = vrot.slane %v12752_v13, %v12968_v57  ;;  %v13055_v17 = vsub.s32 %v3428_v24, %v18122_v0  ;;  %v3458_v36 = vsel %vm17383_vm4, %v3457_v28, %v3453_v10 }
 0x39f   :  { %18139 = vst [vmem:[#allocation206_spill] sm:$0xff] %v13023_v50  ;;  %v13042_v50 = vsub.s32 %v3379_v9, %v18122_v0  ;;  %v3467_v9 = vrot.slane %v12682_v48, %v13014_v46  ;;  %v3526_v41 = vrot.slane %v12766_v22, %v12961_v26  ;;  %v3462_v61 = vrot.slane %v18148_v44, %v12996_v43  ;;  %v18151_v22 = vld [vmem:[#allocation123_spill] sm:$0xff] }
 0x3a0   :  { %18147 = vst [vmem:[#allocation210_spill] sm:$0xff] %v13055_v17  ;;  %v3521_v37 = vrot.slane %v12580_v18, %v12971_v34  ;;  %v3364_v13 = vsel %vm17381_vm5, %v3362_v27, %v3357_v1  ;;  %v13071_v10 = vsub.s32 %v3393_v16, %v18122_v0  ;;  %v3407_v48 = vadd.s32 4294967200, %v12951_v2 }
 0x3a1   :  { %18143 = vst [vmem:[#allocation65_spill] sm:$0xff] %v13042_v50  ;;  %v3371_v24 = vsel %vm17382_vm6, %v3369_v39, %v3364_v13  ;;  %v3383_v28 = vrot.slane %v18149_v5, %v13042_v50  ;;  %v3463_v44 = vsel %vm17381_vm5, %v3462_v61, %v3458_v36  ;;  %v3477_v27 = vrot.slane %v12696_v60, %v13042_v50  ;;  %v13086_v5 = vpop.permute.xlu0 %3268  ;;  %v18153_v60 = vld [vmem:[#allocation135_spill] sm:$0xff] }
 0x3a2   :  { %v13052_v59 = vpop.permute.xlu1 %3229  ;;  %18150 = vst [vmem:[#allocation150_spill] sm:$0xff] %v13071_v10  ;;  %v3522_v18 = vsel %vm17634_vm1, %v3521_v37, %v3517_v30  ;;  %v3468_v39 = vsel %vm17382_vm6, %v3467_v9, %v3463_v44  ;;  %v3536_v13 = vrot.slane %v12780_v19, %v12985_v53  ;;  %v3531_v61 = vrot.slane %v12594_v45, %v12978_v38  ;;  %v18155_v37 = vld [vmem:[#allocation57_spill] sm:$0xff] }
 0x3a3   :  { %18146 = vst [vmem:[#allocation24_spill] sm:$0xff] %v13052_v59  ;;  %v3376_v59 = vrot.slane %v18151_v22, %v12999_v7  ;;  %v3527_v16 = vsel %vm3342_vm2, %v3526_v41, %v3522_v18  ;;  %v18152_v22 = vld [vmem:[#allocation39_spill] sm:$0xff]  ;;  %v3397_v9 = vrot.slane %v18153_v60, %v13071_v10  ;;  %v13097_v41 = vsub.s32 %v3407_v48, %v18122_v0 }
 0x3a4   :  { %v3472_v35 = vrot.slane %v18152_v22, %v12999_v7  ;;  %v3421_v19 = vadd.s32 4294967184, %v12951_v2  ;;  %v3390_v44 = vrot.slane %v18155_v37, %v13020_v31  ;;  %v3532_v45 = vsel %vm3349_vm3, %v3531_v61, %v3527_v16  ;;  %v18156_v22 = vld [vmem:[#allocation128_spill] sm:$0xff] }
 0x3a5   :  { %v3378_v30 = vsel %vm3377_vm7, %v3376_v59, %v3371_v24  ;;  %18154 = vst [vmem:[#allocation132_spill] sm:$0xff] %v13097_v41  ;;  %v3537_v48 = vsel %vm17383_vm4, %v3536_v13, %v3532_v45  ;;  %v3546_v2 = vrot.slane %v12794_v23, %v13014_v46  ;;  %v13123_v61 = vpop.permute.xlu0 %3274  ;;  %v18159_v23 = vld [vmem:[#allocation143_spill] sm:$0xff] }
 0x3a6   :  { %v13078_v1 = vpop.permute.xlu1 %3235  ;;  %v3385_v36 = vsel %vm3384_vm8, %v3383_v28, %v3378_v30  ;;  %v3473_v18 = vsel %vm3377_vm7, %v3472_v35, %v3468_v39  ;;  %v3487_v28 = vrot.slane %v12710_v52, %v13071_v10  ;;  %v3482_v30 = vrot.slane %v18156_v22, %v13020_v31 }
 0x3a7   :  { %v3478_v24 = vsel %vm3384_vm8, %v3477_v27, %v3473_v18  ;;  %v3541_v35 = vrot.slane %v12608_v6, %v12996_v43  ;;  %v3392_v39 = vsel %vm3391_vm9, %v3390_v44, %v3385_v36  ;;  %v18157_v27 = vld [vmem:[#allocation134_spill] sm:$0xff]  ;;  %v13121_v13 = vsub.s32 %v3421_v19, %v18122_v0  ;;  %v18160_v18 = vld [vmem:[#allocation131_spill] sm:$0xff] }
 0x3a8   :  { %v3399_v16 = vsel %vm3398_vm10, %v3397_v9, %v3392_v39  ;;  %v3411_v52 = vrot.slane %v18157_v27, %v13097_v41  ;;  %v3404_v60 = vrot.slane %v18159_v23, %v13026_v25  ;;  %v3483_v6 = vsel %vm3391_vm9, %v3482_v30, %v3478_v24  ;;  %v18162_v30 = vld [vmem:[#allocation31_spill] sm:$0xff] }
 0x3a9   :  { %18158 = vst [vmem:[#allocation123_spill] sm:$0xff] %v13121_v13  ;;  %v3542_v36 = vsel %vm17381_vm5, %v3541_v35, %v3537_v48  ;;  %v3488_v9 = vsel %vm3398_vm10, %v3487_v28, %v3483_v6  ;;  %v3497_v44 = vrot.slane %v12724_v47, %v13097_v41  ;;  %v3556_v19 = vrot.slane %v12808_v4, %v13042_v50  ;;  %v18161_v47 = vld [vmem:[#allocation138_spill] sm:$0xff] }
 0x3aa   :  { %v13104_v59 = vpop.permute.xlu1 %3241  ;;  %v3547_v0 = vsel %vm17382_vm6, %v3546_v2, %v3542_v36  ;;  %v3492_v45 = vrot.slane %v18160_v18, %v13026_v25  ;;  %v3551_v24 = vrot.slane %v12622_v15, %v12999_v7  ;;  %v3406_v48 = vsel %vm17384_vm11, %v3404_v60, %v3399_v16  ;;  %v13163_v60 = vpop.permute.xlu0 %3280  ;;  %v18164_v36 = vld [vmem:[#allocation136_spill] sm:$0xff] }
 0x3ab   :  { %v3596_v22 = vrot.slane %v12844_v20, %v12968_v57  ;;  %v3413_v28 = vsel %vm3412_vm12, %v3411_v52, %v3406_v48  ;;  %v3425_v2 = vrot.slane %v18161_v47, %v13121_v13  ;;  %v3605_v4 = vrot.slane %v12852_v63, %v12961_v26  ;;  %v18165_v18 = vld [vmem:[#allocation124_spill] sm:$0xff] }
 0x3ac   :  { %v3418_v35 = vrot.slane %v18162_v30, %v13033_v42  ;;  %v3600_v15 = vrot.slane %v12692_v14, %v12971_v34  ;;  %v3493_v39 = vsel %vm17384_vm11, %v3492_v45, %v3488_v9  ;;  %v3552_v16 = vsel %vm3377_vm7, %v3551_v24, %v3547_v0  ;;  %v18163_v14 = vld [vmem:[#allocation130_spill] sm:$0xff] }
 0x3ad   :  { %v3498_v27 = vsel %vm3412_vm12, %v3497_v44, %v3493_v39  ;;  %v3507_v52 = vrot.slane %v12738_v40, %v13121_v13  ;;  %v3557_v23 = vsel %vm3384_vm8, %v3556_v19, %v3552_v16  ;;  %v3566_v63 = vrot.slane %v12817_v3, %v13071_v10 }
 0x3ae   :  { %v13129_v37 = vpop.permute.xlu1 %3247  ;;  %v3502_v6 = vrot.slane %v18163_v14, %v13033_v42  ;;  %v3561_v9 = vrot.slane %v18164_v36, %v13020_v31  ;;  %v3420_v0 = vsel %vm3419_vm13, %v3418_v35, %v3413_v28  ;;  %v3601_v44 = vsel %vm17634_vm1, %v3600_v15, %v3596_v22  ;;  %v18166_v22 = vld [vmem:[#allocation133_spill] sm:$0xff] }
 0x3af   :  { %v3427_v40 = vsel %vm3426_vm14, %v3425_v2, %v3420_v0  ;;  %v3606_v19 = vsel %vm3342_vm2, %v3605_v4, %v3601_v44  ;;  %v3615_v3 = vrot.slane %v12861_v62, %v12985_v53  ;;  %v3432_v45 = vrot.slane %v18165_v18, %v13055_v17  ;;  %v18168_v44 = vld [vmem:[#allocation76_spill] sm:$0xff] }
 0x3b0   :  { %v3610_v24 = vrot.slane %v12706_v29, %v12978_v38  ;;  %v3503_v48 = vsel %vm3419_vm13, %v3502_v6, %v3498_v27  ;;  %v3562_v28 = vsel %vm3391_vm9, %v3561_v9, %v3557_v23  ;;  %v3512_v2 = vrot.slane %v18166_v22, %v13055_v17  ;;  %v13204_v23 = vpop.permute.xlu0 %3286  ;;  %v18167_v9 = vld [vmem:[#allocation74_spill] sm:$0xff] }
 0x3b1   :  { %v3508_v4 = vsel %vm3426_vm14, %v3507_v52, %v3503_v48  ;;  %v3567_v30 = vsel %vm3398_vm10, %v3566_v63, %v3562_v28  ;;  %v3576_v62 = vrot.slane %v12826_v51, %v13097_v41  ;;  %v13190_v35 = vsel %vm3433_vm15, %v3432_v45, %v3427_v40  ;;  %v18170_v45 = vld [vmem:[#allocation100_spill] sm:$0xff] }
 0x3b2   :  { %v13155_v20 = vpop.permute.xlu1 %3253  ;;  %v3571_v29 = vrot.slane %v12650_v56, %v13026_v25  ;;  %v3581_v15 = vrot.slane %v12664_v12, %v13033_v42  ;;  %v3611_v39 = vsel %vm3349_vm3, %v3610_v24, %v3606_v19  ;;  %v3620_v27 = vrot.slane %v12720_v54, %v12996_v43  ;;  %v18172_v28 = vld [vmem:[#allocation80_spill] sm:$0xff] }
 0x3b3   :  { %v3616_v52 = vsel %vm17383_vm4, %v3615_v3, %v3611_v39  ;;  %v3625_v51 = vrot.slane %v12870_v32, %v13014_v46  ;;  %v3630_v56 = vrot.slane %v12734_v33, %v12999_v7  ;;  %v3640_v12 = vrot.slane %v12748_v11, %v13020_v31 }
 0x3b4   :  { %v13211_v63 = vsel %vm3433_vm15, %v3512_v2, %v3508_v4  ;;  %v3572_v14 = vsel %vm17384_vm11, %v3571_v29, %v3567_v30  ;;  %v3650_v54 = vrot.slane %v12762_v58, %v13026_v25  ;;  %v3586_v33 = vrot.slane %v12835_v8, %v13121_v13  ;;  %v18169_v58 = vld [vmem:[#allocation78_spill] sm:$0xff]  ;;  %v18171_v8 = vld [vmem:[#allocation21_spill] sm:$0xff] }
 0x3b5   :  { %v3577_v36 = vsel %vm3412_vm12, %v3576_v62, %v3572_v14  ;;  %v3679_v0 = vrot.slane %v18167_v9, %v12971_v34  ;;  %v3689_v40 = vrot.slane %v18168_v44, %v12978_v38  ;;  %v3621_v19 = vsel %vm17381_vm5, %v3620_v27, %v3616_v52  ;;  %v18173_v4 = vld [vmem:[#allocation178_spill] sm:$0xff]  ;;  %v18174_v62 = vld [vmem:[#allocation189_spill] sm:$0xff]  ;;  %v18175_v27 = vld [vmem:[#allocation84_spill] sm:$0xff]  ;;  %v13253_v44 = vpop.permute.xlu0 %3292 }
 0x3b6   :  { %v13181_v47 = vpop.permute.xlu1 %3259  ;;  %v3699_v3 = vrot.slane %v18169_v58, %v12996_v43  ;;  %v3626_v18 = vsel %vm17382_vm6, %v3625_v51, %v3621_v19  ;;  %v3635_v24 = vrot.slane %v18170_v45, %v13042_v50  ;;  %v3675_v48 = vrot.slane %v18171_v8, %v12968_v57  ;;  %v18176_v14 = vld [vmem:[#allocation191_spill] sm:$0xff]  ;;  %v18178_v19 = vld [vmem:[#allocation88_spill] sm:$0xff]  ;;  %v18179_v45 = vld [vmem:[#allocation102_spill] sm:$0xff] }
 0x3b7   :  { %v3709_v22 = vrot.slane %v18172_v28, %v12999_v7  ;;  %v3582_v2 = vsel %vm3419_vm13, %v3581_v15, %v3577_v36  ;;  %v3684_v30 = vrot.slane %v18173_v4, %v12961_v26  ;;  %v3754_v29 = vrot.slane %v18174_v62, %v12968_v57  ;;  %v18177_v15 = vld [vmem:[#allocation24_spill] sm:$0xff] }
 0x3b8   :  { %v13249_v51 = vsel %vm3426_vm14, %v3586_v33, %v3582_v2  ;;  %v3763_v9 = vrot.slane %v18176_v14, %v12961_v26  ;;  %v3833_v36 = vrot.slane %v18177_v15, %v12968_v57  ;;  %v3758_v8 = vrot.slane %v18179_v45, %v12971_v34  ;;  %v18180_v62 = vld [vmem:[#allocation172_spill] sm:$0xff]  ;;  %v18181_v15 = vld [vmem:[#allocation190_spill] sm:$0xff] }
 0x3b9   :  { %v3631_v4 = vsel %vm3377_vm7, %v3630_v56, %v3626_v18  ;;  %v3842_v33 = vrot.slane %v13078_v1, %v12961_v26  ;;  %v3645_v14 = vrot.slane %v18180_v62, %v13071_v10  ;;  %v3680_v11 = vsel %vm17634_vm1, %v3679_v0, %v3675_v48  ;;  %v18182_v58 = vld [vmem:[#allocation92_spill] sm:$0xff]  ;;  %v18183_v56 = vld [vmem:[#allocation179_spill] sm:$0xff]  ;;  %v18185_v0 = vld [vmem:[#allocation193_spill] sm:$0xff] }
 0x3ba   :  { %v13214_v6 = vpop.permute.xlu1 %3265  ;;  %v3636_v2 = vsel %vm3384_vm8, %v3635_v24, %v3631_v4  ;;  %v3837_v16 = vrot.slane %v18181_v15, %v12971_v34  ;;  %v3685_v45 = vsel %vm3342_vm2, %v3684_v30, %v3680_v11  ;;  %v3694_v18 = vrot.slane %v18183_v56, %v12985_v53  ;;  %v18184_v24 = vld [vmem:[#allocation174_spill] sm:$0xff] }
 0x3bb   :  { %v3759_v1 = vsel %vm17634_vm1, %v3758_v8, %v3754_v29  ;;  %v3768_v4 = vrot.slane %v18184_v24, %v12978_v38  ;;  %v3773_v48 = vrot.slane %v18185_v0, %v12985_v53  ;;  %v3641_v52 = vsel %vm3391_vm9, %v3640_v12, %v3636_v2  ;;  %v18186_v8 = vld [vmem:[#allocation176_spill] sm:$0xff] }
 0x3bc   :  { %v3764_v62 = vsel %vm3342_vm2, %v3763_v9, %v3759_v1  ;;  %v3838_v15 = vsel %vm17634_vm1, %v3837_v16, %v3833_v36  ;;  %v3852_v30 = vrot.slane %v13104_v59, %v12985_v53  ;;  %v3778_v56 = vrot.slane %v18186_v8, %v12996_v43  ;;  %v18187_v1 = vld [vmem:[#allocation192_spill] sm:$0xff]  ;;  %v13293_v16 = vpop.permute.xlu0 %3298  ;;  %v18188_v36 = vld [vmem:[#allocation181_spill] sm:$0xff] }
 0x3bd   :  { %v3843_v11 = vsel %vm3342_vm2, %v3842_v33, %v3838_v15  ;;  %v3646_v24 = vsel %vm3398_vm10, %v3645_v14, %v3641_v52  ;;  %v3690_v9 = vsel %vm3349_vm3, %v3689_v40, %v3685_v45  ;;  %v3847_v0 = vrot.slane %v18187_v1, %v12978_v38  ;;  %v18189_v40 = vld [vmem:[#allocation194_spill] sm:$0xff]  ;;  %v18191_v1 = vld [vmem:[#allocation195_spill] sm:$0xff] }
 0x3be   :  { %v13244_v39 = vpop.permute.xlu1 %3271  ;;  %v3695_v12 = vsel %vm17383_vm4, %v3694_v18, %v3690_v9  ;;  %v3704_v33 = vrot.slane %v18188_v36, %v13014_v46  ;;  %v3769_v59 = vsel %vm3349_vm3, %v3768_v4, %v3764_v62  ;;  %v3783_v14 = vrot.slane %v18189_v40, %v13014_v46  ;;  %v18194_v40 = vld [vmem:[#allocation177_spill] sm:$0xff] }
 0x3bf   :  { %v3774_v52 = vsel %vm17383_vm4, %v3773_v48, %v3769_v59  ;;  %v3848_v45 = vsel %vm3349_vm3, %v3847_v0, %v3843_v11  ;;  %v3651_v18 = vsel %vm17384_vm11, %v3650_v54, %v3646_v24  ;;  %v3862_v4 = vrot.slane %v13129_v37, %v13014_v46  ;;  %v18192_v54 = vld [vmem:[#allocation183_spill] sm:$0xff] }
 0x3c0   :  { %v3853_v8 = vsel %vm17383_vm4, %v3852_v30, %v3848_v45  ;;  %v3700_v48 = vsel %vm17381_vm5, %v3699_v3, %v3695_v12  ;;  %v3857_v36 = vrot.slane %v18191_v1, %v12996_v43  ;;  %v3714_v30 = vrot.slane %v18192_v54, %v13042_v50  ;;  %v18193_v3 = vld [vmem:[#allocation196_spill] sm:$0xff] }
 0x3c1   :  { %v3705_v0 = vsel %vm17382_vm6, %v3704_v33, %v3700_v48  ;;  %v3779_v24 = vsel %vm17381_vm5, %v3778_v56, %v3774_v52  ;;  %v3926_v37 = vrot.slane %v13204_v23, %v12978_v38  ;;  %v3793_v12 = vrot.slane %v18193_v3, %v13042_v50  ;;  %v18198_v54 = vld [vmem:[#allocation180_spill] sm:$0xff] }
 0x3c2   :  { %v3278_v32 = vpop.permute.xlu1 %3277  ;;  %v3784_v59 = vsel %vm17382_vm6, %v3783_v14, %v3779_v24  ;;  %v3788_v45 = vrot.slane %v18194_v40, %v12999_v7  ;;  %v3872_v23 = vrot.slane %v13155_v20, %v13042_v50  ;;  %v18200_v3 = vrot.slane %v18175_v27, %v13020_v31 }
 0x3c3   :  { %v3912_v29 = vrot.slane %v3278_v32, %v12968_v57  ;;  %v3916_v32 = vrot.slane %v13163_v60, %v12971_v34  ;;  %v18190_v60 = vld [vmem:[#allocation175_spill] sm:$0xff] }
 0x3c4   :  { %v3655_v9 = vrot.slane %v18190_v60, %v13097_v41  ;;  %v3789_v20 = vsel %vm3377_vm7, %v3788_v45, %v3784_v59 }
 0x3c5   :  { %v3917_v62 = vsel %vm17634_vm1, %v3916_v32, %v3912_v29  ;;  %v13326_v32 = vpop.permute.xlu0 %3304  ;;  %v3794_v28 = vsel %vm3384_vm8, %v3793_v12, %v3789_v20  ;;  %v3892_v20 = vrot.slane %v13214_v6, %v13097_v41  ;;  %v18208_v6 = vld [vmem:[#allocation188_spill] sm:$0xff] }
 0x3c6   :  { %v3284_v2 = vpop.permute.xlu1 %3283  ;;  %v3656_v14 = vsel %vm3412_vm12, %v3655_v9, %v3651_v18  ;;  %v3936_v18 = vrot.slane %v13253_v44, %v12996_v43 }
 0x3c7   :  { %v3921_v15 = vrot.slane %v3284_v2, %v12961_v26  ;;  %v3858_v2 = vsel %vm17381_vm5, %v3857_v36, %v3853_v8  ;;  %v18195_v8 = vld [vmem:[#allocation197_spill] sm:$0xff] }
 0x3c8   :  { %v3863_v56 = vsel %vm17382_vm6, %v3862_v4, %v3858_v2  ;;  %v18196_v4 = vld [vmem:[#allocation184_spill] sm:$0xff]  ;;  %v18201_v2 = vld [vmem:[#allocation205_spill] sm:$0xff] }
 0x3c9   :  { %v3922_v11 = vsel %vm3342_vm2, %v3921_v15, %v3917_v62  ;;  %v3710_v15 = vsel %vm3377_vm7, %v3709_v22, %v3705_v0  ;;  %v3867_v62 = vrot.slane %v18195_v8, %v12999_v7  ;;  %v3724_v1 = vrot.slane %v18196_v4, %v13071_v10  ;;  %v18197_v22 = vld [vmem:[#allocation200_spill] sm:$0xff]  ;;  %v3311_v40 = vpop.permute.xlu0 %3310 }
 0x3ca   :  { %v3290_v29 = vpop.permute.xlu1 %3289  ;;  %v3927_v52 = vsel %vm3349_vm3, %v3926_v37, %v3922_v11  ;;  %v3715_v48 = vsel %vm3384_vm8, %v3714_v30, %v3710_v15  ;;  %v3803_v36 = vrot.slane %v18197_v22, %v13071_v10  ;;  %v3798_v30 = vrot.slane %v18198_v54, %v13020_v31  ;;  %v18203_v15 = vld [vmem:[#allocation22_spill] sm:$0xff] }
 0x3cb   :  { %v3931_v33 = vrot.slane %v3290_v29, %v12985_v53  ;;  %v3868_v11 = vsel %vm3377_vm7, %v3867_v62, %v3863_v56  ;;  %v3882_v37 = vrot.slane %v13181_v47, %v13071_v10  ;;  %v18199_v29 = vrot.slane %v12776_v55, %v13033_v42  ;;  %v18202_v56 = vld [vmem:[#allocation186_spill] sm:$0xff] }
 0x3cc   :  { %v3873_v24 = vsel %vm3384_vm8, %v3872_v23, %v3868_v11  ;;  %v3720_v12 = vsel %vm3391_vm9, %v18200_v3, %v3715_v48  ;;  %v3734_v23 = vrot.slane %v18202_v56, %v13097_v41  ;;  %v3799_v55 = vsel %vm3391_vm9, %v3798_v30, %v3794_v28  ;;  %v18204_v48 = vld [vmem:[#allocation182_spill] sm:$0xff] }
 0x3cd   :  { %v3932_v60 = vsel %vm17383_vm4, %v3931_v33, %v3927_v52  ;;  %v3661_v59 = vsel %vm3419_vm13, %v18199_v29, %v3656_v14  ;;  %v3877_v33 = vrot.slane %v18201_v2, %v13020_v31  ;;  %v3725_v47 = vsel %vm3398_vm10, %v3724_v1, %v3720_v12  ;;  %v18209_v29 = vld [vmem:[#allocation206_spill] sm:$0xff]  ;;  %v3317_v12 = vpop.permute.xlu0 %3316 }
 0x3ce   :  { %v3296_v9 = vpop.permute.xlu1 %3295  ;;  %v3937_v44 = vsel %vm17381_vm5, %v3936_v18, %v3932_v60  ;;  %v3946_v52 = vrot.slane %v13293_v16, %v12999_v7  ;;  %vm17386_vm5 = vcmask 1042434   ;;  %v3804_v14 = vsel %vm3398_vm10, %v3803_v36, %v3799_v55  ;;  %v18205_v18 = vld [vmem:[#allocation45_spill] sm:$0xff] }
 0x3cf   :  { %v3941_v0 = vrot.slane %v3296_v9, %v13014_v46  ;;  %v3813_v8 = vrot.slane %v18203_v15, %v13097_v41  ;;  %v3878_v62 = vsel %vm3391_vm9, %v3877_v33, %v3873_v24  ;;  %v3808_v4 = vrot.slane %v18204_v48, %v13026_v25  ;;  %v18207_v36 = vld [vmem:[#allocation209_spill] sm:$0xff]  ;;  %v18213_v48 = vld [vmem:[#allocation96_spill] sm:$0xff] }
 0x3d0   :  { %v3883_v1 = vsel %vm3398_vm10, %v3882_v37, %v3878_v62  ;;  %v3665_v9 = vrot.slane %v18205_v18, %v13121_v13  ;;  %v18206_v28 = vrot.slane %v18178_v19, %v13026_v25  ;;  %v3887_v11 = vrot.slane %v18207_v36, %v13026_v25 }
 0x3d1   :  { %v3942_v45 = vsel %vm17382_vm6, %v3941_v0, %v3937_v44  ;;  %vm17635_vm6 = vcmask 1043459   ;;  %vm17529_vm4 = vcmask 1044484   ;;  %v3744_v30 = vrot.slane %v18208_v6, %v13121_v13 }
 0x3d2   :  { %v3302_v27 = vpop.permute.xlu1 %3301  ;;  %v3947_v16 = vsel %vm3377_vm7, %v3946_v52, %v3942_v45  ;;  %v3730_v22 = vsel %vm17384_vm11, %v18206_v28, %v3725_v47  ;;  %v3809_v24 = vsel %vm17384_vm11, %v3808_v4, %v3804_v14  ;;  %v3956_v37 = vrot.slane %v13326_v32, %v13020_v31  ;;  %v18210_v45 = vld [vmem:[#allocation185_spill] sm:$0xff] }
 0x3d3   :  { %v3951_v60 = vrot.slane %v3302_v27, %v13042_v50  ;;  %v3735_v54 = vsel %vm3412_vm12, %v3734_v23, %v3730_v22  ;;  %v3814_v19 = vsel %vm3412_vm12, %v3813_v8, %v3809_v24  ;;  %v3823_v3 = vrot.slane %v18209_v29, %v13121_v13 }
 0x3d4   :  { %v3888_v2 = vsel %vm17384_vm11, %v3887_v11, %v3883_v1  ;;  %v3818_v47 = vrot.slane %v18210_v45, %v13033_v42  ;;  %v3902_v23 = vrot.slane %v13244_v39, %v13121_v13  ;;  %v3666_v55 = vsel %vm3426_vm14, %v3665_v9, %v3661_v59  ;;  %v3323_v11 = vpop.permute.xlu0 %3322  ;;  %v18216_v45 = vld [vmem:[#allocation3_spill] sm:$0xff] }
 0x3d5   :  { %v3952_v0 = vsel %vm3384_vm8, %v3951_v60, %v3947_v16  ;;  %v3893_v56 = vsel %vm3412_vm12, %v3892_v20, %v3888_v2  ;;  %v18211_v52 = vrot.slane %v18182_v58, %v13033_v42  ;;  %v3897_v14 = vrot.slane %v13086_v5, %v13033_v42  ;;  %v18215_v16 = vld [vmem:[#allocation187_spill] sm:$0xff] }
 0x3d6   :  { %v3308_v44 = vpop.permute.xlu1 %3307  ;;  %v3957_v32 = vsel %vm3391_vm9, %v3956_v37, %v3952_v0  ;;  %v18212_v8 = vrot.slane %v12678_v49, %v13055_v17  ;;  %v3819_v59 = vsel %vm3419_vm13, %v3818_v47, %v3814_v19  ;;  %v3966_v60 = vrot.slane %v3311_v40, %v13026_v25 }
 0x3d7   :  { %v3961_v33 = vrot.slane %v3308_v44, %v13071_v10  ;;  %v3740_v27 = vsel %vm3419_vm13, %v18211_v52, %v3735_v54  ;;  %v3749_v4 = vrot.slane %v18213_v48, %v13055_v17  ;;  %v3824_v5 = vsel %vm3426_vm14, %v3823_v3, %v3819_v59  ;;  %v18219_v52 = vld [vmem:[#allocation152_spill] sm:$0xff] }
 0x3d8   :  { %v3592_v39 = vsel %vm3433_vm15, %v18212_v8, %v13249_v51  ;;  %v3745_v62 = vsel %vm3426_vm14, %v3744_v30, %v3740_v27  ;;  %v3898_v1 = vsel %vm3419_vm13, %v3897_v14, %v3893_v56  ;;  %v18214_v49 = vrot.slane %v12790_v21, %v13055_v17  ;;  %v18217_v56 = vld [vmem:[#allocation4_spill] sm:$0xff]  ;;  %v18221_v8 = vld [vmem:[#allocation166_spill] sm:$0xff] }
 0x3d9   :  { %v3962_v15 = vsel %vm3398_vm10, %v3961_v33, %v3957_v32  ;;  %v3828_v18 = vrot.slane %v18215_v16, %v13055_v17  ;;  %v3903_v40 = vsel %vm3426_vm14, %v3902_v23, %v3898_v1  ;;  %v3989_v28 = vsel %vm17385_vm0, %v13211_v63, %v13190_v35  ;;  %v18218_v32 = vld [vmem:[#allocation157_spill] sm:$0xff]  ;;  %v18220_v14 = vld [vmem:[#allocation160_spill] sm:$0xff] }
 0x3da   :  { %v3314_v58 = vpop.permute.xlu1 %3313  ;;  %v3671_v51 = vsel %vm3433_vm15, %v18214_v49, %v3666_v55  ;;  %v3967_v9 = vsel %vm17384_vm11, %v3966_v60, %v3962_v15  ;;  %v3750_v22 = vsel %vm3433_vm15, %v3749_v4, %v3745_v62  ;;  %v3907_v36 = vrot.slane %v13123_v61, %v13055_v17  ;;  %v18224_v49 = vld [vmem:[#allocation162_spill] sm:$0xff] }
 0x3db   :  { %v3971_v20 = vrot.slane %v3314_v58, %v13097_v41  ;;  %v3991_v0 = vsel %vm17386_vm5, %v3592_v39, %v3989_v28  ;;  %v3976_v54 = vrot.slane %v3317_v12, %v13033_v42  ;;  %v3829_v30 = vsel %vm3433_vm15, %v3828_v18, %v3824_v5  ;;  %v18222_v58 = vld [vmem:[#allocation161_spill] sm:$0xff]  ;;  %v18223_v5 = vld [vmem:[#allocation168_spill] sm:$0xff]  ;;  %v18225_v18 = vld [vmem:[#allocation154_spill] sm:$0xff] }
 0x3dc   :  { %vm17528_vm11 = vcmask 1045509   ;;  %v3908_v35 = vsel %vm3433_vm15, %v3907_v36, %v3903_v40  ;;  %v3993_v63 = vsel %vm17635_vm6, %v3671_v51, %v3991_v0  ;;  %vm17527_vm0 = vcmask 1046534   ;;  %v18226_v28 = vld [vmem:[#allocation163_spill] sm:$0xff] }
 0x3dd   :  { %v3972_v21 = vsel %vm3412_vm12, %v3971_v20, %v3967_v9  ;;  %v3986_v61 = vrot.slane %v3323_v11, %v13055_v17  ;;  %v3995_v44 = vsel %vm17529_vm4, %v3750_v22, %v3993_v63  ;;  %vm17526_vm5 = vcmask 1047559   ;;  %v18227_v11 = vld [vmem:[#allocation170_spill] sm:$0xff] }
 0x3de   :  { %v3320_v6 = vpop.permute.xlu1 %3319  ;;  %v3977_v37 = vsel %vm3419_vm13, %v3976_v54, %v3972_v21  ;;  %v3997_v29 = vsel %vm17528_vm11, %v3829_v30, %v3995_v44  ;;  %v18228_v54 = vld [vmem:[#allocation164_spill] sm:$0xff]  ;;  %v18232_v44 = vld [vmem:[#allocation165_spill] sm:$0xff]  ;;  %vm18542_vm4 = vcmask 458112  }
 0x3df   :  { %v3981_v24 = vrot.slane %v3320_v6, %v13121_v13  ;;  %v3999_v12 = vsel %vm17527_vm0, %v3908_v35, %v3997_v29  ;;  %v18230_v35 = vld [vmem:[#allocation155_spill] sm:$0xff] }
 0x3e1   :  { %v3982_v19 = vsel %vm3426_vm14, %v3981_v24, %v3977_v37 }
 0x3e2   :  { %v3987_v3 = vsel %vm3433_vm15, %v3986_v61, %v3982_v19 }
 0x3e3   :  { %v4001_v2 = vsel %vm17526_vm5, %v3987_v3, %v3999_v12  ;;  %v18234_v12 = vld [vmem:[#allocation107_spill] sm:$0xff]  ;;  %vm18538_vm5 = vcmask 326912  }
 0x3e4   :  { %4003 = vmax.xlane.f32.xlu1 %v4001_v2  ;;  %vm18539_vm0 = vmmov %vm18538_vm5 }
 0x46d   :  { %v13465_v33 = vpop.xlane.xlu1 %4003 }
 0x46e   :  { %v13469_v47 = vrot.slane %v13465_v33, %v18216_v45  ;;  %v13473_v23 = vrot.slane %v13465_v33, %v18217_v56 }
 0x470   :  { %v4055_v55 = vsub.f32 %v18218_v32, %v13469_v47  ;;  %v4046_v27 = vsub.f32 %v18219_v52, %v13469_v47  ;;  %v4061_v15 = vsub.f32 %v18220_v14, %v13469_v47  ;;  %v4047_v39 = vsub.f32 %v18221_v8, %v13469_v47  ;;  %v18236_v52 = vld [vmem:[#allocation167_spill] sm:$0xff]  ;;  %v18238_v8 = vld [vmem:[#allocation156_spill] sm:$0xff] }
 0x471   :  { %v4063_v48 = vsub.f32 %v18222_v58, %v13473_v23  ;;  %v4048_v1 = vsub.f32 %v18223_v5, %v13469_v47  ;;  %v4065_v51 = vsub.f32 %v18224_v49, %v13473_v23  ;;  %v4049_v40 = vsub.f32 %v18225_v18, %v13469_v47  ;;  %v18242_v5 = vld [vmem:[#allocation26_spill] sm:$0xff]  ;;  %v18245_v18 = vld [vmem:[#allocation171_spill] sm:$0xff] }
 0x472   :  { %v4192_v62 = vmul.f32 1.442695, %v4055_v55  ;;  %v4174_v59 = vmul.f32 1.442695, %v4046_v27  ;;  %v4204_v60 = vmul.f32 1.442695, %v4061_v15  ;;  %v4067_v22 = vsub.f32 %v18226_v28, %v13473_v23 }
 0x473   :  { %v4176_v4 = vmul.f32 1.442695, %v4047_v39  ;;  %v4208_v20 = vmul.f32 1.442695, %v4063_v48  ;;  %v4178_v16 = vmul.f32 1.442695, %v4048_v1  ;;  %v4050_v21 = vsub.f32 %v18227_v11, %v13469_v47 }
 0x474   :  { %10413 = vpow2.f32 %v4192_v62  ;;  %v4212_v9 = vmul.f32 1.442695, %v4065_v51  ;;  %v4180_v36 = vmul.f32 1.442695, %v4049_v40  ;;  %v4216_v0 = vmul.f32 1.442695, %v4067_v22 }
 0x475   :  { %10415 = vpow2.f32 %v4174_v59  ;;  %v4069_v6 = vsub.f32 %v18228_v54, %v13473_v23  ;;  %v4182_v24 = vmul.f32 1.442695, %v4050_v21  ;;  %v4051_v63 = vsub.f32 %v18230_v35, %v13469_v47  ;;  %v18244_v49 = vld [vmem:[#allocation6_spill] sm:$0xff] }
 0x476   :  { %10417 = vpow2.f32 %v4204_v60  ;;  %v4071_v19 = vsub.f32 %v18232_v44, %v13473_v23  ;;  %v4052_v2 = vsub.f32 %v18234_v12, %v13469_v47  ;;  %v4073_v27 = vsub.f32 %v18236_v52, %v13473_v23  ;;  %v18240_v60 = vld [vmem:[#allocation169_spill] sm:$0xff]  ;;  %v18247_v22 = vld [vmem:[#allocation10_spill] sm:$0xff] }
 0x477   :  { %10419 = vpow2.f32 %v4176_v4  ;;  %v4220_v37 = vmul.f32 1.442695, %v4069_v6  ;;  %v4184_v3 = vmul.f32 1.442695, %v4051_v63  ;;  %v4053_v39 = vsub.f32 %v18238_v8, %v13469_v47  ;;  %v18251_v35 = vld [vmem:[#allocation158_spill] sm:$0xff]  ;;  %v18257_v8 = vld [vmem:[#allocation28_spill] sm:$0xff] }
 0x478   :  { %10421 = vpow2.f32 %v4208_v20  ;;  %v4224_v55 = vmul.f32 1.442695, %v4071_v19  ;;  %v4186_v15 = vmul.f32 1.442695, %v4052_v2  ;;  %v4228_v59 = vmul.f32 1.442695, %v4073_v27 }
 0x479   :  { %10423 = vpow2.f32 %v4178_v16  ;;  %v4075_v58 = vsub.f32 %v18240_v60, %v13473_v23  ;;  %v4188_v4 = vmul.f32 1.442695, %v4053_v39  ;;  %v4054_v1 = vsub.f32 %v18242_v5, %v13469_v47  ;;  %v18253_v19 = vld [vmem:[#allocation109_spill] sm:$0xff] }
 0x47a   :  { %10425 = vpow2.f32 %v4212_v9  ;;  %v13537_v51 = vrot.slane %v13465_v33, %v18244_v49  ;;  %v4077_v40 = vsub.f32 %v18245_v18, %v13473_v23  ;;  %v4057_v63 = vsub.f32 %v18251_v35, %v13469_v47 }
 0x47b   :  { %10427 = vpow2.f32 %v4180_v36  ;;  %v4232_v16 = vmul.f32 1.442695, %v4075_v58  ;;  %v4190_v28 = vmul.f32 1.442695, %v4054_v1  ;;  %v4056_v36 = vsub.f32 %v18247_v22, %v13469_v47  ;;  %v18259_v58 = vld [vmem:[#allocation159_spill] sm:$0xff]  ;;  %v18263_v22 = vld [vmem:[#allocation30_spill] sm:$0xff] }
 0x47c   :  { %10429 = vpow2.f32 %v4216_v0  ;;  %v4236_v21 = vmul.f32 1.442695, %v4077_v40  ;;  %v18249_v0 = vld [vmem:[#allocation9_spill] sm:$0xff]  ;;  %v4196_v2 = vmul.f32 1.442695, %v4057_v63  ;;  %v4083_v39 = vsub.f32 %v18257_v8, %v13537_v51  ;;  %v18271_v8 = vld [vmem:[#allocation110_spill] sm:$0xff] }
 0x47d   :  { %10431 = vpow2.f32 %v4182_v24  ;;  %v4079_v54 = vsub.f32 %v18249_v0, %v13537_v51  ;;  %v4194_v24 = vmul.f32 1.442695, %v4056_v36  ;;  %v4060_v36 = vsub.f32 %v18263_v22, %v13469_v47 }
 0x47e   :  { %10433 = vpow2.f32 %v4220_v37  ;;  %v4248_v1 = vmul.f32 1.442695, %v4083_v39  ;;  %v4064_v39 = vsub.f32 %v18271_v8, %v13473_v23 }
 0x47f   :  { %10435 = vpow2.f32 %v4184_v3  ;;  %v4240_v44 = vmul.f32 1.442695, %v4079_v54  ;;  %v4081_v3 = vsub.f32 %v18253_v19, %v13537_v51  ;;  %v18265_v54 = vld [vmem:[#allocation111_spill] sm:$0xff]  ;;  %v4202_v63 = vmul.f32 1.442695, %v4060_v36 }
 0x480   :  { %10437 = vpow2.f32 %v4224_v55  ;;  %v18255_v55 = vld [vmem:[#allocation108_spill] sm:$0xff] }
 0x481   :  { %v13497_v30 = vpop.eup %10413  ;;  %10439 = vpow2.f32 %v4186_v15  ;;  %v4058_v52 = vsub.f32 %v18255_v55, %v13469_v47  ;;  %v4244_v15 = vmul.f32 1.442695, %v4081_v3 }
 0x482   :  { %18229 = vst [vmem:[#allocation39_spill] sm:$0xff] %v13497_v30  ;;  %v13501_v61 = vpop.eup %10415  ;;  %4586 = vperm.xlu1 %9980, %v13497_v30   ;;  %10441 = vpow2.f32 %v4228_v59 }
 0x483   :  { %18231 = vst [vmem:[#allocation135_spill] sm:$0xff] %v13501_v61  ;;  %4559 = vperm.xlu0 %9979, %v13501_v61   ;;  %v13507_v29 = vpop.eup %10417  ;;  %10443 = vpow2.f32 %v4188_v4  ;;  %v4198_v60 = vmul.f32 1.442695, %v4058_v52  ;;  %v4059_v4 = vsub.f32 %v18259_v58, %v13469_v47 }
 0x484   :  { %18233 = vst [vmem:[#allocation57_spill] sm:$0xff] %v13507_v29  ;;  %v13511_v32 = vpop.eup %10419  ;;  %10445 = vpow2.f32 %v4232_v16  ;;  %v18261_v16 = vld [vmem:[#allocation11_spill] sm:$0xff] }
 0x485   :  { %18235 = vst [vmem:[#allocation128_spill] sm:$0xff] %v13511_v32  ;;  %v13517_v14 = vpop.eup %10421  ;;  %10447 = vpow2.f32 %v4190_v28  ;;  %v4085_v18 = vsub.f32 %v18261_v16, %v13537_v51  ;;  %v4200_v28 = vmul.f32 1.442695, %v4059_v4  ;;  %v18273_v4 = vld [vmem:[#allocation34_spill] sm:$0xff] }
 0x486   :  { %4604 = vperm.xlu1 %9980, %v13507_v29   ;;  %18237 = vst [vmem:[#allocation134_spill] sm:$0xff] %v13517_v14  ;;  %v13521_v62 = vpop.eup %10423  ;;  %10449 = vpow2.f32 %v4236_v21 }
 0x487   :  { %4562 = vperm.xlu0 %9979, %v13511_v32   ;;  %18239 = vst [vmem:[#allocation143_spill] sm:$0xff] %v13521_v62  ;;  %v13527_v48 = vpop.eup %10425  ;;  %10451 = vpow2.f32 %v4194_v24  ;;  %v4252_v0 = vmul.f32 1.442695, %v4085_v18  ;;  %v4087_v24 = vsub.f32 %v18265_v54, %v13537_v51  ;;  %v4210_v18 = vmul.f32 1.442695, %v4064_v39  ;;  %v18282_v39 = vld [vmem:[#allocation15_spill] sm:$0xff] }
 0x488   :  { %18241 = vst [vmem:[#allocation131_spill] sm:$0xff] %v13527_v48  ;;  %v13531_v20 = vpop.eup %10427  ;;  %10453 = vpow2.f32 %v4240_v44  ;;  %v18267_v44 = vld [vmem:[#allocation12_spill] sm:$0xff]  ;;  %v18415_v32 = vld [vmem:[#allocation91_spill] sm:$0xff] }
 0x489   :  { %18243 = vst [vmem:[#allocation138_spill] sm:$0xff] %v13531_v20  ;;  %v13541_v9 = vpop.eup %10429  ;;  %10455 = vpow2.f32 %v4196_v2  ;;  %v4062_v19 = vsub.f32 %v18267_v44, %v13473_v23  ;;  %v4256_v47 = vmul.f32 1.442695, %v4087_v24  ;;  %v18269_v2 = vld [vmem:[#allocation32_spill] sm:$0xff] }
 0x48a   :  { %4610 = vperm.xlu1 %9980, %v13517_v14   ;;  %18246 = vst [vmem:[#allocation31_spill] sm:$0xff] %v13541_v9  ;;  %v13545_v11 = vpop.eup %10431  ;;  %10457 = vpow2.f32 %v4244_v15  ;;  %v4089_v55 = vsub.f32 %v18269_v2, %v13537_v51  ;;  %v18280_v2 = vld [vmem:[#allocation112_spill] sm:$0xff] }
 0x48b   :  { %4565 = vperm.xlu0 %9979, %v13521_v62   ;;  %18248 = vst [vmem:[#allocation130_spill] sm:$0xff] %v13545_v11  ;;  %v13551_v6 = vpop.eup %10433  ;;  %10459 = vpow2.f32 %v4198_v60  ;;  %v4206_v15 = vmul.f32 1.442695, %v4062_v19 }
 0x48c   :  { %18250 = vst [vmem:[#allocation136_spill] sm:$0xff] %v13551_v6  ;;  %v13555_v37 = vpop.eup %10435  ;;  %10461 = vpow2.f32 %v4248_v1  ;;  %v4260_v58 = vmul.f32 1.442695, %v4089_v55  ;;  %v4091_v1 = vsub.f32 %v18273_v4, %v13537_v51  ;;  %v4068_v55 = vsub.f32 %v18280_v2, %v13473_v23 }
 0x48d   :  { %18252 = vst [vmem:[#allocation124_spill] sm:$0xff] %v13555_v37  ;;  %v13561_v12 = vpop.eup %10437  ;;  %10463 = vpow2.f32 %v4200_v28  ;;  %v18275_v28 = vld [vmem:[#allocation113_spill] sm:$0xff] }
 0x48e   :  { %4616 = vperm.xlu1 %9980, %v13527_v48   ;;  %18254 = vst [vmem:[#allocation133_spill] sm:$0xff] %v13561_v12  ;;  %v13565_v27 = vpop.eup %10439  ;;  %10465 = vpow2.f32 %v4252_v0  ;;  %v4066_v22 = vsub.f32 %v18275_v28, %v13473_v23  ;;  %v18277_v0 = vld [vmem:[#allocation7_spill] sm:$0xff]  ;;  %v4264_v24 = vmul.f32 1.442695, %v4091_v1  ;;  %v4218_v1 = vmul.f32 1.442695, %v4068_v55 }
 0x48f   :  { %4568 = vperm.xlu0 %9979, %v13531_v20   ;;  %18256 = vst [vmem:[#allocation74_spill] sm:$0xff] %v13565_v27  ;;  %v13571_v59 = vpop.eup %10441  ;;  %10467 = vpow2.f32 %v4202_v63  ;;  %v13621_v54 = vrot.slane %v13465_v33, %v18277_v0  ;;  %v18278_v63 = vld [vmem:[#allocation36_spill] sm:$0xff] }
 0x490   :  { %18258 = vst [vmem:[#allocation76_spill] sm:$0xff] %v13571_v59  ;;  %v13575_v5 = vpop.eup %10443  ;;  %10469 = vpow2.f32 %v4256_v47  ;;  %v4093_v44 = vsub.f32 %v18278_v63, %v13537_v51  ;;  %v4214_v47 = vmul.f32 1.442695, %v4066_v22 }
 0x491   :  { %18260 = vst [vmem:[#allocation78_spill] sm:$0xff] %v13575_v5  ;;  %v13581_v40 = vpop.eup %10445  ;;  %10471 = vpow2.f32 %v4206_v15 }
 0x492   :  { %4622 = vperm.xlu1 %9980, %v13541_v9   ;;  %18262 = vst [vmem:[#allocation100_spill] sm:$0xff] %v13581_v40  ;;  %v13585_v21 = vpop.eup %10447  ;;  %10473 = vpow2.f32 %v4260_v58  ;;  %v4268_v8 = vmul.f32 1.442695, %v4093_v44  ;;  %v4095_v58 = vsub.f32 %v18282_v39, %v13621_v54 }
 0x493   :  { %4571 = vperm.xlu0 %9979, %v13545_v11   ;;  %18264 = vst [vmem:[#allocation21_spill] sm:$0xff] %v13585_v21  ;;  %v13591_v35 = vpop.eup %10449  ;;  %10475 = vpow2.f32 %v4210_v18  ;;  %v18284_v18 = vld [vmem:[#allocation38_spill] sm:$0xff] }
 0x494   :  { %18266 = vst [vmem:[#allocation80_spill] sm:$0xff] %v13591_v35  ;;  %v13595_v3 = vpop.eup %10451  ;;  %10477 = vpow2.f32 %v4264_v24  ;;  %v4070_v28 = vsub.f32 %v18284_v18, %v13473_v23  ;;  %v4272_v63 = vmul.f32 1.442695, %v4095_v58  ;;  %v18286_v24 = vld [vmem:[#allocation115_spill] sm:$0xff] }
 0x495   :  { %18268 = vst [vmem:[#allocation178_spill] sm:$0xff] %v13595_v3  ;;  %v13601_v52 = vpop.eup %10453  ;;  %10479 = vpow2.f32 %v4214_v47  ;;  %v4097_v44 = vsub.f32 %v18286_v24, %v13621_v54  ;;  %v18288_v47 = vld [vmem:[#allocation17_spill] sm:$0xff] }
 0x496   :  { %4628 = vperm.xlu1 %9980, %v13551_v6   ;;  %18270 = vst [vmem:[#allocation189_spill] sm:$0xff] %v13601_v52  ;;  %v13605_v60 = vpop.eup %10455  ;;  %10481 = vpow2.f32 %v4268_v8  ;;  %v4222_v39 = vmul.f32 1.442695, %v4070_v28  ;;  %v4072_v55 = vsub.f32 %v18288_v47, %v13473_v23  ;;  %v18290_v8 = vld [vmem:[#allocation40_spill] sm:$0xff]  ;;  %v18380_v6 = vld [vmem:[#allocation77_spill] sm:$0xff] }
 0x497   :  { %4574 = vperm.xlu0 %9979, %v13555_v37   ;;  %18272 = vst [vmem:[#allocation84_spill] sm:$0xff] %v13605_v60  ;;  %v13611_v16 = vpop.eup %10457  ;;  %10483 = vpow2.f32 %v4218_v1  ;;  %v4276_v18 = vmul.f32 1.442695, %v4097_v44  ;;  %v4099_v58 = vsub.f32 %v18290_v8, %v13621_v54  ;;  %v18292_v1 = vld [vmem:[#allocation114_spill] sm:$0xff] }
 0x498   :  { %18274 = vst [vmem:[#allocation191_spill] sm:$0xff] %v13611_v16  ;;  %v13615_v36 = vpop.eup %10459  ;;  %10485 = vpow2.f32 %v4272_v63  ;;  %v4226_v24 = vmul.f32 1.442695, %v4072_v55  ;;  %v4074_v28 = vsub.f32 %v18292_v1, %v13473_v23  ;;  %v18294_v63 = vld [vmem:[#allocation18_spill] sm:$0xff] }
 0x499   :  { %18276 = vst [vmem:[#allocation24_spill] sm:$0xff] %v13615_v36  ;;  %v13625_v19 = vpop.eup %10461  ;;  %10487 = vpow2.f32 %v4222_v39  ;;  %v4280_v47 = vmul.f32 1.442695, %v4099_v58  ;;  %v4101_v44 = vsub.f32 %v18294_v63, %v13621_v54  ;;  %v18296_v39 = vld [vmem:[#allocation43_spill] sm:$0xff] }
 0x49a   :  { %4634 = vperm.xlu1 %9980, %v13561_v12   ;;  %18279 = vst [vmem:[#allocation88_spill] sm:$0xff] %v13625_v19  ;;  %v13629_v15 = vpop.eup %10463  ;;  %10489 = vpow2.f32 %v4276_v18  ;;  %v4230_v8 = vmul.f32 1.442695, %v4074_v28  ;;  %v4076_v55 = vsub.f32 %v18296_v39, %v13473_v23  ;;  %v18298_v18 = vld [vmem:[#allocation117_spill] sm:$0xff] }
 0x49b   :  { %4577 = vperm.xlu0 %9979, %v13565_v27   ;;  %18281 = vst [vmem:[#allocation102_spill] sm:$0xff] %v13629_v15  ;;  %v13635_v4 = vpop.eup %10465  ;;  %10491 = vpow2.f32 %v4226_v24  ;;  %v4284_v1 = vmul.f32 1.442695, %v4101_v44  ;;  %v4103_v58 = vsub.f32 %v18298_v18, %v13621_v54  ;;  %v18300_v24 = vld [vmem:[#allocation19_spill] sm:$0xff] }
 0x49c   :  { %18283 = vst [vmem:[#allocation172_spill] sm:$0xff] %v13635_v4  ;;  %v13639_v22 = vpop.eup %10467  ;;  %10493 = vpow2.f32 %v4280_v47  ;;  %v4234_v63 = vmul.f32 1.442695, %v4076_v55  ;;  %v4078_v28 = vsub.f32 %v18300_v24, %v13537_v51  ;;  %v18302_v47 = vld [vmem:[#allocation116_spill] sm:$0xff] }
 0x49d   :  { %18285 = vst [vmem:[#allocation190_spill] sm:$0xff] %v13639_v22  ;;  %v13645_v2 = vpop.eup %10469  ;;  %10495 = vpow2.f32 %v4230_v8  ;;  %v4288_v23 = vmul.f32 1.442695, %v4103_v58  ;;  %v4105_v44 = vsub.f32 %v18302_v47, %v13621_v54  ;;  %v18304_v8 = vld [vmem:[#allocation20_spill] sm:$0xff] }
 0x49e   :  { %4640 = vperm.xlu1 %9980, %v13571_v59   ;;  %18287 = vst [vmem:[#allocation92_spill] sm:$0xff] %v13645_v2  ;;  %10497 = vpow2.f32 %v4284_v1  ;;  %v4238_v18 = vmul.f32 1.442695, %v4078_v28  ;;  %v4080_v55 = vsub.f32 %v18304_v8, %v13537_v51  ;;  %v18306_v1 = vld [vmem:[#allocation47_spill] sm:$0xff]  ;;  %v18310_v8 = vld [vmem:[#allocation8_spill] sm:$0xff] }
 0x49f   :  { %4580 = vperm.xlu0 %9979, %v13575_v5   ;;  %10499 = vpow2.f32 %v4234_v63  ;;  %v4292_v24 = vmul.f32 1.442695, %v4105_v44  ;;  %v4107_v58 = vsub.f32 %v18306_v1, %v13621_v54  ;;  %v18308_v63 = vld [vmem:[#allocation119_spill] sm:$0xff]  ;;  %v18311_v1 = vld [vmem:[#allocation49_spill] sm:$0xff] }
 0x4a0   :  { %10501 = vpow2.f32 %v4288_v23  ;;  %v4242_v47 = vmul.f32 1.442695, %v4080_v55  ;;  %v4082_v28 = vsub.f32 %v18308_v63, %v13537_v51  ;;  %v13705_v23 = vrot.slane %v13465_v33, %v18310_v8  ;;  %v18313_v63 = vld [vmem:[#allocation118_spill] sm:$0xff] }
 0x4a1   :  { %v4296_v44 = vmul.f32 1.442695, %v4107_v58 }
 0x4a2   :  { %4646 = vperm.xlu1 %9980, %v13581_v40   ;;  %v4246_v55 = vmul.f32 1.442695, %v4082_v28 }
 0x4a3   :  { %4583 = vperm.xlu0 %9979, %v13585_v21  }
 0x4a6   :  { %4652 = vperm.xlu1 %9980, %v13591_v35  }
 0x4a7   :  { %4589 = vperm.xlu0 %9979, %v13595_v3  }
 0x4aa   :  { %4658 = vperm.xlu1 %9980, %v13601_v52  }
 0x4ab   :  { %4592 = vperm.xlu0 %9979, %v13605_v60  }
 0x4ae   :  { %4664 = vperm.xlu1 %9980, %v13611_v16  }
 0x4af   :  { %4595 = vperm.xlu0 %9979, %v13615_v36  }
 0x4b2   :  { %4670 = vperm.xlu1 %9980, %v13625_v19   ;;  %v13649_v19 = vpop.eup %10471  ;;  %10503 = vpow2.f32 %v4238_v18 }
 0x4b3   :  { %4598 = vperm.xlu0 %9979, %v13629_v15   ;;  %18289 = vst [vmem:[#allocation179_spill] sm:$0xff] %v13649_v19 }
 0x4b6   :  { %4676 = vperm.xlu1 %9980, %v13635_v4   ;;  %v13655_v4 = vpop.eup %10473  ;;  %10505 = vpow2.f32 %v4292_v24  ;;  %v18315_v24 = vld [vmem:[#allocation51_spill] sm:$0xff] }
 0x4b7   :  { %4601 = vperm.xlu0 %9979, %v13639_v22   ;;  %18291 = vst [vmem:[#allocation174_spill] sm:$0xff] %v13655_v4  ;;  %v13659_v16 = vpop.eup %10475  ;;  %10507 = vpow2.f32 %v4242_v47  ;;  %v4111_v58 = vsub.f32 %v18315_v24, %v13705_v23  ;;  %v18317_v47 = vld [vmem:[#allocation121_spill] sm:$0xff] }
 0x4b8   :  { %18293 = vst [vmem:[#allocation193_spill] sm:$0xff] %v13659_v16  ;;  %v4086_v28 = vsub.f32 %v18317_v47, %v13537_v51 }
 0x4ba   :  { %4682 = vperm.xlu1 %9980, %v13645_v2   ;;  %v13665_v2 = vpop.eup %10477  ;;  %10509 = vpow2.f32 %v4296_v44  ;;  %v4254_v24 = vmul.f32 1.442695, %v4086_v28 }
 0x4bb   :  { %4607 = vperm.xlu0 %9979, %v13649_v19   ;;  %18295 = vst [vmem:[#allocation176_spill] sm:$0xff] %v13665_v2  ;;  %v13669_v52 = vpop.eup %10479  ;;  %10511 = vpow2.f32 %v4246_v55 }
 0x4bc   :  { %18297 = vst [vmem:[#allocation192_spill] sm:$0xff] %v13669_v52 }
 0x4be   :  { %4688 = vperm.xlu1 %9980, %v13655_v4   ;;  %v13675_v4 = vpop.eup %10481 }
 0x4bf   :  { %4613 = vperm.xlu0 %9979, %v13659_v16   ;;  %18299 = vst [vmem:[#allocation181_spill] sm:$0xff] %v13675_v4  ;;  %v13679_v35 = vpop.eup %10483 }
 0x4c0   :  { %18301 = vst [vmem:[#allocation194_spill] sm:$0xff] %v13679_v35  ;;  %v13685_v39 = vpop.eup %10485 }
 0x4c1   :  { %18303 = vst [vmem:[#allocation175_spill] sm:$0xff] %v13685_v39 }
 0x4c2   :  { %4694 = vperm.xlu1 %9980, %v13665_v2   ;;  %v13689_v2 = vpop.eup %10487 }
 0x4c3   :  { %4619 = vperm.xlu0 %9979, %v13669_v52   ;;  %18305 = vst [vmem:[#allocation195_spill] sm:$0xff] %v13689_v2 }
 0x4c6   :  { %4700 = vperm.xlu1 %9980, %v13675_v4   ;;  %v13695_v4 = vpop.eup %10489 }
 0x4c7   :  { %4625 = vperm.xlu0 %9979, %v13679_v35   ;;  %18307 = vst [vmem:[#allocation183_spill] sm:$0xff] %v13695_v4  ;;  %v13699_v35 = vpop.eup %10491 }
 0x4c8   :  { %18309 = vst [vmem:[#allocation196_spill] sm:$0xff] %v13699_v35  ;;  %v13709_v18 = vpop.eup %10493 }
 0x4c9   :  { %18312 = vst [vmem:[#allocation177_spill] sm:$0xff] %v13709_v18  ;;  %v13713_v40 = vpop.eup %10495 }
 0x4ca   :  { %4706 = vperm.xlu1 %9980, %v13685_v39   ;;  %v4109_v39 = vsub.f32 %v18311_v1, %v13621_v54  ;;  %18314 = vst [vmem:[#allocation197_spill] sm:$0xff] %v13713_v40 }
 0x4cb   :  { %4631 = vperm.xlu0 %9979, %v13689_v2   ;;  %v4084_v2 = vsub.f32 %v18313_v63, %v13537_v51  ;;  %v4304_v63 = vmul.f32 1.442695, %v4111_v58 }
 0x4cc   :  { %v4300_v8 = vmul.f32 1.442695, %v4109_v39  ;;  %v18319_v39 = vld [vmem:[#allocation53_spill] sm:$0xff] }
 0x4cd   :  { %v4250_v1 = vmul.f32 1.442695, %v4084_v2  ;;  %v4113_v44 = vsub.f32 %v18319_v39, %v13705_v23  ;;  %v18321_v2 = vld [vmem:[#allocation120_spill] sm:$0xff] }
 0x4ce   :  { %4712 = vperm.xlu1 %9980, %v13695_v4   ;;  %v13719_v4 = vpop.eup %10497  ;;  %10513 = vpow2.f32 %v4300_v8  ;;  %v4088_v55 = vsub.f32 %v18321_v2, %v13537_v51  ;;  %v18323_v8 = vld [vmem:[#allocation139_spill] sm:$0xff] }
 0x4cf   :  { %4637 = vperm.xlu0 %9979, %v13699_v35   ;;  %18316 = vst [vmem:[#allocation184_spill] sm:$0xff] %v13719_v4  ;;  %v13723_v35 = vpop.eup %10499  ;;  %10515 = vpow2.f32 %v4250_v1  ;;  %v4308_v47 = vmul.f32 1.442695, %v4113_v44  ;;  %v4115_v58 = vsub.f32 %v18323_v8, %v13705_v23  ;;  %v18325_v1 = vld [vmem:[#allocation55_spill] sm:$0xff] }
 0x4d0   :  { %18318 = vst [vmem:[#allocation200_spill] sm:$0xff] %v13723_v35  ;;  %10517 = vpow2.f32 %v4304_v63  ;;  %v4258_v39 = vmul.f32 1.442695, %v4088_v55  ;;  %v4090_v28 = vsub.f32 %v18325_v1, %v13537_v51  ;;  %v18327_v63 = vld [vmem:[#allocation27_spill] sm:$0xff] }
 0x4d1   :  { %10519 = vpow2.f32 %v4254_v24  ;;  %v4312_v2 = vmul.f32 1.442695, %v4115_v58  ;;  %v4117_v44 = vsub.f32 %v18327_v63, %v13705_v23  ;;  %v18329_v24 = vld [vmem:[#allocation137_spill] sm:$0xff] }
 0x4d2   :  { %4718 = vperm.xlu1 %9980, %v13709_v18   ;;  %v13729_v18 = vpop.eup %10501  ;;  %10521 = vpow2.f32 %v4308_v47  ;;  %v4262_v8 = vmul.f32 1.442695, %v4090_v28  ;;  %v4092_v55 = vsub.f32 %v18329_v24, %v13537_v51  ;;  %v18331_v47 = vld [vmem:[#allocation122_spill] sm:$0xff] }
 0x4d3   :  { %4643 = vperm.xlu0 %9979, %v13713_v40   ;;  %18320 = vst [vmem:[#allocation180_spill] sm:$0xff] %v13729_v18  ;;  %v13733_v40 = vpop.eup %10503  ;;  %10523 = vpow2.f32 %v4258_v39  ;;  %v4316_v1 = vmul.f32 1.442695, %v4117_v44  ;;  %v4119_v58 = vsub.f32 %v18331_v47, %v13705_v23  ;;  %v18333_v39 = vld [vmem:[#allocation29_spill] sm:$0xff] }
 0x4d4   :  { %18322 = vst [vmem:[#allocation205_spill] sm:$0xff] %v13733_v40  ;;  %10525 = vpow2.f32 %v4312_v2  ;;  %v4266_v63 = vmul.f32 1.442695, %v4092_v55  ;;  %v4094_v28 = vsub.f32 %v18333_v39, %v13621_v54  ;;  %v18335_v2 = vld [vmem:[#allocation59_spill] sm:$0xff] }
 0x4d5   :  { %10527 = vpow2.f32 %v4262_v8  ;;  %v4320_v51 = vmul.f32 1.442695, %v4119_v58  ;;  %v4121_v44 = vsub.f32 %v18335_v2, %v13705_v23  ;;  %v18337_v8 = vld [vmem:[#allocation125_spill] sm:$0xff] }
 0x4d6   :  { %4724 = vperm.xlu1 %9980, %v13719_v4   ;;  %v13739_v4 = vpop.eup %10505  ;;  %10529 = vpow2.f32 %v4316_v1  ;;  %v4270_v47 = vmul.f32 1.442695, %v4094_v28  ;;  %v4096_v55 = vsub.f32 %v18337_v8, %v13621_v54  ;;  %v18339_v1 = vld [vmem:[#allocation141_spill] sm:$0xff]  ;;  %v18343_v8 = vld [vmem:[#allocation16_spill] sm:$0xff] }
 0x4d7   :  { %4649 = vperm.xlu0 %9979, %v13723_v35   ;;  %18324 = vst [vmem:[#allocation186_spill] sm:$0xff] %v13739_v4  ;;  %v13743_v35 = vpop.eup %10507  ;;  %10531 = vpow2.f32 %v4266_v63  ;;  %v4324_v39 = vmul.f32 1.442695, %v4121_v44  ;;  %v4123_v58 = vsub.f32 %v18339_v1, %v13705_v23  ;;  %v18341_v63 = vld [vmem:[#allocation61_spill] sm:$0xff] }
 0x4d8   :  { %18326 = vst [vmem:[#allocation22_spill] sm:$0xff] %v13743_v35  ;;  %10533 = vpow2.f32 %v4320_v51  ;;  %v4274_v2 = vmul.f32 1.442695, %v4096_v55  ;;  %v4098_v28 = vsub.f32 %v18341_v63, %v13621_v54  ;;  %v13789_v51 = vrot.slane %v13465_v33, %v18343_v8  ;;  %v18344_v1 = vld [vmem:[#allocation33_spill] sm:$0xff]  ;;  %v18346_v63 = vld [vmem:[#allocation63_spill] sm:$0xff] }
 0x4d9   :  { %10535 = vpow2.f32 %v4270_v47  ;;  %v4328_v44 = vmul.f32 1.442695, %v4123_v58 }
 0x4da   :  { %4730 = vperm.xlu1 %9980, %v13729_v18   ;;  %v13749_v18 = vpop.eup %10509  ;;  %10537 = vpow2.f32 %v4324_v39  ;;  %v4278_v55 = vmul.f32 1.442695, %v4098_v28  ;;  %v18348_v39 = vld [vmem:[#allocation35_spill] sm:$0xff] }
 0x4db   :  { %4655 = vperm.xlu0 %9979, %v13733_v40   ;;  %18328 = vst [vmem:[#allocation182_spill] sm:$0xff] %v13749_v18  ;;  %v13753_v40 = vpop.eup %10511  ;;  %10539 = vpow2.f32 %v4274_v2  ;;  %v4127_v58 = vsub.f32 %v18348_v39, %v13789_v51  ;;  %v18350_v2 = vld [vmem:[#allocation145_spill] sm:$0xff] }
 0x4dc   :  { %18330 = vst [vmem:[#allocation45_spill] sm:$0xff] %v13753_v40  ;;  %10541 = vpow2.f32 %v4328_v44  ;;  %v4102_v28 = vsub.f32 %v18350_v2, %v13621_v54 }
 0x4dd   :  { %10543 = vpow2.f32 %v4278_v55 }
 0x4de   :  { %4736 = vperm.xlu1 %9980, %v13739_v4   ;;  %v13759_v4 = vpop.eup %10513  ;;  %v4286_v39 = vmul.f32 1.442695, %v4102_v28  ;;  %v18358_v28 = vld [vmem:[#allocation129_spill] sm:$0xff] }
 0x4df   :  { %4661 = vperm.xlu0 %9979, %v13743_v35   ;;  %18332 = vst [vmem:[#allocation209_spill] sm:$0xff] %v13759_v4  ;;  %v13763_v35 = vpop.eup %10515 }
 0x4e0   :  { %18334 = vst [vmem:[#allocation188_spill] sm:$0xff] %v13763_v35  ;;  %v13769_v24 = vpop.eup %10517 }
 0x4e1   :  { %18336 = vst [vmem:[#allocation206_spill] sm:$0xff] %v13769_v24 }
 0x4e2   :  { %4742 = vperm.xlu1 %9980, %v13749_v18   ;;  %v13773_v18 = vpop.eup %10519 }
 0x4e3   :  { %4667 = vperm.xlu0 %9979, %v13753_v40   ;;  %18338 = vst [vmem:[#allocation185_spill] sm:$0xff] %v13773_v18 }
 0x4e6   :  { %4748 = vperm.xlu1 %9980, %v13759_v4   ;;  %v13779_v4 = vpop.eup %10521 }
 0x4e7   :  { %4673 = vperm.xlu0 %9979, %v13763_v35   ;;  %18340 = vst [vmem:[#allocation96_spill] sm:$0xff] %v13779_v4  ;;  %v13783_v35 = vpop.eup %10523 }
 0x4e8   :  { %18342 = vst [vmem:[#allocation187_spill] sm:$0xff] %v13783_v35  ;;  %v13793_v47 = vpop.eup %10525 }
 0x4e9   :  { %18345 = vst [vmem:[#allocation157_spill] sm:$0xff] %v13793_v47  ;;  %v13797_v40 = vpop.eup %10527 }
 0x4ea   :  { %4754 = vperm.xlu1 %9980, %v13769_v24   ;;  %v4125_v24 = vsub.f32 %v18344_v1, %v13705_v23  ;;  %18347 = vst [vmem:[#allocation152_spill] sm:$0xff] %v13797_v40 }
 0x4eb   :  { %4679 = vperm.xlu0 %9979, %v13773_v18   ;;  %v4100_v18 = vsub.f32 %v18346_v63, %v13621_v54  ;;  %v4336_v63 = vmul.f32 1.442695, %v4127_v58 }
 0x4ec   :  { %v4332_v8 = vmul.f32 1.442695, %v4125_v24  ;;  %v18352_v24 = vld [vmem:[#allocation126_spill] sm:$0xff] }
 0x4ed   :  { %v4282_v1 = vmul.f32 1.442695, %v4100_v18  ;;  %v4129_v44 = vsub.f32 %v18352_v24, %v13789_v51  ;;  %v18354_v18 = vld [vmem:[#allocation37_spill] sm:$0xff] }
 0x4ee   :  { %4760 = vperm.xlu1 %9980, %v13779_v4   ;;  %v13803_v4 = vpop.eup %10529  ;;  %10545 = vpow2.f32 %v4332_v8  ;;  %v4104_v55 = vsub.f32 %v18354_v18, %v13621_v54  ;;  %v18356_v8 = vld [vmem:[#allocation67_spill] sm:$0xff]  ;;  %v4106_v18 = vsub.f32 %v18358_v28, %v13621_v54  ;;  %v18363_v28 = vld [vmem:[#allocation69_spill] sm:$0xff] }
 0x4ef   :  { %4685 = vperm.xlu0 %9979, %v13783_v35   ;;  %18349 = vst [vmem:[#allocation160_spill] sm:$0xff] %v13803_v4  ;;  %v13807_v35 = vpop.eup %10531  ;;  %10547 = vpow2.f32 %v4282_v1  ;;  %v4340_v2 = vmul.f32 1.442695, %v4129_v44  ;;  %v4131_v58 = vsub.f32 %v18356_v8, %v13789_v51  ;;  %v18360_v44 = vld [vmem:[#allocation148_spill] sm:$0xff] }
 0x4f0   :  { %18351 = vst [vmem:[#allocation166_spill] sm:$0xff] %v13807_v35  ;;  %10549 = vpow2.f32 %v4336_v63  ;;  %v4290_v1 = vmul.f32 1.442695, %v4104_v55  ;;  %v4133_v8 = vsub.f32 %v18360_v44, %v13789_v51  ;;  %v4294_v55 = vmul.f32 1.442695, %v4106_v18 }
 0x4f1   :  { %10551 = vpow2.f32 %v4286_v39  ;;  %v4344_v63 = vmul.f32 1.442695, %v4131_v58  ;;  %v18365_v58 = vld [vmem:[#allocation41_spill] sm:$0xff] }
 0x4f2   :  { %4766 = vperm.xlu1 %9980, %v13793_v47   ;;  %v13813_v47 = vpop.eup %10533  ;;  %10553 = vpow2.f32 %v4340_v2  ;;  %v4348_v2 = vmul.f32 1.442695, %v4133_v8  ;;  %v4135_v44 = vsub.f32 %v18365_v58, %v13789_v51  ;;  %v18369_v8 = vld [vmem:[#allocation44_spill] sm:$0xff] }
 0x4f3   :  { %4691 = vperm.xlu0 %9979, %v13797_v40   ;;  %18353 = vst [vmem:[#allocation161_spill] sm:$0xff] %v13813_v47  ;;  %v13817_v40 = vpop.eup %10535  ;;  %10555 = vpow2.f32 %v4290_v1  ;;  %v4137_v58 = vsub.f32 %v18369_v8, %v13789_v51 }
 0x4f4   :  { %18355 = vst [vmem:[#allocation168_spill] sm:$0xff] %v13817_v40  ;;  %10557 = vpow2.f32 %v4344_v63  ;;  %v4352_v63 = vmul.f32 1.442695, %v4135_v44  ;;  %v18373_v44 = vld [vmem:[#allocation46_spill] sm:$0xff] }
 0x4f5   :  { %10559 = vpow2.f32 %v4294_v55  ;;  %v4139_v8 = vsub.f32 %v18373_v44, %v13789_v51 }
 0x4f6   :  { %4772 = vperm.xlu1 %9980, %v13803_v4   ;;  %v13823_v4 = vpop.eup %10537  ;;  %10561 = vpow2.f32 %v4348_v2  ;;  %v4356_v2 = vmul.f32 1.442695, %v4137_v58 }
 0x4f7   :  { %4697 = vperm.xlu0 %9979, %v13807_v35   ;;  %18357 = vst [vmem:[#allocation162_spill] sm:$0xff] %v13823_v4  ;;  %v13829_v35 = vpop.eup %10539  ;;  %v4360_v44 = vmul.f32 1.442695, %v4139_v8  ;;  %v18382_v8 = vld [vmem:[#allocation50_spill] sm:$0xff] }
 0x4f8   :  { %18359 = vst [vmem:[#allocation154_spill] sm:$0xff] %v13829_v35 }
 0x4fa   :  { %4778 = vperm.xlu1 %9980, %v13813_v47   ;;  %v13837_v47 = vpop.eup %10541 }
 0x4fb   :  { %4703 = vperm.xlu0 %9979, %v13817_v40   ;;  %18361 = vst [vmem:[#allocation163_spill] sm:$0xff] %v13837_v47  ;;  %v4108_v40 = vsub.f32 %v18363_v28, %v13621_v54  ;;  %v13843_v59 = vpop.eup %10543  ;;  %v18367_v54 = vld [vmem:[#allocation71_spill] sm:$0xff] }
 0x4fc   :  { %18364 = vst [vmem:[#allocation164_spill] sm:$0xff] %v13843_v59  ;;  %v4110_v28 = vsub.f32 %v18367_v54, %v13705_v23  ;;  %v18371_v54 = vld [vmem:[#allocation73_spill] sm:$0xff] }
 0x4fd   :  { %v13825_v24 = vpop.permute.xlu1 %4586  ;;  %v4298_v18 = vmul.f32 1.442695, %v4108_v40 }
 0x4fe   :  { %v13831_v52 = vpop.permute.xlu0 %4559  ;;  %4784 = vperm.xlu1 %9980, %v13823_v4   ;;  %v13851_v4 = vpop.eup %10545  ;;  %v4302_v40 = vmul.f32 1.442695, %v4110_v28 }
 0x4ff   :  { %4709 = vperm.xlu0 %9979, %v13829_v35   ;;  %18366 = vst [vmem:[#allocation155_spill] sm:$0xff] %v13851_v4  ;;  %v13857_v35 = vpop.eup %10547  ;;  %10563 = vpow2.f32 %v4298_v18 }
 0x500   :  { %18368 = vst [vmem:[#allocation165_spill] sm:$0xff] %v13857_v35  ;;  %10565 = vpow2.f32 %v4352_v63  ;;  %v18377_v63 = vld [vmem:[#allocation25_spill] sm:$0xff] }
 0x501   :  { %v13839_v39 = vpop.permute.xlu1 %4604  ;;  %10567 = vpow2.f32 %v4302_v40  ;;  %v13893_v58 = vrot.slane %v13465_v33, %v18377_v63  ;;  %v18378_v40 = vld [vmem:[#allocation48_spill] sm:$0xff] }
 0x502   :  { %18362 = vst [vmem:[#allocation170_spill] sm:$0xff] %v13839_v39  ;;  %v13845_v12 = vpop.permute.xlu0 %4562  ;;  %4790 = vperm.xlu1 %9980, %v13837_v47   ;;  %v13865_v47 = vpop.eup %10549  ;;  %10569 = vpow2.f32 %v4356_v2 }
 0x503   :  { %4715 = vperm.xlu0 %9979, %v13843_v59   ;;  %18370 = vst [vmem:[#allocation107_spill] sm:$0xff] %v13865_v47  ;;  %v4112_v59 = vsub.f32 %v18371_v54, %v13705_v23  ;;  %v13871_v19 = vpop.eup %10551  ;;  %v18375_v54 = vld [vmem:[#allocation75_spill] sm:$0xff] }
 0x504   :  { %18372 = vst [vmem:[#allocation167_spill] sm:$0xff] %v13871_v19 }
 0x505   :  { %v13853_v1 = vpop.permute.xlu1 %4610  ;;  %v4306_v28 = vmul.f32 1.442695, %v4112_v59  ;;  %v4141_v59 = vsub.f32 %v18378_v40, %v13789_v51  ;;  %v4143_v40 = vsub.f32 %v18382_v8, %v13893_v58 }
 0x506   :  { %v13859_v16 = vpop.permute.xlu0 %4565  ;;  %4796 = vperm.xlu1 %9980, %v13851_v4   ;;  %v13879_v4 = vpop.eup %10553 }
 0x507   :  { %4721 = vperm.xlu0 %9979, %v13857_v35   ;;  %18374 = vst [vmem:[#allocation156_spill] sm:$0xff] %v13879_v4  ;;  %v4114_v35 = vsub.f32 %v18375_v54, %v13705_v23  ;;  %v13885_v15 = vpop.eup %10555  ;;  %10571 = vpow2.f32 %v4306_v28  ;;  %v4364_v2 = vmul.f32 1.442695, %v4141_v59  ;;  %v18386_v59 = vld [vmem:[#allocation52_spill] sm:$0xff] }
 0x508   :  { %18376 = vst [vmem:[#allocation169_spill] sm:$0xff] %v13885_v15  ;;  %10573 = vpow2.f32 %v4360_v44  ;;  %v4368_v44 = vmul.f32 1.442695, %v4143_v40  ;;  %v4145_v8 = vsub.f32 %v18386_v59, %v13893_v58  ;;  %v18390_v40 = vld [vmem:[#allocation54_spill] sm:$0xff] }
 0x509   :  { %v13867_v55 = vpop.permute.xlu1 %4616  ;;  %v4147_v59 = vsub.f32 %v18390_v40, %v13893_v58 }
 0x50a   :  { %v13873_v22 = vpop.permute.xlu0 %4568  ;;  %4802 = vperm.xlu1 %9980, %v13865_v47   ;;  %v13897_v47 = vpop.eup %10557 }
 0x50b   :  { %4727 = vperm.xlu0 %9979, %v13871_v19   ;;  %18379 = vst [vmem:[#allocation26_spill] sm:$0xff] %v13897_v47  ;;  %v4310_v19 = vmul.f32 1.442695, %v4114_v35  ;;  %v13903_v60 = vpop.eup %10559 }
 0x50c   :  { %18381 = vst [vmem:[#allocation171_spill] sm:$0xff] %v13903_v60  ;;  %v13911_v63 = vpop.eup %10561 }
 0x50d   :  { %v13881_v18 = vpop.permute.xlu1 %4622  ;;  %18383 = vst [vmem:[#allocation10_spill] sm:$0xff] %v13911_v63  ;;  %10575 = vpow2.f32 %v4310_v19  ;;  %v13917_v9 = vpop.eup %10563 }
 0x50e   :  { %v13887_v36 = vpop.permute.xlu0 %4571  ;;  %4808 = vperm.xlu1 %9980, %v13879_v4   ;;  %v4116_v4 = vsub.f32 %v18380_v6, %v13705_v23  ;;  %v18384_v6 = vld [vmem:[#allocation79_spill] sm:$0xff]  ;;  %18385 = vst [vmem:[#allocation9_spill] sm:$0xff] %v13917_v9  ;;  %10577 = vpow2.f32 %v4364_v2  ;;  %v4372_v2 = vmul.f32 1.442695, %v4145_v8  ;;  %v18395_v8 = vld [vmem:[#allocation56_spill] sm:$0xff] }
 0x50f   :  { %4733 = vperm.xlu0 %9979, %v13885_v15   ;;  %v4118_v3 = vsub.f32 %v18384_v6, %v13705_v23  ;;  %v18388_v6 = vld [vmem:[#allocation81_spill] sm:$0xff]  ;;  %v4149_v40 = vsub.f32 %v18395_v8, %v13893_v58 }
 0x510   :  { %v4314_v35 = vmul.f32 1.442695, %v4116_v4 }
 0x511   :  { %v13899_v54 = vpop.permute.xlu1 %4628  ;;  %v4318_v4 = vmul.f32 1.442695, %v4118_v3 }
 0x512   :  { %v13905_v15 = vpop.permute.xlu0 %4574  ;;  %4814 = vperm.xlu1 %9980, %v13897_v47   ;;  %v13925_v47 = vpop.eup %10565  ;;  %10579 = vpow2.f32 %v4314_v35 }
 0x513   :  { %4739 = vperm.xlu0 %9979, %v13903_v60   ;;  %18387 = vst [vmem:[#allocation158_spill] sm:$0xff] %v13925_v47  ;;  %v4120_v60 = vsub.f32 %v18388_v6, %v13705_v23  ;;  %v13931_v30 = vpop.eup %10567  ;;  %10581 = vpow2.f32 %v4368_v44  ;;  %v18393_v6 = vld [vmem:[#allocation83_spill] sm:$0xff]  ;;  %v4376_v44 = vmul.f32 1.442695, %v4147_v59  ;;  %v18400_v59 = vld [vmem:[#allocation58_spill] sm:$0xff] }
 0x514   :  { %18389 = vst [vmem:[#allocation109_spill] sm:$0xff] %v13931_v30  ;;  %10583 = vpow2.f32 %v4318_v4  ;;  %v4151_v8 = vsub.f32 %v18400_v59, %v13893_v58 }
 0x515   :  { %v13913_v28 = vpop.permute.xlu1 %4634  ;;  %v4322_v3 = vmul.f32 1.442695, %v4120_v60  ;;  %10585 = vpow2.f32 %v4372_v2  ;;  %v4380_v2 = vmul.f32 1.442695, %v4149_v40  ;;  %v18404_v40 = vld [vmem:[#allocation142_spill] sm:$0xff] }
 0x516   :  { %v13919_v48 = vpop.permute.xlu0 %4577  ;;  %4820 = vperm.xlu1 %9980, %v13911_v63   ;;  %v13939_v63 = vpop.eup %10569  ;;  %v4153_v59 = vsub.f32 %v18404_v40, %v13893_v58 }
 0x517   :  { %4745 = vperm.xlu0 %9979, %v13917_v9   ;;  %18391 = vst [vmem:[#allocation108_spill] sm:$0xff] %v13939_v63  ;;  %v4122_v9 = vsub.f32 %v18393_v6, %v13705_v23  ;;  %v13945_v27 = vpop.eup %10571  ;;  %10587 = vpow2.f32 %v4322_v3  ;;  %v18398_v6 = vld [vmem:[#allocation85_spill] sm:$0xff] }
 0x518   :  { %18394 = vst [vmem:[#allocation159_spill] sm:$0xff] %v13945_v27  ;;  %10589 = vpow2.f32 %v4376_v44  ;;  %v4384_v44 = vmul.f32 1.442695, %v4151_v8  ;;  %v18408_v8 = vld [vmem:[#allocation89_spill] sm:$0xff] }
 0x519   :  { %v13927_v19 = vpop.permute.xlu1 %4640  ;;  %v4326_v60 = vmul.f32 1.442695, %v4122_v9  ;;  %v4155_v40 = vsub.f32 %v18408_v8, %v13893_v58 }
 0x51a   :  { %v13933_v5 = vpop.permute.xlu0 %4580  ;;  %4826 = vperm.xlu1 %9980, %v13925_v47   ;;  %v13953_v47 = vpop.eup %10573 }
 0x51b   :  { %4751 = vperm.xlu0 %9979, %v13931_v30   ;;  %18396 = vst [vmem:[#allocation11_spill] sm:$0xff] %v13953_v47  ;;  %v4124_v30 = vsub.f32 %v18398_v6, %v13705_v23  ;;  %v13959_v37 = vpop.eup %10575  ;;  %10591 = vpow2.f32 %v4326_v60  ;;  %v18402_v23 = vld [vmem:[#allocation87_spill] sm:$0xff]  ;;  %v4392_v8 = vmul.f32 1.442695, %v4155_v40 }
 0x51c   :  { %18399 = vst [vmem:[#allocation111_spill] sm:$0xff] %v13959_v37  ;;  %v4126_v6 = vsub.f32 %v18402_v23, %v13789_v51  ;;  %10593 = vpow2.f32 %v4380_v2  ;;  %v18406_v23 = vld [vmem:[#allocation60_spill] sm:$0xff]  ;;  %v4388_v2 = vmul.f32 1.442695, %v4153_v59 }
 0x51d   :  { %v13941_v35 = vpop.permute.xlu1 %4646  ;;  %v4330_v9 = vmul.f32 1.442695, %v4124_v30 }
 0x51e   :  { %18392 = vst [vmem:[#allocation28_spill] sm:$0xff] %v13941_v35  ;;  %v13947_v0 = vpop.permute.xlu0 %4583  ;;  %4832 = vperm.xlu1 %9980, %v13939_v63   ;;  %v13967_v63 = vpop.eup %10577  ;;  %v4334_v30 = vmul.f32 1.442695, %v4126_v6 }
 0x51f   :  { %4757 = vperm.xlu0 %9979, %v13945_v27   ;;  %18401 = vst [vmem:[#allocation12_spill] sm:$0xff] %v13967_v63  ;;  %v13973_v27 = vpop.eup %10579  ;;  %10595 = vpow2.f32 %v4330_v9 }
 0x520   :  { %18403 = vst [vmem:[#allocation32_spill] sm:$0xff] %v13973_v27  ;;  %10597 = vpow2.f32 %v4384_v44  ;;  %v18412_v44 = vld [vmem:[#allocation42_spill] sm:$0xff] }
 0x521   :  { %v13955_v4 = vpop.permute.xlu1 %4652  ;;  %10599 = vpow2.f32 %v4334_v30  ;;  %v14009_v59 = vrot.slane %v13465_v33, %v18412_v44  ;;  %v18413_v30 = vld [vmem:[#allocation62_spill] sm:$0xff] }
 0x522   :  { %18397 = vst [vmem:[#allocation30_spill] sm:$0xff] %v13955_v4  ;;  %v13961_v11 = vpop.permute.xlu0 %4589  ;;  %4838 = vperm.xlu1 %9980, %v13953_v47   ;;  %v13981_v47 = vpop.eup %10581  ;;  %10601 = vpow2.f32 %v4388_v2  ;;  %v18418_v2 = vld [vmem:[#allocation146_spill] sm:$0xff] }
 0x523   :  { %4763 = vperm.xlu0 %9979, %v13959_v37   ;;  %18405 = vst [vmem:[#allocation110_spill] sm:$0xff] %v13981_v47  ;;  %v4128_v37 = vsub.f32 %v18406_v23, %v13789_v51  ;;  %v13987_v49 = vpop.eup %10583  ;;  %v18410_v23 = vld [vmem:[#allocation140_spill] sm:$0xff]  ;;  %v4159_v40 = vsub.f32 %v18418_v2, %v14009_v59 }
 0x524   :  { %18407 = vst [vmem:[#allocation34_spill] sm:$0xff] %v13987_v49 }
 0x525   :  { %v13969_v3 = vpop.permute.xlu1 %4658  ;;  %v4338_v6 = vmul.f32 1.442695, %v4128_v37  ;;  %v4157_v37 = vsub.f32 %v18413_v30, %v13893_v58 }
 0x526   :  { %v13975_v20 = vpop.permute.xlu0 %4592  ;;  %4844 = vperm.xlu1 %9980, %v13967_v63   ;;  %v13995_v63 = vpop.eup %10585 }
 0x527   :  { %4769 = vperm.xlu0 %9979, %v13973_v27   ;;  %18409 = vst [vmem:[#allocation113_spill] sm:$0xff] %v13995_v63  ;;  %v4130_v27 = vsub.f32 %v18410_v23, %v13789_v51  ;;  %v14001_v14 = vpop.eup %10587  ;;  %10603 = vpow2.f32 %v4338_v6  ;;  %v4396_v33 = vmul.f32 1.442695, %v4157_v37  ;;  %v18423_v37 = vld [vmem:[#allocation93_spill] sm:$0xff] }
 0x528   :  { %18411 = vst [vmem:[#allocation36_spill] sm:$0xff] %v14001_v14  ;;  %10605 = vpow2.f32 %v4392_v8  ;;  %v4400_v8 = vmul.f32 1.442695, %v4159_v40  ;;  %v4161_v2 = vsub.f32 %v18423_v37, %v14009_v59  ;;  %v18428_v40 = vld [vmem:[#allocation66_spill] sm:$0xff] }
 0x529   :  { %v13983_v60 = vpop.permute.xlu1 %4664  ;;  %v4163_v37 = vsub.f32 %v18428_v40, %v14009_v59 }
 0x52a   :  { %v13989_v62 = vpop.permute.xlu0 %4595  ;;  %4850 = vperm.xlu1 %9980, %v13981_v47   ;;  %v14013_v47 = vpop.eup %10589 }
 0x52b   :  { %4775 = vperm.xlu0 %9979, %v13987_v49   ;;  %18414 = vst [vmem:[#allocation112_spill] sm:$0xff] %v14013_v47  ;;  %v4342_v49 = vmul.f32 1.442695, %v4130_v27  ;;  %v14019_v29 = vpop.eup %10591 }
 0x52c   :  { %18416 = vst [vmem:[#allocation15_spill] sm:$0xff] %v14019_v29  ;;  %v14027_v30 = vpop.eup %10593 }
 0x52d   :  { %v13997_v9 = vpop.permute.xlu1 %4670  ;;  %18419 = vst [vmem:[#allocation115_spill] sm:$0xff] %v14027_v30  ;;  %10607 = vpow2.f32 %v4342_v49  ;;  %v14033_v61 = vpop.eup %10595 }
 0x52e   :  { %v14003_v56 = vpop.permute.xlu0 %4598  ;;  %4856 = vperm.xlu1 %9980, %v13995_v63   ;;  %v4132_v63 = vsub.f32 %v18415_v32, %v13789_v51  ;;  %v18421_v32 = vld [vmem:[#allocation64_spill] sm:$0xff]  ;;  %18422 = vst [vmem:[#allocation40_spill] sm:$0xff] %v14033_v61  ;;  %10609 = vpow2.f32 %v4396_v33  ;;  %v4404_v33 = vmul.f32 1.442695, %v4161_v2  ;;  %v18433_v2 = vld [vmem:[#allocation149_spill] sm:$0xff] }
 0x52f   :  { %4781 = vperm.xlu0 %9979, %v14001_v14   ;;  %v4134_v44 = vsub.f32 %v18421_v32, %v13789_v51  ;;  %v18426_v32 = vld [vmem:[#allocation144_spill] sm:$0xff]  ;;  %v4165_v40 = vsub.f32 %v18433_v2, %v14009_v59 }
 0x530   :  { %v4346_v27 = vmul.f32 1.442695, %v4132_v63 }
 0x531   :  { %v14015_v23 = vpop.permute.xlu1 %4676  ;;  %v4350_v63 = vmul.f32 1.442695, %v4134_v44 }
 0x532   :  { %v14021_v14 = vpop.permute.xlu0 %4601  ;;  %4862 = vperm.xlu1 %9980, %v14013_v47   ;;  %v14041_v47 = vpop.eup %10597  ;;  %10611 = vpow2.f32 %v4346_v27 }
 0x533   :  { %18417 = vst [vmem:[#allocation38_spill] sm:$0xff] %v14021_v14  ;;  %4787 = vperm.xlu0 %9979, %v14019_v29   ;;  %18424 = vst [vmem:[#allocation114_spill] sm:$0xff] %v14041_v47  ;;  %v4136_v29 = vsub.f32 %v18426_v32, %v13789_v51  ;;  %v14047_v45 = vpop.eup %10599  ;;  %10613 = vpow2.f32 %v4400_v8  ;;  %v18431_v32 = vld [vmem:[#allocation95_spill] sm:$0xff]  ;;  %v4408_v8 = vmul.f32 1.442695, %v4163_v37  ;;  %v18438_v37 = vld [vmem:[#allocation97_spill] sm:$0xff] }
 0x534   :  { %18427 = vst [vmem:[#allocation43_spill] sm:$0xff] %v14047_v45  ;;  %10615 = vpow2.f32 %v4350_v63  ;;  %v4167_v2 = vsub.f32 %v18438_v37, %v14009_v59 }
 0x535   :  { %v14029_v6 = vpop.permute.xlu1 %4682  ;;  %v4354_v44 = vmul.f32 1.442695, %v4136_v29  ;;  %10617 = vpow2.f32 %v4404_v33  ;;  %v4412_v33 = vmul.f32 1.442695, %v4165_v40  ;;  %v18443_v40 = vld [vmem:[#allocation70_spill] sm:$0xff] }
 0x536   :  { %18420 = vst [vmem:[#allocation17_spill] sm:$0xff] %v14029_v6  ;;  %v14035_v21 = vpop.permute.xlu0 %4607  ;;  %4868 = vperm.xlu1 %9980, %v14027_v30   ;;  %v14055_v30 = vpop.eup %10601  ;;  %v4169_v37 = vsub.f32 %v18443_v40, %v14009_v59 }
 0x537   :  { %4793 = vperm.xlu0 %9979, %v14033_v61   ;;  %18429 = vst [vmem:[#allocation117_spill] sm:$0xff] %v14055_v30  ;;  %v4138_v61 = vsub.f32 %v18431_v32, %v13789_v51  ;;  %10619 = vpow2.f32 %v4354_v44  ;;  %v18436_v32 = vld [vmem:[#allocation68_spill] sm:$0xff] }
 0x538   :  { %10621 = vpow2.f32 %v4408_v8  ;;  %v4416_v8 = vmul.f32 1.442695, %v4167_v2  ;;  %v18448_v2 = vld [vmem:[#allocation153_spill] sm:$0xff] }
 0x539   :  { %v14043_v49 = vpop.permute.xlu1 %4688  ;;  %v4358_v29 = vmul.f32 1.442695, %v4138_v61  ;;  %v4171_v40 = vsub.f32 %v18448_v2, %v14009_v59 }
 0x53a   :  { %18425 = vst [vmem:[#allocation18_spill] sm:$0xff] %v14043_v49  ;;  %v14049_v4 = vpop.permute.xlu0 %4613  ;;  %4874 = vperm.xlu1 %9980, %v14041_v47   ;;  %v14061_v49 = vpop.eup %10603 }
 0x53b   :  { %4799 = vperm.xlu0 %9979, %v14047_v45   ;;  %18432 = vst [vmem:[#allocation116_spill] sm:$0xff] %v14061_v49  ;;  %v14069_v47 = vpop.eup %10605  ;;  %v4140_v45 = vsub.f32 %v18436_v32, %v13789_v51  ;;  %10623 = vpow2.f32 %v4358_v29  ;;  %v18441_v51 = vld [vmem:[#allocation147_spill] sm:$0xff] }
 0x53c   :  { %18434 = vst [vmem:[#allocation20_spill] sm:$0xff] %v14069_v47  ;;  %v4142_v32 = vsub.f32 %v18441_v51, %v13893_v58  ;;  %10625 = vpow2.f32 %v4412_v33  ;;  %v18446_v51 = vld [vmem:[#allocation99_spill] sm:$0xff]  ;;  %v4420_v33 = vmul.f32 1.442695, %v4169_v37  ;;  %v18453_v37 = vld [vmem:[#allocation101_spill] sm:$0xff] }
 0x53d   :  { %v14057_v27 = vpop.permute.xlu1 %4694  ;;  %v4362_v61 = vmul.f32 1.442695, %v4140_v45  ;;  %v4173_v2 = vsub.f32 %v18453_v37, %v14009_v59 }
 0x53e   :  { %18430 = vst [vmem:[#allocation19_spill] sm:$0xff] %v14057_v27  ;;  %v14063_v39 = vpop.permute.xlu0 %4619  ;;  %4880 = vperm.xlu1 %9980, %v14055_v30   ;;  %v14075_v27 = vpop.eup %10607  ;;  %v4366_v45 = vmul.f32 1.442695, %v4142_v32 }
 0x53f   :  { %4805 = vperm.xlu0 %9979, %v14061_v49   ;;  %18437 = vst [vmem:[#allocation119_spill] sm:$0xff] %v14075_v27  ;;  %v14083_v30 = vpop.eup %10609  ;;  %10627 = vpow2.f32 %v4362_v61 }
 0x540   :  { %18439 = vst [vmem:[#allocation49_spill] sm:$0xff] %v14083_v30  ;;  %v14089_v49 = vpop.eup %10611  ;;  %10629 = vpow2.f32 %v4416_v8  ;;  %v4424_v8 = vmul.f32 1.442695, %v4171_v40 }
 0x541   :  { %v14071_v63 = vpop.permute.xlu1 %4700  ;;  %18442 = vst [vmem:[#allocation51_spill] sm:$0xff] %v14089_v49  ;;  %10631 = vpow2.f32 %v4366_v45 }
 0x542   :  { %18435 = vst [vmem:[#allocation47_spill] sm:$0xff] %v14071_v63  ;;  %v14077_v17 = vpop.permute.xlu0 %4625  ;;  %4886 = vperm.xlu1 %9980, %v14069_v47   ;;  %v14097_v47 = vpop.eup %10613  ;;  %10633 = vpow2.f32 %v4420_v33  ;;  %v4428_v33 = vmul.f32 1.442695, %v4173_v2 }
 0x543   :  { %4811 = vperm.xlu0 %9979, %v14075_v27   ;;  %18444 = vst [vmem:[#allocation121_spill] sm:$0xff] %v14097_v47  ;;  %v4144_v27 = vsub.f32 %v18446_v51, %v13893_v58  ;;  %v14103_v6 = vpop.eup %10615  ;;  %v18451_v51 = vld [vmem:[#allocation72_spill] sm:$0xff] }
 0x544   :  { %18447 = vst [vmem:[#allocation120_spill] sm:$0xff] %v14103_v6 }
 0x545   :  { %v14085_v44 = vpop.permute.xlu1 %4706  ;;  %v4370_v32 = vmul.f32 1.442695, %v4144_v27 }
 0x546   :  { %18440 = vst [vmem:[#allocation118_spill] sm:$0xff] %v14085_v44  ;;  %v14091_v63 = vpop.permute.xlu0 %4631  ;;  %4892 = vperm.xlu1 %9980, %v14083_v30   ;;  %v14111_v30 = vpop.eup %10617 }
 0x547   :  { %4817 = vperm.xlu0 %9979, %v14089_v49   ;;  %18449 = vst [vmem:[#allocation139_spill] sm:$0xff] %v14111_v30  ;;  %v4146_v49 = vsub.f32 %v18451_v51, %v13893_v58  ;;  %10635 = vpow2.f32 %v4370_v32  ;;  %v18456_v51 = vld [vmem:[#allocation151_spill] sm:$0xff] }
 0x548   :  { %10637 = vpow2.f32 %v4424_v8 }
 0x549   :  { %v14099_v29 = vpop.permute.xlu1 %4712  ;;  %v4374_v27 = vmul.f32 1.442695, %v4146_v49  ;;  %v18461_v49 = vld [vmem:[#allocation103_spill] sm:$0xff] }
 0x54a   :  { %18445 = vst [vmem:[#allocation53_spill] sm:$0xff] %v14099_v29  ;;  %v14105_v35 = vpop.permute.xlu0 %4637  ;;  %4898 = vperm.xlu1 %9980, %v14097_v47   ;;  %v14117_v29 = vpop.eup %10619 }
 0x54b   :  { %4823 = vperm.xlu0 %9979, %v14103_v6   ;;  %18452 = vst [vmem:[#allocation27_spill] sm:$0xff] %v14117_v29  ;;  %v14125_v47 = vpop.eup %10621  ;;  %v4148_v6 = vsub.f32 %v18456_v51, %v13893_v58  ;;  %10639 = vpow2.f32 %v4374_v27 }
 0x54c   :  { %18454 = vst [vmem:[#allocation137_spill] sm:$0xff] %v14125_v47  ;;  %10641 = vpow2.f32 %v4428_v33 }
 0x54d   :  { %v14113_v61 = vpop.permute.xlu1 %4718  ;;  %v4378_v32 = vmul.f32 1.442695, %v4148_v6  ;;  %v18465_v6 = vld [vmem:[#allocation105_spill] sm:$0xff] }
 0x54e   :  { %18450 = vst [vmem:[#allocation55_spill] sm:$0xff] %v14113_v61  ;;  %v14119_v44 = vpop.permute.xlu0 %4643  ;;  %4904 = vperm.xlu1 %9980, %v14111_v30   ;;  %v14131_v61 = vpop.eup %10623  ;;  %v4150_v30 = vsub.f32 %v18461_v49, %v13893_v58  ;;  %v4152_v27 = vsub.f32 %v18465_v6, %v13893_v58 }
 0x54f   :  { %4829 = vperm.xlu0 %9979, %v14117_v29   ;;  %18457 = vst [vmem:[#allocation29_spill] sm:$0xff] %v14131_v61  ;;  %v14137_v40 = vpop.eup %10625  ;;  %10643 = vpow2.f32 %v4378_v32  ;;  %v18469_v32 = vld [vmem:[#allocation106_spill] sm:$0xff] }
 0x550   :  { %18459 = vst [vmem:[#allocation125_spill] sm:$0xff] %v14137_v40  ;;  %v14143_v51 = vpop.eup %10627 }
 0x551   :  { %v14127_v45 = vpop.permute.xlu1 %4724  ;;  %18462 = vst [vmem:[#allocation61_spill] sm:$0xff] %v14143_v51  ;;  %v14149_v8 = vpop.eup %10629 }
 0x552   :  { %18455 = vst [vmem:[#allocation122_spill] sm:$0xff] %v14127_v45  ;;  %v14133_v14 = vpop.permute.xlu0 %4649  ;;  %4910 = vperm.xlu1 %9980, %v14125_v47   ;;  %18463 = vst [vmem:[#allocation33_spill] sm:$0xff] %v14149_v8  ;;  %v4382_v47 = vmul.f32 1.442695, %v4150_v30  ;;  %v4154_v30 = vsub.f32 %v18469_v32, %v13893_v58 }
 0x553   :  { %18458 = vst [vmem:[#allocation59_spill] sm:$0xff] %v14133_v14  ;;  %4835 = vperm.xlu0 %9979, %v14131_v61   ;;  %v14155_v61 = vpop.eup %10631 }
 0x554   :  { %18466 = vst [vmem:[#allocation35_spill] sm:$0xff] %v14155_v61  ;;  %10645 = vpow2.f32 %v4382_v47  ;;  %v18473_v47 = vld [vmem:[#allocation82_spill] sm:$0xff] }
 0x555   :  { %v14139_v37 = vpop.permute.xlu1 %4730 }
 0x556   :  { %18460 = vst [vmem:[#allocation141_spill] sm:$0xff] %v14139_v37  ;;  %v14145_v29 = vpop.permute.xlu0 %4655  ;;  %4916 = vperm.xlu1 %9980, %v14137_v40   ;;  %v14161_v40 = vpop.eup %10633  ;;  %v4390_v37 = vmul.f32 1.442695, %v4154_v30 }
 0x557   :  { %4841 = vperm.xlu0 %9979, %v14143_v51   ;;  %18467 = vst [vmem:[#allocation145_spill] sm:$0xff] %v14161_v40  ;;  %v4386_v51 = vmul.f32 1.442695, %v4152_v27  ;;  %v4156_v27 = vsub.f32 %v18473_v47, %v13893_v58 }
 0x559   :  { %v14151_v2 = vpop.permute.xlu1 %4736  ;;  %10647 = vpow2.f32 %v4386_v51  ;;  %v4394_v45 = vmul.f32 1.442695, %v4156_v27  ;;  %v18477_v51 = vld [vmem:[#allocation86_spill] sm:$0xff] }
 0x55a   :  { %18464 = vst [vmem:[#allocation63_spill] sm:$0xff] %v14151_v2  ;;  %v14157_v49 = vpop.permute.xlu0 %4661  ;;  %4922 = vperm.xlu1 %9980, %v14149_v8   ;;  %v14167_v2 = vpop.eup %10635  ;;  %10649 = vpow2.f32 %v4390_v37  ;;  %v4158_v30 = vsub.f32 %v18477_v51, %v14009_v59 }
 0x55b   :  { %4847 = vperm.xlu0 %9979, %v14155_v61   ;;  %18470 = vst [vmem:[#allocation37_spill] sm:$0xff] %v14167_v2  ;;  %v14173_v8 = vpop.eup %10637  ;;  %10651 = vpow2.f32 %v4394_v45 }
 0x55c   :  { %18471 = vst [vmem:[#allocation67_spill] sm:$0xff] %v14173_v8 }
 0x55d   :  { %v14163_v33 = vpop.permute.xlu1 %4742 }
 0x55e   :  { %18468 = vst [vmem:[#allocation126_spill] sm:$0xff] %v14163_v33  ;;  %v14169_v6 = vpop.permute.xlu0 %4667  ;;  %4928 = vperm.xlu1 %9980, %v14161_v40   ;;  %v14179_v33 = vpop.eup %10639 }
 0x55f   :  { %4853 = vperm.xlu0 %9979, %v14167_v2   ;;  %18474 = vst [vmem:[#allocation148_spill] sm:$0xff] %v14179_v33  ;;  %v14185_v40 = vpop.eup %10641 }
 0x560   :  { %18475 = vst [vmem:[#allocation69_spill] sm:$0xff] %v14185_v40 }
 0x561   :  { %v14175_v61 = vpop.permute.xlu1 %4748 }
 0x562   :  { %18472 = vst [vmem:[#allocation129_spill] sm:$0xff] %v14175_v61  ;;  %v14181_v32 = vpop.permute.xlu0 %4673  ;;  %4934 = vperm.xlu1 %9980, %v14173_v8   ;;  %v14191_v61 = vpop.eup %10643  ;;  %v4398_v8 = vmul.f32 1.442695, %v4158_v30 }
 0x563   :  { %4859 = vperm.xlu0 %9979, %v14179_v33   ;;  %18478 = vst [vmem:[#allocation71_spill] sm:$0xff] %v14191_v61  ;;  %v18480_v33 = vld [vmem:[#allocation90_spill] sm:$0xff]  ;;  %v14201_v37 = vpop.eup %10645 }
 0x564   :  { %18481 = vst [vmem:[#allocation73_spill] sm:$0xff] %v14201_v37  ;;  %10653 = vpow2.f32 %v4398_v8 }
 0x565   :  { %v14187_v2 = vpop.permute.xlu1 %4754 }
 0x566   :  { %18476 = vst [vmem:[#allocation41_spill] sm:$0xff] %v14187_v2  ;;  %v14193_v58 = vpop.permute.xlu0 %4679  ;;  %4940 = vperm.xlu1 %9980, %v14185_v40   ;;  %v4160_v2 = vsub.f32 %v18480_v33, %v14009_v59  ;;  %v18484_v40 = vld [vmem:[#allocation94_spill] sm:$0xff]  ;;  %v14210_v13 = vpop.eup %10647 }
 0x567   :  { %4865 = vperm.xlu0 %9979, %v14191_v61   ;;  %v4162_v61 = vsub.f32 %v18484_v40, %v14009_v59  ;;  %18485 = vst [vmem:[#allocation48_spill] sm:$0xff] %v14210_v13 }
 0x568   :  { %v4402_v14 = vmul.f32 1.442695, %v4160_v2 }
 0x569   :  { %v14197_v47 = vpop.permute.xlu1 %4760  ;;  %v4406_v30 = vmul.f32 1.442695, %v4162_v61 }
 0x56a   :  { %18479 = vst [vmem:[#allocation44_spill] sm:$0xff] %v14197_v47  ;;  %v14203_v27 = vpop.permute.xlu0 %4685  ;;  %10655 = vpow2.f32 %v4402_v14  ;;  %v18488_v47 = vld [vmem:[#allocation98_spill] sm:$0xff] }
 0x56b   :  { %18482 = vst [vmem:[#allocation46_spill] sm:$0xff] %v14203_v27  ;;  %4871 = vperm.xlu0 %9979, %v14201_v37   ;;  %v4164_v37 = vsub.f32 %v18488_v47, %v14009_v59  ;;  %v14219_v27 = vpop.eup %10649  ;;  %10657 = vpow2.f32 %v4406_v30 }
 0x56c   :  { %18489 = vst [vmem:[#allocation79_spill] sm:$0xff] %v14219_v27 }
 0x56d   :  { %v14206_v51 = vpop.permute.xlu1 %4766  ;;  %v4410_v2 = vmul.f32 1.442695, %v4164_v37 }
 0x56e   :  { %18483 = vst [vmem:[#allocation75_spill] sm:$0xff] %v14206_v51  ;;  %v14212_v45 = vpop.permute.xlu0 %4691  ;;  %v18492_v51 = vld [vmem:[#allocation104_spill] sm:$0xff] }
 0x56f   :  { %18486 = vst [vmem:[#allocation77_spill] sm:$0xff] %v14212_v45  ;;  %4877 = vperm.xlu0 %9979, %v14210_v13   ;;  %v4166_v13 = vsub.f32 %v18492_v51, %v14009_v59  ;;  %v14228_v45 = vpop.eup %10651  ;;  %10659 = vpow2.f32 %v4410_v2 }
 0x570   :  { %18493 = vst [vmem:[#allocation54_spill] sm:$0xff] %v14228_v45 }
 0x571   :  { %v14215_v33 = vpop.permute.xlu1 %4772  ;;  %v4414_v47 = vmul.f32 1.442695, %v4166_v13 }
 0x572   :  { %18487 = vst [vmem:[#allocation50_spill] sm:$0xff] %v14215_v33  ;;  %v14221_v8 = vpop.permute.xlu0 %4697  ;;  %v18496_v33 = vld [vmem:[#allocation173_spill] sm:$0xff] }
 0x573   :  { %18490 = vst [vmem:[#allocation52_spill] sm:$0xff] %v14221_v8  ;;  %4883 = vperm.xlu0 %9979, %v14219_v27   ;;  %v4168_v27 = vsub.f32 %v18496_v33, %v14009_v59  ;;  %v14237_v8 = vpop.eup %10653  ;;  %10661 = vpow2.f32 %v4414_v47 }
 0x574   :  { %18497 = vst [vmem:[#allocation85_spill] sm:$0xff] %v14237_v8 }
 0x575   :  { %v14224_v40 = vpop.permute.xlu1 %4778  ;;  %v4418_v51 = vmul.f32 1.442695, %v4168_v27 }
 0x576   :  { %18491 = vst [vmem:[#allocation81_spill] sm:$0xff] %v14224_v40  ;;  %v14230_v14 = vpop.permute.xlu0 %4703  ;;  %v18500_v40 = vld [vmem:[#allocation14_spill] sm:$0xff] }
 0x577   :  { %18494 = vst [vmem:[#allocation83_spill] sm:$0xff] %v14230_v14  ;;  %4889 = vperm.xlu0 %9979, %v14228_v45   ;;  %v4170_v45 = vsub.f32 %v18500_v40, %v14009_v59  ;;  %v14246_v14 = vpop.eup %10655  ;;  %10663 = vpow2.f32 %v4418_v51 }
 0x578   :  { %18501 = vst [vmem:[#allocation142_spill] sm:$0xff] %v14246_v14 }
 0x579   :  { %v14233_v61 = vpop.permute.xlu1 %4784  ;;  %v4422_v33 = vmul.f32 1.442695, %v4170_v45 }
 0x57a   :  { %18495 = vst [vmem:[#allocation56_spill] sm:$0xff] %v14233_v61  ;;  %v14239_v30 = vpop.permute.xlu0 %4709  ;;  %v18503_v61 = vld [vmem:[#allocation13_spill] sm:$0xff] }
 0x57b   :  { %18498 = vst [vmem:[#allocation58_spill] sm:$0xff] %v14239_v30  ;;  %4895 = vperm.xlu0 %9979, %v14237_v8   ;;  %v4172_v8 = vsub.f32 %v18503_v61, %v14009_v59  ;;  %v14255_v30 = vpop.eup %10657  ;;  %10665 = vpow2.f32 %v4422_v33 }
 0x57c   :  { %18504 = vst [vmem:[#allocation89_spill] sm:$0xff] %v14255_v30  ;;  %v14260_v40 = vpop.eup %10659 }
 0x57d   :  { %v14242_v37 = vpop.permute.xlu1 %4790  ;;  %v4426_v27 = vmul.f32 1.442695, %v4172_v8  ;;  %18505 = vst [vmem:[#allocation140_spill] sm:$0xff] %v14260_v40 }
 0x57e   :  { %18499 = vst [vmem:[#allocation87_spill] sm:$0xff] %v14242_v37  ;;  %v14248_v2 = vpop.permute.xlu0 %4715 }
 0x57f   :  { %4901 = vperm.xlu0 %9979, %v14246_v14   ;;  %10667 = vpow2.f32 %v4426_v27 }
 0x580   :  { %v14267_v45 = vpop.eup %10661 }
 0x581   :  { %v14251_v13 = vpop.permute.xlu1 %4796  ;;  %18507 = vst [vmem:[#allocation91_spill] sm:$0xff] %v14267_v45 }
 0x582   :  { %18502 = vst [vmem:[#allocation60_spill] sm:$0xff] %v14251_v13  ;;  %v14257_v47 = vpop.permute.xlu0 %4721 }
 0x583   :  { %4907 = vperm.xlu0 %9979, %v14255_v30  }
 0x584   :  { %v14274_v51 = vpop.eup %10663 }
 0x585   :  { %v14264_v14 = vpop.permute.xlu1 %4802  ;;  %18510 = vst [vmem:[#allocation93_spill] sm:$0xff] %v14274_v51 }
 0x586   :  { %v14262_v37 = vpop.permute.xlu0 %4727  ;;  %18506 = vst [vmem:[#allocation62_spill] sm:$0xff] %v14264_v14 }
 0x587   :  { %4913 = vperm.xlu0 %9979, %v14260_v40  }
 0x588   :  { %v14279_v33 = vpop.eup %10665 }
 0x589   :  { %v14272_v61 = vpop.permute.xlu1 %4808  ;;  %18512 = vst [vmem:[#allocation66_spill] sm:$0xff] %v14279_v33 }
 0x58a   :  { %v14269_v59 = vpop.permute.xlu0 %4733  ;;  %18509 = vst [vmem:[#allocation64_spill] sm:$0xff] %v14272_v61 }
 0x58b   :  { %18508 = vst [vmem:[#allocation146_spill] sm:$0xff] %v14269_v59  ;;  %4919 = vperm.xlu0 %9979, %v14267_v45  }
 0x58c   :  { %v14286_v27 = vpop.eup %10667 }
 0x58d   :  { %v14283_v40 = vpop.permute.xlu1 %4814  ;;  %18515 = vst [vmem:[#allocation68_spill] sm:$0xff] %v14286_v27 }
 0x58e   :  { %v14276_v8 = vpop.permute.xlu0 %4739  ;;  %18514 = vst [vmem:[#allocation149_spill] sm:$0xff] %v14283_v40 }
 0x58f   :  { %18511 = vst [vmem:[#allocation144_spill] sm:$0xff] %v14276_v8  ;;  %4925 = vperm.xlu0 %9979, %v14274_v51  }
 0x591   :  { %v14291_v45 = vpop.permute.xlu1 %4820 }
 0x592   :  { %v14281_v30 = vpop.permute.xlu0 %4745  ;;  %18517 = vst [vmem:[#allocation147_spill] sm:$0xff] %v14291_v45 }
 0x593   :  { %18513 = vst [vmem:[#allocation95_spill] sm:$0xff] %v14281_v30  ;;  %4931 = vperm.xlu0 %9979, %v14279_v33  }
 0x595   :  { %v14297_v51 = vpop.permute.xlu1 %4826 }
 0x596   :  { %v14288_v13 = vpop.permute.xlu0 %4751  ;;  %18520 = vst [vmem:[#allocation153_spill] sm:$0xff] %v14297_v51 }
 0x597   :  { %18516 = vst [vmem:[#allocation97_spill] sm:$0xff] %v14288_v13  ;;  %4937 = vperm.xlu0 %9979, %v14286_v27  }
 0x599   :  { %v14301_v30 = vpop.permute.xlu1 %4832 }
 0x59a   :  { %v14293_v61 = vpop.permute.xlu0 %4757  ;;  %18522 = vst [vmem:[#allocation101_spill] sm:$0xff] %v14301_v30 }
 0x59b   :  { %18518 = vst [vmem:[#allocation70_spill] sm:$0xff] %v14293_v61 }
 0x59d   :  { %v14307_v14 = vpop.permute.xlu1 %4838 }
 0x59e   :  { %v14295_v8 = vpop.permute.xlu0 %4763  ;;  %18525 = vst [vmem:[#allocation105_spill] sm:$0xff] %v14307_v14 }
 0x59f   :  { %18519 = vst [vmem:[#allocation99_spill] sm:$0xff] %v14295_v8 }
 0x5a1   :  { %v14311_v27 = vpop.permute.xlu1 %4844 }
 0x5a2   :  { %v14299_v59 = vpop.permute.xlu0 %4769  ;;  %18527 = vst [vmem:[#allocation82_spill] sm:$0xff] %v14311_v27 }
 0x5a3   :  { %18521 = vst [vmem:[#allocation72_spill] sm:$0xff] %v14299_v59 }
 0x5a5   :  { %v14317_v8 = vpop.permute.xlu1 %4850 }
 0x5a6   :  { %v14303_v40 = vpop.permute.xlu0 %4775  ;;  %18529 = vst [vmem:[#allocation90_spill] sm:$0xff] %v14317_v8 }
 0x5a7   :  { %18523 = vst [vmem:[#allocation151_spill] sm:$0xff] %v14303_v40 }
 0x5a9   :  { %v14321_v59 = vpop.permute.xlu1 %4856 }
 0x5aa   :  { %v14305_v33 = vpop.permute.xlu0 %4781  ;;  %18531 = vst [vmem:[#allocation98_spill] sm:$0xff] %v14321_v59  ;;  %v5033_v59 = vrot.slane %v14049_v4, %v12961_v26  ;;  %v5043_v4 = vrot.slane %v14063_v39, %v12985_v53 }
 0x5ab   :  { %18524 = vst [vmem:[#allocation103_spill] sm:$0xff] %v14305_v33 }
 0x5ad   :  { %v14327_v33 = vpop.permute.xlu1 %4862 }
 0x5ae   :  { %v14309_v13 = vpop.permute.xlu0 %4787  ;;  %18533 = vst [vmem:[#allocation173_spill] sm:$0xff] %v14327_v33 }
 0x5af   :  { %18526 = vst [vmem:[#allocation106_spill] sm:$0xff] %v14309_v13 }
 0x5b1   :  { %v14331_v13 = vpop.permute.xlu1 %4868 }
 0x5b2   :  { %v14313_v45 = vpop.permute.xlu0 %4793  ;;  %18535 = vst [vmem:[#allocation13_spill] sm:$0xff] %v14331_v13 }
 0x5b3   :  { %18528 = vst [vmem:[#allocation86_spill] sm:$0xff] %v14313_v45  ;;  %v5024_v45 = vrot.slane %v14035_v21, %v12968_v57  ;;  %v4954_v21 = vrot.slane %v13859_v16, %v12961_v26 }
 0x5b6   :  { %v14315_v61 = vpop.permute.xlu0 %4799 }
 0x5ba   :  { %v14319_v51 = vpop.permute.xlu0 %4805 }
 0x5bb   :  { %18530 = vst [vmem:[#allocation94_spill] sm:$0xff] %v14319_v51  ;;  %v14341_v51 = vpop.permute.xlu1 %4874 }
 0x5bc   :  { %18537 = vst [vmem:[#allocation212_spill] sm:$0xff] %v14341_v51  ;;  %v4945_v51 = vrot.slane %v13831_v52, %v12968_v57  ;;  %v5103_v52 = vrot.slane %v14145_v29, %v12968_v57  ;;  %v4974_v29 = vrot.slane %v13919_v48, %v13014_v46 }
 0x5be   :  { %v14323_v30 = vpop.permute.xlu0 %4811 }
 0x5c2   :  { %v14325_v40 = vpop.permute.xlu0 %4817 }
 0x5c3   :  { %18532 = vst [vmem:[#allocation104_spill] sm:$0xff] %v14325_v40  ;;  %v5028_v40 = vrot.slane %v13853_v1, %v12971_v34  ;;  %v5038_v1 = vrot.slane %v13867_v55, %v12978_v38 }
 0x5c5   :  { %v5029_v13 = vsel %vm17634_vm1, %v5028_v40, %v5024_v45  ;;  %v4964_v40 = vrot.slane %v13887_v36, %v12985_v53  ;;  %v14363_v45 = vpop.permute.xlu1 %4880  ;;  %v5053_v36 = vrot.slane %v14077_v17, %v13014_v46 }
 0x5c6   :  { %v14329_v14 = vpop.permute.xlu0 %4823 }
 0x5c7   :  { %18534 = vst [vmem:[#allocation14_spill] sm:$0xff] %v14329_v14  ;;  %v4949_v14 = vrot.slane %v13845_v12, %v12971_v34  ;;  %v4959_v12 = vrot.slane %v13873_v22, %v12978_v38 }
 0x5c9   :  { %v4950_v16 = vsel %vm17634_vm1, %v4949_v14, %v4945_v51  ;;  %v5112_v14 = vrot.slane %v14157_v49, %v12961_v26  ;;  %v4984_v49 = vrot.slane %v13947_v0, %v13042_v50  ;;  %v5058_v0 = vrot.slane %v13899_v54, %v12999_v7 }
 0x5ca   :  { %v14333_v27 = vpop.permute.xlu0 %4829  ;;  %v4955_v55 = vsel %vm3342_vm2, %v4954_v21, %v4950_v16  ;;  %v14402_v16 = vpop.permute.xlu1 %4886  ;;  %v5073_v54 = vrot.slane %v14105_v35, %v13071_v10  ;;  %v5078_v35 = vrot.slane %v13927_v19, %v13026_v25  ;;  %v5083_v19 = vrot.slane %v14119_v44, %v13097_v41  ;;  %v18551_v44 = vld [vmem:[#allocation38_spill] sm:$0xff] }
 0x5cb   :  { %v4960_v51 = vsel %vm3349_vm3, %v4959_v12, %v4955_v55 }
 0x5cc   :  { %v4965_v21 = vsel %vm18539_vm0, %v4964_v40, %v4960_v51  ;;  %vm18543_vm0 = vmmov %vm18542_vm4  ;;  %v4989_v51 = vrot.slane %v13825_v24, %v13020_v31  ;;  %v5004_v24 = vrot.slane %v13989_v62, %v13097_v41  ;;  %v5009_v62 = vrot.slane %v14003_v56, %v13033_v42 }
 0x5ce   :  { %v14337_v8 = vpop.permute.xlu0 %4835 }
 0x5cf   :  { %18536 = vst [vmem:[#allocation211_spill] sm:$0xff] %v14337_v8  ;;  %v5034_v8 = vsel %vm3342_vm2, %v5033_v59, %v5029_v13  ;;  %v4969_v13 = vrot.slane %v13905_v15, %v12996_v43  ;;  %v5048_v15 = vrot.slane %v13881_v18, %v12996_v43 }
 0x5d0   :  { %v5039_v39 = vsel %vm3349_vm3, %v5038_v1, %v5034_v8  ;;  %v5107_v8 = vrot.slane %v13969_v3, %v12971_v34  ;;  %v5063_v3 = vrot.slane %v14091_v63, %v13042_v50 }
 0x5d1   :  { %v5044_v22 = vsel %vm18538_vm5, %v5043_v4, %v5039_v39  ;;  %v4979_v4 = vrot.slane %v13933_v5, %v12999_v7  ;;  %vm18540_vm5 = vcmask 392512   ;;  %v5122_v5 = vrot.slane %v14169_v6, %v12985_v53 }
 0x5d2   :  { %v14348_v33 = vpop.permute.xlu0 %4841  ;;  %v4970_v17 = vsel %vm18540_vm5, %v4969_v13, %v4965_v21  ;;  %vm18541_vm11 = vmmov %vm18540_vm5  ;;  %v5108_v18 = vsel %vm17634_vm1, %v5107_v8, %v5103_v52  ;;  %v5117_v39 = vrot.slane %v13983_v60, %v12978_v38  ;;  %v5132_v60 = vrot.slane %v14181_v32, %v13014_v46 }
 0x5d3   :  { %v5049_v1 = vsel %vm18541_vm11, %v5048_v15, %v5044_v22  ;;  %v5113_v40 = vsel %vm3342_vm2, %v5112_v14, %v5108_v18  ;;  %v4975_v13 = vsel %vm18543_vm0, %v4974_v29, %v4970_v17  ;;  %v5068_v15 = vrot.slane %v13913_v28, %v13020_v31  ;;  %vm18546_vm11 = vmmov %vm18540_vm5 }
 0x5d4   :  { %v5054_v48 = vsel %vm18542_vm4, %v5053_v36, %v5049_v1  ;;  %v4980_v52 = vsel %vm3377_vm7, %v4979_v4, %v4975_v13  ;;  %v5118_v22 = vsel %vm3349_vm3, %v5117_v39, %v5113_v40  ;;  %vm18544_vm4 = vcmask 326912   ;;  %v14433_v4 = vpop.permute.xlu1 %4892  ;;  %vm18547_vm5 = vmmov %vm18543_vm0  ;;  %v18552_v13 = vld [vmem:[#allocation58_spill] sm:$0xff] }
 0x5d5   :  { %v4985_v55 = vsel %vm3384_vm8, %v4984_v49, %v4980_v52  ;;  %v5059_v63 = vsel %vm3377_vm7, %v5058_v0, %v5054_v48  ;;  %v5123_v14 = vsel %vm18544_vm4, %v5122_v5, %v5118_v22  ;;  %v4994_v29 = vrot.slane %v13961_v11, %v13071_v10  ;;  %18545 = vst [vmem:[#allocation213_spill] sm:$0xff] %v14433_v4  ;;  %v18548_v48 = vld [vmem:[#allocation83_spill] sm:$0xff]  ;;  %v18553_v52 = vld [vmem:[#allocation118_spill] sm:$0xff] }
 0x5d6   :  { %v14371_v59 = vpop.permute.xlu0 %4847  ;;  %v5064_v6 = vsel %vm3384_vm8, %v5063_v3, %v5059_v63  ;;  %v5127_v8 = vrot.slane %v13997_v9, %v12996_v43  ;;  %v4999_v21 = vrot.slane %v13975_v20, %v13026_v25  ;;  %v4990_v32 = vsel %vm3391_vm9, %v4989_v51, %v4985_v55  ;;  %v18550_v5 = vld [vmem:[#allocation123_spill] sm:$0xff] }
 0x5d7   :  { %v5069_v28 = vsel %vm3391_vm9, %v5068_v15, %v5064_v6  ;;  %v5142_v49 = vrot.slane %v14193_v58, %v13042_v50  ;;  %v4995_v1 = vsel %vm3398_vm10, %v4994_v29, %v4990_v32  ;;  %v5137_v18 = vrot.slane %v14015_v23, %v12999_v7  ;;  %v18555_v6 = vld [vmem:[#allocation59_spill] sm:$0xff]  ;;  %v18557_v29 = vld [vmem:[#allocation28_spill] sm:$0xff] }
 0x5d8   :  { %v5128_v11 = vsel %vm18546_vm11, %v5127_v8, %v5123_v14  ;;  %v5074_v9 = vsel %vm3398_vm10, %v5073_v54, %v5069_v28  ;;  %v5182_v3 = vrot.slane %v18548_v48, %v12968_v57  ;;  %vm18549_vm0 = vcmask 786112   ;;  %v14473_v15 = vpop.permute.xlu1 %4898 }
 0x5d9   :  { %v5133_v20 = vsel %vm18547_vm5, %v5132_v60, %v5128_v11  ;;  %v5000_v40 = vsel %vm18549_vm0, %v4999_v21, %v4995_v1  ;;  %v5014_v0 = vrot.slane %v18551_v44, %v18550_v5  ;;  %v5191_v39 = vrot.slane %v18552_v13, %v12961_v26  ;;  %vm18554_vm4 = vmmov %vm18549_vm0  ;;  %v18556_v60 = vld [vmem:[#allocation46_spill] sm:$0xff]  ;;  %v18558_v21 = vld [vmem:[#allocation17_spill] sm:$0xff] }
 0x5da   :  { %v14394_v12 = vpop.permute.xlu0 %4853  ;;  %v5005_v58 = vsel %vm3412_vm12, %v5004_v24, %v5000_v40  ;;  %v5186_v55 = vrot.slane %v18553_v52, %v12971_v34  ;;  %v5079_v56 = vsel %vm18554_vm4, %v5078_v35, %v5074_v9  ;;  %v5138_v23 = vsel %vm3377_vm7, %v5137_v18, %v5133_v20  ;;  %v18560_v20 = vld [vmem:[#allocation170_spill] sm:$0xff]  ;;  %v18561_v1 = vld [vmem:[#allocation53_spill] sm:$0xff]  ;;  %vm18573_vm5 = vmmov %vm18549_vm0 }
 0x5db   :  { %v5084_v22 = vsel %vm3412_vm12, %v5083_v19, %v5079_v56  ;;  %v5093_v54 = vrot.slane %v18555_v6, %v18550_v5  ;;  %v5143_v14 = vsel %vm3384_vm8, %v5142_v49, %v5138_v23  ;;  %v5152_v51 = vrot.slane %v18556_v60, %v13071_v10  ;;  %v18559_v19 = vld [vmem:[#allocation210_spill] sm:$0xff]  ;;  %v18566_v56 = vld [vmem:[#allocation19_spill] sm:$0xff] }
 0x5dc   :  { %v5088_v8 = vrot.slane %v18557_v29, %v13033_v42  ;;  %v5010_v35 = vsel %vm3419_vm13, %v5009_v62, %v5005_v58  ;;  %v5147_v32 = vrot.slane %v18558_v21, %v13020_v31  ;;  %v5187_v24 = vsel %vm17634_vm1, %v5186_v55, %v5182_v3  ;;  %v18562_v3 = vld [vmem:[#allocation30_spill] sm:$0xff]  ;;  %v18567_v6 = vld [vmem:[#allocation47_spill] sm:$0xff] }
 0x5dd   :  { %v5015_v28 = vsel %vm3426_vm14, %v5014_v0, %v5010_v35  ;;  %v5192_v11 = vsel %vm3342_vm2, %v5191_v39, %v5187_v24  ;;  %v5201_v9 = vrot.slane %v14248_v2, %v12985_v53  ;;  %v5019_v49 = vrot.slane %v18560_v20, %v18559_v19  ;;  %v18563_v2 = vld [vmem:[#allocation77_spill] sm:$0xff]  ;;  %v18565_v52 = vld [vmem:[#allocation18_spill] sm:$0xff] }
 0x5de   :  { %v14413_v36 = vpop.permute.xlu0 %4859  ;;  %v5196_v18 = vrot.slane %v18561_v1, %v12978_v38  ;;  %v5089_v62 = vsel %vm3419_vm13, %v5088_v8, %v5084_v22  ;;  %v5148_v48 = vsel %vm3391_vm9, %v5147_v32, %v5143_v14  ;;  %v5098_v44 = vrot.slane %v18562_v3, %v18559_v19  ;;  %v14514_v8 = vpop.permute.xlu1 %4904  ;;  %v18570_v35 = vld [vmem:[#allocation122_spill] sm:$0xff]  ;;  %v18572_v24 = vld [vmem:[#allocation141_spill] sm:$0xff] }
 0x5df   :  { %v5094_v0 = vsel %vm3426_vm14, %v5093_v54, %v5089_v62  ;;  %v5153_v13 = vsel %vm3398_vm10, %v5152_v51, %v5148_v48  ;;  %v5162_v39 = vrot.slane %v18563_v2, %v13097_v41  ;;  %v14500_v58 = vsel %vm3433_vm15, %v5019_v49, %v5015_v28  ;;  %v18568_v54 = vld [vmem:[#allocation55_spill] sm:$0xff]  ;;  %v18576_v62 = vld [vmem:[#allocation52_spill] sm:$0xff]  ;;  %v18577_v3 = vld [vmem:[#allocation129_spill] sm:$0xff] }
 0x5e0   :  { %18564 = vst [vmem:[#allocation83_spill] sm:$0xff] %v14500_v58  ;;  %v5157_v55 = vrot.slane %v18565_v52, %v13026_v25  ;;  %v5167_v23 = vrot.slane %v18566_v56, %v13033_v42  ;;  %v5197_v22 = vsel %vm3349_vm3, %v5196_v18, %v5192_v11  ;;  %v5206_v60 = vrot.slane %v18568_v54, %v12996_v43  ;;  %v18581_v56 = vld [vmem:[#allocation75_spill] sm:$0xff] }
 0x5e1   :  { %vm18569_vm11 = vcmask 326912   ;;  %v5211_v29 = vrot.slane %v14257_v47, %v13014_v46  ;;  %v5216_v21 = vrot.slane %v18570_v35, %v12999_v7  ;;  %v14519_v32 = vsel %vm3433_vm15, %v5098_v44, %v5094_v0  ;;  %v18575_v47 = vld [vmem:[#allocation126_spill] sm:$0xff]  ;;  %v18578_v0 = vld [vmem:[#allocation41_spill] sm:$0xff] }
 0x5e2   :  { %v14440_v17 = vpop.permute.xlu0 %4865  ;;  %v5202_v51 = vsel %vm18569_vm11, %v5201_v9, %v5197_v22  ;;  %18571 = vst [vmem:[#allocation38_spill] sm:$0xff] %v14519_v32  ;;  %v5226_v28 = vrot.slane %v18572_v24, %v13020_v31  ;;  %v5158_v11 = vsel %vm18573_vm5, %v5157_v55, %v5153_v13  ;;  %v18574_v9 = vld [vmem:[#allocation63_spill] sm:$0xff]  ;;  %v5172_v48 = vrot.slane %v18576_v62, %v18550_v5  ;;  %v18579_v13 = vld [vmem:[#allocation44_spill] sm:$0xff]  ;;  %v18583_v35 = vld [vmem:[#allocation97_spill] sm:$0xff]  ;;  %v14563_v44 = vpop.permute.xlu1 %4910 }
 0x5e3   :  { %v5236_v49 = vrot.slane %v18574_v9, %v13026_v25  ;;  %v5163_v18 = vsel %vm3412_vm12, %v5162_v39, %v5158_v11  ;;  %v5265_v2 = vrot.slane %v18578_v0, %v12971_v34  ;;  %v5275_v52 = vrot.slane %v18579_v13, %v12978_v38  ;;  %v18584_v11 = vld [vmem:[#allocation50_spill] sm:$0xff]  ;;  %vm18598_vm5 = vmmov %vm18569_vm11 }
 0x5e4   :  { %vm18580_vm0 = vcmask 392512   ;;  %v5285_v22 = vrot.slane %v18581_v56, %v12996_v43  ;;  %vm18582_vm4 = vcmask 458112   ;;  %v5221_v39 = vrot.slane %v14262_v37, %v13042_v50  ;;  %v18585_v0 = vld [vmem:[#allocation70_spill] sm:$0xff]  ;;  %v18586_v37 = vld [vmem:[#allocation81_spill] sm:$0xff] }
 0x5e5   :  { %v5207_v55 = vsel %vm18580_vm0, %v5206_v60, %v5202_v51  ;;  %v5261_v24 = vrot.slane %v18583_v35, %v12968_v57  ;;  %v5168_v62 = vsel %vm3419_vm13, %v5167_v23, %v5163_v18  ;;  %v5270_v13 = vrot.slane %v18585_v0, %v12961_v26  ;;  %v18587_v56 = vld [vmem:[#allocation94_spill] sm:$0xff]  ;;  %v18588_v18 = vld [vmem:[#allocation56_spill] sm:$0xff]  ;;  %v18592_v0 = vld [vmem:[#allocation87_spill] sm:$0xff] }
 0x5e6   :  { %v14465_v63 = vpop.permute.xlu0 %4871  ;;  %v5212_v54 = vsel %vm18582_vm4, %v5211_v29, %v5207_v55  ;;  %v5340_v60 = vrot.slane %v14315_v61, %v12968_v57  ;;  %v14557_v29 = vsel %vm3426_vm14, %v5172_v48, %v5168_v62  ;;  %v5349_v35 = vrot.slane %v18587_v56, %v12961_v26  ;;  %v18589_v61 = vld [vmem:[#allocation62_spill] sm:$0xff]  ;;  %vm18601_vm4 = vmmov %vm18598_vm5 }
 0x5e7   :  { %v5419_v23 = vrot.slane %v14371_v59, %v12968_v57  ;;  %v5344_v14 = vrot.slane %v18589_v61, %v12971_v34  ;;  %v5217_v48 = vsel %vm3377_vm7, %v5216_v21, %v5212_v54  ;;  %v5428_v62 = vrot.slane %v14394_v12, %v12961_v26  ;;  %v18590_v56 = vld [vmem:[#allocation146_spill] sm:$0xff]  ;;  %v18593_v21 = vld [vmem:[#allocation99_spill] sm:$0xff] }
 0x5e8   :  { %v5222_v55 = vsel %vm3384_vm8, %v5221_v39, %v5217_v48  ;;  %v5231_v1 = vrot.slane %v18590_v56, %v13071_v10  ;;  %v5266_v9 = vsel %vm17634_vm1, %v5265_v2, %v5261_v24  ;;  %v18591_v59 = vld [vmem:[#allocation90_spill] sm:$0xff]  ;;  %v5325_v32 = vrot.slane %v18592_v0, %v13033_v42  ;;  %v18594_v39 = vld [vmem:[#allocation64_spill] sm:$0xff] }
 0x5e9   :  { %v5423_v4 = vrot.slane %v18591_v59, %v12971_v34  ;;  %v5271_v61 = vsel %vm3342_vm2, %v5270_v13, %v5266_v9  ;;  %v5280_v54 = vrot.slane %v18593_v21, %v12985_v53  ;;  %v5345_v12 = vsel %vm17634_vm1, %v5344_v14, %v5340_v60  ;;  %v18595_v21 = vld [vmem:[#allocation149_spill] sm:$0xff] }
 0x5ea   :  { %v14491_v40 = vpop.permute.xlu0 %4877  ;;  %v5354_v48 = vrot.slane %v18594_v39, %v12978_v38  ;;  %v5350_v56 = vsel %vm3342_vm2, %v5349_v35, %v5345_v12  ;;  %v5359_v2 = vrot.slane %v14323_v30, %v12985_v53  ;;  %v5227_v59 = vsel %vm3391_vm9, %v5226_v28, %v5222_v55  ;;  %v18596_v30 = vld [vmem:[#allocation98_spill] sm:$0xff]  ;;  %v18597_v55 = vld [vmem:[#allocation72_spill] sm:$0xff] }
 0x5eb   :  { %v5424_v24 = vsel %vm17634_vm1, %v5423_v4, %v5419_v23  ;;  %v5438_v13 = vrot.slane %v14413_v36, %v12985_v53  ;;  %v5232_v60 = vsel %vm3398_vm10, %v5231_v1, %v5227_v59  ;;  %v5364_v39 = vrot.slane %v18595_v21, %v12996_v43  ;;  %v14603_v4 = vpop.permute.xlu1 %4916 }
 0x5ec   :  { %v5429_v9 = vsel %vm3342_vm2, %v5428_v62, %v5424_v24  ;;  %v5276_v35 = vsel %vm3349_vm3, %v5275_v52, %v5271_v61  ;;  %v5433_v12 = vrot.slane %v18596_v30, %v12978_v38  ;;  %v5290_v23 = vrot.slane %v18597_v55, %v13014_v46  ;;  %v18599_v52 = vld [vmem:[#allocation104_spill] sm:$0xff]  ;;  %v18604_v30 = vld [vmem:[#allocation173_spill] sm:$0xff] }
 0x5ed   :  { %v5281_v28 = vsel %vm18569_vm11, %v5280_v54, %v5276_v35  ;;  %v5355_v36 = vsel %vm3349_vm3, %v5354_v48, %v5350_v56  ;;  %v5369_v61 = vrot.slane %v18599_v52, %v13014_v46  ;;  %vm18600_vm0 = vcmask 786112  }
 0x5ee   :  { %v14524_v20 = vpop.permute.xlu0 %4883  ;;  %v5360_v62 = vsel %vm18598_vm5, %v5359_v2, %v5355_v36  ;;  %v5434_v24 = vsel %vm3349_vm3, %v5433_v12, %v5429_v9  ;;  %v5237_v54 = vsel %vm18600_vm0, %v5236_v49, %v5232_v60  ;;  %v5448_v48 = vrot.slane %v14440_v17, %v13014_v46  ;;  %v18606_v49 = vld [vmem:[#allocation151_spill] sm:$0xff] }
 0x5ef   :  { %v5439_v21 = vsel %vm18601_vm4, %v5438_v13, %v5434_v24  ;;  %vm18603_vm11 = vcmask 392512   ;;  %v5443_v55 = vrot.slane %v18604_v30, %v12996_v43  ;;  %vm18605_vm5 = vcmask 458112  }
 0x5f0   :  { %v5286_v2 = vsel %vm18603_vm11, %v5285_v22, %v5281_v28  ;;  %v5300_v13 = vrot.slane %v18606_v49, %v13042_v50  ;;  %vm18607_vm0 = vmmov %vm18603_vm11  ;;  %v5512_v17 = vrot.slane %v14514_v8, %v12978_v38  ;;  %v18609_v22 = vld [vmem:[#allocation14_spill] sm:$0xff]  ;;  %v18706_v38 = vld [vmem:[#allocation183_spill] sm:$0xff] }
 0x5f1   :  { %v5291_v12 = vsel %vm18605_vm5, %v5290_v23, %v5286_v2  ;;  %v5365_v60 = vsel %vm18607_vm0, %v5364_v39, %v5360_v62  ;;  %vm18608_vm4 = vmmov %vm18605_vm5  ;;  %v5379_v28 = vrot.slane %v18609_v22, %v13042_v50  ;;  %v18611_v23 = vld [vmem:[#allocation147_spill] sm:$0xff]  ;;  %v5458_v39 = vrot.slane %v14465_v63, %v13042_v50 }
 0x5f2   :  { %v14554_v51 = vpop.permute.xlu0 %4889  ;;  %v5370_v36 = vsel %vm18608_vm4, %v5369_v61, %v5365_v60  ;;  %vm18610_vm11 = vmmov %vm18607_vm0  ;;  %v5374_v24 = vrot.slane %v18611_v23, %v12999_v7  ;;  %v18613_v61 = vrot.slane %v18584_v11, %v12999_v7  ;;  %vm18615_vm0 = vcmask 326912  }
 0x5f3   :  { %vm18612_vm5 = vmmov %vm18608_vm4 }
 0x5f4   :  { %v5375_v63 = vsel %vm3377_vm7, %v5374_v24, %v5370_v36  ;;  %vm18618_vm4 = vmmov %vm18610_vm11  ;;  %v18619_v36 = vrot.slane %v18575_v47, %v13033_v42 }
 0x5f5   :  { %v5380_v11 = vsel %vm3384_vm8, %v5379_v28, %v5375_v63  ;;  %v18626_v63 = vld [vmem:[#allocation95_spill] sm:$0xff] }
 0x5f6   :  { %v4896_v58 = vpop.permute.xlu0 %4895 }
 0x5f7   :  { %v5498_v14 = vrot.slane %v4896_v58, %v12968_v57  ;;  %v5502_v58 = vrot.slane %v14473_v15, %v12971_v34  ;;  %v18602_v15 = vld [vmem:[#allocation144_spill] sm:$0xff]  ;;  %v18707_v34 = vld [vmem:[#allocation166_spill] sm:$0xff] }
 0x5f8   :  { %v5241_v35 = vrot.slane %v18602_v15, %v13097_v41  ;;  %v18709_v57 = vld [vmem:[#allocation168_spill] sm:$0xff] }
 0x5f9   :  { %v5503_v56 = vsel %vm17634_vm1, %v5502_v58, %v5498_v14  ;;  %v4923_v58 = vpop.permute.xlu1 %4922 }
 0x5fa   :  { %v4902_v1 = vpop.permute.xlu0 %4901  ;;  %v5242_v62 = vsel %vm3412_vm12, %v5241_v35, %v5237_v54  ;;  %v5522_v54 = vrot.slane %v14563_v44, %v12996_v43 }
 0x5fb   :  { %v5507_v59 = vrot.slane %v4902_v1, %v12961_v26  ;;  %v5444_v1 = vsel %vm18610_vm11, %v5443_v55, %v5439_v21  ;;  %v18614_v21 = vld [vmem:[#allocation13_spill] sm:$0xff]  ;;  %v5247_v22 = vsel %vm3419_vm13, %v18619_v36, %v5242_v62  ;;  %vm18622_vm11 = vmmov %vm18612_vm5 }
 0x5fc   :  { %v5453_v15 = vrot.slane %v18614_v21, %v12999_v7 }
 0x5fd   :  { %v5508_v9 = vsel %vm3342_vm2, %v5507_v59, %v5503_v56  ;;  %v5449_v59 = vsel %vm18612_vm5, %v5448_v48, %v5444_v1  ;;  %v5296_v56 = vsel %vm3377_vm7, %v18613_v61, %v5291_v12  ;;  %v18616_v48 = vld [vmem:[#allocation103_spill] sm:$0xff]  ;;  %v18621_v1 = vld [vmem:[#allocation212_spill] sm:$0xff]  ;;  %v4929_v23 = vpop.permute.xlu1 %4928  ;;  %vm18628_vm5 = vcmask 786112  }
 0x5fe   :  { %v4908_v14 = vpop.permute.xlu0 %4907  ;;  %v5513_v8 = vsel %vm3349_vm3, %v5512_v17, %v5508_v9  ;;  %v5301_v30 = vsel %vm3384_vm8, %v5300_v13, %v5296_v56  ;;  %v5310_v55 = vrot.slane %v18616_v48, %v13071_v10  ;;  %v5389_v9 = vrot.slane %v14333_v27, %v13071_v10  ;;  %v18617_v13 = vld [vmem:[#allocation153_spill] sm:$0xff]  ;;  %v18624_v61 = vld [vmem:[#allocation211_spill] sm:$0xff] }
 0x5ff   :  { %v5517_v52 = vrot.slane %v4908_v14, %v12985_v53  ;;  %v5454_v12 = vsel %vm3377_vm7, %v5453_v15, %v5449_v59  ;;  %v5384_v60 = vrot.slane %v18617_v13, %v13020_v31  ;;  %v5468_v14 = vrot.slane %v14491_v40, %v13071_v10  ;;  %v18623_v59 = vld [vmem:[#allocation106_spill] sm:$0xff] }
 0x600   :  { %v5459_v17 = vsel %vm3384_vm8, %v5458_v39, %v5454_v12  ;;  %v18620_v27 = vrot.slane %v18586_v37, %v13020_v31  ;;  %v5320_v39 = vrot.slane %v18623_v59, %v13097_v41  ;;  %v5399_v56 = vrot.slane %v18624_v61, %v13097_v41  ;;  %v18629_v13 = vld [vmem:[#allocation86_spill] sm:$0xff] }
 0x601   :  { %v5518_v2 = vsel %vm18615_vm0, %v5517_v52, %v5513_v8  ;;  %v5463_v52 = vrot.slane %v18621_v1, %v13020_v31  ;;  %v5385_v47 = vsel %vm3391_vm9, %v5384_v60, %v5380_v11  ;;  %v5532_v8 = vrot.slane %v14603_v4, %v12999_v7  ;;  %vm18630_vm0 = vmmov %vm18628_vm5  ;;  %v4935_v36 = vpop.permute.xlu1 %4934 }
 0x602   :  { %v4914_v35 = vpop.permute.xlu0 %4913  ;;  %v5523_v44 = vsel %vm18618_vm4, %v5522_v54, %v5518_v2  ;;  %v5306_v28 = vsel %vm3391_vm9, %v18620_v27, %v5301_v30  ;;  %v5390_v37 = vsel %vm3398_vm10, %v5389_v9, %v5385_v47  ;;  %v18625_v2 = vld [vmem:[#allocation101_spill] sm:$0xff]  ;;  %v5251_v54 = vrot.slane %v18626_v63, %v18550_v5  ;;  %vm18631_vm4 = vmmov %vm18630_vm0 }
 0x603   :  { %v5527_v49 = vrot.slane %v4914_v35, %v13014_v46  ;;  %v5311_v40 = vsel %vm3398_vm10, %v5310_v55, %v5306_v28  ;;  %v5464_v21 = vsel %vm3391_vm9, %v5463_v52, %v5459_v17  ;;  %v5394_v30 = vrot.slane %v18625_v2, %v13026_v25  ;;  %v18632_v28 = vld [vmem:[#allocation105_spill] sm:$0xff]  ;;  %v18702_v46 = vld [vmem:[#allocation152_spill] sm:$0xff] }
 0x604   :  { %v5469_v48 = vsel %vm3398_vm10, %v5468_v14, %v5464_v21  ;;  %v5478_v55 = vrot.slane %v14524_v20, %v13097_v41  ;;  %v18627_v35 = vrot.slane %v18588_v18, %v13026_v25  ;;  %v5473_v9 = vrot.slane %v14363_v45, %v13026_v25  ;;  %v18636_v21 = vld [vmem:[#allocation82_spill] sm:$0xff]  ;;  %v18641_v63 = vld [vmem:[#allocation213_spill] sm:$0xff] }
 0x605   :  { %v5528_v24 = vsel %vm18622_vm11, %v5527_v49, %v5523_v44  ;;  %v5330_v20 = vrot.slane %v18629_v13, %v18550_v5  ;;  %v5395_v60 = vsel %vm18630_vm0, %v5394_v30, %v5390_v37  ;;  %v5542_v17 = vrot.slane %v4923_v58, %v13020_v31  ;;  %vm18637_vm11 = vmmov %vm18630_vm0  ;;  %v18638_v30 = vld [vmem:[#allocation83_spill] sm:$0xff]  ;;  %v18698_v31 = vld [vmem:[#allocation185_spill] sm:$0xff] }
 0x606   :  { %v4920_v62 = vpop.permute.xlu0 %4919  ;;  %v5533_v4 = vsel %vm3377_vm7, %v5532_v8, %v5528_v24  ;;  %v5316_v11 = vsel %vm18628_vm5, %v18627_v35, %v5311_v40  ;;  %v5400_v44 = vsel %vm3412_vm12, %v5399_v56, %v5395_v60  ;;  %v5409_v18 = vrot.slane %v14348_v33, %v18550_v5  ;;  %v4941_v35 = vpop.permute.xlu1 %4940 }
 0x607   :  { %v5537_v15 = vrot.slane %v4920_v62, %v13042_v50  ;;  %v5321_v49 = vsel %vm3412_vm12, %v5320_v39, %v5316_v11  ;;  %v5474_v45 = vsel %vm18631_vm4, %v5473_v9, %v5469_v48  ;;  %v5404_v1 = vrot.slane %v18632_v28, %v13033_v42  ;;  %v18639_v48 = vld [vmem:[#allocation38_spill] sm:$0xff] }
 0x608   :  { %v5479_v52 = vsel %vm3412_vm12, %v5478_v55, %v5474_v45  ;;  %v5488_v24 = vrot.slane %v14554_v51, %v18550_v5  ;;  %v5252_v40 = vsel %vm3426_vm14, %v5251_v54, %v5247_v22  ;;  %v5326_v33 = vsel %vm3419_vm13, %v5325_v32, %v5321_v49  ;;  %v18634_v32 = vld [vmem:[#allocation60_spill] sm:$0xff] }
 0x609   :  { %v5538_v12 = vsel %vm3384_vm8, %v5537_v15, %v5533_v4  ;;  %v5483_v59 = vrot.slane %v14402_v16, %v13033_v42  ;;  %v18633_v47 = vrot.slane %v18567_v6, %v18559_v19  ;;  %v5331_v8 = vsel %vm3426_vm14, %v5330_v20, %v5326_v33 }
 0x60a   :  { %v4926_v14 = vpop.permute.xlu0 %4925  ;;  %v5543_v58 = vsel %vm3391_vm9, %v5542_v17, %v5538_v12  ;;  %v5405_v22 = vsel %vm3419_vm13, %v5404_v1, %v5400_v44  ;;  %v5552_v62 = vrot.slane %v4929_v23, %v13026_v25  ;;  %v5335_v37 = vrot.slane %v18634_v32, %v18559_v19  ;;  %v18654_v32 = vld [vmem:[#allocation134_spill] sm:$0xff] }
 0x60b   :  { %v5547_v27 = vrot.slane %v4926_v14, %v13071_v10  ;;  %v5178_v51 = vsel %vm3433_vm15, %v18633_v47, %v14557_v29  ;;  %v5410_v16 = vsel %vm3426_vm14, %v5409_v18, %v5405_v22  ;;  %v5484_v61 = vsel %vm3419_vm13, %v5483_v59, %v5479_v52  ;;  %v18650_v59 = vld [vmem:[#allocation135_spill] sm:$0xff]  ;;  %v18651_v47 = vld [vmem:[#allocation57_spill] sm:$0xff] }
 0x60c   :  { %v18635_v6 = vrot.slane %v18577_v3, %v18559_v19  ;;  %v5414_v15 = vrot.slane %v18636_v21, %v18559_v19  ;;  %v5489_v23 = vsel %vm3426_vm14, %v5488_v24, %v5484_v61  ;;  %vm18640_vm5 = vcmask 1041409   ;;  %v18648_v24 = vld [vmem:[#allocation3_spill] sm:$0xff] }
 0x60d   :  { %v5548_v39 = vsel %vm3398_vm10, %v5547_v27, %v5543_v58  ;;  %v5574_v55 = vsel %vm18640_vm5, %v18639_v48, %v18638_v30  ;;  %v5336_v4 = vsel %vm3433_vm15, %v5335_v37, %v5331_v8  ;;  %v5493_v54 = vrot.slane %v18641_v63, %v18559_v19  ;;  %v18652_v8 = vld [vmem:[#allocation128_spill] sm:$0xff]  ;;  %v18660_v48 = vld [vmem:[#allocation7_spill] sm:$0xff] }
 0x60e   :  { %v4932_v0 = vpop.permute.xlu0 %4931  ;;  %v5257_v29 = vsel %vm3433_vm15, %v18635_v6, %v5252_v40  ;;  %v5553_v2 = vsel %vm18637_vm11, %v5552_v62, %v5548_v39  ;;  %vm18642_vm0 = vcmask 1042434   ;;  %v5562_v9 = vrot.slane %v4935_v36, %v13033_v42  ;;  %v18649_v40 = vld [vmem:[#allocation21_spill] sm:$0xff]  ;;  %v18653_v62 = vld [vmem:[#allocation4_spill] sm:$0xff] }
 0x60f   :  { %v5557_v56 = vrot.slane %v4932_v0, %v13097_v41  ;;  %v5575_v11 = vsel %vm18642_vm0, %v5178_v51, %v5574_v55  ;;  %v5415_v49 = vsel %vm3433_vm15, %v5414_v15, %v5410_v16  ;;  %v5494_v20 = vsel %vm3433_vm15, %v5493_v54, %v5489_v23  ;;  %v18655_v16 = vld [vmem:[#allocation143_spill] sm:$0xff]  ;;  %v18658_v15 = vld [vmem:[#allocation130_spill] sm:$0xff]  ;;  %v18695_v41 = vld [vmem:[#allocation188_spill] sm:$0xff] }
 0x610   :  { %v5576_v60 = vsel %vm17635_vm6, %v5257_v29, %v5575_v11  ;;  %v5572_v17 = vrot.slane %v4941_v35, %v18559_v19  ;;  %vm18643_vm4 = vcmask 1044484   ;;  %vm18644_vm11 = vcmask 1045509   ;;  %v18657_v29 = vld [vmem:[#allocation138_spill] sm:$0xff] }
 0x611   :  { %v5558_v3 = vsel %vm3412_vm12, %v5557_v56, %v5553_v2  ;;  %v5577_v44 = vsel %vm18643_vm4, %v5336_v4, %v5576_v60  ;;  %vm18645_vm5 = vcmask 1046534   ;;  %vm18646_vm0 = vcmask 1047559   ;;  %v18656_v56 = vld [vmem:[#allocation6_spill] sm:$0xff]  ;;  %v18659_v2 = vld [vmem:[#allocation124_spill] sm:$0xff] }
 0x612   :  { %v4938_v12 = vpop.permute.xlu0 %4937  ;;  %v5563_v14 = vsel %vm3419_vm13, %v5562_v9, %v5558_v3  ;;  %v5578_v45 = vsel %vm18644_vm11, %v5415_v49, %v5577_v44  ;;  %v18661_v4 = vld [vmem:[#allocation74_spill] sm:$0xff]  ;;  %v18663_v3 = vld [vmem:[#allocation39_spill] sm:$0xff]  ;;  %v18668_v44 = vld [vmem:[#allocation136_spill] sm:$0xff]  ;;  %vm18874_vm4 = vcmask 326912   ;;  %vm18877_vm11 = vcmask 392512  }
 0x613   :  { %v5567_v13 = vrot.slane %v4938_v12, %v18550_v5  ;;  %v5579_v27 = vsel %vm18645_vm5, %v5494_v20, %v5578_v45  ;;  %v18662_v54 = vld [vmem:[#allocation78_spill] sm:$0xff]  ;;  %v18664_v9 = vld [vmem:[#allocation131_spill] sm:$0xff]  ;;  %v18669_v45 = vld [vmem:[#allocation24_spill] sm:$0xff]  ;;  %vm18882_vm5 = vcmask 458112  }
 0x614   :  { %v18665_v49 = vld [vmem:[#allocation31_spill] sm:$0xff]  ;;  %v18666_v20 = vld [vmem:[#allocation178_spill] sm:$0xff] }
 0x615   :  { %v5568_v18 = vsel %vm3426_vm14, %v5567_v13, %v5563_v14 }
 0x616   :  { %v5573_v36 = vsel %vm3433_vm15, %v5572_v17, %v5568_v18  ;;  %v18667_v17 = vld [vmem:[#allocation84_spill] sm:$0xff] }
 0x617   :  { %v5580_v28 = vsel %vm18646_vm0, %v5573_v36, %v5579_v27  ;;  %v18670_v27 = vld [vmem:[#allocation102_spill] sm:$0xff]  ;;  %vm18897_vm0 = vcmask 786112  }
 0x618   :  { %5582 = vadd.xlane.f32.xlu0 %v5580_v28 }
 0x6a1   :  { %v5583_v1 = vpop.xlane.xlu0 %5582 }
 0x6a2   :  { %10669 = vrcp.f32 %v5583_v1 }
 0x6af   :  { %v14772_v52 = vpop.eup %10669 }
 0x6b0   :  { %18647 = vst [vmem:[#allocation58_spill] sm:$0xff] %v14772_v52  ;;  %v5589_v58 = vrot.slane %v14772_v52, %v18648_v24  ;;  %v5593_v0 = vrot.slane %v14772_v52, %v18653_v62  ;;  %v14786_v6 = vrot.slane %v14772_v52, %v18656_v56  ;;  %v14793_v55 = vrot.slane %v14772_v52, %v18660_v48  ;;  %v18675_v48 = vld [vmem:[#allocation76_spill] sm:$0xff] }
 0x6b1   :  { %v18686_v62 = vld [vmem:[#allocation200_spill] sm:$0xff] }
 0x6b2   :  { %v5634_v33 = vmul.f32 %v18649_v40, %v5589_v58  ;;  %v5626_v39 = vmul.f32 %v18650_v59, %v5589_v58  ;;  %v5641_v51 = vmul.f32 %v18651_v47, %v5589_v58  ;;  %v5627_v22 = vmul.f32 %v18652_v8, %v5589_v58  ;;  %v18671_v40 = vld [vmem:[#allocation190_spill] sm:$0xff]  ;;  %v18672_v47 = vld [vmem:[#allocation179_spill] sm:$0xff] }
 0x6b3   :  { %v5643_v37 = vmul.f32 %v18654_v32, %v5593_v0  ;;  %v5628_v61 = vmul.f32 %v18655_v16, %v5589_v58  ;;  %v5629_v21 = vmul.f32 %v18657_v29, %v5589_v58  ;;  %v5630_v23 = vmul.f32 %v18658_v15, %v5589_v58  ;;  %v18673_v29 = vld [vmem:[#allocation193_spill] sm:$0xff] }
 0x6b4   :  { %5907 = vperm.xlu0 %9979, %v5634_v33   ;;  %5883 = vperm.xlu1 %9980, %v5626_v39   ;;  %v5631_v30 = vmul.f32 %v18659_v2, %v5589_v58  ;;  %v14796_v63 = vmul.f32 %v18661_v4, %v5589_v58  ;;  %v14799_v35 = vmul.f32 %v18662_v54, %v5589_v58 }
 0x6b5   :  { %v14802_v11 = vmul.f32 %v18663_v3, %v5589_v58  ;;  %v5645_v12 = vmul.f32 %v18664_v9, %v5593_v0  ;;  %v5647_v13 = vmul.f32 %v18665_v49, %v5593_v0  ;;  %v14807_v60 = vmul.f32 %v18666_v20, %v5589_v58  ;;  %v18677_v3 = vld [vmem:[#allocation100_spill] sm:$0xff] }
 0x6b6   :  { %v14810_v14 = vmul.f32 %v18667_v17, %v5589_v58  ;;  %v5649_v18 = vmul.f32 %v18668_v44, %v5593_v0  ;;  %v14814_v36 = vmul.f32 %v18669_v45, %v5589_v58  ;;  %v14817_v28 = vmul.f32 %v18670_v27, %v5589_v58  ;;  %v18678_v49 = vld [vmem:[#allocation80_spill] sm:$0xff]  ;;  %v18679_v17 = vld [vmem:[#allocation194_spill] sm:$0xff]  ;;  %v18680_v45 = vld [vmem:[#allocation189_spill] sm:$0xff] }
 0x6b7   :  { %v14819_v1 = vpack.c.bf16 %v5627_v22, %v5626_v39  ;;  %v14822_v59 = vmul.f32 %v18671_v40, %v5589_v58  ;;  %v14825_v8 = vmul.f32 %v18672_v47, %v5593_v0  ;;  %v14827_v32 = vpack.c.bf16 %v5629_v21, %v5628_v61  ;;  %v18674_v58 = vld [vmem:[#allocation133_spill] sm:$0xff]  ;;  %v18681_v40 = vld [vmem:[#allocation195_spill] sm:$0xff] }
 0x6b8   :  { %5928 = vperm.xlu0 %9979, %v5641_v51   ;;  %5886 = vperm.xlu1 %9980, %v5627_v22   ;;  %v14829_v16 = vpack.c.bf16 %v5631_v30, %v5630_v23  ;;  %v14832_v15 = vmul.f32 %v18673_v29, %v5593_v0  ;;  %v14836_v2 = vpack.c.bf16 %v14799_v35, %v14796_v63  ;;  %v18682_v29 = vld [vmem:[#allocation196_spill] sm:$0xff] }
 0x6b9   :  { %v14839_v39 = vpack.c.bf16 %v14802_v11, %v5634_v33  ;;  %v5651_v22 = vmul.f32 %v18674_v58, %v5593_v0  ;;  %v5653_v4 = vmul.f32 %v18675_v48, %v5593_v0  ;;  %v14851_v9 = vmul.f32 %v18677_v3, %v5593_v0 }
 0x6ba   :  { %v14854_v20 = vmul.f32 %v18678_v49, %v5593_v0  ;;  %v14857_v33 = vmul.f32 %v18679_v17, %v5593_v0  ;;  %v14861_v44 = vpack.c.bf16 %v14817_v28, %v14814_v36  ;;  %v14865_v27 = vmul.f32 %v18680_v45, %v14786_v6  ;;  %v18684_v45 = vld [vmem:[#allocation191_spill] sm:$0xff] }
 0x6bb   :  { %v14868_v47 = vmul.f32 %v18681_v40, %v5593_v0  ;;  %v14871_v58 = vmul.f32 %v18682_v29, %v5593_v0  ;;  %v14874_v48 = vpack.c.bf16 %v5641_v51, %v14822_v59  ;;  %v14880_v49 = vpack.c.bf16 %v5643_v37, %v14825_v8  ;;  %v18685_v29 = vld [vmem:[#allocation88_spill] sm:$0xff] }
 0x6bc   :  { %5934 = vperm.xlu0 %9979, %v5643_v37   ;;  %5889 = vperm.xlu1 %9980, %v5628_v61   ;;  %v18676_v61 = vld [vmem:[#allocation192_spill] sm:$0xff]  ;;  %v14883_v17 = vpack.c.bf16 %v5645_v12, %v14832_v15  ;;  %v5661_v40 = vmul.f32 %v18684_v45, %v14786_v6  ;;  %v5663_v56 = vmul.f32 %v18685_v29, %v14786_v6  ;;  %v18688_v37 = vld [vmem:[#allocation205_spill] sm:$0xff] }
 0x6bd   :  { %v14844_v54 = vmul.f32 %v18676_v61, %v5593_v0  ;;  %v18683_v61 = vld [vmem:[#allocation197_spill] sm:$0xff]  ;;  %v14890_v51 = vmul.f32 %v18686_v62, %v5593_v0  ;;  %v14899_v19 = vmul.f32 %v18688_v37, %v14786_v6  ;;  %v14906_v45 = vpack.c.bf16 %v5649_v18, %v14857_v33  ;;  %v18690_v62 = vld [vmem:[#allocation92_spill] sm:$0xff] }
 0x6be   :  { %v14877_v3 = vmul.f32 %v18683_v61, %v5593_v0  ;;  %v18687_v61 = vld [vmem:[#allocation172_spill] sm:$0xff]  ;;  %v5667_v0 = vmul.f32 %v18690_v62, %v14786_v6  ;;  %v14918_v37 = vpack.c.bf16 %v5653_v4, %v14871_v58  ;;  %v14924_v25 = vmul.f32 %v18695_v41, %v14786_v6  ;;  %v18701_v41 = vld [vmem:[#allocation181_spill] sm:$0xff] }
 0x6bf   :  { %v5665_v24 = vmul.f32 %v18687_v61, %v14786_v6  ;;  %v14915_v61 = vpack.c.bf16 %v5651_v22, %v14868_v47  ;;  %v14934_v50 = vmul.f32 %v18698_v31, %v14786_v6  ;;  %v5673_v7 = vmul.f32 %v18701_v41, %v14786_v6 }
 0x6c0   :  { %5940 = vperm.xlu0 %9979, %v5645_v12   ;;  %5892 = vperm.xlu1 %9980, %v5629_v21   ;;  %v14848_v21 = vpack.c.bf16 %v14810_v14, %v14807_v60  ;;  %v18689_v12 = vld [vmem:[#allocation22_spill] sm:$0xff]  ;;  %18693 = vst [vmem:[#allocation59_spill] sm:$0xff] %v14918_v37  ;;  %v14928_v62 = vpack.c.bf16 %v14851_v9, %v14877_v3  ;;  %v18719_v37 = vld [vmem:[#allocation167_spill] sm:$0xff] }
 0x6c1   :  { %v14903_v5 = vmul.f32 %v18689_v12, %v14786_v6  ;;  %18692 = vst [vmem:[#allocation118_spill] sm:$0xff] %v14915_v61  ;;  %v18694_v12 = vld [vmem:[#allocation174_spill] sm:$0xff]  ;;  %v14948_v43 = vmul.f32 %v18702_v46, %v14786_v6  ;;  %v5677_v26 = vmul.f32 %v18706_v38, %v14793_v55  ;;  %v14963_v41 = vmul.f32 %v18707_v34, %v14786_v6  ;;  %v18712_v34 = vld [vmem:[#allocation177_spill] sm:$0xff] }
 0x6c2   :  { %v5669_v42 = vmul.f32 %v18694_v12, %v14786_v6  ;;  %18696 = vst [vmem:[#allocation46_spill] sm:$0xff] %v14928_v62  ;;  %v14942_v12 = vpack.c.bf16 %v14854_v20, %v14890_v51  ;;  %v14971_v52 = vmul.f32 %v18709_v57, %v14793_v55  ;;  %v14978_v38 = vpack.c.bf16 %v5665_v24, %v14924_v25 }
 0x6c3   :  { %v14955_v31 = vpack.c.bf16 %v5661_v40, %v14903_v5  ;;  %v15005_v61 = vmul.f32 %v18719_v37, %v14793_v55 }
 0x6c4   :  { %5946 = vperm.xlu0 %9979, %v5647_v13   ;;  %5895 = vperm.xlu1 %9980, %v5630_v23   ;;  %v14893_v23 = vpack.c.bf16 %v5647_v13, %v14844_v54  ;;  %v18691_v13 = vld [vmem:[#allocation45_spill] sm:$0xff]  ;;  %18700 = vst [vmem:[#allocation28_spill] sm:$0xff] %v14942_v12  ;;  %18711 = vst [vmem:[#allocation30_spill] sm:$0xff] %v14978_v38 }
 0x6c5   :  { %v14912_v29 = vmul.f32 %v18691_v13, %v14786_v6  ;;  %v18697_v13 = vld [vmem:[#allocation176_spill] sm:$0xff]  ;;  %18704 = vst [vmem:[#allocation170_spill] sm:$0xff] %v14955_v31  ;;  %v18710_v31 = vld [vmem:[#allocation154_spill] sm:$0xff]  ;;  %v18716_v12 = vld [vmem:[#allocation165_spill] sm:$0xff] }
 0x6c6   :  { %v5671_v10 = vmul.f32 %v18697_v13, %v14786_v6  ;;  %v14952_v13 = vpack.c.bf16 %v14865_v27, %v14899_v19  ;;  %v14996_v62 = vmul.f32 %v18716_v12, %v14793_v55 }
 0x6c7   :  { %v14966_v46 = vpack.c.bf16 %v5663_v56, %v14912_v29 }
 0x6c8   :  { %5952 = vperm.xlu0 %9979, %v5649_v18   ;;  %5898 = vperm.xlu1 %9980, %v5631_v30   ;;  %v18699_v30 = vld [vmem:[#allocation187_spill] sm:$0xff]  ;;  %18703 = vst [vmem:[#allocation17_spill] sm:$0xff] %v14952_v13  ;;  %v18713_v13 = vld [vmem:[#allocation164_spill] sm:$0xff]  ;;  %v14999_v38 = vpack.c.bf16 %v5671_v10, %v14948_v43 }
 0x6c9   :  { %v14938_v18 = vmul.f32 %v18699_v30, %v14786_v6  ;;  %v18705_v30 = vld [vmem:[#allocation175_spill] sm:$0xff]  ;;  %18708 = vst [vmem:[#allocation53_spill] sm:$0xff] %v14966_v46  ;;  %v5679_v6 = vmul.f32 %v18712_v34, %v14793_v55  ;;  %v14984_v46 = vmul.f32 %v18713_v13, %v14793_v55  ;;  %v18718_v34 = vld [vmem:[#allocation180_spill] sm:$0xff] }
 0x6ca   :  { %v5675_v53 = vmul.f32 %v18705_v30, %v14793_v55  ;;  %v14975_v30 = vmul.f32 %v18710_v31, %v14793_v55  ;;  %18717 = vst [vmem:[#allocation18_spill] sm:$0xff] %v14999_v38  ;;  %v5683_v13 = vmul.f32 %v18718_v34, %v14793_v55 }
 0x6cb   :  { %v14990_v57 = vpack.c.bf16 %v5669_v42, %v14938_v18  ;;  %v15018_v38 = vpack.c.bf16 %v5679_v6, %v14984_v46 }
 0x6cc   :  { %5958 = vperm.xlu0 %9979, %v5651_v22   ;;  %5901 = vperm.xlu1 %9980, %v14796_v63   ;;  %v14987_v63 = vpack.c.bf16 %v5667_v0, %v14934_v50  ;;  %v18715_v22 = vld [vmem:[#allocation184_spill] sm:$0xff]  ;;  %v15015_v12 = vpack.c.bf16 %v5677_v26, %v14975_v30  ;;  %v15024_v37 = vpack.c.bf16 %v5683_v13, %v15005_v61 }
 0x6cd   :  { %v5681_v31 = vmul.f32 %v18715_v22, %v14793_v55  ;;  %v15012_v22 = vpack.c.bf16 %v5675_v53, %v14971_v52 }
 0x6ce   :  { %18714 = vst [vmem:[#allocation77_spill] sm:$0xff] %v14987_v63  ;;  %v15008_v63 = vpack.c.bf16 %v5673_v7, %v14963_v41 }
 0x6cf   :  { %v15021_v34 = vpack.c.bf16 %v5681_v31, %v14996_v62 }
 0x6d0   :  { %5964 = vperm.xlu0 %9979, %v5653_v4   ;;  %5904 = vperm.xlu1 %9980, %v14799_v35   ;;  %v18729_v4 = vld [vmem:[#allocation118_spill] sm:$0xff] }
 0x6d4   :  { %5970 = vperm.xlu0 %9979, %v14851_v9   ;;  %5910 = vperm.xlu1 %9980, %v14802_v11  }
 0x6d8   :  { %5976 = vperm.xlu0 %9979, %v14854_v20   ;;  %5913 = vperm.xlu1 %9980, %v14807_v60  }
 0x6dc   :  { %5982 = vperm.xlu0 %9979, %v14865_v27   ;;  %5916 = vperm.xlu1 %9980, %v14810_v14   ;;  %v18732_v27 = vld [vmem:[#allocation59_spill] sm:$0xff] }
 0x6e0   :  { %5988 = vperm.xlu0 %9979, %v5661_v40   ;;  %5919 = vperm.xlu1 %9980, %v14814_v36   ;;  %v7178_v36 = vunpack.c.l.b16 %v14906_v45  ;;  %v6982_v40 = vunpack.c.h.b16 %v14827_v32 }
 0x6e4   :  { %5994 = vperm.xlu0 %9979, %v5663_v56   ;;  %5922 = vperm.xlu1 %9980, %v14817_v28  }
 0x6e8   :  { %6000 = vperm.xlu0 %9979, %v5665_v24   ;;  %5925 = vperm.xlu1 %9980, %v14822_v59  }
 0x6ec   :  { %6006 = vperm.xlu0 %9979, %v5667_v0   ;;  %5931 = vperm.xlu1 %9980, %v14825_v8   ;;  %v18728_v8 = vld [vmem:[#allocation169_spill] sm:$0xff] }
 0x6f0   :  { %6012 = vperm.xlu0 %9979, %v5669_v42   ;;  %5937 = vperm.xlu1 %9980, %v14832_v15   ;;  %v6979_v42 = vunpack.c.l.b16 %v14819_v1  ;;  %v15086_v15 = vmul.f32 %v18728_v8, %v14793_v55  ;;  %v18753_v8 = vld [vmem:[#allocation77_spill] sm:$0xff] }
 0x6f4   :  { %6018 = vperm.xlu0 %9979, %v5671_v10   ;;  %5943 = vperm.xlu1 %9980, %v14844_v54   ;;  %v6987_v10 = vunpack.c.l.b16 %v14839_v39  ;;  %v7180_v54 = vunpack.c.l.b16 %v18729_v4 }
 0x6f8   :  { %6024 = vperm.xlu0 %9979, %v5673_v7   ;;  %5949 = vperm.xlu1 %9980, %v14857_v33   ;;  %v6985_v7 = vunpack.c.l.b16 %v14836_v2  ;;  %v6980_v33 = vunpack.c.h.b16 %v14819_v1  ;;  %v6984_v1 = vunpack.c.h.b16 %v14829_v16 }
 0x6fc   :  { %6030 = vperm.xlu0 %9979, %v5675_v53   ;;  %5955 = vperm.xlu1 %9980, %v14868_v47   ;;  %v6981_v53 = vunpack.c.l.b16 %v14827_v32  ;;  %v7182_v47 = vunpack.c.l.b16 %v18732_v27  ;;  %v6986_v32 = vunpack.c.h.b16 %v14836_v2  ;;  %v6990_v2 = vunpack.c.h.b16 %v14848_v21 }
 0x700   :  { %6036 = vperm.xlu0 %9979, %v5677_v26   ;;  %5961 = vperm.xlu1 %9980, %v14871_v58   ;;  %v6983_v26 = vunpack.c.l.b16 %v14829_v16  ;;  %v6988_v16 = vunpack.c.h.b16 %v14839_v39  ;;  %v6992_v39 = vunpack.c.h.b16 %v14861_v44 }
 0x704   :  { %6042 = vperm.xlu0 %9979, %v5679_v6   ;;  %5967 = vperm.xlu1 %9980, %v14877_v3  }
 0x708   :  { %6048 = vperm.xlu0 %9979, %v5681_v31   ;;  %5973 = vperm.xlu1 %9980, %v14890_v51   ;;  %v18735_v51 = vld [vmem:[#allocation46_spill] sm:$0xff] }
 0x709   :  { %v7184_v0 = vunpack.c.l.b16 %v18735_v51 }
 0x70c   :  { %6054 = vperm.xlu0 %9979, %v5683_v13   ;;  %5979 = vperm.xlu1 %9980, %v14899_v19   ;;  %v6991_v19 = vunpack.c.l.b16 %v14861_v44  ;;  %v7173_v44 = vunpack.c.h.b16 %v14880_v49 }
 0x710   :  { %5985 = vperm.xlu1 %9980, %v14903_v5   ;;  %6996 = vperm.xlu0 %9979, %v6979_v42   ;;  %v6989_v5 = vunpack.c.l.b16 %v14848_v21  ;;  %v18744_v42 = vld [vmem:[#allocation170_spill] sm:$0xff]  ;;  %v6994_v21 = vunpack.c.h.b16 %v14874_v48 }
 0x714   :  { %5991 = vperm.xlu1 %9980, %v14912_v29   ;;  %7002 = vperm.xlu0 %9979, %v6981_v53   ;;  %v7367_v53 = vunpack.c.l.b16 %v18744_v42 }
 0x718   :  { %5997 = vperm.xlu1 %9980, %v14924_v25   ;;  %7008 = vperm.xlu0 %9979, %v6983_v26   ;;  %v6993_v25 = vunpack.c.l.b16 %v14874_v48  ;;  %v7175_v48 = vunpack.c.h.b16 %v14883_v17 }
 0x71c   :  { %6003 = vperm.xlu1 %9980, %v14934_v50   ;;  %7014 = vperm.xlu0 %9979, %v6985_v7   ;;  %v7172_v50 = vunpack.c.l.b16 %v14880_v49  ;;  %v7177_v49 = vunpack.c.h.b16 %v14893_v23 }
 0x720   :  { %6009 = vperm.xlu1 %9980, %v14938_v18   ;;  %7020 = vperm.xlu0 %9979, %v6987_v10   ;;  %v18747_v10 = vld [vmem:[#allocation53_spill] sm:$0xff] }
 0x724   :  { %6015 = vperm.xlu1 %9980, %v14948_v43   ;;  %7026 = vperm.xlu0 %9979, %v6989_v5   ;;  %v7174_v43 = vunpack.c.l.b16 %v14883_v17  ;;  %v7369_v5 = vunpack.c.l.b16 %v18747_v10  ;;  %v7179_v17 = vunpack.c.h.b16 %v14906_v45  ;;  %v7183_v45 = vunpack.c.h.b16 %v18732_v27 }
 0x728   :  { %6021 = vperm.xlu1 %9980, %v14963_v41   ;;  %7032 = vperm.xlu0 %9979, %v6991_v19  }
 0x72c   :  { %6027 = vperm.xlu1 %9980, %v14971_v52   ;;  %7038 = vperm.xlu0 %9979, %v6993_v25   ;;  %v7176_v52 = vunpack.c.l.b16 %v14893_v23  ;;  %v7181_v23 = vunpack.c.h.b16 %v18729_v4  ;;  %v7185_v4 = vunpack.c.h.b16 %v18735_v51  ;;  %v18772_v51 = vld [vmem:[#allocation171_spill] sm:$0xff] }
 0x72f   :  { %v15061_v24 = vpop.permute.xlu0 %5907  ;;  %v15063_v56 = vpop.permute.xlu1 %5883 }
 0x730   :  { %18720 = vst [vmem:[#allocation19_spill] sm:$0xff] %v15061_v24  ;;  %18721 = vst [vmem:[#allocation47_spill] sm:$0xff] %v15063_v56  ;;  %6033 = vperm.xlu1 %9980, %v14975_v30   ;;  %7189 = vperm.xlu0 %9979, %v7172_v50   ;;  %v18741_v30 = vld [vmem:[#allocation17_spill] sm:$0xff]  ;;  %v18750_v50 = vld [vmem:[#allocation30_spill] sm:$0xff] }
 0x731   :  { %v7365_v6 = vunpack.c.l.b16 %v18741_v30 }
 0x733   :  { %v15067_v35 = vpop.permute.xlu0 %5928  ;;  %v15069_v11 = vpop.permute.xlu1 %5886 }
 0x734   :  { %18722 = vst [vmem:[#allocation55_spill] sm:$0xff] %v15067_v35  ;;  %18723 = vst [vmem:[#allocation122_spill] sm:$0xff] %v15069_v11  ;;  %6039 = vperm.xlu1 %9980, %v14984_v46   ;;  %7195 = vperm.xlu0 %9979, %v7174_v43   ;;  %v7371_v43 = vunpack.c.l.b16 %v18750_v50 }
 0x737   :  { %v15073_v60 = vpop.permute.xlu0 %5934  ;;  %v15075_v14 = vpop.permute.xlu1 %5889 }
 0x738   :  { %18724 = vst [vmem:[#allocation141_spill] sm:$0xff] %v15073_v60  ;;  %18725 = vst [vmem:[#allocation63_spill] sm:$0xff] %v15075_v14  ;;  %6045 = vperm.xlu1 %9980, %v14996_v62   ;;  %7201 = vperm.xlu0 %9979, %v7176_v52   ;;  %v18738_v62 = vld [vmem:[#allocation28_spill] sm:$0xff] }
 0x739   :  { %v7186_v18 = vunpack.c.l.b16 %v18738_v62  ;;  %v7187_v27 = vunpack.c.h.b16 %v18738_v62  ;;  %v7366_v62 = vunpack.c.h.b16 %v18741_v30 }
 0x73b   :  { %v15079_v28 = vpop.permute.xlu0 %5940  ;;  %v15081_v59 = vpop.permute.xlu1 %5892 }
 0x73c   :  { %18726 = vst [vmem:[#allocation126_spill] sm:$0xff] %v15079_v28  ;;  %18727 = vst [vmem:[#allocation52_spill] sm:$0xff] %v15081_v59  ;;  %6051 = vperm.xlu1 %9980, %v15005_v61   ;;  %7207 = vperm.xlu0 %9979, %v7178_v36  }
 0x73f   :  { %v15089_v9 = vpop.permute.xlu0 %5946  ;;  %v15091_v20 = vpop.permute.xlu1 %5895 }
 0x740   :  { %18730 = vst [vmem:[#allocation129_spill] sm:$0xff] %v15089_v9  ;;  %18731 = vst [vmem:[#allocation41_spill] sm:$0xff] %v15091_v20  ;;  %6057 = vperm.xlu1 %9980, %v15086_v15   ;;  %7213 = vperm.xlu0 %9979, %v7180_v54   ;;  %v7373_v54 = vunpack.c.l.b16 %v18753_v8 }
 0x743   :  { %v15096_v58 = vpop.permute.xlu0 %5952  ;;  %v15098_v3 = vpop.permute.xlu1 %5898 }
 0x744   :  { %18733 = vst [vmem:[#allocation44_spill] sm:$0xff] %v15096_v58  ;;  %18734 = vst [vmem:[#allocation75_spill] sm:$0xff] %v15098_v3  ;;  %6999 = vperm.xlu1 %9980, %v6980_v33   ;;  %7219 = vperm.xlu0 %9979, %v7182_v47  }
 0x747   :  { %v15102_v29 = vpop.permute.xlu0 %5958  ;;  %v15104_v61 = vpop.permute.xlu1 %5901 }
 0x748   :  { %18736 = vst [vmem:[#allocation97_spill] sm:$0xff] %v15102_v29  ;;  %18737 = vst [vmem:[#allocation50_spill] sm:$0xff] %v15104_v61  ;;  %7005 = vperm.xlu1 %9980, %v6982_v40   ;;  %7225 = vperm.xlu0 %9979, %v7184_v0   ;;  %v7375_v40 = vunpack.c.l.b16 %v14990_v57 }
 0x74b   :  { %v15108_v41 = vpop.permute.xlu0 %5964  ;;  %v15110_v46 = vpop.permute.xlu1 %5904 }
 0x74c   :  { %18739 = vst [vmem:[#allocation70_spill] sm:$0xff] %v15108_v41  ;;  %18740 = vst [vmem:[#allocation81_spill] sm:$0xff] %v15110_v46  ;;  %7011 = vperm.xlu1 %9980, %v6984_v1   ;;  %7231 = vperm.xlu0 %9979, %v7186_v18   ;;  %v18758_v18 = vld [vmem:[#allocation18_spill] sm:$0xff] }
 0x74f   :  { %v15114_v31 = vpop.permute.xlu0 %5970  ;;  %v15116_v13 = vpop.permute.xlu1 %5910 }
 0x750   :  { %18742 = vst [vmem:[#allocation94_spill] sm:$0xff] %v15114_v31  ;;  %18743 = vst [vmem:[#allocation56_spill] sm:$0xff] %v15116_v13  ;;  %7017 = vperm.xlu1 %9980, %v6986_v32   ;;  %7382 = vperm.xlu0 %9979, %v7365_v6   ;;  %v7377_v32 = vunpack.c.l.b16 %v18758_v18 }
 0x753   :  { %v15120_v26 = vpop.permute.xlu0 %5976  ;;  %v15122_v7 = vpop.permute.xlu1 %5913 }
 0x754   :  { %18745 = vst [vmem:[#allocation62_spill] sm:$0xff] %v15120_v26  ;;  %18746 = vst [vmem:[#allocation146_spill] sm:$0xff] %v15122_v7  ;;  %7023 = vperm.xlu1 %9980, %v6988_v16   ;;  %7388 = vperm.xlu0 %9979, %v7367_v53   ;;  %v7379_v53 = vunpack.c.l.b16 %v15008_v63 }
 0x757   :  { %v15126_v19 = vpop.permute.xlu0 %5982  ;;  %v15128_v25 = vpop.permute.xlu1 %5916 }
 0x758   :  { %18748 = vst [vmem:[#allocation90_spill] sm:$0xff] %v15126_v19  ;;  %18749 = vst [vmem:[#allocation87_spill] sm:$0xff] %v15128_v25  ;;  %7029 = vperm.xlu1 %9980, %v6990_v2   ;;  %7394 = vperm.xlu0 %9979, %v7369_v5  }
 0x75b   :  { %v15132_v52 = vpop.permute.xlu0 %5988  ;;  %v15134_v36 = vpop.permute.xlu1 %5919 }
 0x75c   :  { %18751 = vst [vmem:[#allocation99_spill] sm:$0xff] %v15132_v52  ;;  %18752 = vst [vmem:[#allocation64_spill] sm:$0xff] %v15134_v36  ;;  %7035 = vperm.xlu1 %9980, %v6992_v39   ;;  %7400 = vperm.xlu0 %9979, %v7371_v43   ;;  %v7558_v39 = vunpack.c.l.b16 %v15012_v22  ;;  %v18781_v36 = vld [vmem:[#allocation209_spill] sm:$0xff] }
 0x75f   :  { %v15138_v33 = vpop.permute.xlu0 %5994  ;;  %v15140_v47 = vpop.permute.xlu1 %5922 }
 0x760   :  { %18754 = vst [vmem:[#allocation149_spill] sm:$0xff] %v15138_v33  ;;  %18755 = vst [vmem:[#allocation98_spill] sm:$0xff] %v15140_v47  ;;  %7041 = vperm.xlu1 %9980, %v6994_v21   ;;  %7406 = vperm.xlu0 %9979, %v7373_v54   ;;  %v7560_v54 = vunpack.c.l.b16 %v15015_v12 }
 0x763   :  { %v15144_v0 = vpop.permute.xlu0 %6000  ;;  %v15146_v1 = vpop.permute.xlu1 %5925 }
 0x764   :  { %18756 = vst [vmem:[#allocation72_spill] sm:$0xff] %v15144_v0  ;;  %18757 = vst [vmem:[#allocation104_spill] sm:$0xff] %v15146_v1  ;;  %7192 = vperm.xlu1 %9980, %v7173_v44   ;;  %7412 = vperm.xlu0 %9979, %v7375_v40  }
 0x767   :  { %v15150_v6 = vpop.permute.xlu0 %6006  ;;  %v15152_v16 = vpop.permute.xlu1 %5931 }
 0x768   :  { %18759 = vst [vmem:[#allocation144_spill] sm:$0xff] %v15150_v6  ;;  %18760 = vst [vmem:[#allocation173_spill] sm:$0xff] %v15152_v16  ;;  %7198 = vperm.xlu1 %9980, %v7175_v48   ;;  %7418 = vperm.xlu0 %9979, %v7377_v32   ;;  %v7562_v48 = vunpack.c.l.b16 %v15018_v38 }
 0x76b   :  { %v15156_v2 = vpop.permute.xlu0 %6012  ;;  %v15158_v5 = vpop.permute.xlu1 %5937 }
 0x76c   :  { %18761 = vst [vmem:[#allocation151_spill] sm:$0xff] %v15156_v2  ;;  %18762 = vst [vmem:[#allocation14_spill] sm:$0xff] %v15158_v5  ;;  %7204 = vperm.xlu1 %9980, %v7177_v49   ;;  %7424 = vperm.xlu0 %9979, %v7379_v53   ;;  %v7564_v53 = vunpack.c.l.b16 %v15021_v34 }
 0x76f   :  { %v15162_v43 = vpop.permute.xlu0 %6018  ;;  %v15164_v21 = vpop.permute.xlu1 %5943 }
 0x770   :  { %18763 = vst [vmem:[#allocation147_spill] sm:$0xff] %v15162_v43  ;;  %18764 = vst [vmem:[#allocation13_spill] sm:$0xff] %v15164_v21  ;;  %7210 = vperm.xlu1 %9980, %v7179_v17   ;;  %7575 = vperm.xlu0 %9979, %v7558_v39   ;;  %v18769_v17 = vld [vmem:[#allocation186_spill] sm:$0xff] }
 0x771   :  { %v15182_v39 = vmul.f32 %v18769_v17, %v14793_v55  ;;  %v18774_v17 = vld [vmem:[#allocation182_spill] sm:$0xff] }
 0x772   :  { %v15200_v35 = vmul.f32 %v18774_v17, %v14793_v55  ;;  %v18778_v43 = vld [vmem:[#allocation58_spill] sm:$0xff]  ;;  %v18779_v17 = vld [vmem:[#allocation9_spill] sm:$0xff] }
 0x773   :  { %v15168_v44 = vpop.permute.xlu0 %6024  ;;  %v15170_v40 = vpop.permute.xlu1 %5949  ;;  %v15218_v47 = vmul.f32 %v18779_v17, %v14793_v55  ;;  %v18784_v17 = vld [vmem:[#allocation109_spill] sm:$0xff] }
 0x774   :  { %18765 = vst [vmem:[#allocation103_spill] sm:$0xff] %v15168_v44  ;;  %18766 = vst [vmem:[#allocation153_spill] sm:$0xff] %v15170_v40  ;;  %7216 = vperm.xlu1 %9980, %v7181_v23   ;;  %7581 = vperm.xlu0 %9979, %v7560_v54   ;;  %v7566_v44 = vunpack.c.l.b16 %v15024_v37 }
 0x775   :  { %18780 = vst [vmem:[#allocation60_spill] sm:$0xff] %v15218_v47 }
 0x777   :  { %v15174_v32 = vpop.permute.xlu0 %6030  ;;  %v15176_v49 = vpop.permute.xlu1 %5955 }
 0x778   :  { %18767 = vst [vmem:[#allocation212_spill] sm:$0xff] %v15174_v32  ;;  %18768 = vst [vmem:[#allocation106_spill] sm:$0xff] %v15176_v49  ;;  %7222 = vperm.xlu1 %9980, %v7183_v45   ;;  %7587 = vperm.xlu0 %9979, %v7562_v48   ;;  %v15192_v45 = vpack.c.bf16 %v15182_v39, %v15086_v15  ;;  %v15196_v48 = vmul.f32 %v18772_v51, %v14793_v55 }
 0x77a   :  { %18773 = vst [vmem:[#allocation95_spill] sm:$0xff] %v15196_v48  ;;  %v7568_v1 = vunpack.c.l.b16 %v15192_v45  ;;  %v15214_v51 = vpack.c.bf16 %v15200_v35, %v15196_v48 }
 0x77b   :  { %v15184_v23 = vpop.permute.xlu0 %6036  ;;  %v15186_v54 = vpop.permute.xlu1 %5961 }
 0x77c   :  { %18770 = vst [vmem:[#allocation211_spill] sm:$0xff] %v15184_v23  ;;  %18771 = vst [vmem:[#allocation101_spill] sm:$0xff] %v15186_v54  ;;  %7228 = vperm.xlu1 %9980, %v7185_v4   ;;  %7593 = vperm.xlu0 %9979, %v7564_v53   ;;  %v18777_v53 = vld [vmem:[#allocation8_spill] sm:$0xff]  ;;  %v7570_v25 = vunpack.c.l.b16 %v15214_v51 }
 0x77d   :  { %v15209_v15 = vrot.slane %v18778_v43, %v18777_v53  ;;  %v7368_v53 = vunpack.c.h.b16 %v18744_v42  ;;  %v7370_v42 = vunpack.c.h.b16 %v18747_v10  ;;  %v7372_v10 = vunpack.c.h.b16 %v18750_v50 }
 0x77e   :  { %v7374_v50 = vunpack.c.h.b16 %v18753_v8  ;;  %v7376_v8 = vunpack.c.h.b16 %v14990_v57  ;;  %v7378_v57 = vunpack.c.h.b16 %v18758_v18  ;;  %v7380_v18 = vunpack.c.h.b16 %v15008_v63 }
 0x77f   :  { %v15202_v26 = vpop.permute.xlu0 %6042  ;;  %v15204_v4 = vpop.permute.xlu1 %5967  ;;  %v15236_v7 = vmul.f32 %v18784_v17, %v15209_v15  ;;  %v18789_v17 = vld [vmem:[#allocation159_spill] sm:$0xff]  ;;  %v7559_v63 = vunpack.c.h.b16 %v15012_v22 }
 0x780   :  { %18775 = vst [vmem:[#allocation86_spill] sm:$0xff] %v15202_v26  ;;  %18776 = vst [vmem:[#allocation105_spill] sm:$0xff] %v15204_v4  ;;  %7234 = vperm.xlu1 %9980, %v7187_v27   ;;  %7599 = vperm.xlu0 %9979, %v7566_v44   ;;  %v15222_v27 = vmul.f32 %v18781_v36, %v14793_v55  ;;  %v18786_v55 = vld [vmem:[#allocation206_spill] sm:$0xff]  ;;  %v15254_v4 = vmul.f32 %v18789_v17, %v15209_v15  ;;  %v18794_v17 = vld [vmem:[#allocation111_spill] sm:$0xff] }
 0x781   :  { %18785 = vst [vmem:[#allocation38_spill] sm:$0xff] %v15236_v7  ;;  %v15240_v36 = vmul.f32 %v18786_v55, %v15209_v15  ;;  %v18791_v55 = vld [vmem:[#allocation96_spill] sm:$0xff]  ;;  %v15272_v29 = vmul.f32 %v18794_v17, %v15209_v15 }
 0x782   :  { %v15232_v2 = vpack.c.bf16 %v15222_v27, %v15218_v47  ;;  %18790 = vst [vmem:[#allocation135_spill] sm:$0xff] %v15254_v4  ;;  %v15258_v41 = vmul.f32 %v18791_v55, %v15209_v15  ;;  %v18796_v55 = vld [vmem:[#allocation157_spill] sm:$0xff]  ;;  %v18799_v17 = vld [vmem:[#allocation32_spill] sm:$0xff] }
 0x783   :  { %v15224_v44 = vpop.permute.xlu0 %6048  ;;  %v15226_v30 = vpop.permute.xlu1 %5973  ;;  %18795 = vst [vmem:[#allocation134_spill] sm:$0xff] %v15272_v29  ;;  %v15276_v54 = vmul.f32 %v18796_v55, %v15209_v15  ;;  %v15290_v49 = vmul.f32 %v18799_v17, %v15209_v15  ;;  %v18801_v55 = vld [vmem:[#allocation160_spill] sm:$0xff]  ;;  %v18804_v17 = vld [vmem:[#allocation34_spill] sm:$0xff] }
 0x784   :  { %18782 = vst [vmem:[#allocation82_spill] sm:$0xff] %v15224_v44  ;;  %18783 = vst [vmem:[#allocation83_spill] sm:$0xff] %v15226_v30  ;;  %7385 = vperm.xlu1 %9980, %v7366_v62   ;;  %7605 = vperm.xlu0 %9979, %v7568_v1   ;;  %v7572_v1 = vunpack.c.l.b16 %v15232_v2  ;;  %v15250_v30 = vpack.c.bf16 %v15240_v36, %v15236_v7  ;;  %v15268_v13 = vpack.c.bf16 %v15258_v41, %v15254_v4 }
 0x785   :  { %18792 = vst [vmem:[#allocation57_spill] sm:$0xff] %v15258_v41  ;;  %18797 = vst [vmem:[#allocation143_spill] sm:$0xff] %v15276_v54  ;;  %v15286_v0 = vpack.c.bf16 %v15276_v54, %v15272_v29  ;;  %v15294_v46 = vmul.f32 %v18801_v55, %v15209_v15  ;;  %v15308_v61 = vmul.f32 %v18804_v17, %v15209_v15  ;;  %v18806_v55 = vld [vmem:[#allocation161_spill] sm:$0xff]  ;;  %v18809_v17 = vld [vmem:[#allocation36_spill] sm:$0xff] }
 0x786   :  { %18800 = vst [vmem:[#allocation130_spill] sm:$0xff] %v15290_v49  ;;  %v15312_v3 = vmul.f32 %v18806_v55, %v15209_v15  ;;  %v15326_v9 = vmul.f32 %v18809_v17, %v15209_v15  ;;  %v18811_v55 = vld [vmem:[#allocation162_spill] sm:$0xff]  ;;  %v18814_v17 = vld [vmem:[#allocation15_spill] sm:$0xff]  ;;  %v18861_v29 = vld [vmem:[#allocation61_spill] sm:$0xff] }
 0x787   :  { %v15242_v31 = vpop.permute.xlu0 %6054  ;;  %v15244_v62 = vpop.permute.xlu1 %5979  ;;  %18802 = vst [vmem:[#allocation124_spill] sm:$0xff] %v15294_v46  ;;  %v15304_v33 = vpack.c.bf16 %v15294_v46, %v15290_v49  ;;  %18805 = vst [vmem:[#allocation74_spill] sm:$0xff] %v15308_v61  ;;  %v15330_v52 = vmul.f32 %v18811_v55, %v15209_v15  ;;  %v18816_v55 = vld [vmem:[#allocation163_spill] sm:$0xff] }
 0x788   :  { %18787 = vst [vmem:[#allocation213_spill] sm:$0xff] %v15242_v31  ;;  %18788 = vst [vmem:[#allocation21_spill] sm:$0xff] %v15244_v62  ;;  %7391 = vperm.xlu1 %9980, %v7368_v53   ;;  %7611 = vperm.xlu0 %9979, %v7570_v25   ;;  %v7751_v25 = vunpack.c.l.b16 %v15250_v30  ;;  %v15322_v40 = vpack.c.bf16 %v15312_v3, %v15308_v61  ;;  %v15348_v21 = vmul.f32 %v18816_v55, %v15209_v15  ;;  %v18820_v55 = vld [vmem:[#allocation40_spill] sm:$0xff] }
 0x789   :  { %18807 = vst [vmem:[#allocation78_spill] sm:$0xff] %v15312_v3  ;;  %18810 = vst [vmem:[#allocation131_spill] sm:$0xff] %v15326_v9  ;;  %v15340_v20 = vpack.c.bf16 %v15330_v52, %v15326_v9  ;;  %v15366_v19 = vmul.f32 %v18820_v55, %v15209_v15  ;;  %v18825_v55 = vld [vmem:[#allocation43_spill] sm:$0xff] }
 0x78a   :  { %18812 = vst [vmem:[#allocation31_spill] sm:$0xff] %v15330_v52  ;;  %18817 = vst [vmem:[#allocation136_spill] sm:$0xff] %v15348_v21 }
 0x78b   :  { %v15260_v6 = vpop.permute.xlu1 %5985  ;;  %v15262_v53 = vpop.permute.xlu0 %6996  ;;  %v7761_v28 = vunpack.c.l.b16 %v15340_v20  ;;  %18821 = vst [vmem:[#allocation102_spill] sm:$0xff] %v15366_v19 }
 0x78c   :  { %18793 = vst [vmem:[#allocation128_spill] sm:$0xff] %v15260_v6  ;;  %7397 = vperm.xlu1 %9980, %v7370_v42   ;;  %7617 = vperm.xlu0 %9979, %v7572_v1   ;;  %v7753_v1 = vunpack.c.l.b16 %v15268_v13 }
 0x78f   :  { %v15278_v24 = vpop.permute.xlu1 %5991  ;;  %v15280_v42 = vpop.permute.xlu0 %7002 }
 0x790   :  { %18798 = vst [vmem:[#allocation138_spill] sm:$0xff] %v15278_v24  ;;  %7403 = vperm.xlu1 %9980, %v7372_v10   ;;  %7768 = vperm.xlu0 %9979, %v7751_v25   ;;  %v7755_v25 = vunpack.c.l.b16 %v15286_v0  ;;  %v15344_v24 = vmul.f32 %v18814_v17, %v15209_v15 }
 0x792   :  { %18815 = vst [vmem:[#allocation84_spill] sm:$0xff] %v15344_v24  ;;  %v15362_v17 = vpack.c.bf16 %v15348_v21, %v15344_v24 }
 0x793   :  { %v15296_v58 = vpop.permute.xlu1 %5997  ;;  %v15298_v10 = vpop.permute.xlu0 %7008 }
 0x794   :  { %18803 = vst [vmem:[#allocation7_spill] sm:$0xff] %v15296_v58  ;;  %7409 = vperm.xlu1 %9980, %v7374_v50   ;;  %7774 = vperm.xlu0 %9979, %v7753_v1   ;;  %v7757_v1 = vunpack.c.l.b16 %v15304_v33  ;;  %v7763_v6 = vunpack.c.l.b16 %v15362_v17 }
 0x797   :  { %v15314_v58 = vpop.permute.xlu1 %6003  ;;  %v15316_v50 = vpop.permute.xlu0 %7014 }
 0x798   :  { %18808 = vst [vmem:[#allocation39_spill] sm:$0xff] %v15314_v58  ;;  %7415 = vperm.xlu1 %9980, %v7376_v8   ;;  %7780 = vperm.xlu0 %9979, %v7755_v25   ;;  %v7759_v25 = vunpack.c.l.b16 %v15322_v40 }
 0x79b   :  { %v15332_v58 = vpop.permute.xlu1 %6009  ;;  %v15334_v8 = vpop.permute.xlu0 %7020 }
 0x79c   :  { %18813 = vst [vmem:[#allocation178_spill] sm:$0xff] %v15332_v58  ;;  %7421 = vperm.xlu1 %9980, %v7378_v57   ;;  %7786 = vperm.xlu0 %9979, %v7757_v1   ;;  %v18819_v1 = vld [vmem:[#allocation16_spill] sm:$0xff] }
 0x79d   :  { %v15357_v59 = vrot.slane %v18778_v43, %v18819_v1  ;;  %v7561_v1 = vunpack.c.h.b16 %v15015_v12  ;;  %v7563_v12 = vunpack.c.h.b16 %v15018_v38  ;;  %v7565_v38 = vunpack.c.h.b16 %v15021_v34 }
 0x79e   :  { %v7567_v34 = vunpack.c.h.b16 %v15024_v37  ;;  %v7569_v37 = vunpack.c.h.b16 %v15192_v45  ;;  %v7571_v45 = vunpack.c.h.b16 %v15214_v51  ;;  %v7573_v51 = vunpack.c.h.b16 %v15232_v2 }
 0x79f   :  { %v15350_v58 = vpop.permute.xlu1 %6015  ;;  %v15352_v57 = vpop.permute.xlu0 %7026  ;;  %v15384_v14 = vmul.f32 %v18825_v55, %v15357_v59  ;;  %v18830_v55 = vld [vmem:[#allocation116_spill] sm:$0xff] }
 0x7a0   :  { %18818 = vst [vmem:[#allocation24_spill] sm:$0xff] %v15350_v58  ;;  %7427 = vperm.xlu1 %9980, %v7380_v18   ;;  %7792 = vperm.xlu0 %9979, %v7759_v25   ;;  %v18822_v58 = vld [vmem:[#allocation155_spill] sm:$0xff]  ;;  %v15402_v16 = vmul.f32 %v18830_v55, %v15357_v59 }
 0x7a1   :  { %v15370_v18 = vmul.f32 %v18822_v58, %v15209_v15  ;;  %18826 = vst [vmem:[#allocation193_spill] sm:$0xff] %v15384_v14  ;;  %v18827_v58 = vld [vmem:[#allocation107_spill] sm:$0xff] }
 0x7a2   :  { %v15388_v15 = vmul.f32 %v18827_v58, %v15357_v59  ;;  %18831 = vst [vmem:[#allocation192_spill] sm:$0xff] %v15402_v16  ;;  %v18832_v58 = vld [vmem:[#allocation156_spill] sm:$0xff]  ;;  %v18835_v55 = vld [vmem:[#allocation119_spill] sm:$0xff] }
 0x7a3   :  { %18823 = vst [vmem:[#allocation190_spill] sm:$0xff] %v15370_v18  ;;  %v15372_v25 = vpop.permute.xlu1 %6021  ;;  %v15374_v22 = vpop.permute.xlu0 %7032  ;;  %v15380_v5 = vpack.c.bf16 %v15370_v18, %v15366_v19  ;;  %v15406_v60 = vmul.f32 %v18832_v58, %v15357_v59  ;;  %v15420_v11 = vmul.f32 %v18835_v55, %v15357_v59  ;;  %v18837_v58 = vld [vmem:[#allocation26_spill] sm:$0xff]  ;;  %v18840_v55 = vld [vmem:[#allocation51_spill] sm:$0xff] }
 0x7a4   :  { %18824 = vst [vmem:[#allocation179_spill] sm:$0xff] %v15372_v25  ;;  %7578 = vperm.xlu1 %9980, %v7559_v63   ;;  %7798 = vperm.xlu0 %9979, %v7761_v28   ;;  %18828 = vst [vmem:[#allocation133_spill] sm:$0xff] %v15388_v15  ;;  %v15398_v62 = vpack.c.bf16 %v15388_v15, %v15384_v14  ;;  %v15424_v44 = vmul.f32 %v18837_v58, %v15357_v59  ;;  %v18842_v58 = vld [vmem:[#allocation10_spill] sm:$0xff] }
 0x7a5   :  { %v7765_v28 = vunpack.c.l.b16 %v15380_v5  ;;  %18833 = vst [vmem:[#allocation100_spill] sm:$0xff] %v15406_v60  ;;  %v15416_v31 = vpack.c.bf16 %v15406_v60, %v15402_v16  ;;  %18836 = vst [vmem:[#allocation194_spill] sm:$0xff] %v15420_v11  ;;  %v15438_v32 = vmul.f32 %v18840_v55, %v15357_v59  ;;  %v18845_v55 = vld [vmem:[#allocation120_spill] sm:$0xff] }
 0x7a6   :  { %18838 = vst [vmem:[#allocation189_spill] sm:$0xff] %v15424_v44  ;;  %v15434_v23 = vpack.c.bf16 %v15424_v44, %v15420_v11  ;;  %v15456_v11 = vmul.f32 %v18845_v55, %v15357_v59  ;;  %v18850_v55 = vld [vmem:[#allocation27_spill] sm:$0xff] }
 0x7a7   :  { %v15390_v25 = vpop.permute.xlu1 %6027  ;;  %v15392_v63 = vpop.permute.xlu0 %7038  ;;  %18841 = vst [vmem:[#allocation196_spill] sm:$0xff] %v15438_v32  ;;  %v15474_v14 = vmul.f32 %v18850_v55, %v15357_v59  ;;  %v18855_v55 = vld [vmem:[#allocation29_spill] sm:$0xff] }
 0x7a8   :  { %18829 = vst [vmem:[#allocation76_spill] sm:$0xff] %v15390_v25  ;;  %7584 = vperm.xlu1 %9980, %v7561_v1   ;;  %7804 = vperm.xlu0 %9979, %v7763_v6   ;;  %v7944_v6 = vunpack.c.l.b16 %v15398_v62  ;;  %18846 = vst [vmem:[#allocation88_spill] sm:$0xff] %v15456_v11  ;;  %v15492_v24 = vmul.f32 %v18855_v55, %v15357_v59  ;;  %v15506_v55 = vmul.f32 %v18861_v29, %v15357_v59 }
 0x7a9   :  { %18851 = vst [vmem:[#allocation205_spill] sm:$0xff] %v15474_v14 }
 0x7aa   :  { %18856 = vst [vmem:[#allocation45_spill] sm:$0xff] %v15492_v24  ;;  %18862 = vst [vmem:[#allocation188_spill] sm:$0xff] %v15506_v55 }
 0x7ab   :  { %v15408_v56 = vpop.permute.xlu1 %6033  ;;  %v15410_v1 = vpop.permute.xlu0 %7189 }
 0x7ac   :  { %18834 = vst [vmem:[#allocation80_spill] sm:$0xff] %v15408_v56  ;;  %7590 = vperm.xlu1 %9980, %v7563_v12   ;;  %7810 = vperm.xlu0 %9979, %v7765_v28   ;;  %v7946_v28 = vunpack.c.l.b16 %v15416_v31  ;;  %v15442_v56 = vmul.f32 %v18842_v58, %v15357_v59  ;;  %v18847_v58 = vld [vmem:[#allocation158_spill] sm:$0xff] }
 0x7ad   :  { %v15460_v16 = vmul.f32 %v18847_v58, %v15357_v59  ;;  %v18852_v58 = vld [vmem:[#allocation108_spill] sm:$0xff] }
 0x7ae   :  { %18843 = vst [vmem:[#allocation197_spill] sm:$0xff] %v15442_v56  ;;  %v15452_v25 = vpack.c.bf16 %v15442_v56, %v15438_v32  ;;  %v15478_v19 = vmul.f32 %v18852_v58, %v15357_v59  ;;  %v18857_v58 = vld [vmem:[#allocation11_spill] sm:$0xff] }
 0x7af   :  { %v15426_v26 = vpop.permute.xlu1 %6039  ;;  %v15428_v12 = vpop.permute.xlu0 %7195  ;;  %18848 = vst [vmem:[#allocation200_spill] sm:$0xff] %v15460_v16  ;;  %v15470_v32 = vpack.c.bf16 %v15460_v16, %v15456_v11  ;;  %v15496_v9 = vmul.f32 %v18857_v58, %v15357_v59 }
 0x7b0   :  { %18839 = vst [vmem:[#allocation195_spill] sm:$0xff] %v15426_v26  ;;  %7596 = vperm.xlu1 %9980, %v7565_v38   ;;  %7961 = vperm.xlu0 %9979, %v7944_v6   ;;  %v7948_v6 = vunpack.c.l.b16 %v15434_v23  ;;  %18853 = vst [vmem:[#allocation22_spill] sm:$0xff] %v15478_v19  ;;  %v15488_v11 = vpack.c.bf16 %v15478_v19, %v15474_v14  ;;  %v7752_v14 = vunpack.c.h.b16 %v15250_v30  ;;  %v18863_v19 = vld [vmem:[#allocation25_spill] sm:$0xff]  ;;  %v18866_v30 = vld [vmem:[#allocation2_spill] sm:$0xff] }
 0x7b1   :  { %18858 = vst [vmem:[#allocation174_spill] sm:$0xff] %v15496_v9  ;;  %v15510_v58 = vrot.slane %v18778_v43, %v18863_v19  ;;  %v7055_v29 = vrot.slane %v15280_v42, %v18866_v30  ;;  %v18867_v19 = vld [vmem:[#allocation201_spill] sm:$0xff] }
 0x7b2   :  { %v7954_v16 = vunpack.c.l.b16 %v15488_v11 }
 0x7b3   :  { %v15444_v26 = vpop.permute.xlu1 %6045  ;;  %v15446_v38 = vpop.permute.xlu0 %7201 }
 0x7b4   :  { %18844 = vst [vmem:[#allocation191_spill] sm:$0xff] %v15444_v26  ;;  %7602 = vperm.xlu1 %9980, %v7567_v34   ;;  %7967 = vperm.xlu0 %9979, %v7946_v28   ;;  %v7950_v28 = vunpack.c.l.b16 %v15452_v25 }
 0x7b7   :  { %v15462_v26 = vpop.permute.xlu1 %6051  ;;  %v15464_v34 = vpop.permute.xlu0 %7207 }
 0x7b8   :  { %18849 = vst [vmem:[#allocation172_spill] sm:$0xff] %v15462_v26  ;;  %7608 = vperm.xlu1 %9980, %v7569_v37   ;;  %7973 = vperm.xlu0 %9979, %v7948_v6   ;;  %v7952_v6 = vunpack.c.l.b16 %v15470_v32 }
 0x7bb   :  { %v15480_v26 = vpop.permute.xlu1 %6057  ;;  %v15482_v37 = vpop.permute.xlu0 %7213 }
 0x7bc   :  { %18854 = vst [vmem:[#allocation92_spill] sm:$0xff] %v15480_v26  ;;  %7614 = vperm.xlu1 %9980, %v7571_v45   ;;  %7979 = vperm.xlu0 %9979, %v7950_v28   ;;  %v18859_v45 = vld [vmem:[#allocation198_spill] sm:$0xff]  ;;  %v18860_v28 = vld [vmem:[#allocation199_spill] sm:$0xff] }
 0x7bd   :  { %v7046_v2 = vrot.slane %v15262_v53, %v18859_v45  ;;  %v15516_v53 = vpack.c.bf16 %v15496_v9, %v15492_v24  ;;  %v18868_v24 = vld [vmem:[#allocation35_spill] sm:$0xff] }
 0x7be   :  { %v15531_v9 = vmul.f32 %v18868_v24, %v15510_v58  ;;  %v18873_v24 = vld [vmem:[#allocation203_spill] sm:$0xff] }
 0x7bf   :  { %v7000_v26 = vpop.permute.xlu1 %6999  ;;  %v15498_v61 = vpop.permute.xlu0 %7219 }
 0x7c0   :  { %v7050_v49 = vrot.slane %v7000_v26, %v18860_v28  ;;  %7620 = vperm.xlu1 %9980, %v7573_v51   ;;  %7985 = vperm.xlu0 %9979, %v7952_v6   ;;  %v18864_v26 = vld [vmem:[#allocation12_spill] sm:$0xff]  ;;  %18869 = vst [vmem:[#allocation185_spill] sm:$0xff] %v15531_v9 }
 0x7c1   :  { %v15520_v51 = vmul.f32 %v18864_v26, %v15357_v59  ;;  %v7956_v26 = vunpack.c.l.b16 %v15516_v53 }
 0x7c2   :  { %v7051_v4 = vsel %vm17634_vm1, %v7050_v49, %v7046_v2  ;;  %v7754_v2 = vunpack.c.h.b16 %v15268_v13 }
 0x7c3   :  { %18865 = vst [vmem:[#allocation176_spill] sm:$0xff] %v15520_v51  ;;  %v7006_v6 = vpop.permute.xlu1 %7005  ;;  %v15524_v7 = vpop.permute.xlu0 %7225  ;;  %v7056_v49 = vsel %vm3342_vm2, %v7055_v29, %v7051_v4  ;;  %v15537_v42 = vpack.c.bf16 %v15520_v51, %v15506_v55  ;;  %v18875_v55 = vld [vmem:[#allocation37_spill] sm:$0xff] }
 0x7c4   :  { %v7060_v56 = vrot.slane %v7006_v6, %v18867_v19  ;;  %7771 = vperm.xlu1 %9980, %v7752_v14   ;;  %7991 = vperm.xlu0 %9979, %v7954_v16   ;;  %v18870_v6 = vld [vmem:[#allocation110_spill] sm:$0xff]  ;;  %v15552_v51 = vmul.f32 %v18875_v55, %v15510_v58  ;;  %v18881_v55 = vld [vmem:[#allocation204_spill] sm:$0xff] }
 0x7c5   :  { %v15541_v14 = vmul.f32 %v18870_v6, %v15510_v58  ;;  %v18872_v16 = vld [vmem:[#allocation202_spill] sm:$0xff]  ;;  %v7958_v44 = vunpack.c.l.b16 %v15537_v42 }
 0x7c6   :  { %v7061_v59 = vsel %vm3349_vm3, %v7060_v56, %v7056_v49  ;;  %v7065_v4 = vrot.slane %v15298_v10, %v18872_v16  ;;  %v7756_v49 = vunpack.c.h.b16 %v15286_v0  ;;  %18876 = vst [vmem:[#allocation181_spill] sm:$0xff] %v15552_v51 }
 0x7c7   :  { %18871 = vst [vmem:[#allocation187_spill] sm:$0xff] %v15541_v14  ;;  %v7012_v13 = vpop.permute.xlu1 %7011  ;;  %v15545_v29 = vpop.permute.xlu0 %7231  ;;  %v15558_v10 = vpack.c.bf16 %v15541_v14, %v15531_v9  ;;  %v18883_v9 = vld [vmem:[#allocation148_spill] sm:$0xff] }
 0x7c8   :  { %v7070_v47 = vrot.slane %v7012_v13, %v18873_v24  ;;  %7777 = vperm.xlu1 %9980, %v7754_v2   ;;  %7997 = vperm.xlu0 %9979, %v7956_v26   ;;  %v7066_v56 = vsel %vm18874_vm4, %v7065_v4, %v7061_v59  ;;  %v18878_v13 = vld [vmem:[#allocation113_spill] sm:$0xff]  ;;  %v18880_v26 = vld [vmem:[#allocation127_spill] sm:$0xff]  ;;  %v15573_v14 = vmul.f32 %v18883_v9, %v15510_v58  ;;  %vm18918_vm4 = vmmov 0  }
 0x7c9   :  { %v15562_v2 = vmul.f32 %v18878_v13, %v15510_v58  ;;  %v7075_v59 = vrot.slane %v15316_v50, %v18880_v26  ;;  %v8137_v60 = vunpack.c.l.b16 %v15558_v10  ;;  %v18888_v9 = vld [vmem:[#allocation23_spill] sm:$0xff] }
 0x7ca   :  { %v7071_v6 = vsel %vm18877_vm11, %v7070_v47, %v7066_v56  ;;  %v7758_v56 = vunpack.c.h.b16 %v15304_v33  ;;  %18884 = vst [vmem:[#allocation175_spill] sm:$0xff] %v15573_v14  ;;  %vm18923_vm11 = vcmask 326912  }
 0x7cb   :  { %18879 = vst [vmem:[#allocation152_spill] sm:$0xff] %v15562_v2  ;;  %v7018_v0 = vpop.permute.xlu1 %7017  ;;  %v15566_v4 = vpop.permute.xlu0 %7382  ;;  %v7076_v47 = vsel %vm18882_vm5, %v7075_v59, %v7071_v6  ;;  %v15579_v50 = vpack.c.bf16 %v15562_v2, %v15552_v51  ;;  %v18889_v51 = vld [vmem:[#allocation71_spill] sm:$0xff]  ;;  %vm18926_vm5 = vcmask 392512  }
 0x7cc   :  { %v7080_v48 = vrot.slane %v7018_v0, %v18881_v55  ;;  %7783 = vperm.xlu1 %9980, %v7756_v49   ;;  %8003 = vperm.xlu0 %9979, %v7958_v44   ;;  %v18885_v0 = vld [vmem:[#allocation112_spill] sm:$0xff]  ;;  %v18887_v44 = vld [vmem:[#allocation65_spill] sm:$0xff]  ;;  %v15594_v2 = vmul.f32 %v18889_v51, %v15510_v58  ;;  %v18894_v51 = vld [vmem:[#allocation207_spill] sm:$0xff] }
 0x7cd   :  { %v15583_v49 = vmul.f32 %v18885_v0, %v15510_v58  ;;  %v7085_v6 = vrot.slane %v15334_v8, %v18887_v44  ;;  %v8139_v18 = vunpack.c.l.b16 %v15579_v50 }
 0x7ce   :  { %v7081_v13 = vsel %vm3377_vm7, %v7080_v48, %v7076_v47  ;;  %v7760_v47 = vunpack.c.h.b16 %v15322_v40  ;;  %18890 = vst [vmem:[#allocation166_spill] sm:$0xff] %v15594_v2 }
 0x7cf   :  { %18886 = vst [vmem:[#allocation183_spill] sm:$0xff] %v15583_v49  ;;  %v7024_v33 = vpop.permute.xlu1 %7023  ;;  %v15587_v59 = vpop.permute.xlu0 %7388  ;;  %v7086_v48 = vsel %vm3384_vm8, %v7085_v6, %v7081_v13  ;;  %v15600_v8 = vpack.c.bf16 %v15583_v49, %v15573_v14  ;;  %v18895_v14 = vld [vmem:[#allocation73_spill] sm:$0xff] }
 0x7d0   :  { %v7090_v15 = vrot.slane %v7024_v33, %v18888_v9  ;;  %7789 = vperm.xlu1 %9980, %v7758_v56   ;;  %8154 = vperm.xlu0 %9979, %v8137_v60   ;;  %v18891_v33 = vld [vmem:[#allocation115_spill] sm:$0xff]  ;;  %v18893_v60 = vld [vmem:[#allocation150_spill] sm:$0xff]  ;;  %v15615_v49 = vmul.f32 %v18895_v14, %v15510_v58  ;;  %v18901_v14 = vld [vmem:[#allocation208_spill] sm:$0xff] }
 0x7d1   :  { %v15604_v56 = vmul.f32 %v18891_v33, %v15510_v58  ;;  %v7095_v13 = vrot.slane %v15352_v57, %v18893_v60  ;;  %v8141_v52 = vunpack.c.l.b16 %v15600_v8 }
 0x7d2   :  { %v7091_v0 = vsel %vm3391_vm9, %v7090_v15, %v7086_v48  ;;  %v7762_v48 = vunpack.c.h.b16 %v15340_v20  ;;  %18896 = vst [vmem:[#allocation154_spill] sm:$0xff] %v15615_v49 }
 0x7d3   :  { %18892 = vst [vmem:[#allocation168_spill] sm:$0xff] %v15604_v56  ;;  %v7030_v40 = vpop.permute.xlu1 %7029  ;;  %v15608_v6 = vpop.permute.xlu0 %7394  ;;  %v7096_v15 = vsel %vm3398_vm10, %v7095_v13, %v7091_v0  ;;  %v15621_v57 = vpack.c.bf16 %v15604_v56, %v15594_v2  ;;  %v18902_v2 = vld [vmem:[#allocation48_spill] sm:$0xff] }
 0x7d4   :  { %v7100_v21 = vrot.slane %v7030_v40, %v18894_v51  ;;  %7795 = vperm.xlu1 %9980, %v7760_v47   ;;  %8160 = vperm.xlu0 %9979, %v8139_v18   ;;  %v18898_v40 = vld [vmem:[#allocation114_spill] sm:$0xff]  ;;  %v18900_v18 = vld [vmem:[#allocation132_spill] sm:$0xff]  ;;  %v15636_v56 = vmul.f32 %v18902_v2, %v15510_v58 }
 0x7d5   :  { %v15625_v47 = vmul.f32 %v18898_v40, %v15510_v58  ;;  %v7105_v0 = vrot.slane %v15374_v22, %v18900_v18  ;;  %v8143_v46 = vunpack.c.l.b16 %v15621_v57  ;;  %v18907_v2 = vld [vmem:[#allocation210_spill] sm:$0xff] }
 0x7d6   :  { %v7101_v33 = vsel %vm18897_vm0, %v7100_v21, %v7096_v15  ;;  %v7764_v15 = vunpack.c.h.b16 %v15362_v17  ;;  %18903 = vst [vmem:[#allocation164_spill] sm:$0xff] %v15636_v56  ;;  %vm18929_vm0 = vcmask 458112  }
 0x7d7   :  { %18899 = vst [vmem:[#allocation177_spill] sm:$0xff] %v15625_v47  ;;  %v7036_v20 = vpop.permute.xlu1 %7035  ;;  %v15629_v13 = vpop.permute.xlu0 %7400  ;;  %v7106_v21 = vsel %vm3412_vm12, %v7105_v0, %v7101_v33  ;;  %v15642_v22 = vpack.c.bf16 %v15625_v47, %v15615_v49  ;;  %v18908_v49 = vld [vmem:[#allocation79_spill] sm:$0xff] }
 0x7d8   :  { %v7110_v3 = vrot.slane %v7036_v20, %v18901_v14  ;;  %7801 = vperm.xlu1 %9980, %v7762_v48   ;;  %8166 = vperm.xlu0 %9979, %v8141_v52   ;;  %v18904_v20 = vld [vmem:[#allocation117_spill] sm:$0xff]  ;;  %v18906_v52 = vld [vmem:[#allocation123_spill] sm:$0xff]  ;;  %v15657_v47 = vmul.f32 %v18908_v49, %v15510_v58 }
 0x7d9   :  { %v15646_v48 = vmul.f32 %v18904_v20, %v15510_v58  ;;  %v7115_v33 = vrot.slane %v15392_v63, %v18906_v52  ;;  %v8145_v41 = vunpack.c.l.b16 %v15642_v22 }
 0x7da   :  { %v7111_v40 = vsel %vm3419_vm13, %v7110_v3, %v7106_v21  ;;  %v7766_v21 = vunpack.c.h.b16 %v15380_v5  ;;  %18909 = vst [vmem:[#allocation165_spill] sm:$0xff] %v15657_v47  ;;  %v7239_v5 = vrot.slane %v15410_v1, %v18859_v45  ;;  %v10682_v1 = vld [vmem:[%s17211_s2 + $0x78] sm:$0xff]  }
 0x7db   :  { %18905 = vst [vmem:[#allocation184_spill] sm:$0xff] %v15646_v48  ;;  %v7042_v17 = vpop.permute.xlu1 %7041  ;;  %v15650_v0 = vpop.permute.xlu0 %7406  ;;  %v7116_v3 = vsel %vm3426_vm14, %v7115_v33, %v7111_v40  ;;  %v15663_v63 = vpack.c.bf16 %v15646_v48, %v15636_v56 }
 0x7dc   :  { %v7120_v54 = vrot.slane %v7042_v17, %v18907_v2  ;;  %7807 = vperm.xlu1 %9980, %v7764_v15   ;;  %8172 = vperm.xlu0 %9979, %v8143_v46   ;;  %v18910_v17 = vld [vmem:[#allocation20_spill] sm:$0xff] }
 0x7dd   :  { %v15667_v15 = vmul.f32 %v18910_v17, %v15510_v58  ;;  %v18914_v17 = vld [vmem:[#allocation42_spill] sm:$0xff] }
 0x7de   :  { %v7121_v20 = vsel %vm3433_vm15, %v7120_v54, %v7116_v3  ;;  %v7945_v54 = vunpack.c.h.b16 %v15398_v62  ;;  %v18912_v3 = vld [vmem:[#allocation54_spill] sm:$0xff] }
 0x7df   :  { %18911 = vst [vmem:[#allocation180_spill] sm:$0xff] %v15667_v15  ;;  %v7122_v46 = vpack.c.b16 %v7121_v20, %v7121_v20  ;;  %v7193_v40 = vpop.permute.xlu1 %7192  ;;  %v15669_v33 = vpop.permute.xlu0 %7412  ;;  %v15677_v56 = vmul.f32 %v18912_v3, %v15510_v58  ;;  %v15681_v20 = vrot.slane %v18778_v43, %v18914_v17  ;;  %v15690_v62 = vpack.c.bf16 %v15667_v15, %v15657_v47 }
 0x7e0   :  { %v7243_v49 = vrot.slane %v7193_v40, %v18860_v28  ;;  %7813 = vperm.xlu1 %9980, %v7766_v21   ;;  %8178 = vperm.xlu0 %9979, %v8145_v41   ;;  %v8147_v41 = vunpack.c.l.b16 %v15663_v63  ;;  %v18915_v21 = vld [vmem:[#allocation49_spill] sm:$0xff]  ;;  %v18917_v40 = vmov 0.0   ;;  %v7248_v43 = vrot.slane %v15428_v12, %v18866_v30  ;;  %v10683_v12 = vld [vmem:[%s17211_s2 + $0x70] sm:$0xff]  }
 0x7e1   :  { %9812 = vmatmul.mubr.bf16.vlgmr.msra.gmra.mxu0 %v7122_v46  ;;  %18913 = vst [vmem:[#allocation167_spill] sm:$0xff] %v15677_v56  ;;  %v15694_v46 = vmul.f32 %v18915_v21, %v15510_v58  ;;  %v7947_v58 = vunpack.c.h.b16 %v15416_v31  ;;  %v8149_v47 = vunpack.c.l.b16 %v15690_v62 }
 0x7e2   :  { %v7244_v48 = vsel %vm17634_vm1, %v7243_v49, %v7239_v5  ;;  %9816 = vmatpush3.bf16.msra.mxu0 %v10682_v1  ;;  %9831 = vmatprep.mubr.msk.bf16.mxu0 %vm18918_vm4, %v18917_v40  ;;  %v18919_v1 = vld [vmem:[#allocation85_spill] sm:$0xff] }
 0x7e3   :  { %18916 = vst [vmem:[#allocation169_spill] sm:$0xff] %v15694_v46  ;;  %v7199_v5 = vpop.permute.xlu1 %7198  ;;  %v15700_v49 = vpop.permute.xlu0 %7418  ;;  %9817 = vmatprep.subr.bf16.mxu0 %v18917_v40  ;;  %v7249_v17 = vsel %vm3342_vm2, %v7248_v43, %v7244_v48  ;;  %v15708_v21 = vmul.f32 %v18919_v1, %v15681_v20  ;;  %v18921_v48 = vld [vmem:[#allocation121_spill] sm:$0xff]  ;;  %v7949_v1 = vunpack.c.h.b16 %v15434_v23 }
 0x7e4   :  { %v7253_v3 = vrot.slane %v7199_v5, %v18867_v19  ;;  %7964 = vperm.xlu1 %9980, %v7945_v54   ;;  %8184 = vperm.xlu0 %9979, %v8147_v41   ;;  %v15717_v54 = vpack.c.bf16 %v15694_v46, %v15677_v56  ;;  %v15721_v31 = vmul.f32 %v18921_v48, %v15681_v20 }
 0x7e5   :  { %18920 = vst [vmem:[#allocation118_spill] sm:$0xff] %v15708_v21  ;;  %v7258_v41 = vrot.slane %v15446_v38, %v18872_v16  ;;  %v10684_v38 = vld [vmem:[%s17211_s2 + $0x68] sm:$0xff]  }
 0x7e6   :  { %v7254_v15 = vsel %vm3349_vm3, %v7253_v3, %v7249_v17  ;;  %9818 = vmatpush3.bf16.msra.mxu0 %v10683_v12  ;;  %18922 = vst [vmem:[#allocation59_spill] sm:$0xff] %v15721_v31  ;;  %v18924_v12 = vld [vmem:[#allocation142_spill] sm:$0xff]  ;;  %v8151_v56 = vunpack.c.l.b16 %v15717_v54 }
 0x7e7   :  { %v7205_v43 = vpop.permute.xlu1 %7204  ;;  %v15725_v5 = vpop.permute.xlu0 %7424  ;;  %9819 = vmatprep.subr.bf16.mxu0 %v18917_v40  ;;  %v7259_v17 = vsel %vm18923_vm11, %v7258_v41, %v7254_v15  ;;  %v15733_v48 = vmul.f32 %v18924_v12, %v15681_v20  ;;  %v18927_v15 = vld [vmem:[#allocation139_spill] sm:$0xff]  ;;  %v7951_v12 = vunpack.c.h.b16 %v15452_v25  ;;  %vm18940_vm11 = vcmask 786112  }
 0x7e8   :  { %v7263_v3 = vrot.slane %v7205_v43, %v18873_v24  ;;  %7970 = vperm.xlu1 %9980, %v7947_v58   ;;  %8190 = vperm.xlu0 %9979, %v8149_v47   ;;  %v15742_v47 = vpack.c.bf16 %v15721_v31, %v15708_v21  ;;  %v15746_v23 = vmul.f32 %v18927_v15, %v15681_v20 }
 0x7e9   :  { %18925 = vst [vmem:[#allocation46_spill] sm:$0xff] %v15733_v48  ;;  %v7268_v58 = vrot.slane %v15464_v34, %v18880_v26  ;;  %v10685_v34 = vld [vmem:[%s17211_s2 + $0x60] sm:$0xff]  }
 0x7ea   :  { %v7264_v46 = vsel %vm18926_vm5, %v7263_v3, %v7259_v17  ;;  %9820 = vmatpush3.bf16.msra.mxu0 %v10684_v38  ;;  %18928 = vst [vmem:[#allocation28_spill] sm:$0xff] %v15746_v23  ;;  %v18930_v38 = vld [vmem:[#allocation89_spill] sm:$0xff]  ;;  %v8330_v31 = vunpack.c.l.b16 %v15742_v47  ;;  %vm18952_vm5 = vcmask 326912  }
 0x7eb   :  { %v7211_v41 = vpop.permute.xlu1 %7210  ;;  %v15750_v43 = vpop.permute.xlu0 %7575  ;;  %9821 = vmatprep.subr.bf16.mxu0 %v18917_v40  ;;  %v7269_v17 = vsel %vm18929_vm0, %v7268_v58, %v7264_v46  ;;  %v15758_v15 = vmul.f32 %v18930_v38, %v15681_v20  ;;  %v18932_v46 = vld [vmem:[#allocation137_spill] sm:$0xff]  ;;  %v7953_v38 = vunpack.c.h.b16 %v15470_v32  ;;  %vm18953_vm0 = vcmask 392512  }
 0x7ec   :  { %v7273_v3 = vrot.slane %v7211_v41, %v18881_v55  ;;  %7976 = vperm.xlu1 %9980, %v7949_v1   ;;  %8196 = vperm.xlu0 %9979, %v8151_v56   ;;  %v15767_v56 = vpack.c.bf16 %v15746_v23, %v15733_v48  ;;  %v15771_v25 = vmul.f32 %v18932_v46, %v15681_v20 }
 0x7ed   :  { %18931 = vst [vmem:[#allocation17_spill] sm:$0xff] %v15758_v15  ;;  %v7278_v1 = vrot.slane %v15482_v37, %v18887_v44  ;;  %v10686_v37 = vld [vmem:[%s17211_s2 + $0x58] sm:$0xff]  }
 0x7ee   :  { %v7274_v21 = vsel %vm3377_vm7, %v7273_v3, %v7269_v17  ;;  %9822 = vmatpush3.bf16.msra.mxu0 %v10685_v34  ;;  %18933 = vst [vmem:[#allocation170_spill] sm:$0xff] %v15771_v25  ;;  %v18934_v34 = vld [vmem:[#allocation140_spill] sm:$0xff]  ;;  %v8332_v23 = vunpack.c.l.b16 %v15767_v56 }
 0x7ef   :  { %v7217_v58 = vpop.permute.xlu1 %7216  ;;  %v15775_v41 = vpop.permute.xlu0 %7581  ;;  %9823 = vmatprep.subr.bf16.mxu0 %v18917_v40  ;;  %v7279_v17 = vsel %vm3384_vm8, %v7278_v1, %v7274_v21  ;;  %v15783_v46 = vmul.f32 %v18934_v34, %v15681_v20  ;;  %v18936_v21 = vld [vmem:[#allocation125_spill] sm:$0xff]  ;;  %v7955_v34 = vunpack.c.h.b16 %v15488_v11 }
 0x7f0   :  { %v7283_v3 = vrot.slane %v7217_v58, %v18888_v9  ;;  %7982 = vperm.xlu1 %9980, %v7951_v12   ;;  %8347 = vperm.xlu0 %9979, %v8330_v31   ;;  %v15792_v31 = vpack.c.bf16 %v15771_v25, %v15758_v15  ;;  %v15796_v32 = vmul.f32 %v18936_v21, %v15681_v20 }
 0x7f1   :  { %18935 = vst [vmem:[#allocation53_spill] sm:$0xff] %v15783_v46  ;;  %v7288_v12 = vrot.slane %v15498_v61, %v18893_v60  ;;  %v10687_v61 = vld [vmem:[%s17211_s2 + $0x50] sm:$0xff]  }
 0x7f2   :  { %v7284_v48 = vsel %vm3391_vm9, %v7283_v3, %v7279_v17  ;;  %9824 = vmatpush3.bf16.msra.mxu0 %v10686_v37  ;;  %18937 = vst [vmem:[#allocation30_spill] sm:$0xff] %v15796_v32  ;;  %v18938_v37 = vld [vmem:[#allocation91_spill] sm:$0xff]  ;;  %v8334_v25 = vunpack.c.l.b16 %v15792_v31 }
 0x7f3   :  { %v7223_v1 = vpop.permute.xlu1 %7222  ;;  %v15800_v58 = vpop.permute.xlu0 %7587  ;;  %9825 = vmatprep.subr.bf16.mxu0 %v18917_v40  ;;  %v7289_v17 = vsel %vm3398_vm10, %v7288_v12, %v7284_v48  ;;  %v15808_v21 = vmul.f32 %v18938_v37, %v15681_v20  ;;  %v18941_v48 = vld [vmem:[#allocation33_spill] sm:$0xff]  ;;  %v7957_v37 = vunpack.c.h.b16 %v15516_v53 }
 0x7f4   :  { %v7293_v3 = vrot.slane %v7223_v1, %v18894_v51  ;;  %7988 = vperm.xlu1 %9980, %v7953_v38   ;;  %8353 = vperm.xlu0 %9979, %v8332_v23   ;;  %v15817_v23 = vpack.c.bf16 %v15796_v32, %v15783_v46  ;;  %v15821_v11 = vmul.f32 %v18941_v48, %v15681_v20 }
 0x7f5   :  { %18939 = vst [vmem:[#allocation77_spill] sm:$0xff] %v15808_v21  ;;  %v7298_v38 = vrot.slane %v15524_v7, %v18900_v18  ;;  %v10688_v7 = vld [vmem:[%s17211_s2 + $0x48] sm:$0xff]  }
 0x7f6   :  { %v7294_v15 = vsel %vm18940_vm11, %v7293_v3, %v7289_v17  ;;  %9826 = vmatpush3.bf16.msra.mxu0 %v10687_v61  ;;  %18942 = vst [vmem:[#allocation18_spill] sm:$0xff] %v15821_v11  ;;  %v18943_v61 = vld [vmem:[#allocation93_spill] sm:$0xff]  ;;  %v8336_v32 = vunpack.c.l.b16 %v15817_v23  ;;  %vm18954_vm11 = vcmask 458112  }
 0x7f7   :  { %v7229_v12 = vpop.permute.xlu1 %7228  ;;  %v15825_v1 = vpop.permute.xlu0 %7593  ;;  %9827 = vmatprep.subr.bf16.mxu0 %v18917_v40  ;;  %v7299_v17 = vsel %vm3412_vm12, %v7298_v38, %v7294_v15  ;;  %v15833_v48 = vmul.f32 %v18943_v61, %v15681_v20  ;;  %v18944_v15 = vld [vmem:[#allocation145_spill] sm:$0xff]  ;;  %v7959_v61 = vunpack.c.h.b16 %v15537_v42 }
 0x7f8   :  { %v7303_v3 = vrot.slane %v7229_v12, %v18901_v14  ;;  %7994 = vperm.xlu1 %9980, %v7955_v34   ;;  %8359 = vperm.xlu0 %9979, %v8334_v25   ;;  %v15842_v25 = vpack.c.bf16 %v15821_v11, %v15808_v21  ;;  %v15846_v53 = vmul.f32 %v18944_v15, %v15681_v20 }
 0x7f9   :  { %v7308_v34 = vrot.slane %v15545_v29, %v18906_v52  ;;  %v10689_v29 = vld [vmem:[%s17211_s2 + $0x40] sm:$0xff]  }
 0x7fa   :  { %v7304_v46 = vsel %vm3419_vm13, %v7303_v3, %v7299_v17  ;;  %9828 = vmatpush3.bf16.msra.mxu0 %v10688_v7  ;;  %18945 = vst [vmem:[#allocation186_spill] sm:$0xff] %v15846_v53  ;;  %v18946_v7 = vld [vmem:[#allocation66_spill] sm:$0xff]  ;;  %v8338_v11 = vunpack.c.l.b16 %v15842_v25 }
 0x7fb   :  { %v7235_v38 = vpop.permute.xlu1 %7234  ;;  %v15850_v12 = vpop.permute.xlu0 %7599  ;;  %9829 = vmatprep.subr.bf16.mxu0 %v18917_v40  ;;  %v7309_v17 = vsel %vm3426_vm14, %v7308_v34, %v7304_v46  ;;  %v15858_v15 = vmul.f32 %v18946_v7, %v15681_v20  ;;  %v18947_v46 = vld [vmem:[#allocation67_spill] sm:$0xff]  ;;  %v8138_v7 = vunpack.c.h.b16 %v15558_v10 }
 0x7fc   :  { %v7313_v3 = vrot.slane %v7235_v38, %v18907_v2  ;;  %8000 = vperm.xlu1 %9980, %v7957_v37   ;;  %8365 = vperm.xlu0 %9979, %v8336_v32   ;;  %v15867_v32 = vpack.c.bf16 %v15846_v53, %v15833_v48  ;;  %v15871_v42 = vmul.f32 %v18947_v46, %v15681_v20  ;;  %v10690_v53 = vld [vmem:[%s17211_s2 + $0xb8] sm:$0xff]  }
 0x7fe   :  { %v7314_v21 = vsel %vm3433_vm15, %v7313_v3, %v7309_v17  ;;  %9830 = vmatpush3.bf16.msra.mxu0 %v10689_v29  ;;  %18948 = vst [vmem:[#allocation171_spill] sm:$0xff] %v15871_v42  ;;  %v7432_v3 = vrot.slane %v15566_v4, %v18859_v45  ;;  %v18949_v29 = vld [vmem:[#allocation68_spill] sm:$0xff]  ;;  %v8340_v4 = vunpack.c.l.b16 %v15867_v32 }
 0x7ff   :  { %v7315_v37 = vpack.c.b16 %v7314_v21, %v7314_v21  ;;  %v7386_v34 = vpop.permute.xlu1 %7385  ;;  %v15873_v38 = vpop.permute.xlu0 %7605  ;;  %9835 = vmatprep.subr.bf16.mxu0 %v18917_v40  ;;  %v15882_v46 = vmul.f32 %v18949_v29, %v15681_v20  ;;  %v10691_v29 = vld [vmem:[%s17211_s2 + $0xb0] sm:$0xff]  }
 0x800   :  { %v7436_v17 = vrot.slane %v7386_v34, %v18860_v28  ;;  %8006 = vperm.xlu1 %9980, %v7959_v61   ;;  %8371 = vperm.xlu0 %9979, %v8338_v11   ;;  %v15891_v61 = vpack.c.bf16 %v15871_v42, %v15858_v15  ;;  %v18951_v11 = vld [vmem:[#allocation69_spill] sm:$0xff] }
 0x801   :  { %9832 = vmatmul.mubr.bf16.vlgmr.msra.gmra.mxu0 %v7315_v37  ;;  %18950 = vst [vmem:[#allocation182_spill] sm:$0xff] %v15882_v46  ;;  %v15895_v10 = vmul.f32 %v18951_v11, %v15681_v20  ;;  %v7441_v37 = vrot.slane %v15587_v59, %v18866_v30  ;;  %v8140_v59 = vunpack.c.h.b16 %v15579_v50 }
 0x802   :  { %v7437_v21 = vsel %vm17634_vm1, %v7436_v17, %v7432_v3  ;;  %9836 = vmatpush3.bf16.msra.mxu0 %v10690_v53  ;;  %9851 = vmatprep.mubr.msk.bf16.mxu0 %vm18918_vm4, %v18917_v40  ;;  %v8342_v11 = vunpack.c.l.b16 %v15891_v61 }
 0x803   :  { %v7392_v34 = vpop.permute.xlu1 %7391  ;;  %v15901_v3 = vpop.permute.xlu0 %7611  ;;  %9837 = vmatprep.subr.bf16.mxu0 %v18917_v40  ;;  %v7442_v17 = vsel %vm3342_vm2, %v7441_v37, %v7437_v21  ;;  %v15914_v42 = vpack.c.bf16 %v15895_v10, %v15882_v46 }
 0x804   :  { %v7446_v53 = vrot.slane %v7392_v34, %v18867_v19  ;;  %8157 = vperm.xlu1 %9980, %v8138_v7   ;;  %8377 = vperm.xlu0 %9979, %v8340_v4   ;;  %v7451_v7 = vrot.slane %v15608_v6, %v18872_v16  ;;  %v8142_v6 = vunpack.c.h.b16 %v15600_v8  ;;  %v10063_v8 = vld [vmem:[%s17215_s8 + $0xac] ss:$12 sps:$4 sm:$0xff]  }
 0x805   :  { %8892 = vmatprep.subr.bf16.mxu1 %v10063_v8 }
 0x806   :  { %v7447_v20 = vsel %vm3349_vm3, %v7446_v53, %v7442_v17  ;;  %9838 = vmatpush3.bf16.msra.mxu0 %v10691_v29  ;;  %v10692_v53 = vld [vmem:[%s17211_s2 + $0xa8] sm:$0xff]   ;;  %v8344_v17 = vunpack.c.l.b16 %v15914_v42  ;;  %v7461_v29 = vrot.slane %v15629_v13, %v18880_v26 }
 0x807   :  { %v7398_v4 = vpop.permute.xlu1 %7397  ;;  %v15918_v21 = vpop.permute.xlu0 %7617  ;;  %9839 = vmatprep.subr.bf16.mxu0 %v18917_v40  ;;  %v7452_v50 = vsel %vm18952_vm5, %v7451_v7, %v7447_v20  ;;  %v10061_v20 = vld [vmem:[%s17215_s8 + $0xa8] ss:$12 sps:$4 sm:$0xff]   ;;  %v10693_v7 = vld [vmem:[%s17211_s2 + $0xa0] sm:$0xff]   ;;  %vm18955_vm5 = vcmask 786112  }
 0x808   :  { %v7456_v37 = vrot.slane %v7398_v4, %v18873_v24  ;;  %8163 = vperm.xlu1 %9980, %v8140_v59   ;;  %8383 = vperm.xlu0 %9979, %v8342_v11  }
 0x809   :  { %8893 = vmatpush1.bf16.msra.mxu1 %v10061_v20 }
 0x80a   :  { %v7457_v34 = vsel %vm18953_vm0, %v7456_v37, %v7452_v50  ;;  %9840 = vmatpush3.bf16.msra.mxu0 %v10692_v53  ;;  %v8144_v37 = vunpack.c.h.b16 %v15621_v57  ;;  %v10694_v57 = vld [vmem:[%s17211_s2 + $0x98] sm:$0xff]   ;;  %vm18959_vm0 = vcmask 326912  }
 0x80b   :  { %v7404_v46 = vpop.permute.xlu1 %7403  ;;  %v15931_v4 = vpop.permute.xlu0 %7768  ;;  %9841 = vmatprep.subr.bf16.mxu0 %v18917_v40  ;;  %v7462_v11 = vsel %vm18954_vm11, %v7461_v29, %v7457_v34  ;;  %v7481_v29 = vrot.slane %v15669_v33, %v18893_v60  ;;  %v8148_v33 = vunpack.c.h.b16 %v15663_v63  ;;  %v10696_v63 = vld [vmem:[%s17211_s2 + $0x88] sm:$0xff]   ;;  %vm18960_vm11 = vcmask 392512  }
 0x80c   :  { %v7466_v59 = vrot.slane %v7404_v46, %v18881_v55  ;;  %8169 = vperm.xlu1 %9980, %v8142_v6   ;;  %8389 = vperm.xlu0 %9979, %v8344_v17   ;;  %v7471_v46 = vrot.slane %v15650_v0, %v18887_v44  ;;  %v8146_v0 = vunpack.c.h.b16 %v15642_v22  ;;  %v10695_v22 = vld [vmem:[%s17211_s2 + $0x90] sm:$0xff]  }
 0x80e   :  { %v7467_v13 = vsel %vm3377_vm7, %v7466_v59, %v7462_v11  ;;  %9842 = vmatpush3.bf16.msra.mxu0 %v10693_v7 }
 0x80f   :  { %v7410_v50 = vpop.permute.xlu1 %7409  ;;  %v15949_v53 = vpop.permute.xlu0 %7774  ;;  %9843 = vmatprep.subr.bf16.mxu0 %v18917_v40  ;;  %v7472_v6 = vsel %vm3384_vm8, %v7471_v46, %v7467_v13  ;;  %v7491_v13 = vrot.slane %v15700_v49, %v18900_v18  ;;  %v8150_v49 = vunpack.c.h.b16 %v15690_v62 }
 0x810   :  { %v7476_v34 = vrot.slane %v7410_v50, %v18888_v9  ;;  %8175 = vperm.xlu1 %9980, %v8144_v37   ;;  %6060 = vperm.xlu0 %9979, %v15182_v39  }
 0x812   :  { %v7477_v17 = vsel %vm3391_vm9, %v7476_v34, %v7472_v6  ;;  %9844 = vmatpush3.bf16.msra.mxu0 %v10694_v57  ;;  %v10064_v34 = vld [vmem:[%s17215_s8 + $0x90] ss:$12 sps:$4 sm:$0xff]   ;;  %v10066_v6 = vld [vmem:[%s17215_s8 + $0x94] ss:$12 sps:$4 sm:$0xff]  }
 0x813   :  { %v7416_v20 = vpop.permute.xlu1 %7415  ;;  %v15962_v59 = vpop.permute.xlu0 %7780  ;;  %9845 = vmatprep.subr.bf16.mxu0 %v18917_v40  ;;  %v7482_v8 = vsel %vm3398_vm10, %v7481_v29, %v7477_v17  ;;  %8894 = vmatprep.subr.bf16.mxu1 %v10066_v6  ;;  %v7644_v6 = vrot.slane %v15800_v58, %v18872_v16  ;;  %v8335_v58 = vunpack.c.h.b16 %v15792_v31  ;;  %v18961_v31 = vld [vmem:[#allocation78_spill] sm:$0xff] }
 0x814   :  { %v7486_v39 = vrot.slane %v7416_v20, %v18894_v51  ;;  %8181 = vperm.xlu1 %9980, %v8146_v0   ;;  %6066 = vperm.xlu0 %9979, %v15200_v35   ;;  %v10697_v20 = vld [vmem:[%s17211_s2 + $0x80] sm:$0xff]  }
 0x815   :  { %8895 = vmatpush1.bf16.msra.mxu1 %v10064_v34  ;;  %v10699_v34 = vld [vmem:[%s17211_s2 + $0xf0] sm:$0xff]  }
 0x816   :  { %v7487_v11 = vsel %vm18955_vm5, %v7486_v39, %v7482_v8  ;;  %9846 = vmatpush3.bf16.msra.mxu0 %v10695_v22  ;;  %vm18962_vm5 = vcmask 458112  }
 0x817   :  { %v7422_v7 = vpop.permute.xlu1 %7421  ;;  %v15975_v37 = vpop.permute.xlu0 %7786  ;;  %9847 = vmatprep.subr.bf16.mxu0 %v18917_v40  ;;  %v7492_v46 = vsel %vm3412_vm12, %v7491_v13, %v7487_v11 }
 0x818   :  { %v7496_v35 = vrot.slane %v7422_v7, %v18901_v14  ;;  %8187 = vperm.xlu1 %9980, %v8148_v33   ;;  %6072 = vperm.xlu0 %9979, %v15222_v27   ;;  %v7501_v27 = vrot.slane %v15725_v5, %v18906_v52  ;;  %v8152_v5 = vunpack.c.h.b16 %v15717_v54  ;;  %v18956_v33 = vld [vmem:[#allocation57_spill] sm:$0xff]  ;;  %v8331_v7 = vunpack.c.h.b16 %v15742_v47 }
 0x819   :  { %v10698_v54 = vld [vmem:[%s17211_s2 + $0xf8] sm:$0xff]  }
 0x81a   :  { %v7497_v50 = vsel %vm3419_vm13, %v7496_v35, %v7492_v46  ;;  %9848 = vmatpush3.bf16.msra.mxu0 %v10696_v63  ;;  %v18957_v63 = vld [vmem:[#allocation143_spill] sm:$0xff] }
 0x81b   :  { %v7428_v17 = vpop.permute.xlu1 %7427  ;;  %v15994_v57 = vpop.permute.xlu0 %7792  ;;  %9849 = vmatprep.subr.bf16.mxu0 %v18917_v40  ;;  %v7502_v62 = vsel %vm3426_vm14, %v7501_v27, %v7497_v50 }
 0x81c   :  { %v7506_v0 = vrot.slane %v7428_v17, %v18907_v2  ;;  %8193 = vperm.xlu1 %9980, %v8150_v49   ;;  %6078 = vperm.xlu0 %9979, %v15240_v36   ;;  %v7625_v36 = vrot.slane %v15750_v43, %v18859_v45  ;;  %v7634_v43 = vrot.slane %v15775_v41, %v18866_v30  ;;  %v8333_v41 = vunpack.c.h.b16 %v15767_v56  ;;  %v10700_v56 = vld [vmem:[%s17211_s2 + $0xe8] sm:$0xff]  }
 0x81e   :  { %v7507_v29 = vsel %vm3433_vm15, %v7506_v0, %v7502_v62  ;;  %9850 = vmatpush3.bf16.msra.mxu0 %v10697_v20  ;;  %v18958_v62 = vld [vmem:[#allocation124_spill] sm:$0xff] }
 0x81f   :  { %v7508_v39 = vpack.c.b16 %v7507_v29, %v7507_v29  ;;  %v7579_v8 = vpop.permute.xlu1 %7578  ;;  %v16005_v11 = vpop.permute.xlu0 %7798  ;;  %9855 = vmatprep.subr.bf16.mxu0 %v18917_v40 }
 0x820   :  { %v7629_v22 = vrot.slane %v7579_v8, %v18860_v28  ;;  %8199 = vperm.xlu1 %9980, %v8152_v5   ;;  %6084 = vperm.xlu0 %9979, %v18956_v33   ;;  %v10067_v5 = vld [vmem:[%s17215_s8 + $0x78] ss:$12 sps:$4 sm:$0xff]   ;;  %v7654_v8 = vrot.slane %v15825_v1, %v18880_v26  ;;  %v8337_v1 = vunpack.c.h.b16 %v15817_v23 }
 0x821   :  { %9852 = vmatmul.mubr.bf16.vlgmr.msra.gmra.mxu0 %v7508_v39  ;;  %v10069_v39 = vld [vmem:[%s17215_s8 + $0x7c] ss:$12 sps:$4 sm:$0xff]  }
 0x822   :  { %v7630_v13 = vsel %vm17634_vm1, %v7629_v22, %v7625_v36  ;;  %9856 = vmatpush3.bf16.msra.mxu0 %v10698_v54  ;;  %9871 = vmatprep.mubr.msk.bf16.mxu0 %vm18918_vm4, %v18917_v40  ;;  %v10702_v23 = vld [vmem:[%s17211_s2 + $0xd8] sm:$0xff]  }
 0x823   :  { %v7585_v35 = vpop.permute.xlu1 %7584  ;;  %v16021_v46 = vpop.permute.xlu0 %7804  ;;  %9857 = vmatprep.subr.bf16.mxu0 %v18917_v40  ;;  %v7635_v49 = vsel %vm3342_vm2, %v7634_v43, %v7630_v13  ;;  %8896 = vmatprep.subr.bf16.mxu1 %v10069_v39  ;;  %v7664_v43 = vrot.slane %v15850_v12, %v18887_v44  ;;  %v8339_v12 = vunpack.c.h.b16 %v15842_v25  ;;  %v10703_v25 = vld [vmem:[%s17211_s2 + $0xd0] sm:$0xff]  }
 0x824   :  { %v7639_v50 = vrot.slane %v7585_v35, %v18867_v19  ;;  %8350 = vperm.xlu1 %9980, %v8331_v7   ;;  %6090 = vperm.xlu0 %9979, %v18957_v63   ;;  %v10701_v7 = vld [vmem:[%s17211_s2 + $0xe0] sm:$0xff]  }
 0x825   :  { %8897 = vmatpush1.bf16.msra.mxu1 %v10067_v5 }
 0x826   :  { %v7640_v47 = vsel %vm3349_vm3, %v7639_v50, %v7635_v49  ;;  %9858 = vmatpush3.bf16.msra.mxu0 %v10699_v34  ;;  %v18963_v49 = vld [vmem:[#allocation31_spill] sm:$0xff] }
 0x827   :  { %v7591_v27 = vpop.permute.xlu1 %7590  ;;  %v16034_v17 = vpop.permute.xlu0 %7810  ;;  %9859 = vmatprep.subr.bf16.mxu0 %v18917_v40  ;;  %v7645_v29 = vsel %vm18959_vm0, %v7644_v6, %v7640_v47  ;;  %vm18965_vm0 = vcmask 786112  }
 0x828   :  { %v7649_v0 = vrot.slane %v7591_v27, %v18873_v24  ;;  %8356 = vperm.xlu1 %9980, %v8333_v41   ;;  %6096 = vperm.xlu0 %9979, %v18958_v62   ;;  %v7674_v41 = vrot.slane %v15873_v38, %v18893_v60  ;;  %v18964_v62 = vld [vmem:[#allocation136_spill] sm:$0xff]  ;;  %v8341_v38 = vunpack.c.h.b16 %v15867_v32  ;;  %v10704_v32 = vld [vmem:[%s17211_s2 + $0xc8] sm:$0xff]  }
 0x82a   :  { %v7650_v20 = vsel %vm18960_vm11, %v7649_v0, %v7645_v29  ;;  %9860 = vmatpush3.bf16.msra.mxu0 %v10700_v56  ;;  %v7684_v56 = vrot.slane %v15901_v3, %v18900_v18  ;;  %v8343_v3 = vunpack.c.h.b16 %v15891_v61  ;;  %v18967_v61 = vld [vmem:[#allocation133_spill] sm:$0xff]  ;;  %vm18973_vm11 = vcmask 326912  }
 0x82b   :  { %v7597_v36 = vpop.permute.xlu1 %7596  ;;  %v16053_v22 = vpop.permute.xlu0 %7961  ;;  %9861 = vmatprep.subr.bf16.mxu0 %v18917_v40  ;;  %v7655_v13 = vsel %vm18962_vm5, %v7654_v8, %v7650_v20  ;;  %v18966_v8 = vld [vmem:[#allocation190_spill] sm:$0xff]  ;;  %vm18974_vm5 = vcmask 392512  }
 0x82c   :  { %v7659_v33 = vrot.slane %v7597_v36, %v18881_v55  ;;  %8362 = vperm.xlu1 %9980, %v8335_v58   ;;  %6102 = vperm.xlu0 %9979, %v18961_v31   ;;  %v10070_v31 = vld [vmem:[%s17215_s8 + $0x60] ss:$12 sps:$4 sm:$0xff]  }
 0x82e   :  { %v7660_v54 = vsel %vm3377_vm7, %v7659_v33, %v7655_v13  ;;  %9862 = vmatpush3.bf16.msra.mxu0 %v10701_v7  ;;  %v10072_v13 = vld [vmem:[%s17215_s8 + $0x64] ss:$12 sps:$4 sm:$0xff]  }
 0x82f   :  { %v7603_v35 = vpop.permute.xlu1 %7602  ;;  %v16066_v50 = vpop.permute.xlu0 %7967  ;;  %9863 = vmatprep.subr.bf16.mxu0 %v18917_v40  ;;  %v7665_v47 = vsel %vm3384_vm8, %v7664_v43, %v7660_v54  ;;  %v7694_v54 = vrot.slane %v15918_v21, %v18906_v52  ;;  %8898 = vmatprep.subr.bf16.mxu1 %v10072_v13  ;;  %v8345_v21 = vunpack.c.h.b16 %v15914_v42  ;;  %v10706_v42 = vld [vmem:[%s17211_s2 + $0x138] sm:$0xff]  }
 0x830   :  { %v7669_v63 = vrot.slane %v7603_v35, %v18888_v9  ;;  %8368 = vperm.xlu1 %9980, %v8337_v1   ;;  %6108 = vperm.xlu0 %9979, %v18963_v49   ;;  %v10705_v49 = vld [vmem:[%s17211_s2 + $0xc0] sm:$0xff]  }
 0x831   :  { %8899 = vmatpush1.bf16.msra.mxu1 %v10070_v31 }
 0x832   :  { %v7670_v34 = vsel %vm3391_vm9, %v7669_v63, %v7665_v47  ;;  %9864 = vmatpush3.bf16.msra.mxu0 %v10702_v23 }
 0x833   :  { %v7609_v6 = vpop.permute.xlu1 %7608  ;;  %v16079_v27 = vpop.permute.xlu0 %7973  ;;  %9865 = vmatprep.subr.bf16.mxu0 %v18917_v40  ;;  %v7675_v29 = vsel %vm3398_vm10, %v7674_v41, %v7670_v34 }
 0x834   :  { %v7679_v0 = vrot.slane %v7609_v6, %v18894_v51  ;;  %8374 = vperm.xlu1 %9980, %v8339_v12   ;;  %6114 = vperm.xlu0 %9979, %v18964_v62   ;;  %v7818_v12 = vrot.slane %v15931_v4, %v18859_v45  ;;  %v18968_v6 = vld [vmem:[#allocation100_spill] sm:$0xff]  ;;  %v7827_v62 = vrot.slane %v15949_v53, %v18866_v30 }
 0x835   :  { %v7837_v53 = vrot.slane %v15962_v59, %v18872_v16  ;;  %v10073_v59 = vld [vmem:[%s17215_s8 + $0x48] ss:$12 sps:$4 sm:$0xff]  }
 0x836   :  { %v7680_v20 = vsel %vm18965_vm0, %v7679_v0, %v7675_v29  ;;  %9866 = vmatpush3.bf16.msra.mxu0 %v10703_v25  ;;  %v18969_v25 = vld [vmem:[#allocation95_spill] sm:$0xff]  ;;  %vm18977_vm0 = vcmask 458112  }
 0x837   :  { %v7615_v58 = vpop.permute.xlu1 %7614  ;;  %v16092_v5 = vpop.permute.xlu0 %7979  ;;  %9867 = vmatprep.subr.bf16.mxu0 %v18917_v40  ;;  %v7685_v36 = vsel %vm3412_vm12, %v7684_v56, %v7680_v20 }
 0x838   :  { %v7689_v39 = vrot.slane %v7615_v58, %v18901_v14  ;;  %8380 = vperm.xlu1 %9980, %v8341_v38   ;;  %6120 = vperm.xlu0 %9979, %v18966_v8   ;;  %v18970_v38 = vld [vmem:[#allocation189_spill] sm:$0xff] }
 0x83a   :  { %v7690_v33 = vsel %vm3419_vm13, %v7689_v39, %v7685_v36  ;;  %9868 = vmatpush3.bf16.msra.mxu0 %v10704_v32  ;;  %v10707_v39 = vld [vmem:[%s17211_s2 + $0x130] sm:$0xff]  }
 0x83b   :  { %v7621_v7 = vpop.permute.xlu1 %7620  ;;  %v16111_v1 = vpop.permute.xlu0 %7985  ;;  %9869 = vmatprep.subr.bf16.mxu0 %v18917_v40  ;;  %v7695_v35 = vsel %vm3426_vm14, %v7694_v54, %v7690_v33  ;;  %v18971_v32 = vld [vmem:[#allocation60_spill] sm:$0xff]  ;;  %v10708_v54 = vld [vmem:[%s17211_s2 + $0x128] sm:$0xff]  }
 0x83c   :  { %v7699_v43 = vrot.slane %v7621_v7, %v18907_v2  ;;  %8386 = vperm.xlu1 %9980, %v8343_v3   ;;  %6126 = vperm.xlu0 %9979, %v18967_v61   ;;  %v18972_v3 = vld [vmem:[#allocation197_spill] sm:$0xff] }
 0x83d   :  { %v10075_v7 = vld [vmem:[%s17215_s8 + $0x4c] ss:$12 sps:$4 sm:$0xff]  }
 0x83e   :  { %v7700_v63 = vsel %vm3433_vm15, %v7699_v43, %v7695_v35  ;;  %9870 = vmatpush3.bf16.msra.mxu0 %v10705_v49  ;;  %v7847_v43 = vrot.slane %v15975_v37, %v18880_v26  ;;  %v18975_v49 = vld [vmem:[#allocation38_spill] sm:$0xff]  ;;  %8900 = vmatprep.subr.bf16.mxu1 %v10075_v7 }
 0x83f   :  { %v7701_v47 = vpack.c.b16 %v7700_v63, %v7700_v63  ;;  %v7772_v34 = vpop.permute.xlu1 %7771  ;;  %v16122_v23 = vpop.permute.xlu0 %7991  ;;  %9875 = vmatprep.subr.bf16.mxu0 %v18917_v40  ;;  %v10709_v37 = vld [vmem:[%s17211_s2 + $0x120] sm:$0xff]   ;;  %8901 = vmatpush1.bf16.msra.mxu1 %v10073_v59  ;;  %v18984_v59 = vld [vmem:[#allocation176_spill] sm:$0xff] }
 0x840   :  { %v7822_v41 = vrot.slane %v7772_v34, %v18860_v28  ;;  %8392 = vperm.xlu1 %9980, %v8345_v21   ;;  %6132 = vperm.xlu0 %9979, %v18968_v6   ;;  %v18976_v21 = vld [vmem:[#allocation200_spill] sm:$0xff] }
 0x841   :  { %9872 = vmatmul.mubr.bf16.vlgmr.msra.gmra.mxu0 %v7701_v47 }
 0x842   :  { %v7823_v0 = vsel %vm17634_vm1, %v7822_v41, %v7818_v12  ;;  %9876 = vmatpush3.bf16.msra.mxu0 %v10706_v42  ;;  %9891 = vmatprep.mubr.msk.bf16.mxu0 %vm18918_vm4, %v18917_v40  ;;  %v7857_v12 = vrot.slane %v15994_v57, %v18887_v44  ;;  %v18978_v42 = vld [vmem:[#allocation135_spill] sm:$0xff]  ;;  %v7867_v57 = vrot.slane %v16005_v11, %v18893_v60 }
 0x843   :  { %v7778_v4 = vpop.permute.xlu1 %7777  ;;  %v16137_v29 = vpop.permute.xlu0 %7997  ;;  %9877 = vmatprep.subr.bf16.mxu0 %v18917_v40  ;;  %v7828_v56 = vsel %vm3342_vm2, %v7827_v62, %v7823_v0  ;;  %v18979_v62 = vld [vmem:[#allocation22_spill] sm:$0xff]  ;;  %v7877_v11 = vrot.slane %v16021_v46, %v18900_v18  ;;  %v10076_v46 = vld [vmem:[%s17215_s8 + $0x30] ss:$12 sps:$4 sm:$0xff]  }
 0x844   :  { %v7832_v20 = vrot.slane %v7778_v4, %v18867_v19  ;;  %6063 = vperm.xlu1 %9980, %v18969_v25   ;;  %6138 = vperm.xlu0 %9979, %v18970_v38   ;;  %v10710_v25 = vld [vmem:[%s17211_s2 + $0x118] sm:$0xff]  }
 0x846   :  { %v7833_v58 = vsel %vm3349_vm3, %v7832_v20, %v7828_v56  ;;  %9878 = vmatpush3.bf16.msra.mxu0 %v10707_v39  ;;  %v18980_v39 = vld [vmem:[#allocation134_spill] sm:$0xff] }
 0x847   :  { %v7784_v8 = vpop.permute.xlu1 %7783  ;;  %v16150_v36 = vpop.permute.xlu0 %8003  ;;  %9879 = vmatprep.subr.bf16.mxu0 %v18917_v40  ;;  %v7838_v31 = vsel %vm18973_vm11, %v7837_v53, %v7833_v58  ;;  %v18981_v53 = vld [vmem:[#allocation174_spill] sm:$0xff]  ;;  %vm18982_vm11 = vcmask 786112  }
 0x848   :  { %v7842_v33 = vrot.slane %v7784_v8, %v18873_v24  ;;  %6069 = vperm.xlu1 %9980, %v18971_v32   ;;  %6144 = vperm.xlu0 %9979, %v18972_v3   ;;  %v10711_v32 = vld [vmem:[%s17211_s2 + $0x110] sm:$0xff]  }
 0x84a   :  { %v7843_v13 = vsel %vm18974_vm5, %v7842_v33, %v7838_v31  ;;  %9880 = vmatpush3.bf16.msra.mxu0 %v10708_v54  ;;  %v18983_v54 = vld [vmem:[#allocation130_spill] sm:$0xff]  ;;  %vm18993_vm5 = vcmask 326912  }
 0x84b   :  { %v7790_v61 = vpop.permute.xlu1 %7789  ;;  %v16169_v35 = vpop.permute.xlu0 %8154  ;;  %9881 = vmatprep.subr.bf16.mxu0 %v18917_v40  ;;  %v7848_v47 = vsel %vm18977_vm0, %v7847_v43, %v7843_v13  ;;  %vm18994_vm0 = vcmask 392512  }
 0x84c   :  { %v7852_v63 = vrot.slane %v7790_v61, %v18881_v55  ;;  %6075 = vperm.xlu1 %9980, %v18975_v49   ;;  %6150 = vperm.xlu0 %9979, %v18976_v21   ;;  %v10712_v61 = vld [vmem:[%s17211_s2 + $0x108] sm:$0xff]   ;;  %v7887_v49 = vrot.slane %v16034_v17, %v18906_v52  ;;  %v10713_v17 = vld [vmem:[%s17211_s2 + $0x100] sm:$0xff]  }
 0x84e   :  { %v7853_v34 = vsel %vm3377_vm7, %v7852_v63, %v7848_v47  ;;  %9882 = vmatpush3.bf16.msra.mxu0 %v10709_v37  ;;  %v10078_v63 = vld [vmem:[%s17215_s8 + $0x34] ss:$12 sps:$4 sm:$0xff]  }
 0x84f   :  { %v7796_v41 = vpop.permute.xlu1 %7795  ;;  %v16182_v6 = vpop.permute.xlu0 %8160  ;;  %9883 = vmatprep.subr.bf16.mxu0 %v18917_v40  ;;  %v7858_v4 = vsel %vm3384_vm8, %v7857_v12, %v7853_v34  ;;  %v18985_v37 = vld [vmem:[#allocation74_spill] sm:$0xff]  ;;  %v18986_v12 = vld [vmem:[#allocation187_spill] sm:$0xff]  ;;  %8902 = vmatprep.subr.bf16.mxu1 %v10078_v63 }
 0x850   :  { %v7862_v0 = vrot.slane %v7796_v41, %v18888_v9  ;;  %6081 = vperm.xlu1 %9980, %v18978_v42   ;;  %6156 = vperm.xlu0 %9979, %v18979_v62  }
 0x851   :  { %8903 = vmatpush1.bf16.msra.mxu1 %v10076_v46  ;;  %v18992_v46 = vld [vmem:[#allocation168_spill] sm:$0xff] }
 0x852   :  { %v7863_v20 = vsel %vm3391_vm9, %v7862_v0, %v7858_v4  ;;  %9884 = vmatpush3.bf16.msra.mxu0 %v10710_v25 }
 0x853   :  { %v7802_v38 = vpop.permute.xlu1 %7801  ;;  %v16195_v56 = vpop.permute.xlu0 %8166  ;;  %9885 = vmatprep.subr.bf16.mxu0 %v18917_v40  ;;  %v7868_v8 = vsel %vm3398_vm10, %v7867_v57, %v7863_v20  ;;  %v8011_v20 = vrot.slane %v16053_v22, %v18859_v45  ;;  %v18987_v57 = vld [vmem:[#allocation131_spill] sm:$0xff]  ;;  %v8020_v22 = vrot.slane %v16066_v50, %v18866_v30  ;;  %v8030_v50 = vrot.slane %v16079_v27, %v18872_v16  ;;  %v10079_v27 = vld [vmem:[%s17215_s8 + $0x18] ss:$12 sps:$4 sm:$0xff]  }
 0x854   :  { %v7872_v58 = vrot.slane %v7802_v38, %v18894_v51  ;;  %6087 = vperm.xlu1 %9980, %v18980_v39   ;;  %6162 = vperm.xlu0 %9979, %v18981_v53   ;;  %v18988_v38 = vld [vmem:[#allocation152_spill] sm:$0xff]  ;;  %v10714_v39 = vld [vmem:[%s17211_s2 + $0x178] sm:$0xff]  }
 0x856   :  { %v7873_v33 = vsel %vm18982_vm11, %v7872_v58, %v7868_v8  ;;  %9886 = vmatpush3.bf16.msra.mxu0 %v10711_v32  ;;  %v18989_v32 = vld [vmem:[#allocation84_spill] sm:$0xff]  ;;  %vm18997_vm11 = vcmask 458112  }
 0x857   :  { %v7808_v3 = vpop.permute.xlu1 %7807  ;;  %v16208_v31 = vpop.permute.xlu0 %8172  ;;  %9887 = vmatprep.subr.bf16.mxu0 %v18917_v40  ;;  %v7878_v7 = vsel %vm3412_vm12, %v7877_v11, %v7873_v33  ;;  %v18990_v11 = vld [vmem:[#allocation183_spill] sm:$0xff] }
 0x858   :  { %v7882_v13 = vrot.slane %v7808_v3, %v18901_v14  ;;  %6093 = vperm.xlu1 %9980, %v18983_v54   ;;  %6168 = vperm.xlu0 %9979, %v18984_v59   ;;  %v10715_v54 = vld [vmem:[%s17211_s2 + $0x170] sm:$0xff]  }
 0x85a   :  { %v7883_v43 = vsel %vm3419_vm13, %v7882_v13, %v7878_v7  ;;  %9888 = vmatpush3.bf16.msra.mxu0 %v10712_v61  ;;  %v18991_v61 = vld [vmem:[#allocation102_spill] sm:$0xff] }
 0x85b   :  { %v7814_v21 = vpop.permute.xlu1 %7813  ;;  %v16227_v47 = vpop.permute.xlu0 %8178  ;;  %9889 = vmatprep.subr.bf16.mxu0 %v18917_v40  ;;  %v7888_v41 = vsel %vm3426_vm14, %v7887_v49, %v7883_v43 }
 0x85c   :  { %v7892_v34 = vrot.slane %v7814_v21, %v18907_v2  ;;  %6099 = vperm.xlu1 %9980, %v18985_v37   ;;  %6174 = vperm.xlu0 %9979, %v18986_v12   ;;  %v10716_v21 = vld [vmem:[%s17211_s2 + $0x168] sm:$0xff]   ;;  %v8040_v37 = vrot.slane %v16092_v5, %v18880_v26  ;;  %v10717_v5 = vld [vmem:[%s17211_s2 + $0x160] sm:$0xff]  }
 0x85e   :  { %v7893_v0 = vsel %vm3433_vm15, %v7892_v34, %v7888_v41  ;;  %9890 = vmatpush3.bf16.msra.mxu0 %v10713_v17  ;;  %v10081_v34 = vld [vmem:[%s17215_s8 + $0x1c] ss:$12 sps:$4 sm:$0xff]  }
 0x85f   :  { %v7894_v42 = vpack.c.b16 %v7893_v0, %v7893_v0  ;;  %v7965_v62 = vpop.permute.xlu1 %7964  ;;  %v16238_v4 = vpop.permute.xlu0 %8184  ;;  %9895 = vmatprep.subr.bf16.mxu0 %v18917_v40  ;;  %v18995_v17 = vld [vmem:[#allocation193_spill] sm:$0xff]  ;;  %8904 = vmatprep.subr.bf16.mxu1 %v10081_v34 }
 0x860   :  { %v8015_v25 = vrot.slane %v7965_v62, %v18860_v28  ;;  %6105 = vperm.xlu1 %9980, %v18987_v57   ;;  %6180 = vperm.xlu0 %9979, %v18988_v38  }
 0x861   :  { %9892 = vmatmul.mubr.bf16.vlgmr.msra.gmra.mxu0 %v7894_v42  ;;  %v18996_v42 = vld [vmem:[#allocation177_spill] sm:$0xff]  ;;  %8905 = vmatpush1.bf16.msra.mxu1 %v10079_v27  ;;  %v19004_v27 = vld [vmem:[#allocation28_spill] sm:$0xff] }
 0x862   :  { %v8016_v58 = vsel %vm17634_vm1, %v8015_v25, %v8011_v20  ;;  %9896 = vmatpush3.bf16.msra.mxu0 %v10714_v39  ;;  %9911 = vmatprep.mubr.msk.bf16.mxu0 %vm18918_vm4, %v18917_v40  ;;  %v8050_v25 = vrot.slane %v16111_v1, %v18887_v44  ;;  %v18998_v39 = vld [vmem:[#allocation192_spill] sm:$0xff]  ;;  %v8060_v1 = vrot.slane %v16122_v23, %v18893_v60 }
 0x863   :  { %v7971_v53 = vpop.permute.xlu1 %7970  ;;  %v16254_v8 = vpop.permute.xlu0 %8190  ;;  %9897 = vmatprep.subr.bf16.mxu0 %v18917_v40  ;;  %v8021_v3 = vsel %vm3342_vm2, %v8020_v22, %v8016_v58  ;;  %v18999_v22 = vld [vmem:[#allocation184_spill] sm:$0xff]  ;;  %v8070_v23 = vrot.slane %v16137_v29, %v18900_v18  ;;  %v10082_v29 = vld [vmem:[%s17215_s8] ss:$12 sps:$4 sm:$0xff]  }
 0x864   :  { %v8025_v33 = vrot.slane %v7971_v53, %v18867_v19  ;;  %6111 = vperm.xlu1 %9980, %v18989_v32   ;;  %6186 = vperm.xlu0 %9979, %v18990_v11   ;;  %v10718_v32 = vld [vmem:[%s17211_s2 + $0x158] sm:$0xff]  }
 0x866   :  { %v8026_v13 = vsel %vm3349_vm3, %v8025_v33, %v8021_v3  ;;  %9898 = vmatpush3.bf16.msra.mxu0 %v10715_v54  ;;  %v19000_v54 = vld [vmem:[#allocation194_spill] sm:$0xff] }
 0x867   :  { %v7977_v59 = vpop.permute.xlu1 %7976  ;;  %v16267_v7 = vpop.permute.xlu0 %8196  ;;  %9899 = vmatprep.subr.bf16.mxu0 %v18917_v40  ;;  %v8031_v63 = vsel %vm18993_vm5, %v8030_v50, %v8026_v13  ;;  %v19001_v50 = vld [vmem:[#allocation59_spill] sm:$0xff]  ;;  %vm19002_vm5 = vcmask 786112  }
 0x868   :  { %v8035_v43 = vrot.slane %v7977_v59, %v18873_v24  ;;  %6117 = vperm.xlu1 %9980, %v18991_v61   ;;  %6192 = vperm.xlu0 %9979, %v18992_v46   ;;  %v10719_v61 = vld [vmem:[%s17211_s2 + $0x150] sm:$0xff]  }
 0x86a   :  { %v8036_v49 = vsel %vm18994_vm0, %v8035_v43, %v8031_v63  ;;  %9900 = vmatpush3.bf16.msra.mxu0 %v10716_v21  ;;  %v19003_v21 = vld [vmem:[#allocation196_spill] sm:$0xff]  ;;  %vm19013_vm0 = vcmask 326912  }
 0x86b   :  { %v7983_v12 = vpop.permute.xlu1 %7982  ;;  %v16286_v41 = vpop.permute.xlu0 %8347  ;;  %9901 = vmatprep.subr.bf16.mxu0 %v18917_v40  ;;  %v8041_v62 = vsel %vm18997_vm11, %v8040_v37, %v8036_v49  ;;  %vm19014_vm11 = vcmask 392512  }
 0x86c   :  { %v8045_v0 = vrot.slane %v7983_v12, %v18881_v55  ;;  %6123 = vperm.xlu1 %9980, %v18995_v17   ;;  %6198 = vperm.xlu0 %9979, %v18996_v42   ;;  %v10720_v12 = vld [vmem:[%s17211_s2 + $0x148] sm:$0xff]   ;;  %v8080_v17 = vrot.slane %v16150_v36, %v18906_v52  ;;  %v10721_v36 = vld [vmem:[%s17211_s2 + $0x140] sm:$0xff]  }
 0x86e   :  { %v8046_v20 = vsel %vm3377_vm7, %v8045_v0, %v8041_v62  ;;  %9902 = vmatpush3.bf16.msra.mxu0 %v10717_v5  ;;  %v10084_v0 = vld [vmem:[%s17215_s8 + $0x4] ss:$12 sps:$4 sm:$0xff]  }
 0x86f   :  { %v7989_v57 = vpop.permute.xlu1 %7988  ;;  %v16299_v38 = vpop.permute.xlu0 %8353  ;;  %9903 = vmatprep.subr.bf16.mxu0 %v18917_v40  ;;  %v8051_v53 = vsel %vm3384_vm8, %v8050_v25, %v8046_v20  ;;  %v19005_v5 = vld [vmem:[#allocation88_spill] sm:$0xff]  ;;  %v19006_v25 = vld [vmem:[#allocation170_spill] sm:$0xff]  ;;  %8906 = vmatprep.subr.bf16.mxu1 %v10084_v0 }
 0x870   :  { %v8055_v58 = vrot.slane %v7989_v57, %v18888_v9  ;;  %6129 = vperm.xlu1 %9980, %v18998_v39   ;;  %6204 = vperm.xlu0 %9979, %v18999_v22  }
 0x871   :  { %8907 = vmatpush1.bf16.msra.mxu1 %v10082_v29  ;;  %v19012_v29 = vld [vmem:[#allocation165_spill] sm:$0xff] }
 0x872   :  { %v8056_v33 = vsel %vm3391_vm9, %v8055_v58, %v8051_v53  ;;  %9904 = vmatpush3.bf16.msra.mxu0 %v10718_v32 }
 0x873   :  { %v7995_v11 = vpop.permute.xlu1 %7994  ;;  %v16312_v3 = vpop.permute.xlu0 %8359  ;;  %9905 = vmatprep.subr.bf16.mxu0 %v18917_v40  ;;  %v8061_v59 = vsel %vm3398_vm10, %v8060_v1, %v8056_v33  ;;  %v8204_v33 = vrot.slane %v16169_v35, %v18859_v45  ;;  %v19007_v1 = vld [vmem:[#allocation205_spill] sm:$0xff]  ;;  %v8213_v35 = vrot.slane %v16182_v6, %v18866_v30  ;;  %v8223_v6 = vrot.slane %v16195_v56, %v18872_v16  ;;  %v10085_v56 = vld [vmem:[%s17215_s8 + $0x168] ss:$12 sps:$4 sm:$0xff]  }
 0x874   :  { %v8065_v13 = vrot.slane %v7995_v11, %v18894_v51  ;;  %6135 = vperm.xlu1 %9980, %v19000_v54   ;;  %6222 = vperm.xlu0 %9979, %v19001_v50   ;;  %v19008_v11 = vld [vmem:[#allocation30_spill] sm:$0xff]  ;;  %v10722_v54 = vld [vmem:[%s17211_s2 + $0x1b8] sm:$0xff]  }
 0x876   :  { %v8066_v43 = vsel %vm19002_vm5, %v8065_v13, %v8061_v59  ;;  %9906 = vmatpush3.bf16.msra.mxu0 %v10719_v61  ;;  %v19009_v61 = vld [vmem:[#allocation45_spill] sm:$0xff]  ;;  %vm19017_vm5 = vcmask 458112  }
 0x877   :  { %v8001_v46 = vpop.permute.xlu1 %8000  ;;  %v16325_v63 = vpop.permute.xlu0 %8365  ;;  %9907 = vmatprep.subr.bf16.mxu0 %v18917_v40  ;;  %v8071_v34 = vsel %vm3412_vm12, %v8070_v23, %v8066_v43  ;;  %v19010_v23 = vld [vmem:[#allocation18_spill] sm:$0xff] }
 0x878   :  { %v8075_v49 = vrot.slane %v8001_v46, %v18901_v14  ;;  %6141 = vperm.xlu1 %9980, %v19003_v21   ;;  %6228 = vperm.xlu0 %9979, %v19004_v27   ;;  %v10723_v21 = vld [vmem:[%s17211_s2 + $0x1b0] sm:$0xff]  }
 0x87a   :  { %v8076_v37 = vsel %vm3419_vm13, %v8075_v49, %v8071_v34  ;;  %9908 = vmatpush3.bf16.msra.mxu0 %v10720_v12  ;;  %v19011_v12 = vld [vmem:[#allocation188_spill] sm:$0xff] }
 0x87b   :  { %v8007_v42 = vpop.permute.xlu1 %8006  ;;  %v16344_v62 = vpop.permute.xlu0 %8371  ;;  %9909 = vmatprep.subr.bf16.mxu0 %v18917_v40  ;;  %v8081_v57 = vsel %vm3426_vm14, %v8080_v17, %v8076_v37 }
 0x87c   :  { %v8085_v20 = vrot.slane %v8007_v42, %v18907_v2  ;;  %6147 = vperm.xlu1 %9980, %v19005_v5   ;;  %6234 = vperm.xlu0 %9979, %v19006_v25   ;;  %v10724_v42 = vld [vmem:[%s17211_s2 + $0x1a8] sm:$0xff]   ;;  %v8233_v5 = vrot.slane %v16208_v31, %v18880_v26  ;;  %v10725_v31 = vld [vmem:[%s17211_s2 + $0x1a0] sm:$0xff]  }
 0x87e   :  { %v8086_v58 = vsel %vm3433_vm15, %v8085_v20, %v8081_v57  ;;  %9910 = vmatpush3.bf16.msra.mxu0 %v10721_v36  ;;  %v10087_v20 = vld [vmem:[%s17215_s8 + $0x16c] ss:$12 sps:$4 sm:$0xff]  }
 0x87f   :  { %v8087_v39 = vpack.c.b16 %v8086_v58, %v8086_v58  ;;  %v8158_v22 = vpop.permute.xlu1 %8157  ;;  %v16355_v53 = vpop.permute.xlu0 %8377  ;;  %9915 = vmatprep.subr.bf16.mxu0 %v18917_v40  ;;  %v19015_v36 = vld [vmem:[#allocation185_spill] sm:$0xff]  ;;  %8908 = vmatprep.subr.bf16.mxu1 %v10087_v20 }
 0x880   :  { %v8208_v32 = vrot.slane %v8158_v22, %v18860_v28  ;;  %6153 = vperm.xlu1 %9980, %v19007_v1   ;;  %6240 = vperm.xlu0 %9979, %v19008_v11  }
 0x881   :  { %9912 = vmatmul.mubr.bf16.vlgmr.msra.gmra.mxu0 %v8087_v39  ;;  %v19016_v39 = vld [vmem:[#allocation180_spill] sm:$0xff]  ;;  %8909 = vmatpush2.bf16.msra.mxu1 %v10085_v56 }
 0x882   :  { %v8209_v13 = vsel %vm17634_vm1, %v8208_v32, %v8204_v33  ;;  %9916 = vmatpush3.bf16.msra.mxu0 %v10722_v54  ;;  %9931 = vmatprep.mubr.msk.bf16.mxu0 %vm18918_vm4, %v18917_v40  ;;  %v8243_v32 = vrot.slane %v16227_v47, %v18887_v44  ;;  %v19018_v54 = vld [vmem:[#allocation181_spill] sm:$0xff]  ;;  %v8253_v47 = vrot.slane %v16238_v4, %v18893_v60 }
 0x883   :  { %v8164_v50 = vpop.permute.xlu1 %8163  ;;  %v16371_v59 = vpop.permute.xlu0 %8383  ;;  %9917 = vmatprep.subr.bf16.mxu0 %v18917_v40  ;;  %v8214_v46 = vsel %vm3342_vm2, %v8213_v35, %v8209_v13  ;;  %v19019_v35 = vld [vmem:[#allocation167_spill] sm:$0xff]  ;;  %v8263_v4 = vrot.slane %v16254_v8, %v18900_v18  ;;  %v10088_v8 = vld [vmem:[%s17215_s8 + $0x150] ss:$12 sps:$4 sm:$0xff]  }
 0x884   :  { %v8218_v43 = vrot.slane %v8164_v50, %v18867_v19  ;;  %6159 = vperm.xlu1 %9980, %v19009_v61   ;;  %6246 = vperm.xlu0 %9979, %v19010_v23   ;;  %v10726_v61 = vld [vmem:[%s17211_s2 + $0x198] sm:$0xff]  }
 0x886   :  { %v8219_v49 = vsel %vm3349_vm3, %v8218_v43, %v8214_v46  ;;  %9918 = vmatpush3.bf16.msra.mxu0 %v10723_v21  ;;  %v19020_v21 = vld [vmem:[#allocation175_spill] sm:$0xff] }
 0x887   :  { %v8170_v27 = vpop.permute.xlu1 %8169  ;;  %v16384_v34 = vpop.permute.xlu0 %8389  ;;  %9919 = vmatprep.subr.bf16.mxu0 %v18917_v40  ;;  %v8224_v0 = vsel %vm19013_vm0, %v8223_v6, %v8219_v49  ;;  %v19021_v6 = vld [vmem:[#allocation169_spill] sm:$0xff]  ;;  %vm19022_vm0 = vcmask 786112  }
 0x888   :  { %v8228_v37 = vrot.slane %v8170_v27, %v18873_v24  ;;  %6165 = vperm.xlu1 %9980, %v19011_v12   ;;  %6207 = vperm.xlu0 %9979, %v19012_v29   ;;  %v10727_v12 = vld [vmem:[%s17211_s2 + $0x190] sm:$0xff]  }
 0x88a   :  { %v8229_v17 = vsel %vm19014_vm11, %v8228_v37, %v8224_v0  ;;  %9920 = vmatpush3.bf16.msra.mxu0 %v10724_v42  ;;  %v19023_v42 = vld [vmem:[#allocation166_spill] sm:$0xff]  ;;  %vm19028_vm11 = vcmask 326912  }
 0x88b   :  { %v8176_v25 = vpop.permute.xlu1 %8175  ;;  %v16403_v57 = vpop.permute.xlu0 %6060  ;;  %9921 = vmatprep.subr.bf16.mxu0 %v18917_v40  ;;  %v8234_v22 = vsel %vm19017_vm5, %v8233_v5, %v8229_v17  ;;  %v10728_v5 = vld [vmem:[%s17211_s2 + $0x188] sm:$0xff]   ;;  %vm19029_vm5 = vcmask 392512  }
 0x88c   :  { %v8238_v58 = vrot.slane %v8176_v25, %v18881_v55  ;;  %6171 = vperm.xlu1 %9980, %v19015_v36   ;;  %6210 = vperm.xlu0 %9979, %v19016_v39   ;;  %v10090_v25 = vld [vmem:[%s17215_s8 + $0x154] ss:$12 sps:$4 sm:$0xff]  }
 0x88d   :  { %8910 = vmatprep.subr.bf16.mxu1 %v10090_v25 }
 0x88e   :  { %v8239_v33 = vsel %vm3377_vm7, %v8238_v58, %v8234_v22  ;;  %9922 = vmatpush3.bf16.msra.mxu0 %v10725_v31  ;;  %v19024_v22 = vld [vmem:[#allocation154_spill] sm:$0xff]  ;;  %8911 = vmatpush2.bf16.msra.mxu1 %v10088_v8 }
 0x88f   :  { %v8182_v1 = vpop.permute.xlu1 %8181  ;;  %v16416_v11 = vpop.permute.xlu0 %6066  ;;  %9923 = vmatprep.subr.bf16.mxu0 %v18917_v40  ;;  %v8244_v50 = vsel %vm3384_vm8, %v8243_v32, %v8239_v33  ;;  %v10729_v32 = vld [vmem:[%s17211_s2 + $0x180] sm:$0xff]  }
 0x890   :  { %v8248_v13 = vrot.slane %v8182_v1, %v18888_v9  ;;  %6177 = vperm.xlu1 %9980, %v19018_v54   ;;  %6213 = vperm.xlu0 %9979, %v19019_v35   ;;  %v8397_v54 = vrot.slane %v16286_v41, %v18859_v45  ;;  %v8406_v41 = vrot.slane %v16299_v38, %v18866_v30 }
 0x891   :  { %v8416_v38 = vrot.slane %v16312_v3, %v18872_v16  ;;  %v10091_v3 = vld [vmem:[%s17215_s8 + $0x138] ss:$12 sps:$4 sm:$0xff]  }
 0x892   :  { %v8249_v43 = vsel %vm3391_vm9, %v8248_v13, %v8244_v50  ;;  %9924 = vmatpush3.bf16.msra.mxu0 %v10726_v61  ;;  %v19025_v50 = vld [vmem:[#allocation164_spill] sm:$0xff] }
 0x893   :  { %v8188_v23 = vpop.permute.xlu1 %8187  ;;  %v16429_v46 = vpop.permute.xlu0 %6072  ;;  %9925 = vmatprep.subr.bf16.mxu0 %v18917_v40  ;;  %v8254_v27 = vsel %vm3398_vm10, %v8253_v47, %v8249_v43  ;;  %v10730_v47 = vld [vmem:[%s17211_s2 + $0x1f8] sm:$0xff]  }
 0x894   :  { %v8258_v49 = vrot.slane %v8188_v23, %v18894_v51  ;;  %6183 = vperm.xlu1 %9980, %v19020_v21   ;;  %6216 = vperm.xlu0 %9979, %v19021_v6  }
 0x896   :  { %v8259_v37 = vsel %vm19022_vm0, %v8258_v49, %v8254_v27  ;;  %9926 = vmatpush3.bf16.msra.mxu0 %v10727_v12  ;;  %v19026_v27 = vld [vmem:[#allocation118_spill] sm:$0xff]  ;;  %vm19034_vm0 = vcmask 458112  }
 0x897   :  { %v8194_v29 = vpop.permute.xlu1 %8193  ;;  %v16442_v0 = vpop.permute.xlu0 %6078  ;;  %9927 = vmatprep.subr.bf16.mxu0 %v18917_v40  ;;  %v8264_v56 = vsel %vm3412_vm12, %v8263_v4, %v8259_v37 }
 0x898   :  { %v8268_v17 = vrot.slane %v8194_v29, %v18901_v14  ;;  %6189 = vperm.xlu1 %9980, %v19023_v42   ;;  %6264 = vperm.xlu0 %9979, %v15895_v10   ;;  %v8273_v10 = vrot.slane %v16267_v7, %v18906_v52  ;;  %v10731_v29 = vld [vmem:[%s17211_s2 + $0x1f0] sm:$0xff]  }
 0x89a   :  { %v8269_v20 = vsel %vm3419_vm13, %v8268_v17, %v8264_v56  ;;  %9928 = vmatpush3.bf16.msra.mxu0 %v10728_v5  ;;  %v19027_v5 = vld [vmem:[#allocation46_spill] sm:$0xff] }
 0x89b   :  { %v8200_v58 = vpop.permute.xlu1 %8199  ;;  %v16461_v36 = vpop.permute.xlu0 %6084  ;;  %9929 = vmatprep.subr.bf16.mxu0 %v18917_v40  ;;  %v8274_v33 = vsel %vm3426_vm14, %v8273_v10, %v8269_v20  ;;  %v10732_v10 = vld [vmem:[%s17211_s2 + $0x1e8] sm:$0xff]  }
 0x89c   :  { %v8278_v39 = vrot.slane %v8200_v58, %v18907_v2  ;;  %6195 = vperm.xlu1 %9980, %v19024_v22   ;;  %v10093_v58 = vld [vmem:[%s17215_s8 + $0x13c] ss:$12 sps:$4 sm:$0xff]  }
 0x89d   :  { %8912 = vmatprep.subr.bf16.mxu1 %v10093_v58 }
 0x89e   :  { %v8279_v31 = vsel %vm3433_vm15, %v8278_v39, %v8274_v33  ;;  %9930 = vmatpush3.bf16.msra.mxu0 %v10729_v32  ;;  %v19030_v39 = vld [vmem:[#allocation76_spill] sm:$0xff]  ;;  %v8426_v33 = vrot.slane %v16325_v63, %v18880_v26  ;;  %8913 = vmatpush2.bf16.msra.mxu1 %v10091_v3 }
 0x89f   :  { %v8280_v7 = vpack.c.b16 %v8279_v31, %v8279_v31  ;;  %v8351_v1 = vpop.permute.xlu1 %8350  ;;  %v16471_v13 = vpop.permute.xlu0 %6090  ;;  %9935 = vmatprep.subr.bf16.mxu0 %v18917_v40  ;;  %v6506_v22 = vrot.slane %v19030_v39, %v18859_v45  ;;  %v19038_v39 = vld [vmem:[#allocation191_spill] sm:$0xff] }
 0x8a0   :  { %v8401_v35 = vrot.slane %v8351_v1, %v18860_v28  ;;  %6201 = vperm.xlu1 %9980, %v19025_v50   ;;  %v19033_v50 = vld [vmem:[#allocation212_spill] sm:$0xff] }
 0x8a1   :  { %v16478_v43 = vpop.f32.mrf.mxu0  ;;  %9932 = vmatmul.mubr.bf16.vlgmr.msra.gmra.mxu0 %v8280_v7  ;;  %v19031_v7 = vld [vmem:[#allocation80_spill] sm:$0xff] }
 0x8a2   :  { %v8402_v61 = vsel %vm17634_vm1, %v8401_v35, %v8397_v54  ;;  %9936 = vmatpush3.bf16.msra.mxu0 %v10730_v47  ;;  %9951 = vmatprep.mubr.msk.bf16.mxu0 %vm18918_vm4, %v18917_v40  ;;  %v6515_v1 = vrot.slane %v19031_v7, %v18866_v30  ;;  %v19032_v35 = vld [vmem:[#allocation17_spill] sm:$0xff]  ;;  %v19040_v7 = vld [vmem:[#allocation86_spill] sm:$0xff] }
 0x8a3   :  { %v8357_v23 = vpop.permute.xlu1 %8356  ;;  %v16488_v49 = vpop.permute.xlu0 %6096  ;;  %9937 = vmatprep.subr.bf16.mxu0 %v18917_v40  ;;  %v8407_v37 = vsel %vm3342_vm2, %v8406_v41, %v8402_v61  ;;  %v6510_v61 = vrot.slane %v19033_v50, %v18860_v28  ;;  %v10733_v41 = vld [vmem:[%s17211_s2 + $0x1e0] sm:$0xff]  }
 0x8a4   :  { %v8411_v21 = vrot.slane %v8357_v23, %v18867_v19  ;;  %v9813_v6 = vpop.f32.mrf.mxu0  ;;  %6219 = vperm.xlu1 %9980, %v19026_v27  }
 0x8a5   :  { %v6511_v23 = vsel %vm17634_vm1, %v6510_v61, %v6506_v22  ;;  %v6535_v22 = vrot.slane %v19038_v39, %v18880_v26  ;;  %v8456_v61 = vrot.slane %v16371_v59, %v18900_v18  ;;  %v19048_v39 = vld [vmem:[#allocation186_spill] sm:$0xff] }
 0x8a6   :  { %v8412_v12 = vsel %vm3349_vm3, %v8411_v21, %v8407_v37  ;;  %v7161_v4 = vpop.f32.mrf.mxu0  ;;  %9938 = vmatpush3.bf16.msra.mxu0 %v10731_v29  ;;  %v8436_v21 = vrot.slane %v16344_v62, %v18887_v44  ;;  %v6516_v37 = vsel %vm3342_vm2, %v6515_v1, %v6511_v23  ;;  %v6530_v1 = vrot.slane %v19040_v7, %v18873_v24  ;;  %v19050_v7 = vld [vmem:[#allocation47_spill] sm:$0xff] }
 0x8a7   :  { %v8363_v17 = vpop.permute.xlu1 %8362  ;;  %v16500_v42 = vpop.permute.xlu0 %6102  ;;  %9939 = vmatprep.subr.bf16.mxu0 %v18917_v40  ;;  %v8417_v8 = vsel %vm19028_vm11, %v8416_v38, %v8412_v12  ;;  %v19035_v12 = vld [vmem:[#allocation195_spill] sm:$0xff]  ;;  %v19036_v38 = vld [vmem:[#allocation53_spill] sm:$0xff] }
 0x8a8   :  { %v8421_v56 = vrot.slane %v8363_v17, %v18873_v24  ;;  %v9814_v20 = vpop.f32.mrf.mxu0  ;;  %6225 = vperm.xlu1 %9980, %v19027_v5   ;;  %v6525_v4 = vrot.slane %v19035_v12, %v18872_v16  ;;  %v19037_v17 = vld [vmem:[#allocation211_spill] sm:$0xff]  ;;  %v10734_v5 = vld [vmem:[%s17211_s2 + $0x1d8] sm:$0xff]  }
 0x8aa   :  { %v8422_v25 = vsel %vm19029_vm5, %v8421_v56, %v8417_v8  ;;  %9940 = vmatpush3.bf16.msra.mxu0 %v10732_v10  ;;  %v6520_v56 = vrot.slane %v19037_v17, %v18867_v19  ;;  %vm19041_vm5 = vcmask 786112   ;;  %v19046_v17 = vld [vmem:[#allocation122_spill] sm:$0xff] }
 0x8ab   :  { %v8369_v31 = vpop.permute.xlu1 %8368  ;;  %v16520_v32 = vpop.permute.xlu0 %6108  ;;  %9941 = vmatprep.subr.bf16.mxu0 %v18917_v40  ;;  %v8427_v47 = vsel %vm19034_vm0, %v8426_v33, %v8422_v25  ;;  %v8446_v25 = vrot.slane %v16355_v53, %v18893_v60  ;;  %vm19042_vm0 = vcmask 392512  }
 0x8ac   :  { %v8431_v54 = vrot.slane %v8369_v31, %v18881_v55  ;;  %6231 = vperm.xlu1 %9980, %v19032_v35   ;;  %v6521_v8 = vsel %vm3349_vm3, %v6520_v56, %v6516_v37  ;;  %v19039_v31 = vld [vmem:[#allocation77_spill] sm:$0xff]  ;;  %v10735_v35 = vld [vmem:[%s17211_s2 + $0x1d0] sm:$0xff]   ;;  %v19045_v37 = vld [vmem:[#allocation82_spill] sm:$0xff]  ;;  %v6273_v56 = vrot.slane %v19046_v17, %v18860_v28  ;;  %v8515_v17 = vpack.c.bf16 %v16478_v43, %v16478_v43 }
 0x8ad   :  { %v6526_v58 = vsel %vm19028_vm11, %v6525_v4, %v6521_v8  ;;  %vm19043_vm11 = vcmask 458112   ;;  %v6540_v12 = vrot.slane %v19045_v37, %v18881_v55  ;;  %v19052_v37 = vld [vmem:[#allocation173_spill] sm:$0xff] }
 0x8ae   :  { %v8432_v63 = vsel %vm3377_vm7, %v8431_v54, %v8427_v47  ;;  %9942 = vmatpush3.bf16.msra.mxu0 %v10733_v41  ;;  %v6531_v50 = vsel %vm19042_vm0, %v6530_v1, %v6526_v58  ;;  %v19044_v41 = vld [vmem:[#allocation172_spill] sm:$0xff]  ;;  %v6269_v1 = vrot.slane %v19050_v7, %v18859_v45  ;;  %vm19058_vm0 = vcmask 1041409  }
 0x8af   :  { %v8375_v6 = vpop.permute.xlu1 %8374  ;;  %v16537_v27 = vpop.permute.xlu0 %6114  ;;  %9943 = vmatprep.subr.bf16.mxu0 %v18917_v40  ;;  %v8437_v20 = vsel %vm3384_vm8, %v8436_v21, %v8432_v63  ;;  %v6536_v63 = vsel %vm19043_vm11, %v6535_v22, %v6531_v50  ;;  %v6545_v23 = vrot.slane %v19044_v41, %v18887_v44  ;;  %v19049_v22 = vld [vmem:[#allocation213_spill] sm:$0xff]  ;;  %vm19064_vm11 = vmmov %vm19058_vm0 }
 0x8b0   :  { %v8441_v29 = vrot.slane %v8375_v6, %v18888_v9  ;;  %6237 = vperm.xlu1 %9980, %v19036_v38   ;;  %v10094_v38 = vld [vmem:[%s17215_s8 + $0x120] ss:$12 sps:$4 sm:$0xff]  }
 0x8b2   :  { %v8442_v62 = vsel %vm3391_vm9, %v8441_v29, %v8437_v20  ;;  %9944 = vmatpush3.bf16.msra.mxu0 %v10734_v5  ;;  %v10736_v29 = vld [vmem:[%s17211_s2 + $0x1c8] sm:$0xff]   ;;  %v6541_v20 = vsel %vm3377_vm7, %v6540_v12, %v6536_v63  ;;  %v19051_v63 = vld [vmem:[#allocation141_spill] sm:$0xff]  ;;  %v6348_v12 = vrot.slane %v19052_v37, %v18859_v45 }
 0x8b3   :  { %v8381_v10 = vpop.permute.xlu1 %8380  ;;  %v16555_v3 = vpop.permute.xlu0 %6120  ;;  %9945 = vmatprep.subr.bf16.mxu0 %v18917_v40  ;;  %v8447_v54 = vsel %vm3398_vm10, %v8446_v25, %v8442_v62  ;;  %v8466_v62 = vrot.slane %v16384_v34, %v18906_v52  ;;  %v6546_v8 = vsel %vm3384_vm8, %v6545_v23, %v6541_v20  ;;  %v19047_v25 = vld [vmem:[#allocation92_spill] sm:$0xff]  ;;  %v6352_v41 = vrot.slane %v19051_v63, %v18860_v28 }
 0x8b4   :  { %v8451_v33 = vrot.slane %v8381_v10, %v18894_v51  ;;  %6243 = vperm.xlu1 %9980, %v19039_v31   ;;  %v6555_v10 = vrot.slane %v19047_v25, %v18893_v60  ;;  %v6560_v31 = vrot.slane %v16403_v57, %v18894_v51  ;;  %v6274_v57 = vsel %vm17634_vm1, %v6273_v56, %v6269_v1 }
 0x8b6   :  { %v8452_v53 = vsel %vm19041_vm5, %v8451_v33, %v8447_v54  ;;  %9946 = vmatpush3.bf16.msra.mxu0 %v10735_v35  ;;  %v6550_v33 = vrot.slane %v19049_v22, %v18888_v9  ;;  %v10737_v35 = vld [vmem:[%s17211_s2 + $0x1c0] sm:$0xff]  }
 0x8b7   :  { %v8387_v47 = vpop.permute.xlu1 %8386  ;;  %9947 = vmatprep.subr.bf16.mxu0 %v18917_v40  ;;  %v16578_v6 = vpop.permute.xlu0 %6126  ;;  %v8457_v4 = vsel %vm3412_vm12, %v8456_v61, %v8452_v53  ;;  %v19057_v22 = vld [vmem:[#allocation90_spill] sm:$0xff] }
 0x8b8   :  { %v8461_v21 = vrot.slane %v8387_v47, %v18901_v14  ;;  %6249 = vperm.xlu1 %9980, %v15833_v48   ;;  %v10096_v48 = vld [vmem:[%s17215_s8 + $0x124] ss:$12 sps:$4 sm:$0xff]   ;;  %v6551_v50 = vsel %vm3391_vm9, %v6550_v33, %v6546_v8  ;;  %v6431_v33 = vrot.slane %v19057_v22, %v18860_v28  ;;  %v19067_v22 = vld [vmem:[#allocation99_spill] sm:$0xff] }
 0x8b9   :  { %8914 = vmatprep.subr.bf16.mxu1 %v10096_v48  ;;  %v6556_v23 = vsel %vm3398_vm10, %v6555_v10, %v6551_v50  ;;  %v19055_v8 = vld [vmem:[#allocation14_spill] sm:$0xff]  ;;  %v19056_v10 = vld [vmem:[#allocation128_spill] sm:$0xff] }
 0x8ba   :  { %v8462_v59 = vsel %vm3419_vm13, %v8461_v21, %v8457_v4  ;;  %9948 = vmatpush3.bf16.msra.mxu0 %v10736_v29  ;;  %8915 = vmatpush2.bf16.msra.mxu1 %v10094_v38  ;;  %v19053_v4 = vld [vmem:[#allocation21_spill] sm:$0xff]  ;;  %v6561_v29 = vsel %vm19041_vm5, %v6560_v31, %v6556_v23  ;;  %v6570_v38 = vrot.slane %v16416_v11, %v18901_v14  ;;  %v19060_v50 = vld [vmem:[#allocation126_spill] sm:$0xff]  ;;  %vm19069_vm5 = vcmask 326912  }
 0x8bb   :  { %v8393_v5 = vpop.permute.xlu1 %8392  ;;  %9949 = vmatprep.subr.bf16.mxu0 %v18917_v40  ;;  %v8467_v34 = vsel %vm3426_vm14, %v8466_v62, %v8462_v59  ;;  %v16613_v53 = vpop.permute.xlu0 %6132  ;;  %v6427_v59 = vrot.slane %v19053_v4, %v18859_v45  ;;  %v19054_v62 = vld [vmem:[#allocation63_spill] sm:$0xff]  ;;  %v6357_v25 = vrot.slane %v19055_v8, %v18866_v30  ;;  %v6353_v23 = vsel %vm17634_vm1, %v6352_v41, %v6348_v12 }
 0x8bc   :  { %v8471_v58 = vrot.slane %v8393_v5, %v18907_v2  ;;  %6252 = vperm.xlu1 %9980, %v19048_v39   ;;  %v6278_v5 = vrot.slane %v19054_v62, %v18866_v30 }
 0x8bd   :  { %v6432_v37 = vsel %vm17634_vm1, %v6431_v33, %v6427_v59  ;;  %v6589_v59 = vrot.slane %v16442_v0, %v18860_v28  ;;  %v6441_v33 = vrot.slane %v19067_v22, %v18867_v19  ;;  %v10097_v0 = vld [vmem:[%s17215_s8 + $0x108] ss:$12 sps:$4 sm:$0xff]  }
 0x8be   :  { %v8472_v54 = vsel %vm3433_vm15, %v8471_v58, %v8467_v34  ;;  %9950 = vmatpush3.bf16.msra.mxu0 %v10737_v35  ;;  %v6436_v58 = vrot.slane %v19056_v10, %v18866_v30  ;;  %v19059_v35 = vld [vmem:[#allocation171_spill] sm:$0xff]  ;;  %v19065_v10 = vld [vmem:[#allocation182_spill] sm:$0xff] }
 0x8bf   :  { %v8473_v61 = vpack.c.b16 %v8472_v54, %v8472_v54  ;;  %v6064_v47 = vpop.permute.xlu1 %6063  ;;  %v16644_v31 = vpop.permute.xlu0 %6138 }
 0x8c0   :  { %v6565_v21 = vrot.slane %v6064_v47, %v18900_v18  ;;  %6255 = vperm.xlu1 %9980, %v15858_v15   ;;  %v19061_v47 = vld [vmem:[#allocation52_spill] sm:$0xff] }
 0x8c1   :  { %v7351_v48 = vpop.f32.mrf.mxu0  ;;  %9952 = vmatmul.mubr.bf16.vlgmr.msra.gmra.mxu0 %v8473_v61  ;;  %v6362_v61 = vrot.slane %v19060_v50, %v18867_v19  ;;  %v6283_v63 = vrot.slane %v19061_v47, %v18867_v19  ;;  %v19068_v50 = vld [vmem:[#allocation129_spill] sm:$0xff] }
 0x8c2   :  { %v6566_v56 = vsel %vm3412_vm12, %v6565_v21, %v6561_v29  ;;  %v8516_v20 = vpack.c.bf16 %v7351_v48, %v7351_v48  ;;  %v9261_v15 = vrot.slane %v7351_v48, 7  ;;  %v6580_v21 = vrot.slane %v16429_v46, %v18907_v2  ;;  %v19063_v46 = vld [vmem:[#allocation138_spill] sm:$0xff] }
 0x8c3   :  { %v6070_v39 = vpop.permute.xlu1 %6069  ;;  %v6571_v11 = vsel %vm3419_vm13, %v6570_v38, %v6566_v56  ;;  %v9833_v54 = vpop.f32.mrf.mxu0  ;;  %v6358_v48 = vsel %vm3342_vm2, %v6357_v25, %v6353_v23  ;;  %v19062_v56 = vld [vmem:[#allocation13_spill] sm:$0xff]  ;;  %v6446_v12 = vrot.slane %v19063_v46, %v18872_v16  ;;  %v6372_v47 = vrot.slane %v19068_v50, %v18873_v24 }
 0x8c4   :  { %v8532_v34 = vunpack.c.l.b16 %v8516_v20  ;;  %v16648_v7 = vsel %vm19058_vm0, %v9261_v15, %v16478_v43  ;;  %v6575_v1 = vrot.slane %v6070_v39, %v18906_v52  ;;  %6258 = vperm.xlu1 %9980, %v19059_v35   ;;  %v8531_v43 = vunpack.c.l.b16 %v8515_v17  ;;  %v19066_v39 = vld [vmem:[#allocation41_spill] sm:$0xff]  ;;  %v16690_v35 = vpop.permute.xlu0 %6144  ;;  %vm19072_vm0 = vmmov %vm19069_vm5 }
 0x8c5   :  { %v7354_v38 = vpop.f32.mrf.mxu0  ;;  %v6367_v20 = vrot.slane %v19062_v56, %v18872_v16  ;;  %v6437_v15 = vsel %vm3342_vm2, %v6436_v58, %v6432_v37  ;;  %v6279_v58 = vsel %vm3342_vm2, %v6278_v5, %v6274_v57  ;;  %v6363_v54 = vsel %vm3349_vm3, %v6362_v61, %v6358_v48  ;;  %v10102_v5 = vld [vmem:[%s17215_s8 + $0xf4] ss:$12 sps:$4 sm:$0xff]   ;;  %v19071_v61 = vld [vmem:[#allocation75_spill] sm:$0xff] }
 0x8c6   :  { %v8539_v4 = vrot.slane %v8532_v34, 7  ;;  %v6576_v29 = vsel %vm3426_vm14, %v6575_v1, %v6571_v11  ;;  %v6288_v11 = vrot.slane %v19066_v39, %v18872_v16  ;;  %v10099_v34 = vld [vmem:[%s17215_s8 + $0x10c] ss:$12 sps:$4 sm:$0xff]   ;;  %v6284_v1 = vsel %vm3349_vm3, %v6283_v63, %v6279_v58 }
 0x8c7   :  { %v16666_v62 = vsel %vm3433_vm15, %v6580_v21, %v6576_v29  ;;  %v6076_v41 = vpop.permute.xlu1 %6075  ;;  %v9834_v25 = vpop.f32.mrf.mxu0  ;;  %v6368_v23 = vsel %vm19069_vm5, %v6367_v20, %v6363_v54  ;;  %v19070_v21 = vld [vmem:[#allocation153_spill] sm:$0xff]  ;;  %v6442_v63 = vsel %vm3349_vm3, %v6441_v33, %v6437_v15  ;;  %8916 = vmatprep.subr.bf16.mxu1 %v10099_v34  ;;  %v19073_v38 = vld [vmem:[#allocation7_spill] sm:$0xff]  ;;  %v19075_v15 = vld [vmem:[#allocation50_spill] sm:$0xff]  ;;  %vm19079_vm5 = vcmask 392512  }
 0x8c8   :  { %v16673_v17 = vsel %vm19064_vm11, %v8539_v4, %v8531_v43  ;;  %v6585_v8 = vrot.slane %v6076_v41, %v18859_v45  ;;  %6261 = vperm.xlu1 %9980, %v19065_v10   ;;  %v6377_v37 = vrot.slane %v19070_v21, %v18880_v26  ;;  %v6293_v4 = vrot.slane %v19071_v61, %v18873_v24  ;;  %v10100_v20 = vld [vmem:[%s17215_s8 + $0xf0] ss:$12 sps:$4 sm:$0xff]   ;;  %vm19074_vm11 = vmmov %vm19072_vm0  ;;  %v19085_v21 = vld [vmem:[#allocation39_spill] sm:$0xff] }
 0x8c9   :  { %v6447_v29 = vsel %vm19072_vm0, %v6446_v12, %v6442_v63  ;;  %v6456_v48 = vrot.slane %v19073_v38, %v18880_v26  ;;  %8917 = vmatpush2.bf16.msra.mxu1 %v10097_v0  ;;  %v6289_v41 = vsel %vm19074_vm11, %v6288_v11, %v6284_v1  ;;  %v6298_v46 = vrot.slane %v19075_v15, %v18880_v26  ;;  %v19077_v25 = vld [vmem:[#allocation44_spill] sm:$0xff]  ;;  %v19078_v58 = vld [vmem:[#allocation81_spill] sm:$0xff]  ;;  %v19081_v0 = vld [vmem:[#allocation106_spill] sm:$0xff] }
 0x8ca   :  { %v6590_v57 = vsel %vm17634_vm1, %v6589_v59, %v6585_v8  ;;  %v19076_v59 = vld [vmem:[#allocation149_spill] sm:$0xff]  ;;  %v6599_v12 = vrot.slane %v16461_v36, %v18867_v19  ;;  %8918 = vmatprep.subr.bf16.mxu1 %v10102_v5  ;;  %v6382_v10 = vrot.slane %v19077_v25, %v18881_v55  ;;  %v6303_v39 = vrot.slane %v19078_v58, %v18881_v55  ;;  %vm19082_vm11 = vmmov %vm19079_vm5  ;;  %v19093_v58 = vld [vmem:[#allocation178_spill] sm:$0xff] }
 0x8cb   :  { %v6082_v43 = vpop.permute.xlu1 %6081  ;;  %v6451_v8 = vrot.slane %v19076_v59, %v18873_v24  ;;  %v6373_v22 = vsel %vm19079_vm5, %v6372_v47, %v6368_v23  ;;  %vm19080_vm0 = vcmask 458112   ;;  %v6387_v34 = vrot.slane %v19081_v0, %v18887_v44  ;;  %vm19083_vm1 = vmmov %vm19079_vm5  ;;  %v16733_v47 = vpop.permute.xlu0 %6150 }
 0x8cc   :  { %v6594_v56 = vrot.slane %v6082_v43, %v18866_v30  ;;  %v6378_v33 = vsel %vm19080_vm0, %v6377_v37, %v6373_v22  ;;  %v6294_v5 = vsel %vm19083_vm1, %v6293_v4, %v6289_v41  ;;  %vm19084_vm6 = vmmov %vm19080_vm0  ;;  %v6466_v63 = vrot.slane %v19085_v21, %v18887_v44  ;;  %v19087_v37 = vld [vmem:[#allocation72_spill] sm:$0xff]  ;;  %v19088_v4 = vld [vmem:[#allocation19_spill] sm:$0xff] }
 0x8cd   :  { %v6452_v1 = vsel %vm19082_vm11, %v6451_v8, %v6447_v29  ;;  %8919 = vmatpush2.bf16.msra.mxu1 %v10100_v20  ;;  %vm19086_vm5 = vmmov %vm19080_vm0  ;;  %v6461_v43 = vrot.slane %v19087_v37, %v18881_v55  ;;  %v6609_v61 = vrot.slane %v16471_v13, %v18873_v24  ;;  %v6308_v29 = vrot.slane %v19088_v4, %v18887_v44  ;;  %v19090_v20 = vld [vmem:[#allocation101_spill] sm:$0xff]  ;;  %v19094_v22 = vld [vmem:[#allocation56_spill] sm:$0xff] }
 0x8ce   :  { %v6595_v11 = vsel %vm3342_vm2, %v6594_v56, %v6590_v57  ;;  %v6457_v50 = vsel %vm19084_vm6, %v6456_v48, %v6452_v1  ;;  %v6299_v23 = vsel %vm19086_vm5, %v6298_v46, %v6294_v5  ;;  %v6383_v48 = vsel %vm3377_vm7, %v6382_v10, %v6378_v33  ;;  %vm19091_vm6 = vmmov %vm19082_vm11  ;;  %v19092_v13 = vld [vmem:[#allocation97_spill] sm:$0xff]  ;;  %v19095_v33 = vld [vmem:[#allocation144_spill] sm:$0xff] }
 0x8cf   :  { %v6088_v54 = vpop.permute.xlu1 %6087  ;;  %v6600_v36 = vsel %vm3349_vm3, %v6599_v12, %v6595_v11  ;;  %v6304_v38 = vsel %vm3377_vm7, %v6303_v39, %v6299_v23  ;;  %vm19089_vm1 = vcmask 326912   ;;  %v6388_v41 = vsel %vm3384_vm8, %v6387_v34, %v6383_v48  ;;  %v19096_v1 = vld [vmem:[#allocation70_spill] sm:$0xff] }
 0x8d0   :  { %v6604_v57 = vrot.slane %v6088_v54, %v18872_v16  ;;  %v6397_v15 = vrot.slane %v19090_v20, %v18893_v60  ;;  %v6462_v46 = vsel %vm3377_vm7, %v6461_v43, %v6457_v50  ;;  %v6392_v12 = vrot.slane %v19092_v13, %v18888_v9  ;;  %v16767_v50 = vpop.permute.xlu0 %6156  ;;  %v19100_v20 = vld [vmem:[#allocation146_spill] sm:$0xff]  ;;  %v19102_v13 = vld [vmem:[#allocation87_spill] sm:$0xff] }
 0x8d1   :  { %v6467_v25 = vsel %vm3384_vm8, %v6466_v63, %v6462_v46  ;;  %v6476_v10 = vrot.slane %v19093_v58, %v18893_v60  ;;  %v6313_v11 = vrot.slane %v19094_v22, %v18888_v9  ;;  %v6471_v0 = vrot.slane %v19095_v33, %v18888_v9  ;;  %v19101_v46 = vld [vmem:[#allocation151_spill] sm:$0xff] }
 0x8d2   :  { %v6605_v56 = vsel %vm19089_vm1, %v6604_v57, %v6600_v36  ;;  %v6619_v34 = vrot.slane %v16488_v49, %v18881_v55  ;;  %v6402_v54 = vrot.slane %v19096_v1, %v18894_v51  ;;  %v6309_v36 = vsel %vm3384_vm8, %v6308_v29, %v6304_v38  ;;  %v19097_v57 = vld [vmem:[#allocation105_spill] sm:$0xff]  ;;  %v19099_v38 = vld [vmem:[#allocation24_spill] sm:$0xff]  ;;  %v19107_v1 = vld [vmem:[#allocation98_spill] sm:$0xff] }
 0x8d3   :  { %v6094_v59 = vpop.permute.xlu1 %6093  ;;  %v6610_v8 = vsel %vm19091_vm6, %v6609_v61, %v6605_v56  ;;  %v6393_v5 = vsel %vm3391_vm9, %v6392_v12, %v6388_v41  ;;  %v6407_v23 = vrot.slane %v19097_v57, %v18900_v18  ;;  %v6472_v37 = vsel %vm3391_vm9, %v6471_v0, %v6467_v25  ;;  %v19098_v61 = vld [vmem:[#allocation94_spill] sm:$0xff]  ;;  %v19103_v25 = vld [vmem:[#allocation64_spill] sm:$0xff] }
 0x8d4   :  { %v6614_v39 = vrot.slane %v6094_v59, %v18880_v26  ;;  %v6398_v63 = vsel %vm3398_vm10, %v6397_v15, %v6393_v5  ;;  %v6412_v4 = vrot.slane %v19098_v61, %v18901_v14  ;;  %v6477_v29 = vsel %vm3398_vm10, %v6476_v10, %v6472_v37  ;;  %v19109_v37 = vld [vmem:[#allocation104_spill] sm:$0xff] }
 0x8d5   :  { %v6486_v48 = vrot.slane %v19099_v38, %v18900_v18  ;;  %v6314_v41 = vsel %vm3391_vm9, %v6313_v11, %v6309_v36  ;;  %v6318_v15 = vrot.slane %v19100_v20, %v18893_v60  ;;  %v6481_v59 = vrot.slane %v19101_v46, %v18894_v51  ;;  %v19105_v11 = vld [vmem:[#allocation83_spill] sm:$0xff] }
 0x8d6   :  { %v6615_v21 = vsel %vm19080_vm0, %v6614_v39, %v6610_v8  ;;  %v6629_v8 = vrot.slane %v16500_v42, %v18888_v9  ;;  %v6323_v12 = vrot.slane %v19102_v13, %v18894_v51  ;;  %v6328_v58 = vrot.slane %v19103_v25, %v18900_v18  ;;  %v19114_v25 = vld [vmem:[#allocation55_spill] sm:$0xff] }
 0x8d7   :  { %v6100_v43 = vpop.permute.xlu1 %6099  ;;  %v6620_v49 = vsel %vm3377_vm7, %v6619_v34, %v6615_v21  ;;  %vm19104_vm11 = vcmask 786112   ;;  %v6417_v33 = vrot.slane %v19105_v11, %v18906_v52  ;;  %v6333_v36 = vrot.slane %v19107_v1, %v18901_v14  ;;  %v19108_v21 = vld [vmem:[#allocation179_spill] sm:$0xff] }
 0x8d8   :  { %v6624_v56 = vrot.slane %v6100_v43, %v18887_v44  ;;  %v6403_v10 = vsel %vm19104_vm11, %v6402_v54, %v6398_v63  ;;  %vm19106_vm5 = vmmov %vm19104_vm11  ;;  %v6496_v54 = vrot.slane %v19108_v21, %v18906_v52  ;;  %v16804_v63 = vpop.permute.xlu0 %6162  ;;  %v6338_v43 = vrot.slane %v19109_v37, %v18906_v52 }
 0x8d9   :  { %v6408_v22 = vsel %vm3412_vm12, %v6407_v23, %v6403_v10  ;;  %v6482_v0 = vsel %vm19106_vm5, %v6481_v59, %v6477_v29  ;;  %v6319_v23 = vsel %vm3398_vm10, %v6318_v15, %v6314_v41  ;;  %v6639_v29 = vrot.slane %v16520_v32, %v18894_v51  ;;  %vm19111_vm1 = vmmov %vm19106_vm5 }
 0x8da   :  { %v6625_v39 = vsel %vm3384_vm8, %v6624_v56, %v6620_v49  ;;  %v6487_v5 = vsel %vm3412_vm12, %v6486_v48, %v6482_v0  ;;  %v19110_v49 = vld [vmem:[#allocation147_spill] sm:$0xff]  ;;  %v6324_v38 = vsel %vm19111_vm1, %v6323_v12, %v6319_v23  ;;  %v6413_v48 = vsel %vm3419_vm13, %v6412_v4, %v6408_v22  ;;  %vm19112_vm6 = vmmov %vm19111_vm1 }
 0x8db   :  { %v6106_v34 = vpop.permute.xlu1 %6105  ;;  %v6630_v42 = vsel %vm3391_vm9, %v6629_v8, %v6625_v39  ;;  %v6491_v61 = vrot.slane %v19110_v49, %v18901_v14  ;;  %v6329_v20 = vsel %vm3412_vm12, %v6328_v58, %v6324_v38  ;;  %v6418_v46 = vsel %vm3426_vm14, %v6417_v33, %v6413_v48  ;;  %v19113_v8 = vld [vmem:[#allocation62_spill] sm:$0xff]  ;;  %v19115_v39 = vld [vmem:[#allocation103_spill] sm:$0xff] }
 0x8dc   :  { %v6634_v57 = vrot.slane %v6106_v34, %v18893_v60  ;;  %v6422_v13 = vrot.slane %v19113_v8, %v18907_v2  ;;  %v6334_v32 = vsel %vm3419_vm13, %v6333_v36, %v6329_v20  ;;  %v6343_v10 = vrot.slane %v19114_v25, %v18907_v2  ;;  %v16834_v34 = vpop.permute.xlu0 %6168 }
 0x8dd   :  { %v6492_v41 = vsel %vm3419_vm13, %v6491_v61, %v6487_v5  ;;  %v6339_v58 = vsel %vm3426_vm14, %v6338_v43, %v6334_v32  ;;  %v6501_v22 = vrot.slane %v19115_v39, %v18907_v2  ;;  %v6649_v11 = vrot.slane %v16537_v27, %v18901_v14 }
 0x8de   :  { %v6635_v56 = vsel %vm3398_vm10, %v6634_v57, %v6630_v42  ;;  %v6497_v12 = vsel %vm3426_vm14, %v6496_v54, %v6492_v41  ;;  %v6423_v0 = vsel %vm3433_vm15, %v6422_v13, %v6418_v46  ;;  %v6344_v57 = vsel %vm3433_vm15, %v6343_v10, %v6339_v58  ;;  %v10103_v41 = vld [vmem:[%s17215_s8 + $0xd8] ss:$12 sps:$4 sm:$0xff]  }
 0x8df   :  { %v6112_v15 = vpop.permute.xlu1 %6111  ;;  %v6640_v59 = vsel %vm19112_vm6, %v6639_v29, %v6635_v56  ;;  %v6502_v5 = vsel %vm3433_vm15, %v6501_v22, %v6497_v12  ;;  %vm19116_vm0 = vcmask 1042434   ;;  %vm19117_vm11 = vcmask 1041409   ;;  %v10108_v12 = vld [vmem:[%s17215_s8 + $0xc4] ss:$12 sps:$4 sm:$0xff]  }
 0x8e0   :  { %v6644_v4 = vrot.slane %v6112_v15, %v18900_v18  ;;  %v6898_v49 = vsel %vm19117_vm11, %v6423_v0, %v6344_v57  ;;  %v6659_v61 = vrot.slane %v16555_v3, %v18907_v2  ;;  %vm19118_vm5 = vmmov %vm19116_vm0  ;;  %vm19119_vm1 = vcmask 1043459   ;;  %v10105_v3 = vld [vmem:[%s17215_s8 + $0xdc] ss:$12 sps:$4 sm:$0xff]  }
 0x8e1   :  { %v7544_v33 = vpop.f32.mrf.mxu0  ;;  %v6899_v29 = vsel %vm19118_vm5, %v6502_v5, %v6898_v49  ;;  %v6668_v15 = vrot.slane %v16578_v6, %v18860_v28  ;;  %vm19120_vm6 = vmmov %vm19116_vm0  ;;  %v16877_v6 = vld [vmem:[%s17216_s0] sm:$0xff]  ;;  %8920 = vmatprep.subr.bf16.mxu1 %v10105_v3  ;;  %vm19122_vm11 = vcmask 130112   ;;  %v6678_v58 = vrot.slane %v16613_v53, %v18867_v19 }
 0x8e2   :  { %v6645_v42 = vsel %vm3412_vm12, %v6644_v4, %v6640_v59  ;;  %v8517_v1 = vpack.c.bf16 %v7544_v33, %v7544_v33  ;;  %v9263_v36 = vrot.slane %v7544_v33, 6  ;;  %v6900_v20 = vsel %vm19119_vm1, %v16666_v62, %v6899_v29  ;;  %v16861_v59 = vpop.permute.xlu0 %6174  ;;  %9278 = vst [vmem:[%s17217_s14 + $0x10] sm:$0xff] %v16877_v6  ;;  %8921 = vmatpush2.bf16.msra.mxu1 %v10103_v41  ;;  %v10106_v4 = vld [vmem:[%s17215_s8 + $0xc0] ss:$12 sps:$4 sm:$0xff]  }
 0x8e3   :  { %v6118_v21 = vpop.permute.xlu1 %6117  ;;  %v6650_v54 = vsel %vm3419_vm13, %v6649_v11, %v6645_v42  ;;  %v9853_v43 = vpop.f32.mrf.mxu0  ;;  %8922 = vmatprep.subr.bf16.mxu1 %v10108_v12  ;;  %v6688_v42 = vrot.slane %v16644_v31, %v18873_v24  ;;  %vm19123_vm5 = vcmask 326912   ;;  %vm19124_vm1 = vcmask 392512  }
 0x8e4   :  { %v8533_v23 = vunpack.c.l.b16 %v8517_v1  ;;  %v16842_v27 = vsel %vm19116_vm0, %v9263_v36, %v16648_v7  ;;  %v6654_v37 = vrot.slane %v6118_v21, %v18906_v52  ;;  %vm19121_vm0 = vcmask 1044484  }
 0x8e5   :  { %v7547_v56 = vpop.f32.mrf.mxu0  ;;  %v6708_v31 = vrot.slane %v16733_v47, %v18888_v9  ;;  %v6728_v41 = vrot.slane %v16804_v63, %v18901_v14 }
 0x8e6   :  { %v8541_v38 = vrot.slane %v8533_v23, 6  ;;  %v6655_v48 = vsel %vm3426_vm14, %v6654_v37, %v6650_v54  ;;  %v16890_v39 = vpop.permute.xlu0 %6180  ;;  %8923 = vmatpush2.bf16.msra.mxu1 %v10106_v4  ;;  %v6698_v54 = vrot.slane %v16690_v35, %v18881_v55  ;;  %v6718_v35 = vrot.slane %v16767_v50, %v18894_v51 }
 0x8e7   :  { %v6660_v7 = vsel %vm3433_vm15, %v6659_v61, %v6655_v48  ;;  %v6124_v46 = vpop.permute.xlu1 %6123  ;;  %v9854_v32 = vpop.f32.mrf.mxu0 }
 0x8e8   :  { %v16865_v8 = vsel %vm19120_vm6, %v8541_v38, %v16673_v17  ;;  %v16868_v62 = vsel %vm19121_vm0, %v6660_v7, %v6900_v20  ;;  %v6664_v13 = vrot.slane %v6124_v46, %v18859_v45  ;;  %vm19125_vm6 = vcmask 458112  }
 0x8e9   :  { %vm19126_vm0 = vcmask 786112  }
 0x8ea   :  { %v6669_v17 = vsel %vm19122_vm11, %v6668_v15, %v6664_v13  ;;  %v16899_v21 = vpop.permute.xlu0 %6186  ;;  %vm19127_vm11 = vcmask 1043459  }
 0x8eb   :  { %v6130_v25 = vpop.permute.xlu1 %6129 }
 0x8ec   :  { %v6673_v10 = vrot.slane %v6130_v25, %v18866_v30 }
 0x8ee   :  { %v6674_v22 = vsel %vm3342_vm2, %v6673_v10, %v6669_v17  ;;  %v16909_v49 = vpop.permute.xlu0 %6192 }
 0x8ef   :  { %v6136_v11 = vpop.permute.xlu1 %6135  ;;  %v6679_v33 = vsel %vm3349_vm3, %v6678_v58, %v6674_v22  ;;  %v6738_v58 = vrot.slane %v16834_v34, %v18907_v2 }
 0x8f0   :  { %v6683_v0 = vrot.slane %v6136_v11, %v18872_v16 }
 0x8f2   :  { %v6684_v1 = vsel %vm19123_vm5, %v6683_v0, %v6679_v33  ;;  %v16918_v46 = vpop.permute.xlu0 %6198  ;;  %vm19128_vm5 = vmmov %vm19127_vm11 }
 0x8f3   :  { %v6142_v36 = vpop.permute.xlu1 %6141  ;;  %v6689_v5 = vsel %vm19124_vm1, %v6688_v42, %v6684_v1  ;;  %v10110_v1 = vld [vmem:[%s17215_s8 + $0xb0] ss:$12 sps:$4 sm:$0xff]   ;;  %vm19129_vm1 = vcmask 1045509  }
 0x8f4   :  { %v6693_v53 = vrot.slane %v6142_v36, %v18880_v26 }
 0x8f6   :  { %v6694_v57 = vsel %vm19125_vm6, %v6693_v53, %v6689_v5  ;;  %v16932_v63 = vpop.permute.xlu0 %6204  ;;  %vm19130_vm6 = vcmask 130112  }
 0x8f7   :  { %v6148_v23 = vpop.permute.xlu1 %6147  ;;  %v6699_v37 = vsel %vm3377_vm7, %v6698_v54, %v6694_v57  ;;  %v10111_v54 = vld [vmem:[%s17215_s8 + $0x158] ss:$12 sps:$4 sm:$0xff]  }
 0x8f8   :  { %v6703_v43 = vrot.slane %v6148_v23, %v18887_v44  ;;  %v10116_v23 = vld [vmem:[%s17215_s8 + $0x140] ss:$12 sps:$4 sm:$0xff]  }
 0x8fa   :  { %v6704_v61 = vsel %vm3384_vm8, %v6703_v43, %v6699_v37  ;;  %v16953_v57 = vpop.permute.xlu0 %6222  ;;  %v10120_v43 = vld [vmem:[%s17215_s8 + $0x80] ss:$12 sps:$4 sm:$0xff]  }
 0x8fb   :  { %v6154_v29 = vpop.permute.xlu1 %6153  ;;  %v6709_v38 = vsel %vm3391_vm9, %v6708_v31, %v6704_v61  ;;  %v10121_v31 = vld [vmem:[%s17215_s8 + $0x128] ss:$12 sps:$4 sm:$0xff]  }
 0x8fc   :  { %v6713_v48 = vrot.slane %v6154_v29, %v18893_v60  ;;  %v10125_v29 = vld [vmem:[%s17215_s8 + $0x68] ss:$12 sps:$4 sm:$0xff]  }
 0x8fe   :  { %v6714_v56 = vsel %vm3398_vm10, %v6713_v48, %v6709_v38  ;;  %v16970_v61 = vpop.permute.xlu0 %6228  ;;  %v10126_v48 = vld [vmem:[%s17215_s8 + $0x110] ss:$12 sps:$4 sm:$0xff]  }
 0x8ff   :  { %v6160_v20 = vpop.permute.xlu1 %6159  ;;  %v6719_v7 = vsel %vm19126_vm0, %v6718_v35, %v6714_v56  ;;  %v10130_v35 = vld [vmem:[%s17215_s8 + $0x50] ss:$12 sps:$4 sm:$0xff]   ;;  %vm19131_vm0 = vcmask 1044484  }
 0x900   :  { %v6723_v47 = vrot.slane %v6160_v20, %v18900_v18 }
 0x901   :  { %v7737_v3 = vpop.f32.mrf.mxu0 }
 0x902   :  { %v6724_v15 = vsel %vm3412_vm12, %v6723_v47, %v6719_v7  ;;  %v8518_v13 = vpack.c.bf16 %v7737_v3, %v7737_v3  ;;  %v9265_v32 = vrot.slane %v7737_v3, 5  ;;  %v16981_v20 = vpop.permute.xlu0 %6234  ;;  %v10131_v7 = vld [vmem:[%s17215_s8 + $0xf8] ss:$12 sps:$4 sm:$0xff]   ;;  %v10136_v3 = vld [vmem:[%s17215_s8 + $0xe0] ss:$12 sps:$4 sm:$0xff]  }
 0x903   :  { %v6166_v12 = vpop.permute.xlu1 %6165  ;;  %v6729_v50 = vsel %vm3419_vm13, %v6728_v41, %v6724_v15  ;;  %v9873_v10 = vpop.f32.mrf.mxu0  ;;  %v10135_v47 = vld [vmem:[%s17215_s8 + $0x38] ss:$12 sps:$4 sm:$0xff]  }
 0x904   :  { %v8534_v17 = vunpack.c.l.b16 %v8518_v13  ;;  %v16927_v4 = vsel %vm19127_vm11, %v9265_v32, %v16842_v27  ;;  %v6733_v25 = vrot.slane %v6166_v12, %v18906_v52  ;;  %v10109_v27 = vld [vmem:[%s17215_s8 + $0x170] ss:$12 sps:$4 sm:$0xff]   ;;  %v10140_v32 = vld [vmem:[%s17215_s8 + $0x20] ss:$12 sps:$4 sm:$0xff]   ;;  %v6747_v10 = vrot.slane %v16861_v59, %v18860_v28  ;;  %vm19132_vm11 = vmmov %vm19131_vm0 }
 0x905   :  { %v7740_v33 = vpop.f32.mrf.mxu0  ;;  %9600 = vmatprep.subr.bf16.mxu0 %v10109_v27 }
 0x906   :  { %v8543_v22 = vrot.slane %v8534_v17, 5  ;;  %v6734_v11 = vsel %vm3426_vm14, %v6733_v25, %v6729_v50  ;;  %9601 = vmatpush3.bf16.msra.mxu0 %v10110_v1  ;;  %v16992_v15 = vpop.permute.xlu0 %6240  ;;  %v10141_v25 = vld [vmem:[%s17215_s8 + $0xc8] ss:$12 sps:$4 sm:$0xff]  }
 0x907   :  { %v6739_v0 = vsel %vm3433_vm15, %v6738_v58, %v6734_v11  ;;  %v6172_v42 = vpop.permute.xlu1 %6171  ;;  %v9874_v5 = vpop.f32.mrf.mxu0  ;;  %9602 = vmatprep.subr.bf16.mxu0 %v10111_v54 }
 0x908   :  { %v16944_v34 = vsel %vm19128_vm5, %v8543_v22, %v16865_v8  ;;  %v16948_v36 = vsel %vm19129_vm1, %v6739_v0, %v16868_v62  ;;  %v10114_v8 = vld [vmem:[%s17218_s10 + $0xac] ss:$12 sps:$4 sm:$0xff]   ;;  %v6743_v12 = vrot.slane %v6172_v42, %v18859_v45  ;;  %v10145_v0 = vld [vmem:[%s17215_s8 + $0x8] ss:$12 sps:$4 sm:$0xff]   ;;  %vm19133_vm5 = vcmask 326912  }
 0x909   :  { %v10115_v62 = vld [vmem:[%s17215_s8 + $0x98] ss:$12 sps:$4 sm:$0xff]   ;;  %9150 = vmatprep.subr.bf16.mxu1 %v10114_v8  ;;  %v6757_v8 = vrot.slane %v16890_v39, %v18867_v19  ;;  %vm19134_vm1 = vcmask 392512  }
 0x90a   :  { %9603 = vmatpush3.bf16.msra.mxu0 %v10115_v62  ;;  %v17007_v42 = vpop.permute.xlu0 %6246  ;;  %v6748_v27 = vsel %vm19130_vm6, %v6747_v10, %v6743_v12  ;;  %vm19135_vm6 = vcmask 458112  }
 0x90b   :  { %v6178_v53 = vpop.permute.xlu1 %6177  ;;  %9604 = vmatprep.subr.bf16.mxu0 %v10116_v23 }
 0x90c   :  { %v6752_v50 = vrot.slane %v6178_v53, %v18866_v30 }
 0x90e   :  { %9605 = vmatpush3.bf16.msra.mxu0 %v10120_v43  ;;  %v6753_v59 = vsel %vm3342_vm2, %v6752_v50, %v6748_v27  ;;  %v6208_v39 = vpop.permute.xlu0 %6207 }
 0x90f   :  { %v6184_v37 = vpop.permute.xlu1 %6183  ;;  %9606 = vmatprep.subr.bf16.mxu0 %v10121_v31  ;;  %v6758_v31 = vsel %vm3349_vm3, %v6757_v8, %v6753_v59 }
 0x910   :  { %v6762_v53 = vrot.slane %v6184_v37, %v18872_v16 }
 0x912   :  { %9607 = vmatpush3.bf16.msra.mxu0 %v10125_v29 }
 0x913   :  { %v6190_v38 = vpop.permute.xlu1 %6189  ;;  %9608 = vmatprep.subr.bf16.mxu0 %v10126_v48  ;;  %v6767_v48 = vrot.slane %v16899_v21, %v18873_v24  ;;  %v6211_v21 = vpop.permute.xlu0 %6210 }
 0x914   :  { %v6772_v37 = vrot.slane %v6190_v38, %v18880_v26  ;;  %v6826_v38 = vrot.slane %v16953_v57, %v18860_v28  ;;  %v6836_v28 = vrot.slane %v16970_v61, %v18867_v19  ;;  %v6802_v61 = vrot.slane %v6208_v39, %v18900_v18 }
 0x916   :  { %9609 = vmatpush3.bf16.msra.mxu0 %v10130_v35 }
 0x917   :  { %v6196_v56 = vpop.permute.xlu1 %6195  ;;  %9610 = vmatprep.subr.bf16.mxu0 %v10131_v7 }
 0x91a   :  { %9611 = vmatpush3.bf16.msra.mxu0 %v10135_v47 }
 0x91b   :  { %v6202_v41 = vpop.permute.xlu1 %6201  ;;  %9612 = vmatprep.subr.bf16.mxu0 %v10136_v3  ;;  %v6782_v3 = vrot.slane %v6196_v56, %v18887_v44 }
 0x91c   :  { %v6792_v10 = vrot.slane %v6202_v41, %v18893_v60  ;;  %v6797_v41 = vrot.slane %v16932_v63, %v18894_v51  ;;  %v6856_v63 = vrot.slane %v16992_v15, %v18881_v55 }
 0x91e   :  { %9613 = vmatpush3.bf16.msra.mxu0 %v10140_v32  ;;  %v6777_v32 = vrot.slane %v16909_v49, %v18881_v55 }
 0x91f   :  { %v6220_v13 = vpop.permute.xlu1 %6219  ;;  %9614 = vmatprep.subr.bf16.mxu0 %v10141_v25 }
 0x921   :  { %v7930_v17 = vpop.f32.mrf.mxu0 }
 0x922   :  { %v8519_v58 = vpack.c.bf16 %v7930_v17, %v7930_v17  ;;  %v9267_v22 = vrot.slane %v7930_v17, 4  ;;  %9615 = vmatpush3.bf16.msra.mxu0 %v10145_v0 }
 0x923   :  { %v6226_v11 = vpop.permute.xlu1 %6225  ;;  %v9893_v33 = vpop.f32.mrf.mxu0  ;;  %9955 = vmatprep.subr.bf16.mxu0 %v18917_v40 }
 0x924   :  { %v8535_v1 = vunpack.c.l.b16 %v8519_v58  ;;  %v17012_v5 = vsel %vm19131_vm0, %v9267_v22, %v16927_v4  ;;  %v6763_v4 = vsel %vm19133_vm5, %v6762_v53, %v6758_v31  ;;  %v6831_v12 = vrot.slane %v6226_v11, %v18866_v30  ;;  %v6214_v11 = vpop.permute.xlu0 %6213 }
 0x925   :  { %v7933_v54 = vpop.f32.mrf.mxu0  ;;  %v6768_v7 = vsel %vm19134_vm1, %v6767_v48, %v6763_v4  ;;  %vm19136_vm0 = vcmask 130112  }
 0x926   :  { %v8545_v62 = vrot.slane %v8535_v1, 4  ;;  %v6773_v47 = vsel %vm19135_vm6, %v6772_v37, %v6768_v7  ;;  %v6807_v54 = vrot.slane %v6211_v21, %v18901_v14 }
 0x927   :  { %v6232_v23 = vpop.permute.xlu1 %6231  ;;  %v9894_v43 = vpop.f32.mrf.mxu0  ;;  %v6778_v17 = vsel %vm3377_vm7, %v6777_v32, %v6773_v47 }
 0x928   :  { %v17021_v29 = vsel %vm19132_vm11, %v8545_v62, %v16944_v34  ;;  %v6822_v34 = vrot.slane %v6220_v13, %v18859_v45  ;;  %v6783_v25 = vsel %vm3384_vm8, %v6782_v3, %v6778_v17  ;;  %v6787_v45 = vrot.slane %v16918_v46, %v18888_v9  ;;  %vm19137_vm11 = vmmov %vm19133_vm5 }
 0x929   :  { %v6841_v30 = vrot.slane %v6232_v23, %v18872_v16  ;;  %v6846_v16 = vrot.slane %v16981_v20, %v18873_v24  ;;  %vm19139_vm5 = vmmov %vm19134_vm1  ;;  %v6217_v24 = vpop.permute.xlu0 %6216  ;;  %v6812_v43 = vrot.slane %v6214_v11, %v18906_v52 }
 0x92a   :  { %v6827_v56 = vsel %vm19136_vm0, %v6826_v38, %v6822_v34  ;;  %v6788_v13 = vsel %vm3391_vm9, %v6787_v45, %v6783_v25  ;;  %vm19140_vm1 = vmmov %vm19135_vm6 }
 0x92b   :  { %v6238_v35 = vpop.permute.xlu1 %6237  ;;  %v6832_v49 = vsel %vm3342_vm2, %v6831_v12, %v6827_v56  ;;  %v6793_v58 = vsel %vm3398_vm10, %v6792_v10, %v6788_v13  ;;  %vm19138_vm2 = vcmask 786112  }
 0x92c   :  { %v6837_v22 = vsel %vm3349_vm3, %v6836_v28, %v6832_v49  ;;  %v6851_v33 = vrot.slane %v6238_v35, %v18880_v26  ;;  %v6798_v19 = vsel %vm19138_vm2, %v6797_v41, %v6793_v58  ;;  %v6817_v35 = vrot.slane %v6217_v24, %v18907_v2  ;;  %vm19141_vm3 = vmmov %vm19138_vm2  ;;  %v10150_v24 = vld [vmem:[%s17218_s10 + $0x98] ss:$12 sps:$4 sm:$0xff]  }
 0x92d   :  { %v6842_v46 = vsel %vm19137_vm11, %v6841_v30, %v6837_v22  ;;  %v6803_v53 = vsel %vm3412_vm12, %v6802_v61, %v6798_v19 }
 0x92e   :  { %v6847_v27 = vsel %vm19139_vm5, %v6846_v16, %v6842_v46  ;;  %v6808_v8 = vsel %vm3419_vm13, %v6807_v54, %v6803_v53  ;;  %v10149_v54 = vld [vmem:[%s17218_s10 + $0xb0] ss:$12 sps:$4 sm:$0xff]  }
 0x92f   :  { %v6244_v50 = vpop.permute.xlu1 %6243  ;;  %v6852_v1 = vsel %vm19140_vm1, %v6851_v33, %v6847_v27  ;;  %v6813_v4 = vsel %vm3426_vm14, %v6812_v43, %v6808_v8  ;;  %v19150_v8 = vmov 0   ;;  %v10127_v43 = vld [vmem:[%s17218_s10 + $0x60] ss:$12 sps:$4 sm:$0xff]  }
 0x930   :  { %v6861_v59 = vrot.slane %v6244_v50, %v18887_v44  ;;  %v6857_v20 = vsel %vm3377_vm7, %v6856_v63, %v6852_v1  ;;  %v6866_v44 = vrot.slane %v17007_v42, %v18888_v9  ;;  %vm19142_vm7 = vcmask 1046534  }
 0x932   :  { %v6862_v62 = vsel %vm3384_vm8, %v6861_v59, %v6857_v20  ;;  %vm19143_vm8 = vcmask 1047559   ;;  %v175_v59 = vpack.c.bf16 %v16877_v6, %v16877_v6  ;;  %v10117_v6 = vld [vmem:[%s17218_s10 + $0x90] ss:$12 sps:$4 sm:$0xff]  }
 0x933   :  { %v6250_v57 = vpop.permute.xlu1 %6249  ;;  %v6867_v37 = vsel %vm3391_vm9, %v6866_v44, %v6862_v62  ;;  %vm19144_vm9 = vcmask 1045509   ;;  %v10124_v20 = vld [vmem:[%s17218_s10 + $0x7c] ss:$12 sps:$4 sm:$0xff]   ;;  %v10122_v62 = vld [vmem:[%s17218_s10 + $0x78] ss:$12 sps:$4 sm:$0xff]  }
 0x934   :  { %v6871_v23 = vrot.slane %v6250_v57, %v18893_v60  ;;  %v6265_v60 = vpop.permute.xlu0 %6264  ;;  %v10129_v44 = vld [vmem:[%s17218_s10 + $0x64] ss:$12 sps:$4 sm:$0xff]  }
 0x935   :  { %v6896_v34 = vrot.slane %v6265_v60, %v18907_v2  ;;  %v10142_v60 = vld [vmem:[%s17218_s10 + $0x18] ss:$12 sps:$4 sm:$0xff]  }
 0x936   :  { %v6872_v7 = vsel %vm3398_vm10, %v6871_v23, %v6867_v37  ;;  %vm19145_vm10 = vmmov %vm19142_vm7  ;;  %v10151_v23 = vld [vmem:[%s17218_s10 + $0x80] ss:$12 sps:$4 sm:$0xff]  }
 0x937   :  { %v6253_v0 = vpop.permute.xlu1 %6252  ;;  %v10139_v37 = vld [vmem:[%s17218_s10 + $0x34] ss:$12 sps:$4 sm:$0xff]  }
 0x938   :  { %v6876_v55 = vrot.slane %v6253_v0, %v18894_v51 }
 0x93a   :  { %v6877_v9 = vsel %vm19141_vm3, %v6876_v55, %v6872_v7  ;;  %v10152_v55 = vld [vmem:[%s17218_s10 + $0x68] ss:$12 sps:$4 sm:$0xff]   ;;  %v10155_v7 = vld [vmem:[%s17218_s10 + $0x20] ss:$12 sps:$4 sm:$0xff]  }
 0x93b   :  { %v6256_v26 = vpop.permute.xlu1 %6255 }
 0x93c   :  { %v6881_v31 = vrot.slane %v6256_v26, %v18900_v18  ;;  %v6818_v18 = vsel %vm3433_vm15, %v6817_v35, %v6813_v4  ;;  %v10112_v26 = vld [vmem:[%s17218_s10 + $0xa8] ss:$12 sps:$4 sm:$0xff]   ;;  %v10153_v4 = vld [vmem:[%s17218_s10 + $0x50] ss:$12 sps:$4 sm:$0xff]  }
 0x93d   :  { %v6903_v50 = vsel %vm19142_vm7, %v6818_v18, %v16948_v36  ;;  %v10144_v35 = vld [vmem:[%s17218_s10 + $0x1c] ss:$12 sps:$4 sm:$0xff]  }
 0x93e   :  { %v6882_v51 = vsel %vm3412_vm12, %v6881_v31, %v6877_v9  ;;  %vm19146_vm12 = vmmov %vm19143_vm8  ;;  %v10132_v31 = vld [vmem:[%s17218_s10 + $0x48] ss:$12 sps:$4 sm:$0xff]   ;;  %v10148_v9 = vld [vmem:[%s17218_s10 + $0x4] ss:$12 sps:$4 sm:$0xff]  }
 0x93f   :  { %v6259_v15 = vpop.permute.xlu1 %6258 }
 0x940   :  { %v6886_v48 = vrot.slane %v6259_v15, %v18901_v14  ;;  %v10134_v15 = vld [vmem:[%s17218_s10 + $0x4c] ss:$12 sps:$4 sm:$0xff]  }
 0x941   :  { %v8123_v39 = vpop.f32.mrf.mxu0 }
 0x942   :  { %v6887_v14 = vsel %vm3419_vm13, %v6886_v48, %v6882_v51  ;;  %v8520_v56 = vpack.c.bf16 %v8123_v39, %v8123_v39  ;;  %v9269_v30 = vrot.slane %v8123_v39, 3  ;;  %vm19147_vm13 = vmmov %vm19144_vm9  ;;  %v10137_v48 = vld [vmem:[%s17218_s10 + $0x30] ss:$12 sps:$4 sm:$0xff]   ;;  %v10154_v39 = vld [vmem:[%s17218_s10 + $0x38] ss:$12 sps:$4 sm:$0xff]  }
 0x943   :  { %v6262_v42 = vpop.permute.xlu1 %6261  ;;  %v9913_v47 = vpop.f32.mrf.mxu0  ;;  %v19151_v51 = vld [vmem:[#allocation5_spill] sm:$0xff] }
 0x944   :  { %v6891_v3 = vrot.slane %v6262_v42, %v18906_v52  ;;  %v8536_v49 = vunpack.c.l.b16 %v8520_v56  ;;  %v9270_v36 = vsel %vm19144_vm9, %v9269_v30, %v17012_v5  ;;  %v10146_v42 = vld [vmem:[%s17218_s10] ss:$12 sps:$4 sm:$0xff]   ;;  %v10156_v47 = vld [vmem:[%s17218_s10 + $0x8] ss:$12 sps:$4 sm:$0xff]  }
 0x945   :  { %v8126_v32 = vpop.f32.mrf.mxu0  ;;  %v19153_v30 = vld [vmem:[#allocation4_spill] sm:$0xff] }
 0x946   :  { %v6892_v12 = vsel %vm3426_vm14, %v6891_v3, %v6887_v14  ;;  %v8547_v58 = vrot.slane %v8536_v49, 3  ;;  %vm19148_vm14 = vmmov %vm19142_vm7 }
 0x947   :  { %v6897_v38 = vsel %vm3433_vm15, %v6896_v34, %v6892_v12  ;;  %v9914_v21 = vpop.f32.mrf.mxu0  ;;  %vm19149_vm15 = vmmov %vm19143_vm8 }
 0x948   :  { %v6904_v17 = vsel %vm19143_vm8, %v6897_v38, %v6903_v50  ;;  %v8548_v61 = vsel %vm19147_vm13, %v8547_v58, %v17021_v29  ;;  %v10119_v29 = vld [vmem:[%s17218_s10 + $0x94] ss:$12 sps:$4 sm:$0xff]  }
 0x949   :  { %6906 = vst [vmem:[%s17219_s13] sm:$0xff] %v6904_v17  ;;  %v8619_v17 = vld [vmem:[%s17220_s9] sm:$0x7] }
 0x94a   :  { %v8628_v58 = vrot.slane %v8619_v17, %v19153_v30 }
 0x961   :  { %v8316_v52 = vpop.f32.mrf.mxu0 }
 0x962   :  { %v8521_v45 = vpack.c.bf16 %v8316_v52, %v8316_v52  ;;  %v9271_v57 = vrot.slane %v8316_v52, 2  ;;  %v19152_v52 = vld [vmem:[#allocation3_spill] sm:$0xff] }
 0x963   :  { %v9933_v25 = vpop.f32.mrf.mxu0 }
 0x964   :  { %v8537_v28 = vunpack.c.l.b16 %v8521_v45  ;;  %v9272_v46 = vsel %vm19145_vm10, %v9271_v57, %v9270_v36  ;;  %v8624_v25 = vrot.slane %v8619_v17, %v19152_v52 }
 0x965   :  { %v8319_v2 = vpop.f32.mrf.mxu0 }
 0x966   :  { %v8549_v11 = vrot.slane %v8537_v28, 2 }
 0x967   :  { %v9934_v10 = vpop.f32.mrf.mxu0 }
 0x968   :  { %v8550_v5 = vsel %vm19148_vm14, %v8549_v11, %v8548_v61 }
 0x981   :  { %v8509_v13 = vpop.f32.mrf.mxu0 }
 0x982   :  { %v8522_v22 = vpack.c.bf16 %v8509_v13, %v8509_v13  ;;  %v9273_v41 = vrot.slane %v8509_v13, 1 }
 0x983   :  { %v9953_v33 = vpop.f32.mrf.mxu0 }
 0x984   :  { %v8538_v16 = vunpack.c.l.b16 %v8522_v22  ;;  %v9274_v0 = vsel %vm19146_vm12, %v9273_v41, %v9272_v46 }
 0x985   :  { %9277 = vst [vmem:[%s17217_s14 + $0x8] sm:$0xff] %v9274_v0  ;;  %v8512_v19 = vpop.f32.mrf.mxu0 }
 0x986   :  { %v8551_v27 = vrot.slane %v8538_v16, 1 }
 0x987   :  { %v9954_v1 = vpop.f32.mrf.mxu0 }
 0x988   :  { %v8552_v63 = vsel %vm19149_vm15, %v8551_v27, %v8550_v5  ;;  %v19154_v5 = vld [vmem:[#allocation6_spill] sm:$0xff] }
 0x989   :  { %v8553_v53 = vpack.c.b16 %v8552_v63, %v8552_v63 }
 0x98b   :  { %8924 = vmatprep.mubr.bf16.mxu1 %v8553_v53  ;;  %8965 = vmatprep.mubr.bf16.mxu0 %v8553_v53  ;;  %v8632_v53 = vrot.slane %v8619_v17, %v19154_v5 }
 0x98c   :  { %8925 = vmatmul.mubr.bf16.vlgmr.msra.gmra.mxu1 %v175_v59  ;;  %8966 = vmatmul.mubr.bf16.vlgmr.msra.gmra.mxu0 %v175_v59 }
 0x98d   :  { %9151 = vmatpush1.bf16.msra.mxu1 %v10112_v26  ;;  %9956 = vmatpush3.bf16.msra.mxu0 %v10149_v54 }
 0x98e   :  { %9152 = vmatprep.subr.bf16.mxu1 %v10119_v29  ;;  %9182 = vmatprep.mubr.bf16.mxu1 %v19150_v8 }
 0x98f   :  { %9957 = vmatprep.subr.bf16.mxu0 %v18917_v40  ;;  %9971 = vmatprep.mubr.msk.bf16.mxu0 %vm18918_vm4, %v18917_v40 }
 0x991   :  { %9153 = vmatpush1.bf16.msra.mxu1 %v10117_v6  ;;  %9958 = vmatpush3.bf16.msra.mxu0 %v10150_v24 }
 0x992   :  { %9154 = vmatprep.subr.bf16.mxu1 %v10124_v20  ;;  %9959 = vmatprep.subr.bf16.mxu0 %v18917_v40 }
 0x995   :  { %9155 = vmatpush1.bf16.msra.mxu1 %v10122_v62  ;;  %9960 = vmatpush3.bf16.msra.mxu0 %v10151_v23 }
 0x996   :  { %9156 = vmatprep.subr.bf16.mxu1 %v10129_v44  ;;  %9961 = vmatprep.subr.bf16.mxu0 %v18917_v40  ;;  %v10738_v44 = vld [vmem:[%s17212_s1] sm:$0xff] }
 0x999   :  { %9157 = vmatpush1.bf16.msra.mxu1 %v10127_v43  ;;  %9962 = vmatpush3.bf16.msra.mxu0 %v10152_v55 }
 0x99a   :  { %9158 = vmatprep.subr.bf16.mxu1 %v10134_v15  ;;  %9963 = vmatprep.subr.bf16.mxu0 %v18917_v40 }
 0x99d   :  { %9159 = vmatpush1.bf16.msra.mxu1 %v10132_v31  ;;  %9964 = vmatpush3.bf16.msra.mxu0 %v10153_v4 }
 0x99e   :  { %9160 = vmatprep.subr.bf16.mxu1 %v10139_v37  ;;  %9965 = vmatprep.subr.bf16.mxu0 %v18917_v40 }
 0x9a1   :  { %9161 = vmatpush1.bf16.msra.mxu1 %v10137_v48  ;;  %9966 = vmatpush3.bf16.msra.mxu0 %v10154_v39 }
 0x9a2   :  { %9162 = vmatprep.subr.bf16.mxu1 %v10144_v35  ;;  %9967 = vmatprep.subr.bf16.mxu0 %v18917_v40 }
 0x9a5   :  { %9163 = vmatpush1.bf16.msra.mxu1 %v10142_v60  ;;  %9968 = vmatpush3.bf16.msra.mxu0 %v10155_v7 }
 0x9a6   :  { %9164 = vmatprep.subr.bf16.mxu1 %v10148_v9  ;;  %9969 = vmatprep.subr.bf16.mxu0 %v18917_v40  ;;  %v9005_v40 = vld [vmem:[%s17221_s11] sm:$0x7] }
 0x9a7   :  { %v9010_v2 = vrot.slane %v9005_v40, %v19152_v52  ;;  %v9014_v28 = vrot.slane %v9005_v40, %v19153_v30  ;;  %v9018_v59 = vrot.slane %v9005_v40, %v19154_v5 }
 0x9a9   :  { %9165 = vmatpush1.bf16.msra.mxu1 %v10146_v42  ;;  %9970 = vmatpush3.bf16.msra.mxu0 %v10156_v47 }
 0x9ac   :  { %9183 = vmatmul.mubr.bf16.vlgmr.msra.gmra.mxu1 %v19151_v51  ;;  %9972 = vmatmul.mubr.bf16.vlgmr.msra.gmra.mxu0 %v19151_v51 }
 0xa4c   :  { %v8926_v18 = vpop.f32.mrf.mxu1  ;;  %v9616_v3 = vpop.f32.mrf.mxu0 }
 0xa4d   :  { %v8927_v45 = vadd.f32 %v8926_v18, %v8624_v25 }
 0xa4e   :  { %v8928_v34 = vpop.f32.mrf.mxu1  ;;  %v9617_v14 = vpop.f32.mrf.mxu0 }
 0xa4f   :  { %v9618_v32 = vadd.f32 %v9617_v14, %v9616_v3  ;;  %v8929_v0 = vadd.f32 %v8928_v34, %v8628_v58 }
 0xa50   :  { %v8930_v12 = vpop.f32.mrf.mxu1  ;;  %v9619_v38 = vpop.f32.mrf.mxu0 }
 0xa51   :  { %v8968_v6 = vadd.f32 %v9618_v32, %v8632_v53 }
 0xa52   :  { %v8931_v50 = vpop.f32.mrf.mxu1  ;;  %v9620_v21 = vpop.f32.mrf.mxu0 }
 0xa6c   :  { %v9184_v10 = vpop.f32.mrf.mxu1  ;;  %v9225_v56 = vpop.f32.mrf.mxu0 }
 0xa6d   :  { %v9185_v49 = vadd.f32 %v9184_v10, %v9010_v2  ;;  %v9226_v54 = vadd.f32 %v9225_v56, %v9018_v59 }
 0xa6e   :  { %v9186_v57 = vpop.f32.mrf.mxu1  ;;  %v9973_v13 = vpop.f32.mrf.mxu0 }
 0xa6f   :  { %v9231_v36 = vadd.f32 %v9185_v49, %v8927_v45  ;;  %v9187_v46 = vadd.f32 %v9186_v57, %v9014_v28 }
 0xa70   :  { %v9188_v22 = vpop.f32.mrf.mxu1  ;;  %v9228_v41 = vpop.f32.mrf.mxu0 }
 0xa71   :  { %v9445_v11 = vmul.f32 -1.442695, %v9231_v36  ;;  %v9238_v19 = vadd.f32 %v9187_v46, %v8929_v0 }
 0xa72   :  { %v9189_v33 = vpop.f32.mrf.mxu1  ;;  %v9974_v16 = vpop.f32.mrf.mxu0 }
 0xa73   :  { %10671 = vpow2.f32 %v9445_v11  ;;  %v9446_v61 = vmul.f32 -1.442695, %v9238_v19 }
 0xa75   :  { %10673 = vpow2.f32 %v9446_v61 }
 0xa80   :  { %v10672_v27 = vpop.eup %10671 }
 0xa81   :  { %v9235_v1 = vadd.f32 1.0, %v10672_v27 }
 0xa82   :  { %v10674_v63 = vpop.eup %10673 }
 0xa83   :  { %10675 = vrcp.f32 %v9235_v1  ;;  %v9242_v26 = vadd.f32 1.0, %v10674_v63 }
 0xa85   :  { %10677 = vrcp.f32 %v9242_v26 }
 0xa90   :  { %v10676_v29 = vpop.eup %10675 }
 0xa91   :  { %v9245_v24 = vmul.f32 %v10676_v29, %v9226_v54 }
 0xa92   :  { %v10678_v8 = vpop.eup %10677 }
 0xa93   :  { %v9246_v20 = vadd.f32 %v9245_v24, %v8968_v6  ;;  %v9248_v62 = vsub.f32 1.0, %v10678_v8  ;;  %v9250_v43 = vmul.f32 %v10738_v44, %v10678_v8 }
 0xa95   :  { %10679 = vtanh.f32 %v9246_v20 }
 0xaa2   :  { %v10680_v23 = vpop.eup %10679 }
 0xaa3   :  { %v9249_v55 = vmul.f32 %v10680_v23, %v9248_v62 }
 0xaa5   :  { %v9251_v15 = vadd.f32 %v9250_v43, %v9249_v55 }
 0xaa7   :  { %9252 = vst [vmem:[%s17222_s12] sm:$0xff] %v9251_v15  ;;  %9276 = vst [vmem:[%s17217_s14] sm:$0xff] %v9251_v15 }

</bundles_post_ra>
